<compile_context>
chip_gen: v5e
topology: v5e:2x2
jax: 0.10.0
libtpu: 0.0.40
codegen_flags: <defaults>
</compile_context>

<pallas_src>
import functools

import jax
import jax.numpy as jnp
from jax.experimental import pallas as pl
from jax.experimental.pallas import tpu as pltpu

_LN_EPS = 1e-5   # torch nn.LayerNorm default eps
_SM_EPS = 1e-13  # masked_softmax renormalization epsilon


# ----------------------------------------------------------------------------
# Kernel
# ----------------------------------------------------------------------------
def _mca_kernel(*refs, num_context, heads, kqnorm):
    it = iter(refs)
    xq_ref = next(it)                                           # (TB, Tq, E) bf16
    xkv_ref = next(it)                                          # (TB, T_x, E) bf16
    ctx_refs = [next(it) for _ in range(num_context)]           # (TB, T_ci, E) bf16
    maskq_ref = next(it)                                        # (TB, Tq, 1) f32
    segmask_refs = [next(it) for _ in range(num_context + 1)]   # (TB, 1, T_s) f32
    wq_ref, wk_ref, wv_ref = next(it), next(it), next(it)       # (E, E) bf16
    wck_refs = [next(it) for _ in range(num_context)]           # (E, E) bf16
    wcv_refs = [next(it) for _ in range(num_context)]           # (E, E) bf16
    qlnw_ref, qlnb_ref = next(it), next(it)                     # (1, hs) f32
    klnw_ref, klnb_ref = next(it), next(it)                     # (1, hs) f32
    cklnw_refs = [next(it) for _ in range(num_context)]         # (1, hs) f32
    cklnb_refs = [next(it) for _ in range(num_context)]         # (1, hs) f32
    wu_ref = next(it)                                           # (E, E) bf16
    bu_ref = next(it)                                           # (1, E) f32
    out_ref = next(it)                                          # (TB, Tq, E) f32
    attn_sc = next(it)                                          # (TB, Tq, E) f32 scratch

    f32, bf16 = jnp.float32, jnp.bfloat16
    TB, Tq, E = xq_ref.shape
    T_x = xkv_ref.shape[1]
    H = heads
    hs = E // H

    # ---- full-width projections: (N, E) @ (E, E), bf16 in, f32 accumulate --
    def proj(x2, w_ref):
        return jnp.dot(x2, w_ref[...], preferred_element_type=f32)

    xq2 = xq_ref[...].reshape(TB * Tq, E)
    xkv2 = xkv_ref[...].reshape(TB * T_x, E)

    q_full = proj(xq2, wq_ref)                                  # (TB*Tq, E) f32
    k_full = proj(xkv2, wk_ref)                                 # (TB*T_x, E) f32
    v_full = proj(xkv2, wv_ref)                                 # (TB*T_x, E) f32
    seg_T = [T_x]
    ck_full, cv_full = [], []
    for i in range(num_context):
        T_c = ctx_refs[i].shape[1]
        seg_T.append(T_c)
        c2 = ctx_refs[i][...].reshape(TB * T_c, E)
        ck_full.append(proj(c2, wck_refs[i]))
        cv_full.append(proj(c2, wcv_refs[i]))

    # ---- masks: dotmask_s = mask_q (TB,Tq,1) * seg_mask_s (TB,1,T_s) -------
    maskq = maskq_ref[...].astype(f32)
    dotmasks = [maskq * m[...].astype(f32) for m in segmask_refs]

    # ---- LayerNorm params (E**-0.25 scale already folded in wrapper) -------
    qln = (qlnw_ref[...], qlnb_ref[...])
    kln = (klnw_ref[...], klnb_ref[...])
    ckln = [(w[...], b[...]) for w, b in zip(cklnw_refs, cklnb_refs)]

    def ln(t, wb):                                   # t: (N, hs) f32
        w, b = wb
        mu = jnp.mean(t, axis=-1, keepdims=True)
        d = t - mu
        var = jnp.mean(d * d, axis=-1, keepdims=True)
        return d * jax.lax.rsqrt(var + _LN_EPS) * w + b

    def bmm_qk(q3, k3):                              # bqd,bkd->bqk
        return jax.lax.dot_general(
            q3, k3, (((2,), (2,)), ((0,), (0,))), preferred_element_type=f32)

    def bmm_pv(p3, v3):                              # bqk,bkd->bqd
        return jax.lax.dot_general(
            p3, v3, (((2,), (1,)), ((0,), (0,))), preferred_element_type=f32)

    for h in range(H):
        sl = slice(h * hs, (h + 1) * hs)
        qh = q_full[:, sl]
        kh = k_full[:, sl]
        if kqnorm:
            qh = ln(qh, qln)
            kh = ln(kh, kln)
        q3 = qh.astype(bf16).reshape(TB, Tq, hs)
        key_segs = [kh.astype(bf16).reshape(TB, T_x, hs)]
        val_segs = [v_full[:, sl].astype(bf16).reshape(TB, T_x, hs)]
        for i in range(num_context):
            ckh = ck_full[i][:, sl]
            if kqnorm:
                ckh = ln(ckh, ckln[i])
            key_segs.append(ckh.astype(bf16).reshape(TB, seg_T[i + 1], hs))
            val_segs.append(
                cv_full[i][:, sl].astype(bf16).reshape(TB, seg_T[i + 1], hs))

        # masked_softmax per token segment with shared statistics:
        #   z = dot*mask ; p = softmax(z)*mask ; p /= (p.sum()+1e-13)
        #   == exp(z - m) * mask / (S2 + 1e-13 * S1)
        z_segs = [bmm_qk(q3, k3) * dm for k3, dm in zip(key_segs, dotmasks)]
        m = z_segs[0].max(axis=-1, keepdims=True)
        for z in z_segs[1:]:
            m = jnp.maximum(m, z.max(axis=-1, keepdims=True))
        e_segs = [jnp.exp(z - m) for z in z_segs]
        s1 = e_segs[0].sum(axis=-1, keepdims=True)
        for e in e_segs[1:]:
            s1 = s1 + e.sum(axis=-1, keepdims=True)
        p_segs = [e * dm for e, dm in zip(e_segs, dotmasks)]
        s2 = p_segs[0].sum(axis=-1, keepdims=True)
        for p in p_segs[1:]:
            s2 = s2 + p.sum(axis=-1, keepdims=True)
        inv = pl.reciprocal(s2 + _SM_EPS * s1, approx=True)

        attn_h = bmm_pv((p_segs[0] * inv).astype(bf16), val_segs[0])
        for p, v3 in zip(p_segs[1:], val_segs[1:]):
            attn_h = attn_h + bmm_pv((p * inv).astype(bf16), v3)

        # head-major lane slot of the (TB, Tq, E) attention slab
        attn_sc[:, :, sl] = attn_h

    # ---- unifyheads: one full-width matmul over the concatenated heads -----
    attn = attn_sc[...].reshape(TB * Tq, E).astype(bf16)
    out = jnp.dot(attn, wu_ref[...], preferred_element_type=f32) + bu_ref[...]
    out_ref[...] = out.reshape(TB, Tq, E).astype(out_ref.dtype)


# ----------------------------------------------------------------------------
# Wrapper
# ----------------------------------------------------------------------------
def _vmem_capacity_bytes():
    try:
        return int(pltpu.get_tpu_info().vmem_capacity_bytes)
    except Exception:
        return 64 * 1024 * 1024   # conservative default (v7x per-core VMEM)


def _choose_batch_block(B, per_batch_bytes, budget):
    """Largest divisor of B whose double-buffered block fits `budget`, keeping
    >= 2 batch grid steps when B >= 2 (so both v7x TensorCores get work)."""
    best = 1
    for tb in range(1, B + 1):
        if B % tb:
            continue
        if B >= 2 and B // tb < 2:
            continue
        if 2 * tb * per_batch_bytes <= budget:
            best = tb
    return best


def multi_context_attention(x, context, mask, context_mask, params, *,
                            heads, kqnorm=True, batch_block=None):
    """x: [B,T_x,E]; context: list of [B,T_ci,E]; mask: [B,T_x] (1=keep);
    context_mask: list of [B,T_ci]; params: torch-layout weights."""
    f32, bf16 = jnp.float32, jnp.bfloat16
    B, T_x, E = x.shape
    num_context = len(context)
    assert E % heads == 0
    hs = E // heads
    ctx_T = [c.shape[1] for c in context]
    sum_ctx = sum(ctx_T)
    T_total = T_x + sum_ctx
    scale = float(E) ** (-0.25)

    # activations in bf16 (native MXU dtype); masks stay f32
    x_bf = x.astype(bf16)
    ctx_bf = [c.astype(bf16) for c in context]
    if mask is None:
        mask = jnp.ones((B, T_x), f32)
    mask = mask.astype(f32)
    if context_mask is None:
        context_mask = [None] * num_context
    context_mask = [jnp.ones((B, t), f32) if m is None else m.astype(f32)
                    for m, t in zip(context_mask, ctx_T)]

    # ---- layout plumbing (wrapper-side only, no compute) --------------------
    def wt(w, s=1.0):   # torch Linear weight [E_out, E_in] -> (E_in, E_out) bf16
        return (w.astype(f32).T * s).astype(bf16)

    wscale = 1.0 if kqnorm else scale       # fold scale into weights if no LN
    wq_t = wt(params["wq"], wscale)
    wk_t = wt(params["wk"], wscale)
    wv_t = wt(params["wv"])
    wck_t = [wt(w, wscale) for w in params["wck"]]
    wcv_t = [wt(w) for w in params["wcv"]]
    wu_t = wt(params["wu"])
    bu = params["bu"].astype(f32).reshape(1, E)

    lscale = scale if kqnorm else 1.0       # fold scale into LN affine if LN

    def ln_param(name, default):
        v = params.get(name, None)
        if v is None:
            v = jnp.full((hs,), default, f32)
        return (v.astype(f32) * lscale).reshape(1, hs)

    def ln_param_list(name, default):
        vs = params.get(name, None)
        if vs is None:
            vs = [jnp.full((hs,), default, f32)] * num_context
        return [(v.astype(f32) * lscale).reshape(1, hs) for v in vs]

    qln_w, qln_b = ln_param("qln_w", 1.0), ln_param("qln_b", 0.0)
    kln_w, kln_b = ln_param("kln_w", 1.0), ln_param("kln_b", 0.0)
    ckln_w = ln_param_list("ckln_w", 1.0)
    ckln_b = ln_param_list("ckln_b", 0.0)

    mask_q3 = mask.reshape(B, T_x, 1)
    seg_masks = [mask.reshape(B, 1, T_x)] + [
        m.reshape(B, 1, t) for m, t in zip(context_mask, ctx_T)]

    # ---- VMEM budgeting (inputs + in-kernel intermediates) ------------------
    per_batch_bytes = (
        2 * (2 * T_x + sum_ctx) * E             # bf16 x (query + kv copy) + ctx
        + 4 * (3 * T_x + 2 * sum_ctx) * E       # f32 q/k/v (+ context k/v)
        + 2 * (3 * T_x + 2 * sum_ctx) * hs      # bf16 per-head slices
        + 4 * 5 * T_x * T_total                 # dotmasks + z/e/p score temps
        + 4 * 3 * T_x * E                       # attn scratch + unify + out
        + 4 * (2 * T_x + T_total + 8)           # masks / softmax stats
    )
    weight_bytes = (2 * (4 + 2 * num_context) * E * E
                    + 4 * ((4 + 2 * num_context) * hs + 2 * E))

    cap = _vmem_capacity_bytes()
    budget = max(cap // 8, 4 * 1024 * 1024)
    if batch_block is not None and B % batch_block == 0:
        tb = batch_block
    else:
        tb = _choose_batch_block(B, per_batch_bytes, budget)
    n_b = B // tb

    # split the query axis when only one batch block exists (feed both v7x
    # TensorCores); only when the tile stays bf16-sublane aligned.
    if n_b == 1 and T_x % 2 == 0 and (T_x // 2) % 16 == 0:
        tq = T_x // 2
    else:
        tq = T_x
    n_q = T_x // tq
    grid = (n_b, n_q)

    need = 2 * tb * per_batch_bytes + 2 * weight_bytes + (4 << 20)
    vmem_limit = int(max(16 << 20, min(need, (cap * 3) // 4)))

    # ---- BlockSpecs ----------------------------------------------------------
    def bfull(tail):       # per-batch block, full token length
        return pl.BlockSpec((tb,) + tail, lambda b, q: (b, 0, 0))

    def bq(tail):          # per-batch block, query-tiled
        return pl.BlockSpec((tb,) + tail, lambda b, q: (b, q, 0))

    def fixed(shape):      # whole-array block, DMA'd once (constant index)
        n = len(shape)
        return pl.BlockSpec(shape, lambda b, q, _n=n: (0,) * _n)

    in_specs = [bq((tq, E)), bfull((T_x, E))]
    in_specs += [bfull((t, E)) for t in ctx_T]
    in_specs += [bq((tq, 1))]
    in_specs += [bfull((1, T_x))]
    in_specs += [bfull((1, t)) for t in ctx_T]
    in_specs += [fixed((E, E))] * (3 + 2 * num_context)
    in_specs += [fixed((1, hs))] * (4 + 2 * num_context)
    in_specs += [fixed((E, E)), fixed((1, E))]

    args = ([x_bf, x_bf] + ctx_bf + [mask_q3] + seg_masks
            + [wq_t, wk_t, wv_t] + wck_t + wcv_t
            + [qln_w, qln_b, kln_w, kln_b] + ckln_w + ckln_b
            + [wu_t, bu])

    kernel = functools.partial(_mca_kernel, num_context=num_context,
                               heads=heads, kqnorm=kqnorm)

    return pl.pallas_call(
        kernel,
        out_shape=jax.ShapeDtypeStruct((B, T_x, E), f32),
        grid_spec=pltpu.PrefetchScalarGridSpec(
            num_scalar_prefetch=0,
            grid=grid,
            in_specs=in_specs,
            out_specs=pl.BlockSpec((tb, tq, E), lambda b, q: (b, q, 0)),
            scratch_shapes=[pltpu.VMEM((tb, tq, E), jnp.float32)],
        ),
        compiler_params=pltpu.CompilerParams(
            dimension_semantics=("parallel", "parallel"),
            vmem_limit_bytes=vmem_limit),
    )(*args)


# ----------------------------------------------------------------------------
# Pure-JAX reference (mirrors the PyTorch forward)
# ----------------------------------------------------------------------------
def _reference(x, context, mask, context_mask, params, heads, kqnorm=True):
    hp = jax.lax.Precision.HIGHEST
    B, T_x, E = x.shape
    hs = E // heads

    def lin(inp, w):                   # torch Linear: inp @ W^T
        return jnp.einsum("bte,fe->btf", inp, w, precision=hp)

    q, k, v = lin(x, params["wq"]), lin(x, params["wk"]), lin(x, params["wv"])
    ck = [lin(c, w) for c, w in zip(context, params["wck"])]
    cv = [lin(c, w) for c, w in zip(context, params["wcv"])]

    def hview(t):
        return t.reshape(t.shape[0], t.shape[1], heads, hs)

    q, k, v = hview(q), hview(k), hview(v)
    ck, cv = [hview(t) for t in ck], [hview(t) for t in cv]

    def ln(t, w, b):
        mu = t.mean(-1, keepdims=True)
        var = ((t - mu) ** 2).mean(-1, keepdims=True)
        return (t - mu) * jax.lax.rsqrt(var + _LN_EPS) * w + b

    if kqnorm:
        q = ln(q, params["qln_w"], params["qln_b"])
        k = ln(k, params["kln_w"], params["kln_b"])
        ck = [ln(t, w, b) for t, w, b in
              zip(ck, params["ckln_w"], params["ckln_b"])]

    keys = jnp.concatenate([k] + ck, axis=1)
    vals = jnp.concatenate([v] + cv, axis=1)
    mask_all = jnp.concatenate([mask] + list(context_mask), axis=1)
    T_tot = keys.shape[1]

    def fheads(t):
        return t.transpose(0, 2, 1, 3).reshape(B * heads, t.shape[1], hs)

    qf, kf, vf = fheads(q), fheads(keys), fheads(vals)
    scale = E ** (-0.25)
    dot = jnp.einsum("bqd,bkd->bqk", qf * scale, kf * scale, precision=hp)
    dmask = jnp.einsum("bq,bk->bqk", mask, mask_all)
    dmask = jnp.broadcast_to(dmask[:, None], (B, heads, T_x, T_tot)
                             ).reshape(B * heads, T_x, T_tot)
    z = dot * dmask
    p = jax.nn.softmax(z, axis=-1) * dmask
    p = p / (p.sum(-1, keepdims=True) + _SM_EPS)
    out = jnp.einsum("bqk,bkd->bqd", p, vf, precision=hp)
    out = out.reshape(B, heads, T_x, hs).transpose(0, 2, 1, 3).reshape(B, T_x, E)
    return jnp.einsum("bte,fe->btf", out, params["wu"], precision=hp) + params["bu"]


# ----------------------------------------------------------------------------
if __name__ == "__main__":
    B, T_x, E, heads = 2, 8, 32, 8
    num_context = 2
    ctx_T = [6, 4]
    hs = E // heads

    key = jax.random.PRNGKey(0)
    kit = iter(jax.random.split(key, 32))

    x = jax.random.normal(next(kit), (B, T_x, E), dtype=jnp.float32)
    context = [jax.random.normal(next(kit), (B, t, E), dtype=jnp.float32)
               for t in ctx_T]

    # masks: 1 = attend, 0 = masked; exercise both query- and key-side masking
    mask = jnp.ones((B, T_x), jnp.float32).at[1, -1].set(0.0)
    context_mask = [jnp.ones((B, t), jnp.float32) for t in ctx_T]
    context_mask[0] = context_mask[0].at[0, -2:].set(0.0)

    lim = 1.0 / (E ** 0.5)

    def linw(k):   # torch nn.Linear default init: U(-1/sqrt(E), 1/sqrt(E))
        return jax.random.uniform(k, (E, E), jnp.float32, -lim, lim)

    params = {
        "wq": linw(next(kit)), "wk": linw(next(kit)), "wv": linw(next(kit)),
        "wck": [linw(next(kit)) for _ in range(num_context)],
        "wcv": [linw(next(kit)) for _ in range(num_context)],
        "wu": linw(next(kit)),
        "bu": jax.random.uniform(next(kit), (E,), jnp.float32, -lim, lim),
        # LayerNorm defaults are weight=1 / bias=0; perturb so affine is used.
        "qln_w": 1.0 + 0.05 * jax.random.normal(next(kit), (hs,), jnp.float32),
        "qln_b": 0.05 * jax.random.normal(next(kit), (hs,), jnp.float32),
        "kln_w": 1.0 + 0.05 * jax.random.normal(next(kit), (hs,), jnp.float32),
        "kln_b": 0.05 * jax.random.normal(next(kit), (hs,), jnp.float32),
        "ckln_w": [1.0 + 0.05 * jax.random.normal(next(kit), (hs,), jnp.float32)
                   for _ in range(num_context)],
        "ckln_b": [0.05 * jax.random.normal(next(kit), (hs,), jnp.float32)
                   for _ in range(num_context)],
    }

    out = multi_context_attention(x, context, mask, context_mask, params,
                                  heads=heads, kqnorm=True)
    out = jax.block_until_ready(out)

    ref = _reference(x, context, mask, context_mask, params, heads, kqnorm=True)
    assert out.shape == (B, T_x, E)
    max_err = float(jnp.max(jnp.abs(out - ref)))
    # bf16 MXU operands vs f32 HIGHEST reference -> looser tolerance
    assert jnp.allclose(out, ref, atol=3e-2, rtol=3e-2), max_err

    print("KERNEL_OK")
</pallas_src>

<mosaic_0001>
module attributes {stable_mosaic.version = 11 : i64} {
  func.func @_mca_kernel(%arg0: i32, %arg1: i32, %arg2: memref<1x8x32xbf16, #tpu.memory_space<vmem>>, %arg3: memref<1x8x32xbf16, #tpu.memory_space<vmem>>, %arg4: memref<1x6x32xbf16, #tpu.memory_space<vmem>>, %arg5: memref<1x4x32xbf16, #tpu.memory_space<vmem>>, %arg6: memref<1x8x1xf32, #tpu.memory_space<vmem>>, %arg7: memref<1x1x8xf32, #tpu.memory_space<vmem>>, %arg8: memref<1x1x6xf32, #tpu.memory_space<vmem>>, %arg9: memref<1x1x4xf32, #tpu.memory_space<vmem>>, %arg10: memref<32x32xbf16, #tpu.memory_space<vmem>>, %arg11: memref<32x32xbf16, #tpu.memory_space<vmem>>, %arg12: memref<32x32xbf16, #tpu.memory_space<vmem>>, %arg13: memref<32x32xbf16, #tpu.memory_space<vmem>>, %arg14: memref<32x32xbf16, #tpu.memory_space<vmem>>, %arg15: memref<32x32xbf16, #tpu.memory_space<vmem>>, %arg16: memref<32x32xbf16, #tpu.memory_space<vmem>>, %arg17: memref<1x4xf32, #tpu.memory_space<vmem>>, %arg18: memref<1x4xf32, #tpu.memory_space<vmem>>, %arg19: memref<1x4xf32, #tpu.memory_space<vmem>>, %arg20: memref<1x4xf32, #tpu.memory_space<vmem>>, %arg21: memref<1x4xf32, #tpu.memory_space<vmem>>, %arg22: memref<1x4xf32, #tpu.memory_space<vmem>>, %arg23: memref<1x4xf32, #tpu.memory_space<vmem>>, %arg24: memref<1x4xf32, #tpu.memory_space<vmem>>, %arg25: memref<32x32xbf16, #tpu.memory_space<vmem>>, %arg26: memref<1x32xf32, #tpu.memory_space<vmem>>, %arg27: memref<1x8x32xf32, #tpu.memory_space<vmem>>, %arg28: memref<1x8x32xf32, #tpu.memory_space<vmem>>) attributes {dimension_semantics = [#tpu.dimension_semantics<parallel>, #tpu.dimension_semantics<parallel>], iteration_bounds = array<i64: 2, 1>, scalar_prefetch = 0 : i64, scratch_operands = 1 : i64, tpu.core_type = #tpu.core_type<tc>, window_params = [{transform_indices = @transform_0, window_bounds = array<i64: 1, 8, 32>}, {transform_indices = @transform_1, window_bounds = array<i64: 1, 8, 32>}, {transform_indices = @transform_2, window_bounds = array<i64: 1, 6, 32>}, {transform_indices = @transform_3, window_bounds = array<i64: 1, 4, 32>}, {transform_indices = @transform_4, window_bounds = array<i64: 1, 8, 1>}, {transform_indices = @transform_5, window_bounds = array<i64: 1, 1, 8>}, {transform_indices = @transform_6, window_bounds = array<i64: 1, 1, 6>}, {transform_indices = @transform_7, window_bounds = array<i64: 1, 1, 4>}, {pipeline_mode = #tpu.pipeline_mode<synchronous>, transform_indices = @transform_8, window_bounds = array<i64: 32, 32>}, {pipeline_mode = #tpu.pipeline_mode<synchronous>, transform_indices = @transform_9, window_bounds = array<i64: 32, 32>}, {pipeline_mode = #tpu.pipeline_mode<synchronous>, transform_indices = @transform_10, window_bounds = array<i64: 32, 32>}, {pipeline_mode = #tpu.pipeline_mode<synchronous>, transform_indices = @transform_11, window_bounds = array<i64: 32, 32>}, {pipeline_mode = #tpu.pipeline_mode<synchronous>, transform_indices = @transform_12, window_bounds = array<i64: 32, 32>}, {pipeline_mode = #tpu.pipeline_mode<synchronous>, transform_indices = @transform_13, window_bounds = array<i64: 32, 32>}, {pipeline_mode = #tpu.pipeline_mode<synchronous>, transform_indices = @transform_14, window_bounds = array<i64: 32, 32>}, {pipeline_mode = #tpu.pipeline_mode<synchronous>, transform_indices = @transform_15, window_bounds = array<i64: 1, 4>}, {pipeline_mode = #tpu.pipeline_mode<synchronous>, transform_indices = @transform_16, window_bounds = array<i64: 1, 4>}, {pipeline_mode = #tpu.pipeline_mode<synchronous>, transform_indices = @transform_17, window_bounds = array<i64: 1, 4>}, {pipeline_mode = #tpu.pipeline_mode<synchronous>, transform_indices = @transform_18, window_bounds = array<i64: 1, 4>}, {pipeline_mode = #tpu.pipeline_mode<synchronous>, transform_indices = @transform_19, window_bounds = array<i64: 1, 4>}, {pipeline_mode = #tpu.pipeline_mode<synchronous>, transform_indices = @transform_20, window_bounds = array<i64: 1, 4>}, {pipeline_mode = #tpu.pipeline_mode<synchronous>, transform_indices = @transform_21, window_bounds = array<i64: 1, 4>}, {pipeline_mode = #tpu.pipeline_mode<synchronous>, transform_indices = @transform_22, window_bounds = array<i64: 1, 4>}, {pipeline_mode = #tpu.pipeline_mode<synchronous>, transform_indices = @transform_23, window_bounds = array<i64: 32, 32>}, {pipeline_mode = #tpu.pipeline_mode<synchronous>, transform_indices = @transform_24, window_bounds = array<i64: 1, 32>}, {transform_indices = @transform_25, window_bounds = array<i64: 1, 8, 32>}]} {
    %c0 = arith.constant 0 : index
    %c0_0 = arith.constant 0 : index
    %c0_1 = arith.constant 0 : index
    %0 = vector.load %arg2[%c0, %c0_0, %c0_1] : memref<1x8x32xbf16, #tpu.memory_space<vmem>>, vector<1x8x32xbf16>
    %1 = vector.shape_cast %0 : vector<1x8x32xbf16> to vector<8x32xbf16>
    %c0_2 = arith.constant 0 : index
    %c0_3 = arith.constant 0 : index
    %c0_4 = arith.constant 0 : index
    %2 = vector.load %arg3[%c0_2, %c0_3, %c0_4] : memref<1x8x32xbf16, #tpu.memory_space<vmem>>, vector<1x8x32xbf16>
    %3 = vector.shape_cast %2 : vector<1x8x32xbf16> to vector<8x32xbf16>
    %c0_5 = arith.constant 0 : index
    %c0_6 = arith.constant 0 : index
    %4 = vector.load %arg10[%c0_5, %c0_6] : memref<32x32xbf16, #tpu.memory_space<vmem>>, vector<32x32xbf16>
    %cst = arith.constant dense<0.000000e+00> : vector<8x32xf32>
    %5 = tpu.matmul %1, %4, %cst {dimension_numbers = #tpu.dot_dimension_numbers<[1], [0], [0], [1], [0, 0, 1, 1], [], []>} : vector<8x32xbf16>, vector<32x32xbf16>, vector<8x32xf32> -> vector<8x32xf32>
    %c0_7 = arith.constant 0 : index
    %c0_8 = arith.constant 0 : index
    %6 = vector.load %arg11[%c0_7, %c0_8] : memref<32x32xbf16, #tpu.memory_space<vmem>>, vector<32x32xbf16>
    %cst_9 = arith.constant dense<0.000000e+00> : vector<8x32xf32>
    %7 = tpu.matmul %3, %6, %cst_9 {dimension_numbers = #tpu.dot_dimension_numbers<[1], [0], [0], [1], [0, 0, 1, 1], [], []>} : vector<8x32xbf16>, vector<32x32xbf16>, vector<8x32xf32> -> vector<8x32xf32>
    %c0_10 = arith.constant 0 : index
    %c0_11 = arith.constant 0 : index
    %8 = vector.load %arg12[%c0_10, %c0_11] : memref<32x32xbf16, #tpu.memory_space<vmem>>, vector<32x32xbf16>
    %cst_12 = arith.constant dense<0.000000e+00> : vector<8x32xf32>
    %9 = tpu.matmul %3, %8, %cst_12 {dimension_numbers = #tpu.dot_dimension_numbers<[1], [0], [0], [1], [0, 0, 1, 1], [], []>} : vector<8x32xbf16>, vector<32x32xbf16>, vector<8x32xf32> -> vector<8x32xf32>
    %c0_13 = arith.constant 0 : index
    %c0_14 = arith.constant 0 : index
    %c0_15 = arith.constant 0 : index
    %10 = vector.load %arg4[%c0_13, %c0_14, %c0_15] : memref<1x6x32xbf16, #tpu.memory_space<vmem>>, vector<1x6x32xbf16>
    %11 = vector.shape_cast %10 : vector<1x6x32xbf16> to vector<6x32xbf16>
    %c0_16 = arith.constant 0 : index
    %c0_17 = arith.constant 0 : index
    %12 = vector.load %arg13[%c0_16, %c0_17] : memref<32x32xbf16, #tpu.memory_space<vmem>>, vector<32x32xbf16>
    %cst_18 = arith.constant dense<0.000000e+00> : vector<6x32xf32>
    %13 = tpu.matmul %11, %12, %cst_18 {dimension_numbers = #tpu.dot_dimension_numbers<[1], [0], [0], [1], [0, 0, 1, 1], [], []>} : vector<6x32xbf16>, vector<32x32xbf16>, vector<6x32xf32> -> vector<6x32xf32>
    %c0_19 = arith.constant 0 : index
    %c0_20 = arith.constant 0 : index
    %14 = vector.load %arg15[%c0_19, %c0_20] : memref<32x32xbf16, #tpu.memory_space<vmem>>, vector<32x32xbf16>
    %cst_21 = arith.constant dense<0.000000e+00> : vector<6x32xf32>
    %15 = tpu.matmul %11, %14, %cst_21 {dimension_numbers = #tpu.dot_dimension_numbers<[1], [0], [0], [1], [0, 0, 1, 1], [], []>} : vector<6x32xbf16>, vector<32x32xbf16>, vector<6x32xf32> -> vector<6x32xf32>
    %c0_22 = arith.constant 0 : index
    %c0_23 = arith.constant 0 : index
    %c0_24 = arith.constant 0 : index
    %16 = vector.load %arg5[%c0_22, %c0_23, %c0_24] : memref<1x4x32xbf16, #tpu.memory_space<vmem>>, vector<1x4x32xbf16>
    %17 = vector.shape_cast %16 : vector<1x4x32xbf16> to vector<4x32xbf16>
    %c0_25 = arith.constant 0 : index
    %c0_26 = arith.constant 0 : index
    %18 = vector.load %arg14[%c0_25, %c0_26] : memref<32x32xbf16, #tpu.memory_space<vmem>>, vector<32x32xbf16>
    %cst_27 = arith.constant dense<0.000000e+00> : vector<4x32xf32>
    %19 = tpu.matmul %17, %18, %cst_27 {dimension_numbers = #tpu.dot_dimension_numbers<[1], [0], [0], [1], [0, 0, 1, 1], [], []>} : vector<4x32xbf16>, vector<32x32xbf16>, vector<4x32xf32> -> vector<4x32xf32>
    %c0_28 = arith.constant 0 : index
    %c0_29 = arith.constant 0 : index
    %20 = vector.load %arg16[%c0_28, %c0_29] : memref<32x32xbf16, #tpu.memory_space<vmem>>, vector<32x32xbf16>
    %cst_30 = arith.constant dense<0.000000e+00> : vector<4x32xf32>
    %21 = tpu.matmul %17, %20, %cst_30 {dimension_numbers = #tpu.dot_dimension_numbers<[1], [0], [0], [1], [0, 0, 1, 1], [], []>} : vector<4x32xbf16>, vector<32x32xbf16>, vector<4x32xf32> -> vector<4x32xf32>
    %c0_31 = arith.constant 0 : index
    %c0_32 = arith.constant 0 : index
    %c0_33 = arith.constant 0 : index
    %22 = vector.load %arg6[%c0_31, %c0_32, %c0_33] : memref<1x8x1xf32, #tpu.memory_space<vmem>>, vector<1x8x1xf32>
    %c0_34 = arith.constant 0 : index
    %c0_35 = arith.constant 0 : index
    %c0_36 = arith.constant 0 : index
    %23 = vector.load %arg7[%c0_34, %c0_35, %c0_36] : memref<1x1x8xf32, #tpu.memory_space<vmem>>, vector<1x1x8xf32>
    %24 = vector.broadcast %22 : vector<1x8x1xf32> to vector<1x8x8xf32>
    %25 = vector.broadcast %23 : vector<1x1x8xf32> to vector<1x8x8xf32>
    %26 = arith.mulf %24, %25 : vector<1x8x8xf32>
    %c0_37 = arith.constant 0 : index
    %c0_38 = arith.constant 0 : index
    %c0_39 = arith.constant 0 : index
    %27 = vector.load %arg8[%c0_37, %c0_38, %c0_39] : memref<1x1x6xf32, #tpu.memory_space<vmem>>, vector<1x1x6xf32>
    %28 = vector.broadcast %22 : vector<1x8x1xf32> to vector<1x8x6xf32>
    %29 = vector.broadcast %27 : vector<1x1x6xf32> to vector<1x8x6xf32>
    %30 = arith.mulf %28, %29 : vector<1x8x6xf32>
    %c0_40 = arith.constant 0 : index
    %c0_41 = arith.constant 0 : index
    %c0_42 = arith.constant 0 : index
    %31 = vector.load %arg9[%c0_40, %c0_41, %c0_42] : memref<1x1x4xf32, #tpu.memory_space<vmem>>, vector<1x1x4xf32>
    %32 = vector.broadcast %22 : vector<1x8x1xf32> to vector<1x8x4xf32>
    %33 = vector.broadcast %31 : vector<1x1x4xf32> to vector<1x8x4xf32>
    %34 = arith.mulf %32, %33 : vector<1x8x4xf32>
    %c0_43 = arith.constant 0 : index
    %c0_44 = arith.constant 0 : index
    %35 = vector.load %arg17[%c0_43, %c0_44] : memref<1x4xf32, #tpu.memory_space<vmem>>, vector<1x4xf32>
    %c0_45 = arith.constant 0 : index
    %c0_46 = arith.constant 0 : index
    %36 = vector.load %arg18[%c0_45, %c0_46] : memref<1x4xf32, #tpu.memory_space<vmem>>, vector<1x4xf32>
    %c0_47 = arith.constant 0 : index
    %c0_48 = arith.constant 0 : index
    %37 = vector.load %arg19[%c0_47, %c0_48] : memref<1x4xf32, #tpu.memory_space<vmem>>, vector<1x4xf32>
    %c0_49 = arith.constant 0 : index
    %c0_50 = arith.constant 0 : index
    %38 = vector.load %arg20[%c0_49, %c0_50] : memref<1x4xf32, #tpu.memory_space<vmem>>, vector<1x4xf32>
    %c0_51 = arith.constant 0 : index
    %c0_52 = arith.constant 0 : index
    %39 = vector.load %arg21[%c0_51, %c0_52] : memref<1x4xf32, #tpu.memory_space<vmem>>, vector<1x4xf32>
    %c0_53 = arith.constant 0 : index
    %c0_54 = arith.constant 0 : index
    %40 = vector.load %arg23[%c0_53, %c0_54] : memref<1x4xf32, #tpu.memory_space<vmem>>, vector<1x4xf32>
    %c0_55 = arith.constant 0 : index
    %c0_56 = arith.constant 0 : index
    %41 = vector.load %arg22[%c0_55, %c0_56] : memref<1x4xf32, #tpu.memory_space<vmem>>, vector<1x4xf32>
    %c0_57 = arith.constant 0 : index
    %c0_58 = arith.constant 0 : index
    %42 = vector.load %arg24[%c0_57, %c0_58] : memref<1x4xf32, #tpu.memory_space<vmem>>, vector<1x4xf32>
    %43 = vector.extract_strided_slice %5 {offsets = [0, 0], sizes = [8, 4], strides = [1, 1]} : vector<8x32xf32> to vector<8x4xf32>
    %44 = vector.extract_strided_slice %7 {offsets = [0, 0], sizes = [8, 4], strides = [1, 1]} : vector<8x32xf32> to vector<8x4xf32>
    %cst_59 = arith.constant dense<0.000000e+00> : vector<8xf32>
    %45 = vector.multi_reduction <add>, %43, %cst_59 [1] : vector<8x4xf32> to vector<8xf32>
    %46 = vector.shape_cast %45 : vector<8xf32> to vector<8x1xf32>
    %cst_60 = arith.constant 4.000000e+00 : f32
    %47 = vector.broadcast %cst_60 : f32 to vector<8x1xf32>
    %48 = arith.divf %46, %47 : vector<8x1xf32>
    %49 = vector.broadcast %48 : vector<8x1xf32> to vector<8x4xf32>
    %50 = arith.subf %43, %49 : vector<8x4xf32>
    %51 = arith.mulf %50, %50 : vector<8x4xf32>
    %cst_61 = arith.constant dense<0.000000e+00> : vector<8xf32>
    %52 = vector.multi_reduction <add>, %51, %cst_61 [1] : vector<8x4xf32> to vector<8xf32>
    %53 = vector.shape_cast %52 : vector<8xf32> to vector<8x1xf32>
    %cst_62 = arith.constant 4.000000e+00 : f32
    %54 = vector.broadcast %cst_62 : f32 to vector<8x1xf32>
    %55 = arith.divf %53, %54 : vector<8x1xf32>
    %cst_63 = arith.constant 9.99999974E-6 : f32
    %56 = vector.broadcast %cst_63 : f32 to vector<8x1xf32>
    %57 = arith.addf %55, %56 : vector<8x1xf32>
    %58 = math.rsqrt %57 : vector<8x1xf32>
    %59 = vector.broadcast %58 : vector<8x1xf32> to vector<8x4xf32>
    %60 = arith.mulf %50, %59 : vector<8x4xf32>
    %61 = vector.broadcast %35 : vector<1x4xf32> to vector<8x4xf32>
    %62 = arith.mulf %60, %61 : vector<8x4xf32>
    %63 = vector.broadcast %36 : vector<1x4xf32> to vector<8x4xf32>
    %64 = arith.addf %62, %63 : vector<8x4xf32>
    %cst_64 = arith.constant dense<0.000000e+00> : vector<8xf32>
    %65 = vector.multi_reduction <add>, %44, %cst_64 [1] : vector<8x4xf32> to vector<8xf32>
    %66 = vector.shape_cast %65 : vector<8xf32> to vector<8x1xf32>
    %cst_65 = arith.constant 4.000000e+00 : f32
    %67 = vector.broadcast %cst_65 : f32 to vector<8x1xf32>
    %68 = arith.divf %66, %67 : vector<8x1xf32>
    %69 = vector.broadcast %68 : vector<8x1xf32> to vector<8x4xf32>
    %70 = arith.subf %44, %69 : vector<8x4xf32>
    %71 = arith.mulf %70, %70 : vector<8x4xf32>
    %cst_66 = arith.constant dense<0.000000e+00> : vector<8xf32>
    %72 = vector.multi_reduction <add>, %71, %cst_66 [1] : vector<8x4xf32> to vector<8xf32>
    %73 = vector.shape_cast %72 : vector<8xf32> to vector<8x1xf32>
    %cst_67 = arith.constant 4.000000e+00 : f32
    %74 = vector.broadcast %cst_67 : f32 to vector<8x1xf32>
    %75 = arith.divf %73, %74 : vector<8x1xf32>
    %cst_68 = arith.constant 9.99999974E-6 : f32
    %76 = vector.broadcast %cst_68 : f32 to vector<8x1xf32>
    %77 = arith.addf %75, %76 : vector<8x1xf32>
    %78 = math.rsqrt %77 : vector<8x1xf32>
    %79 = vector.broadcast %78 : vector<8x1xf32> to vector<8x4xf32>
    %80 = arith.mulf %70, %79 : vector<8x4xf32>
    %81 = vector.broadcast %37 : vector<1x4xf32> to vector<8x4xf32>
    %82 = arith.mulf %80, %81 : vector<8x4xf32>
    %83 = vector.broadcast %38 : vector<1x4xf32> to vector<8x4xf32>
    %84 = arith.addf %82, %83 : vector<8x4xf32>
    %85 = arith.truncf %64 : vector<8x4xf32> to vector<8x4xbf16>
    %86 = vector.shape_cast %85 : vector<8x4xbf16> to vector<1x8x4xbf16>
    %87 = arith.truncf %84 : vector<8x4xf32> to vector<8x4xbf16>
    %88 = vector.shape_cast %87 : vector<8x4xbf16> to vector<1x8x4xbf16>
    %89 = vector.extract_strided_slice %9 {offsets = [0, 0], sizes = [8, 4], strides = [1, 1]} : vector<8x32xf32> to vector<8x4xf32>
    %90 = arith.truncf %89 : vector<8x4xf32> to vector<8x4xbf16>
    %91 = vector.shape_cast %90 : vector<8x4xbf16> to vector<1x8x4xbf16>
    %92 = vector.extract_strided_slice %13 {offsets = [0, 0], sizes = [6, 4], strides = [1, 1]} : vector<6x32xf32> to vector<6x4xf32>
    %cst_69 = arith.constant dense<0.000000e+00> : vector<6xf32>
    %93 = vector.multi_reduction <add>, %92, %cst_69 [1] : vector<6x4xf32> to vector<6xf32>
    %94 = vector.shape_cast %93 : vector<6xf32> to vector<6x1xf32>
    %cst_70 = arith.constant 4.000000e+00 : f32
    %95 = vector.broadcast %cst_70 : f32 to vector<6x1xf32>
    %96 = arith.divf %94, %95 : vector<6x1xf32>
    %97 = vector.broadcast %96 : vector<6x1xf32> to vector<6x4xf32>
    %98 = arith.subf %92, %97 : vector<6x4xf32>
    %99 = arith.mulf %98, %98 : vector<6x4xf32>
    %cst_71 = arith.constant dense<0.000000e+00> : vector<6xf32>
    %100 = vector.multi_reduction <add>, %99, %cst_71 [1] : vector<6x4xf32> to vector<6xf32>
    %101 = vector.shape_cast %100 : vector<6xf32> to vector<6x1xf32>
    %cst_72 = arith.constant 4.000000e+00 : f32
    %102 = vector.broadcast %cst_72 : f32 to vector<6x1xf32>
    %103 = arith.divf %101, %102 : vector<6x1xf32>
    %cst_73 = arith.constant 9.99999974E-6 : f32
    %104 = vector.broadcast %cst_73 : f32 to vector<6x1xf32>
    %105 = arith.addf %103, %104 : vector<6x1xf32>
    %106 = math.rsqrt %105 : vector<6x1xf32>
    %107 = vector.broadcast %106 : vector<6x1xf32> to vector<6x4xf32>
    %108 = arith.mulf %98, %107 : vector<6x4xf32>
    %109 = vector.broadcast %39 : vector<1x4xf32> to vector<6x4xf32>
    %110 = arith.mulf %108, %109 : vector<6x4xf32>
    %111 = vector.broadcast %40 : vector<1x4xf32> to vector<6x4xf32>
    %112 = arith.addf %110, %111 : vector<6x4xf32>
    %113 = arith.truncf %112 : vector<6x4xf32> to vector<6x4xbf16>
    %114 = vector.shape_cast %113 : vector<6x4xbf16> to vector<1x6x4xbf16>
    %115 = vector.extract_strided_slice %15 {offsets = [0, 0], sizes = [6, 4], strides = [1, 1]} : vector<6x32xf32> to vector<6x4xf32>
    %116 = arith.truncf %115 : vector<6x4xf32> to vector<6x4xbf16>
    %117 = vector.shape_cast %116 : vector<6x4xbf16> to vector<1x6x4xbf16>
    %118 = vector.extract_strided_slice %19 {offsets = [0, 0], sizes = [4, 4], strides = [1, 1]} : vector<4x32xf32> to vector<4x4xf32>
    %cst_74 = arith.constant dense<0.000000e+00> : vector<4xf32>
    %119 = vector.multi_reduction <add>, %118, %cst_74 [1] : vector<4x4xf32> to vector<4xf32>
    %120 = vector.shape_cast %119 : vector<4xf32> to vector<4x1xf32>
    %cst_75 = arith.constant 4.000000e+00 : f32
    %121 = vector.broadcast %cst_75 : f32 to vector<4x1xf32>
    %122 = arith.divf %120, %121 : vector<4x1xf32>
    %123 = vector.broadcast %122 : vector<4x1xf32> to vector<4x4xf32>
    %124 = arith.subf %118, %123 : vector<4x4xf32>
    %125 = arith.mulf %124, %124 : vector<4x4xf32>
    %cst_76 = arith.constant dense<0.000000e+00> : vector<4xf32>
    %126 = vector.multi_reduction <add>, %125, %cst_76 [1] : vector<4x4xf32> to vector<4xf32>
    %127 = vector.shape_cast %126 : vector<4xf32> to vector<4x1xf32>
    %cst_77 = arith.constant 4.000000e+00 : f32
    %128 = vector.broadcast %cst_77 : f32 to vector<4x1xf32>
    %129 = arith.divf %127, %128 : vector<4x1xf32>
    %cst_78 = arith.constant 9.99999974E-6 : f32
    %130 = vector.broadcast %cst_78 : f32 to vector<4x1xf32>
    %131 = arith.addf %129, %130 : vector<4x1xf32>
    %132 = math.rsqrt %131 : vector<4x1xf32>
    %133 = vector.broadcast %132 : vector<4x1xf32> to vector<4x4xf32>
    %134 = arith.mulf %124, %133 : vector<4x4xf32>
    %135 = vector.broadcast %41 : vector<1x4xf32> to vector<4x4xf32>
    %136 = arith.mulf %134, %135 : vector<4x4xf32>
    %137 = vector.broadcast %42 : vector<1x4xf32> to vector<4x4xf32>
    %138 = arith.addf %136, %137 : vector<4x4xf32>
    %139 = arith.truncf %138 : vector<4x4xf32> to vector<4x4xbf16>
    %140 = vector.shape_cast %139 : vector<4x4xbf16> to vector<1x4x4xbf16>
    %141 = vector.extract_strided_slice %21 {offsets = [0, 0], sizes = [4, 4], strides = [1, 1]} : vector<4x32xf32> to vector<4x4xf32>
    %142 = arith.truncf %141 : vector<4x4xf32> to vector<4x4xbf16>
    %143 = vector.shape_cast %142 : vector<4x4xbf16> to vector<1x4x4xbf16>
    %cst_79 = arith.constant dense<0.000000e+00> : vector<1x8x8xf32>
    %144 = tpu.matmul %86, %88, %cst_79 {dimension_numbers = #tpu.dot_dimension_numbers<[2], [2], [1], [1], [0, 0, 0, 1, 1, 1], [0], [0]>} : vector<1x8x4xbf16>, vector<1x8x4xbf16>, vector<1x8x8xf32> -> vector<1x8x8xf32>
    %145 = arith.mulf %144, %26 : vector<1x8x8xf32>
    %cst_80 = arith.constant dense<0.000000e+00> : vector<1x8x6xf32>
    %146 = tpu.matmul %86, %114, %cst_80 {dimension_numbers = #tpu.dot_dimension_numbers<[2], [2], [1], [1], [0, 0, 0, 1, 1, 1], [0], [0]>} : vector<1x8x4xbf16>, vector<1x6x4xbf16>, vector<1x8x6xf32> -> vector<1x8x6xf32>
    %147 = arith.mulf %146, %30 : vector<1x8x6xf32>
    %cst_81 = arith.constant dense<0.000000e+00> : vector<1x8x4xf32>
    %148 = tpu.matmul %86, %140, %cst_81 {dimension_numbers = #tpu.dot_dimension_numbers<[2], [2], [1], [1], [0, 0, 0, 1, 1, 1], [0], [0]>} : vector<1x8x4xbf16>, vector<1x4x4xbf16>, vector<1x8x4xf32> -> vector<1x8x4xf32>
    %149 = arith.mulf %148, %34 : vector<1x8x4xf32>
    %cst_82 = arith.constant dense<0xFF800000> : vector<1x8xf32>
    %150 = vector.multi_reduction <maximumf>, %145, %cst_82 [2] : vector<1x8x8xf32> to vector<1x8xf32>
    %151 = vector.shape_cast %150 : vector<1x8xf32> to vector<1x8x1xf32>
    %cst_83 = arith.constant dense<0xFF800000> : vector<1x8xf32>
    %152 = vector.multi_reduction <maximumf>, %147, %cst_83 [2] : vector<1x8x6xf32> to vector<1x8xf32>
    %153 = vector.shape_cast %152 : vector<1x8xf32> to vector<1x8x1xf32>
    %154 = arith.maximumf %151, %153 : vector<1x8x1xf32>
    %cst_84 = arith.constant dense<0xFF800000> : vector<1x8xf32>
    %155 = vector.multi_reduction <maximumf>, %149, %cst_84 [2] : vector<1x8x4xf32> to vector<1x8xf32>
    %156 = vector.shape_cast %155 : vector<1x8xf32> to vector<1x8x1xf32>
    %157 = arith.maximumf %154, %156 : vector<1x8x1xf32>
    %158 = vector.broadcast %157 : vector<1x8x1xf32> to vector<1x8x8xf32>
    %159 = arith.subf %145, %158 : vector<1x8x8xf32>
    %160 = math.exp %159 : vector<1x8x8xf32>
    %161 = vector.broadcast %157 : vector<1x8x1xf32> to vector<1x8x6xf32>
    %162 = arith.subf %147, %161 : vector<1x8x6xf32>
    %163 = math.exp %162 : vector<1x8x6xf32>
    %164 = vector.broadcast %157 : vector<1x8x1xf32> to vector<1x8x4xf32>
    %165 = arith.subf %149, %164 : vector<1x8x4xf32>
    %166 = math.exp %165 : vector<1x8x4xf32>
    %cst_85 = arith.constant dense<0.000000e+00> : vector<1x8xf32>
    %167 = vector.multi_reduction <add>, %160, %cst_85 [2] : vector<1x8x8xf32> to vector<1x8xf32>
    %168 = vector.shape_cast %167 : vector<1x8xf32> to vector<1x8x1xf32>
    %cst_86 = arith.constant dense<0.000000e+00> : vector<1x8xf32>
    %169 = vector.multi_reduction <add>, %163, %cst_86 [2] : vector<1x8x6xf32> to vector<1x8xf32>
    %170 = vector.shape_cast %169 : vector<1x8xf32> to vector<1x8x1xf32>
    %171 = arith.addf %168, %170 : vector<1x8x1xf32>
    %cst_87 = arith.constant dense<0.000000e+00> : vector<1x8xf32>
    %172 = vector.multi_reduction <add>, %166, %cst_87 [2] : vector<1x8x4xf32> to vector<1x8xf32>
    %173 = vector.shape_cast %172 : vector<1x8xf32> to vector<1x8x1xf32>
    %174 = arith.addf %171, %173 : vector<1x8x1xf32>
    %175 = arith.mulf %160, %26 : vector<1x8x8xf32>
    %176 = arith.mulf %163, %30 : vector<1x8x6xf32>
    %177 = arith.mulf %166, %34 : vector<1x8x4xf32>
    %cst_88 = arith.constant dense<0.000000e+00> : vector<1x8xf32>
    %178 = vector.multi_reduction <add>, %175, %cst_88 [2] : vector<1x8x8xf32> to vector<1x8xf32>
    %179 = vector.shape_cast %178 : vector<1x8xf32> to vector<1x8x1xf32>
    %cst_89 = arith.constant dense<0.000000e+00> : vector<1x8xf32>
    %180 = vector.multi_reduction <add>, %176, %cst_89 [2] : vector<1x8x6xf32> to vector<1x8xf32>
    %181 = vector.shape_cast %180 : vector<1x8xf32> to vector<1x8x1xf32>
    %182 = arith.addf %179, %181 : vector<1x8x1xf32>
    %cst_90 = arith.constant dense<0.000000e+00> : vector<1x8xf32>
    %183 = vector.multi_reduction <add>, %177, %cst_90 [2] : vector<1x8x4xf32> to vector<1x8xf32>
    %184 = vector.shape_cast %183 : vector<1x8xf32> to vector<1x8x1xf32>
    %185 = arith.addf %182, %184 : vector<1x8x1xf32>
    %cst_91 = arith.constant 9.99999982E-14 : f32
    %186 = vector.broadcast %cst_91 : f32 to vector<1x8x1xf32>
    %187 = arith.mulf %186, %174 : vector<1x8x1xf32>
    %188 = arith.addf %185, %187 : vector<1x8x1xf32>
    %189 = tpu.reciprocal %188 {approx = true} : vector<1x8x1xf32> -> vector<1x8x1xf32>
    %190 = vector.broadcast %189 : vector<1x8x1xf32> to vector<1x8x8xf32>
    %191 = arith.mulf %175, %190 : vector<1x8x8xf32>
    %192 = arith.truncf %191 : vector<1x8x8xf32> to vector<1x8x8xbf16>
    %cst_92 = arith.constant dense<0.000000e+00> : vector<1x8x4xf32>
    %193 = tpu.matmul %192, %91, %cst_92 {dimension_numbers = #tpu.dot_dimension_numbers<[2], [1], [1], [2], [0, 0, 0, 1, 1, 2], [0], [0]>} : vector<1x8x8xbf16>, vector<1x8x4xbf16>, vector<1x8x4xf32> -> vector<1x8x4xf32>
    %194 = vector.broadcast %189 : vector<1x8x1xf32> to vector<1x8x6xf32>
    %195 = arith.mulf %176, %194 : vector<1x8x6xf32>
    %196 = arith.truncf %195 : vector<1x8x6xf32> to vector<1x8x6xbf16>
    %cst_93 = arith.constant dense<0.000000e+00> : vector<1x8x4xf32>
    %197 = tpu.matmul %196, %117, %cst_93 {dimension_numbers = #tpu.dot_dimension_numbers<[2], [1], [1], [2], [0, 0, 0, 1, 1, 2], [0], [0]>} : vector<1x8x6xbf16>, vector<1x6x4xbf16>, vector<1x8x4xf32> -> vector<1x8x4xf32>
    %198 = arith.addf %193, %197 : vector<1x8x4xf32>
    %199 = vector.broadcast %189 : vector<1x8x1xf32> to vector<1x8x4xf32>
    %200 = arith.mulf %177, %199 : vector<1x8x4xf32>
    %201 = arith.truncf %200 : vector<1x8x4xf32> to vector<1x8x4xbf16>
    %cst_94 = arith.constant dense<0.000000e+00> : vector<1x8x4xf32>
    %202 = tpu.matmul %201, %143, %cst_94 {dimension_numbers = #tpu.dot_dimension_numbers<[2], [1], [1], [2], [0, 0, 0, 1, 1, 2], [0], [0]>} : vector<1x8x4xbf16>, vector<1x4x4xbf16>, vector<1x8x4xf32> -> vector<1x8x4xf32>
    %203 = arith.addf %198, %202 : vector<1x8x4xf32>
    %c0_95 = arith.constant 0 : index
    %c0_96 = arith.constant 0 : index
    %c0_97 = arith.constant 0 : index
    %204 = vector.load %arg28[%c0_95, %c0_96, %c0_97] : memref<1x8x32xf32, #tpu.memory_space<vmem>>, vector<1x8x4xf32>
    tpu.vector_store %arg28[%c0_95, %c0_96, %c0_97], %203 {strides = array<i32>} : memref<1x8x32xf32, #tpu.memory_space<vmem>>, vector<1x8x4xf32>,
    %205 = vector.extract_strided_slice %5 {offsets = [0, 4], sizes = [8, 4], strides = [1, 1]} : vector<8x32xf32> to vector<8x4xf32>
    %206 = vector.extract_strided_slice %7 {offsets = [0, 4], sizes = [8, 4], strides = [1, 1]} : vector<8x32xf32> to vector<8x4xf32>
    %cst_98 = arith.constant dense<0.000000e+00> : vector<8xf32>
    %207 = vector.multi_reduction <add>, %205, %cst_98 [1] : vector<8x4xf32> to vector<8xf32>
    %208 = vector.shape_cast %207 : vector<8xf32> to vector<8x1xf32>
    %cst_99 = arith.constant 4.000000e+00 : f32
    %209 = vector.broadcast %cst_99 : f32 to vector<8x1xf32>
    %210 = arith.divf %208, %209 : vector<8x1xf32>
    %211 = vector.broadcast %210 : vector<8x1xf32> to vector<8x4xf32>
    %212 = arith.subf %205, %211 : vector<8x4xf32>
    %213 = arith.mulf %212, %212 : vector<8x4xf32>
    %cst_100 = arith.constant dense<0.000000e+00> : vector<8xf32>
    %214 = vector.multi_reduction <add>, %213, %cst_100 [1] : vector<8x4xf32> to vector<8xf32>
    %215 = vector.shape_cast %214 : vector<8xf32> to vector<8x1xf32>
    %cst_101 = arith.constant 4.000000e+00 : f32
    %216 = vector.broadcast %cst_101 : f32 to vector<8x1xf32>
    %217 = arith.divf %215, %216 : vector<8x1xf32>
    %cst_102 = arith.constant 9.99999974E-6 : f32
    %218 = vector.broadcast %cst_102 : f32 to vector<8x1xf32>
    %219 = arith.addf %217, %218 : vector<8x1xf32>
    %220 = math.rsqrt %219 : vector<8x1xf32>
    %221 = vector.broadcast %220 : vector<8x1xf32> to vector<8x4xf32>
    %222 = arith.mulf %212, %221 : vector<8x4xf32>
    %223 = vector.broadcast %35 : vector<1x4xf32> to vector<8x4xf32>
    %224 = arith.mulf %222, %223 : vector<8x4xf32>
    %225 = vector.broadcast %36 : vector<1x4xf32> to vector<8x4xf32>
    %226 = arith.addf %224, %225 : vector<8x4xf32>
    %cst_103 = arith.constant dense<0.000000e+00> : vector<8xf32>
    %227 = vector.multi_reduction <add>, %206, %cst_103 [1] : vector<8x4xf32> to vector<8xf32>
    %228 = vector.shape_cast %227 : vector<8xf32> to vector<8x1xf32>
    %cst_104 = arith.constant 4.000000e+00 : f32
    %229 = vector.broadcast %cst_104 : f32 to vector<8x1xf32>
    %230 = arith.divf %228, %229 : vector<8x1xf32>
    %231 = vector.broadcast %230 : vector<8x1xf32> to vector<8x4xf32>
    %232 = arith.subf %206, %231 : vector<8x4xf32>
    %233 = arith.mulf %232, %232 : vector<8x4xf32>
    %cst_105 = arith.constant dense<0.000000e+00> : vector<8xf32>
    %234 = vector.multi_reduction <add>, %233, %cst_105 [1] : vector<8x4xf32> to vector<8xf32>
    %235 = vector.shape_cast %234 : vector<8xf32> to vector<8x1xf32>
    %cst_106 = arith.constant 4.000000e+00 : f32
    %236 = vector.broadcast %cst_106 : f32 to vector<8x1xf32>
    %237 = arith.divf %235, %236 : vector<8x1xf32>
    %cst_107 = arith.constant 9.99999974E-6 : f32
    %238 = vector.broadcast %cst_107 : f32 to vector<8x1xf32>
    %239 = arith.addf %237, %238 : vector<8x1xf32>
    %240 = math.rsqrt %239 : vector<8x1xf32>
    %241 = vector.broadcast %240 : vector<8x1xf32> to vector<8x4xf32>
    %242 = arith.mulf %232, %241 : vector<8x4xf32>
    %243 = vector.broadcast %37 : vector<1x4xf32> to vector<8x4xf32>
    %244 = arith.mulf %242, %243 : vector<8x4xf32>
    %245 = vector.broadcast %38 : vector<1x4xf32> to vector<8x4xf32>
    %246 = arith.addf %244, %245 : vector<8x4xf32>
    %247 = arith.truncf %226 : vector<8x4xf32> to vector<8x4xbf16>
    %248 = vector.shape_cast %247 : vector<8x4xbf16> to vector<1x8x4xbf16>
    %249 = arith.truncf %246 : vector<8x4xf32> to vector<8x4xbf16>
    %250 = vector.shape_cast %249 : vector<8x4xbf16> to vector<1x8x4xbf16>
    %251 = vector.extract_strided_slice %9 {offsets = [0, 4], sizes = [8, 4], strides = [1, 1]} : vector<8x32xf32> to vector<8x4xf32>
    %252 = arith.truncf %251 : vector<8x4xf32> to vector<8x4xbf16>
    %253 = vector.shape_cast %252 : vector<8x4xbf16> to vector<1x8x4xbf16>
    %254 = vector.extract_strided_slice %13 {offsets = [0, 4], sizes = [6, 4], strides = [1, 1]} : vector<6x32xf32> to vector<6x4xf32>
    %cst_108 = arith.constant dense<0.000000e+00> : vector<6xf32>
    %255 = vector.multi_reduction <add>, %254, %cst_108 [1] : vector<6x4xf32> to vector<6xf32>
    %256 = vector.shape_cast %255 : vector<6xf32> to vector<6x1xf32>
    %cst_109 = arith.constant 4.000000e+00 : f32
    %257 = vector.broadcast %cst_109 : f32 to vector<6x1xf32>
    %258 = arith.divf %256, %257 : vector<6x1xf32>
    %259 = vector.broadcast %258 : vector<6x1xf32> to vector<6x4xf32>
    %260 = arith.subf %254, %259 : vector<6x4xf32>
    %261 = arith.mulf %260, %260 : vector<6x4xf32>
    %cst_110 = arith.constant dense<0.000000e+00> : vector<6xf32>
    %262 = vector.multi_reduction <add>, %261, %cst_110 [1] : vector<6x4xf32> to vector<6xf32>
    %263 = vector.shape_cast %262 : vector<6xf32> to vector<6x1xf32>
    %cst_111 = arith.constant 4.000000e+00 : f32
    %264 = vector.broadcast %cst_111 : f32 to vector<6x1xf32>
    %265 = arith.divf %263, %264 : vector<6x1xf32>
    %cst_112 = arith.constant 9.99999974E-6 : f32
    %266 = vector.broadcast %cst_112 : f32 to vector<6x1xf32>
    %267 = arith.addf %265, %266 : vector<6x1xf32>
    %268 = math.rsqrt %267 : vector<6x1xf32>
    %269 = vector.broadcast %268 : vector<6x1xf32> to vector<6x4xf32>
    %270 = arith.mulf %260, %269 : vector<6x4xf32>
    %271 = vector.broadcast %39 : vector<1x4xf32> to vector<6x4xf32>
    %272 = arith.mulf %270, %271 : vector<6x4xf32>
    %273 = vector.broadcast %40 : vector<1x4xf32> to vector<6x4xf32>
    %274 = arith.addf %272, %273 : vector<6x4xf32>
    %275 = arith.truncf %274 : vector<6x4xf32> to vector<6x4xbf16>
    %276 = vector.shape_cast %275 : vector<6x4xbf16> to vector<1x6x4xbf16>
    %277 = vector.extract_strided_slice %15 {offsets = [0, 4], sizes = [6, 4], strides = [1, 1]} : vector<6x32xf32> to vector<6x4xf32>
    %278 = arith.truncf %277 : vector<6x4xf32> to vector<6x4xbf16>
    %279 = vector.shape_cast %278 : vector<6x4xbf16> to vector<1x6x4xbf16>
    %280 = vector.extract_strided_slice %19 {offsets = [0, 4], sizes = [4, 4], strides = [1, 1]} : vector<4x32xf32> to vector<4x4xf32>
    %cst_113 = arith.constant dense<0.000000e+00> : vector<4xf32>
    %281 = vector.multi_reduction <add>, %280, %cst_113 [1] : vector<4x4xf32> to vector<4xf32>
    %282 = vector.shape_cast %281 : vector<4xf32> to vector<4x1xf32>
    %cst_114 = arith.constant 4.000000e+00 : f32
    %283 = vector.broadcast %cst_114 : f32 to vector<4x1xf32>
    %284 = arith.divf %282, %283 : vector<4x1xf32>
    %285 = vector.broadcast %284 : vector<4x1xf32> to vector<4x4xf32>
    %286 = arith.subf %280, %285 : vector<4x4xf32>
    %287 = arith.mulf %286, %286 : vector<4x4xf32>
    %cst_115 = arith.constant dense<0.000000e+00> : vector<4xf32>
    %288 = vector.multi_reduction <add>, %287, %cst_115 [1] : vector<4x4xf32> to vector<4xf32>
    %289 = vector.shape_cast %288 : vector<4xf32> to vector<4x1xf32>
    %cst_116 = arith.constant 4.000000e+00 : f32
    %290 = vector.broadcast %cst_116 : f32 to vector<4x1xf32>
    %291 = arith.divf %289, %290 : vector<4x1xf32>
    %cst_117 = arith.constant 9.99999974E-6 : f32
    %292 = vector.broadcast %cst_117 : f32 to vector<4x1xf32>
    %293 = arith.addf %291, %292 : vector<4x1xf32>
    %294 = math.rsqrt %293 : vector<4x1xf32>
    %295 = vector.broadcast %294 : vector<4x1xf32> to vector<4x4xf32>
    %296 = arith.mulf %286, %295 : vector<4x4xf32>
    %297 = vector.broadcast %41 : vector<1x4xf32> to vector<4x4xf32>
    %298 = arith.mulf %296, %297 : vector<4x4xf32>
    %299 = vector.broadcast %42 : vector<1x4xf32> to vector<4x4xf32>
    %300 = arith.addf %298, %299 : vector<4x4xf32>
    %301 = arith.truncf %300 : vector<4x4xf32> to vector<4x4xbf16>
    %302 = vector.shape_cast %301 : vector<4x4xbf16> to vector<1x4x4xbf16>
    %303 = vector.extract_strided_slice %21 {offsets = [0, 4], sizes = [4, 4], strides = [1, 1]} : vector<4x32xf32> to vector<4x4xf32>
    %304 = arith.truncf %303 : vector<4x4xf32> to vector<4x4xbf16>
    %305 = vector.shape_cast %304 : vector<4x4xbf16> to vector<1x4x4xbf16>
    %cst_118 = arith.constant dense<0.000000e+00> : vector<1x8x8xf32>
    %306 = tpu.matmul %248, %250, %cst_118 {dimension_numbers = #tpu.dot_dimension_numbers<[2], [2], [1], [1], [0, 0, 0, 1, 1, 1], [0], [0]>} : vector<1x8x4xbf16>, vector<1x8x4xbf16>, vector<1x8x8xf32> -> vector<1x8x8xf32>
    %307 = arith.mulf %306, %26 : vector<1x8x8xf32>
    %cst_119 = arith.constant dense<0.000000e+00> : vector<1x8x6xf32>
    %308 = tpu.matmul %248, %276, %cst_119 {dimension_numbers = #tpu.dot_dimension_numbers<[2], [2], [1], [1], [0, 0, 0, 1, 1, 1], [0], [0]>} : vector<1x8x4xbf16>, vector<1x6x4xbf16>, vector<1x8x6xf32> -> vector<1x8x6xf32>
    %309 = arith.mulf %308, %30 : vector<1x8x6xf32>
    %cst_120 = arith.constant dense<0.000000e+00> : vector<1x8x4xf32>
    %310 = tpu.matmul %248, %302, %cst_120 {dimension_numbers = #tpu.dot_dimension_numbers<[2], [2], [1], [1], [0, 0, 0, 1, 1, 1], [0], [0]>} : vector<1x8x4xbf16>, vector<1x4x4xbf16>, vector<1x8x4xf32> -> vector<1x8x4xf32>
    %311 = arith.mulf %310, %34 : vector<1x8x4xf32>
    %cst_121 = arith.constant dense<0xFF800000> : vector<1x8xf32>
    %312 = vector.multi_reduction <maximumf>, %307, %cst_121 [2] : vector<1x8x8xf32> to vector<1x8xf32>
    %313 = vector.shape_cast %312 : vector<1x8xf32> to vector<1x8x1xf32>
    %cst_122 = arith.constant dense<0xFF800000> : vector<1x8xf32>
    %314 = vector.multi_reduction <maximumf>, %309, %cst_122 [2] : vector<1x8x6xf32> to vector<1x8xf32>
    %315 = vector.shape_cast %314 : vector<1x8xf32> to vector<1x8x1xf32>
    %316 = arith.maximumf %313, %315 : vector<1x8x1xf32>
    %cst_123 = arith.constant dense<0xFF800000> : vector<1x8xf32>
    %317 = vector.multi_reduction <maximumf>, %311, %cst_123 [2] : vector<1x8x4xf32> to vector<1x8xf32>
    %318 = vector.shape_cast %317 : vector<1x8xf32> to vector<1x8x1xf32>
    %319 = arith.maximumf %316, %318 : vector<1x8x1xf32>
    %320 = vector.broadcast %319 : vector<1x8x1xf32> to vector<1x8x8xf32>
    %321 = arith.subf %307, %320 : vector<1x8x8xf32>
    %322 = math.exp %321 : vector<1x8x8xf32>
    %323 = vector.broadcast %319 : vector<1x8x1xf32> to vector<1x8x6xf32>
    %324 = arith.subf %309, %323 : vector<1x8x6xf32>
    %325 = math.exp %324 : vector<1x8x6xf32>
    %326 = vector.broadcast %319 : vector<1x8x1xf32> to vector<1x8x4xf32>
    %327 = arith.subf %311, %326 : vector<1x8x4xf32>
    %328 = math.exp %327 : vector<1x8x4xf32>
    %cst_124 = arith.constant dense<0.000000e+00> : vector<1x8xf32>
    %329 = vector.multi_reduction <add>, %322, %cst_124 [2] : vector<1x8x8xf32> to vector<1x8xf32>
    %330 = vector.shape_cast %329 : vector<1x8xf32> to vector<1x8x1xf32>
    %cst_125 = arith.constant dense<0.000000e+00> : vector<1x8xf32>
    %331 = vector.multi_reduction <add>, %325, %cst_125 [2] : vector<1x8x6xf32> to vector<1x8xf32>
    %332 = vector.shape_cast %331 : vector<1x8xf32> to vector<1x8x1xf32>
    %333 = arith.addf %330, %332 : vector<1x8x1xf32>
    %cst_126 = arith.constant dense<0.000000e+00> : vector<1x8xf32>
    %334 = vector.multi_reduction <add>, %328, %cst_126 [2] : vector<1x8x4xf32> to vector<1x8xf32>
    %335 = vector.shape_cast %334 : vector<1x8xf32> to vector<1x8x1xf32>
    %336 = arith.addf %333, %335 : vector<1x8x1xf32>
    %337 = arith.mulf %322, %26 : vector<1x8x8xf32>
    %338 = arith.mulf %325, %30 : vector<1x8x6xf32>
    %339 = arith.mulf %328, %34 : vector<1x8x4xf32>
    %cst_127 = arith.constant dense<0.000000e+00> : vector<1x8xf32>
    %340 = vector.multi_reduction <add>, %337, %cst_127 [2] : vector<1x8x8xf32> to vector<1x8xf32>
    %341 = vector.shape_cast %340 : vector<1x8xf32> to vector<1x8x1xf32>
    %cst_128 = arith.constant dense<0.000000e+00> : vector<1x8xf32>
    %342 = vector.multi_reduction <add>, %338, %cst_128 [2] : vector<1x8x6xf32> to vector<1x8xf32>
    %343 = vector.shape_cast %342 : vector<1x8xf32> to vector<1x8x1xf32>
    %344 = arith.addf %341, %343 : vector<1x8x1xf32>
    %cst_129 = arith.constant dense<0.000000e+00> : vector<1x8xf32>
    %345 = vector.multi_reduction <add>, %339, %cst_129 [2] : vector<1x8x4xf32> to vector<1x8xf32>
    %346 = vector.shape_cast %345 : vector<1x8xf32> to vector<1x8x1xf32>
    %347 = arith.addf %344, %346 : vector<1x8x1xf32>
    %cst_130 = arith.constant 9.99999982E-14 : f32
    %348 = vector.broadcast %cst_130 : f32 to vector<1x8x1xf32>
    %349 = arith.mulf %348, %336 : vector<1x8x1xf32>
    %350 = arith.addf %347, %349 : vector<1x8x1xf32>
    %351 = tpu.reciprocal %350 {approx = true} : vector<1x8x1xf32> -> vector<1x8x1xf32>
    %352 = vector.broadcast %351 : vector<1x8x1xf32> to vector<1x8x8xf32>
    %353 = arith.mulf %337, %352 : vector<1x8x8xf32>
    %354 = arith.truncf %353 : vector<1x8x8xf32> to vector<1x8x8xbf16>
    %cst_131 = arith.constant dense<0.000000e+00> : vector<1x8x4xf32>
    %355 = tpu.matmul %354, %253, %cst_131 {dimension_numbers = #tpu.dot_dimension_numbers<[2], [1], [1], [2], [0, 0, 0, 1, 1, 2], [0], [0]>} : vector<1x8x8xbf16>, vector<1x8x4xbf16>, vector<1x8x4xf32> -> vector<1x8x4xf32>
    %356 = vector.broadcast %351 : vector<1x8x1xf32> to vector<1x8x6xf32>
    %357 = arith.mulf %338, %356 : vector<1x8x6xf32>
    %358 = arith.truncf %357 : vector<1x8x6xf32> to vector<1x8x6xbf16>
    %cst_132 = arith.constant dense<0.000000e+00> : vector<1x8x4xf32>
    %359 = tpu.matmul %358, %279, %cst_132 {dimension_numbers = #tpu.dot_dimension_numbers<[2], [1], [1], [2], [0, 0, 0, 1, 1, 2], [0], [0]>} : vector<1x8x6xbf16>, vector<1x6x4xbf16>, vector<1x8x4xf32> -> vector<1x8x4xf32>
    %360 = arith.addf %355, %359 : vector<1x8x4xf32>
    %361 = vector.broadcast %351 : vector<1x8x1xf32> to vector<1x8x4xf32>
    %362 = arith.mulf %339, %361 : vector<1x8x4xf32>
    %363 = arith.truncf %362 : vector<1x8x4xf32> to vector<1x8x4xbf16>
    %cst_133 = arith.constant dense<0.000000e+00> : vector<1x8x4xf32>
    %364 = tpu.matmul %363, %305, %cst_133 {dimension_numbers = #tpu.dot_dimension_numbers<[2], [1], [1], [2], [0, 0, 0, 1, 1, 2], [0], [0]>} : vector<1x8x4xbf16>, vector<1x4x4xbf16>, vector<1x8x4xf32> -> vector<1x8x4xf32>
    %365 = arith.addf %360, %364 : vector<1x8x4xf32>
    %c0_134 = arith.constant 0 : index
    %c0_135 = arith.constant 0 : index
    %c4 = arith.constant 4 : index
    %366 = vector.load %arg28[%c0_134, %c0_135, %c4] : memref<1x8x32xf32, #tpu.memory_space<vmem>>, vector<1x8x4xf32>
    tpu.vector_store %arg28[%c0_134, %c0_135, %c4], %365 {strides = array<i32>} : memref<1x8x32xf32, #tpu.memory_space<vmem>>, vector<1x8x4xf32>,
    %367 = vector.extract_strided_slice %5 {offsets = [0, 8], sizes = [8, 4], strides = [1, 1]} : vector<8x32xf32> to vector<8x4xf32>
    %368 = vector.extract_strided_slice %7 {offsets = [0, 8], sizes = [8, 4], strides = [1, 1]} : vector<8x32xf32> to vector<8x4xf32>
    %cst_136 = arith.constant dense<0.000000e+00> : vector<8xf32>
    %369 = vector.multi_reduction <add>, %367, %cst_136 [1] : vector<8x4xf32> to vector<8xf32>
    %370 = vector.shape_cast %369 : vector<8xf32> to vector<8x1xf32>
    %cst_137 = arith.constant 4.000000e+00 : f32
    %371 = vector.broadcast %cst_137 : f32 to vector<8x1xf32>
    %372 = arith.divf %370, %371 : vector<8x1xf32>
    %373 = vector.broadcast %372 : vector<8x1xf32> to vector<8x4xf32>
    %374 = arith.subf %367, %373 : vector<8x4xf32>
    %375 = arith.mulf %374, %374 : vector<8x4xf32>
    %cst_138 = arith.constant dense<0.000000e+00> : vector<8xf32>
    %376 = vector.multi_reduction <add>, %375, %cst_138 [1] : vector<8x4xf32> to vector<8xf32>
    %377 = vector.shape_cast %376 : vector<8xf32> to vector<8x1xf32>
    %cst_139 = arith.constant 4.000000e+00 : f32
    %378 = vector.broadcast %cst_139 : f32 to vector<8x1xf32>
    %379 = arith.divf %377, %378 : vector<8x1xf32>
    %cst_140 = arith.constant 9.99999974E-6 : f32
    %380 = vector.broadcast %cst_140 : f32 to vector<8x1xf32>
    %381 = arith.addf %379, %380 : vector<8x1xf32>
    %382 = math.rsqrt %381 : vector<8x1xf32>
    %383 = vector.broadcast %382 : vector<8x1xf32> to vector<8x4xf32>
    %384 = arith.mulf %374, %383 : vector<8x4xf32>
    %385 = vector.broadcast %35 : vector<1x4xf32> to vector<8x4xf32>
    %386 = arith.mulf %384, %385 : vector<8x4xf32>
    %387 = vector.broadcast %36 : vector<1x4xf32> to vector<8x4xf32>
    %388 = arith.addf %386, %387 : vector<8x4xf32>
    %cst_141 = arith.constant dense<0.000000e+00> : vector<8xf32>
    %389 = vector.multi_reduction <add>, %368, %cst_141 [1] : vector<8x4xf32> to vector<8xf32>
    %390 = vector.shape_cast %389 : vector<8xf32> to vector<8x1xf32>
    %cst_142 = arith.constant 4.000000e+00 : f32
    %391 = vector.broadcast %cst_142 : f32 to vector<8x1xf32>
    %392 = arith.divf %390, %391 : vector<8x1xf32>
    %393 = vector.broadcast %392 : vector<8x1xf32> to vector<8x4xf32>
    %394 = arith.subf %368, %393 : vector<8x4xf32>
    %395 = arith.mulf %394, %394 : vector<8x4xf32>
    %cst_143 = arith.constant dense<0.000000e+00> : vector<8xf32>
    %396 = vector.multi_reduction <add>, %395, %cst_143 [1] : vector<8x4xf32> to vector<8xf32>
    %397 = vector.shape_cast %396 : vector<8xf32> to vector<8x1xf32>
    %cst_144 = arith.constant 4.000000e+00 : f32
    %398 = vector.broadcast %cst_144 : f32 to vector<8x1xf32>
    %399 = arith.divf %397, %398 : vector<8x1xf32>
    %cst_145 = arith.constant 9.99999974E-6 : f32
    %400 = vector.broadcast %cst_145 : f32 to vector<8x1xf32>
    %401 = arith.addf %399, %400 : vector<8x1xf32>
    %402 = math.rsqrt %401 : vector<8x1xf32>
    %403 = vector.broadcast %402 : vector<8x1xf32> to vector<8x4xf32>
    %404 = arith.mulf %394, %403 : vector<8x4xf32>
    %405 = vector.broadcast %37 : vector<1x4xf32> to vector<8x4xf32>
    %406 = arith.mulf %404, %405 : vector<8x4xf32>
    %407 = vector.broadcast %38 : vector<1x4xf32> to vector<8x4xf32>
    %408 = arith.addf %406, %407 : vector<8x4xf32>
    %409 = arith.truncf %388 : vector<8x4xf32> to vector<8x4xbf16>
    %410 = vector.shape_cast %409 : vector<8x4xbf16> to vector<1x8x4xbf16>
    %411 = arith.truncf %408 : vector<8x4xf32> to vector<8x4xbf16>
    %412 = vector.shape_cast %411 : vector<8x4xbf16> to vector<1x8x4xbf16>
    %413 = vector.extract_strided_slice %9 {offsets = [0, 8], sizes = [8, 4], strides = [1, 1]} : vector<8x32xf32> to vector<8x4xf32>
    %414 = arith.truncf %413 : vector<8x4xf32> to vector<8x4xbf16>
    %415 = vector.shape_cast %414 : vector<8x4xbf16> to vector<1x8x4xbf16>
    %416 = vector.extract_strided_slice %13 {offsets = [0, 8], sizes = [6, 4], strides = [1, 1]} : vector<6x32xf32> to vector<6x4xf32>
    %cst_146 = arith.constant dense<0.000000e+00> : vector<6xf32>
    %417 = vector.multi_reduction <add>, %416, %cst_146 [1] : vector<6x4xf32> to vector<6xf32>
    %418 = vector.shape_cast %417 : vector<6xf32> to vector<6x1xf32>
    %cst_147 = arith.constant 4.000000e+00 : f32
    %419 = vector.broadcast %cst_147 : f32 to vector<6x1xf32>
    %420 = arith.divf %418, %419 : vector<6x1xf32>
    %421 = vector.broadcast %420 : vector<6x1xf32> to vector<6x4xf32>
    %422 = arith.subf %416, %421 : vector<6x4xf32>
    %423 = arith.mulf %422, %422 : vector<6x4xf32>
    %cst_148 = arith.constant dense<0.000000e+00> : vector<6xf32>
    %424 = vector.multi_reduction <add>, %423, %cst_148 [1] : vector<6x4xf32> to vector<6xf32>
    %425 = vector.shape_cast %424 : vector<6xf32> to vector<6x1xf32>
    %cst_149 = arith.constant 4.000000e+00 : f32
    %426 = vector.broadcast %cst_149 : f32 to vector<6x1xf32>
    %427 = arith.divf %425, %426 : vector<6x1xf32>
    %cst_150 = arith.constant 9.99999974E-6 : f32
    %428 = vector.broadcast %cst_150 : f32 to vector<6x1xf32>
    %429 = arith.addf %427, %428 : vector<6x1xf32>
    %430 = math.rsqrt %429 : vector<6x1xf32>
    %431 = vector.broadcast %430 : vector<6x1xf32> to vector<6x4xf32>
    %432 = arith.mulf %422, %431 : vector<6x4xf32>
    %433 = vector.broadcast %39 : vector<1x4xf32> to vector<6x4xf32>
    %434 = arith.mulf %432, %433 : vector<6x4xf32>
    %435 = vector.broadcast %40 : vector<1x4xf32> to vector<6x4xf32>
    %436 = arith.addf %434, %435 : vector<6x4xf32>
    %437 = arith.truncf %436 : vector<6x4xf32> to vector<6x4xbf16>
    %438 = vector.shape_cast %437 : vector<6x4xbf16> to vector<1x6x4xbf16>
    %439 = vector.extract_strided_slice %15 {offsets = [0, 8], sizes = [6, 4], strides = [1, 1]} : vector<6x32xf32> to vector<6x4xf32>
    %440 = arith.truncf %439 : vector<6x4xf32> to vector<6x4xbf16>
    %441 = vector.shape_cast %440 : vector<6x4xbf16> to vector<1x6x4xbf16>
    %442 = vector.extract_strided_slice %19 {offsets = [0, 8], sizes = [4, 4], strides = [1, 1]} : vector<4x32xf32> to vector<4x4xf32>
    %cst_151 = arith.constant dense<0.000000e+00> : vector<4xf32>
    %443 = vector.multi_reduction <add>, %442, %cst_151 [1] : vector<4x4xf32> to vector<4xf32>
    %444 = vector.shape_cast %443 : vector<4xf32> to vector<4x1xf32>
    %cst_152 = arith.constant 4.000000e+00 : f32
    %445 = vector.broadcast %cst_152 : f32 to vector<4x1xf32>
    %446 = arith.divf %444, %445 : vector<4x1xf32>
    %447 = vector.broadcast %446 : vector<4x1xf32> to vector<4x4xf32>
    %448 = arith.subf %442, %447 : vector<4x4xf32>
    %449 = arith.mulf %448, %448 : vector<4x4xf32>
    %cst_153 = arith.constant dense<0.000000e+00> : vector<4xf32>
    %450 = vector.multi_reduction <add>, %449, %cst_153 [1] : vector<4x4xf32> to vector<4xf32>
    %451 = vector.shape_cast %450 : vector<4xf32> to vector<4x1xf32>
    %cst_154 = arith.constant 4.000000e+00 : f32
    %452 = vector.broadcast %cst_154 : f32 to vector<4x1xf32>
    %453 = arith.divf %451, %452 : vector<4x1xf32>
    %cst_155 = arith.constant 9.99999974E-6 : f32
    %454 = vector.broadcast %cst_155 : f32 to vector<4x1xf32>
    %455 = arith.addf %453, %454 : vector<4x1xf32>
    %456 = math.rsqrt %455 : vector<4x1xf32>
    %457 = vector.broadcast %456 : vector<4x1xf32> to vector<4x4xf32>
    %458 = arith.mulf %448, %457 : vector<4x4xf32>
    %459 = vector.broadcast %41 : vector<1x4xf32> to vector<4x4xf32>
    %460 = arith.mulf %458, %459 : vector<4x4xf32>
    %461 = vector.broadcast %42 : vector<1x4xf32> to vector<4x4xf32>
    %462 = arith.addf %460, %461 : vector<4x4xf32>
    %463 = arith.truncf %462 : vector<4x4xf32> to vector<4x4xbf16>
    %464 = vector.shape_cast %463 : vector<4x4xbf16> to vector<1x4x4xbf16>
    %465 = vector.extract_strided_slice %21 {offsets = [0, 8], sizes = [4, 4], strides = [1, 1]} : vector<4x32xf32> to vector<4x4xf32>
    %466 = arith.truncf %465 : vector<4x4xf32> to vector<4x4xbf16>
    %467 = vector.shape_cast %466 : vector<4x4xbf16> to vector<1x4x4xbf16>
    %cst_156 = arith.constant dense<0.000000e+00> : vector<1x8x8xf32>
    %468 = tpu.matmul %410, %412, %cst_156 {dimension_numbers = #tpu.dot_dimension_numbers<[2], [2], [1], [1], [0, 0, 0, 1, 1, 1], [0], [0]>} : vector<1x8x4xbf16>, vector<1x8x4xbf16>, vector<1x8x8xf32> -> vector<1x8x8xf32>
    %469 = arith.mulf %468, %26 : vector<1x8x8xf32>
    %cst_157 = arith.constant dense<0.000000e+00> : vector<1x8x6xf32>
    %470 = tpu.matmul %410, %438, %cst_157 {dimension_numbers = #tpu.dot_dimension_numbers<[2], [2], [1], [1], [0, 0, 0, 1, 1, 1], [0], [0]>} : vector<1x8x4xbf16>, vector<1x6x4xbf16>, vector<1x8x6xf32> -> vector<1x8x6xf32>
    %471 = arith.mulf %470, %30 : vector<1x8x6xf32>
    %cst_158 = arith.constant dense<0.000000e+00> : vector<1x8x4xf32>
    %472 = tpu.matmul %410, %464, %cst_158 {dimension_numbers = #tpu.dot_dimension_numbers<[2], [2], [1], [1], [0, 0, 0, 1, 1, 1], [0], [0]>} : vector<1x8x4xbf16>, vector<1x4x4xbf16>, vector<1x8x4xf32> -> vector<1x8x4xf32>
    %473 = arith.mulf %472, %34 : vector<1x8x4xf32>
    %cst_159 = arith.constant dense<0xFF800000> : vector<1x8xf32>
    %474 = vector.multi_reduction <maximumf>, %469, %cst_159 [2] : vector<1x8x8xf32> to vector<1x8xf32>
    %475 = vector.shape_cast %474 : vector<1x8xf32> to vector<1x8x1xf32>
    %cst_160 = arith.constant dense<0xFF800000> : vector<1x8xf32>
    %476 = vector.multi_reduction <maximumf>, %471, %cst_160 [2] : vector<1x8x6xf32> to vector<1x8xf32>
    %477 = vector.shape_cast %476 : vector<1x8xf32> to vector<1x8x1xf32>
    %478 = arith.maximumf %475, %477 : vector<1x8x1xf32>
    %cst_161 = arith.constant dense<0xFF800000> : vector<1x8xf32>
    %479 = vector.multi_reduction <maximumf>, %473, %cst_161 [2] : vector<1x8x4xf32> to vector<1x8xf32>
    %480 = vector.shape_cast %479 : vector<1x8xf32> to vector<1x8x1xf32>
    %481 = arith.maximumf %478, %480 : vector<1x8x1xf32>
    %482 = vector.broadcast %481 : vector<1x8x1xf32> to vector<1x8x8xf32>
    %483 = arith.subf %469, %482 : vector<1x8x8xf32>
    %484 = math.exp %483 : vector<1x8x8xf32>
    %485 = vector.broadcast %481 : vector<1x8x1xf32> to vector<1x8x6xf32>
    %486 = arith.subf %471, %485 : vector<1x8x6xf32>
    %487 = math.exp %486 : vector<1x8x6xf32>
    %488 = vector.broadcast %481 : vector<1x8x1xf32> to vector<1x8x4xf32>
    %489 = arith.subf %473, %488 : vector<1x8x4xf32>
    %490 = math.exp %489 : vector<1x8x4xf32>
    %cst_162 = arith.constant dense<0.000000e+00> : vector<1x8xf32>
    %491 = vector.multi_reduction <add>, %484, %cst_162 [2] : vector<1x8x8xf32> to vector<1x8xf32>
    %492 = vector.shape_cast %491 : vector<1x8xf32> to vector<1x8x1xf32>
    %cst_163 = arith.constant dense<0.000000e+00> : vector<1x8xf32>
    %493 = vector.multi_reduction <add>, %487, %cst_163 [2] : vector<1x8x6xf32> to vector<1x8xf32>
    %494 = vector.shape_cast %493 : vector<1x8xf32> to vector<1x8x1xf32>
    %495 = arith.addf %492, %494 : vector<1x8x1xf32>
    %cst_164 = arith.constant dense<0.000000e+00> : vector<1x8xf32>
    %496 = vector.multi_reduction <add>, %490, %cst_164 [2] : vector<1x8x4xf32> to vector<1x8xf32>
    %497 = vector.shape_cast %496 : vector<1x8xf32> to vector<1x8x1xf32>
    %498 = arith.addf %495, %497 : vector<1x8x1xf32>
    %499 = arith.mulf %484, %26 : vector<1x8x8xf32>
    %500 = arith.mulf %487, %30 : vector<1x8x6xf32>
    %501 = arith.mulf %490, %34 : vector<1x8x4xf32>
    %cst_165 = arith.constant dense<0.000000e+00> : vector<1x8xf32>
    %502 = vector.multi_reduction <add>, %499, %cst_165 [2] : vector<1x8x8xf32> to vector<1x8xf32>
    %503 = vector.shape_cast %502 : vector<1x8xf32> to vector<1x8x1xf32>
    %cst_166 = arith.constant dense<0.000000e+00> : vector<1x8xf32>
    %504 = vector.multi_reduction <add>, %500, %cst_166 [2] : vector<1x8x6xf32> to vector<1x8xf32>
    %505 = vector.shape_cast %504 : vector<1x8xf32> to vector<1x8x1xf32>
    %506 = arith.addf %503, %505 : vector<1x8x1xf32>
    %cst_167 = arith.constant dense<0.000000e+00> : vector<1x8xf32>
    %507 = vector.multi_reduction <add>, %501, %cst_167 [2] : vector<1x8x4xf32> to vector<1x8xf32>
    %508 = vector.shape_cast %507 : vector<1x8xf32> to vector<1x8x1xf32>
    %509 = arith.addf %506, %508 : vector<1x8x1xf32>
    %cst_168 = arith.constant 9.99999982E-14 : f32
    %510 = vector.broadcast %cst_168 : f32 to vector<1x8x1xf32>
    %511 = arith.mulf %510, %498 : vector<1x8x1xf32>
    %512 = arith.addf %509, %511 : vector<1x8x1xf32>
    %513 = tpu.reciprocal %512 {approx = true} : vector<1x8x1xf32> -> vector<1x8x1xf32>
    %514 = vector.broadcast %513 : vector<1x8x1xf32> to vector<1x8x8xf32>
    %515 = arith.mulf %499, %514 : vector<1x8x8xf32>
    %516 = arith.truncf %515 : vector<1x8x8xf32> to vector<1x8x8xbf16>
    %cst_169 = arith.constant dense<0.000000e+00> : vector<1x8x4xf32>
    %517 = tpu.matmul %516, %415, %cst_169 {dimension_numbers = #tpu.dot_dimension_numbers<[2], [1], [1], [2], [0, 0, 0, 1, 1, 2], [0], [0]>} : vector<1x8x8xbf16>, vector<1x8x4xbf16>, vector<1x8x4xf32> -> vector<1x8x4xf32>
    %518 = vector.broadcast %513 : vector<1x8x1xf32> to vector<1x8x6xf32>
    %519 = arith.mulf %500, %518 : vector<1x8x6xf32>
    %520 = arith.truncf %519 : vector<1x8x6xf32> to vector<1x8x6xbf16>
    %cst_170 = arith.constant dense<0.000000e+00> : vector<1x8x4xf32>
    %521 = tpu.matmul %520, %441, %cst_170 {dimension_numbers = #tpu.dot_dimension_numbers<[2], [1], [1], [2], [0, 0, 0, 1, 1, 2], [0], [0]>} : vector<1x8x6xbf16>, vector<1x6x4xbf16>, vector<1x8x4xf32> -> vector<1x8x4xf32>
    %522 = arith.addf %517, %521 : vector<1x8x4xf32>
    %523 = vector.broadcast %513 : vector<1x8x1xf32> to vector<1x8x4xf32>
    %524 = arith.mulf %501, %523 : vector<1x8x4xf32>
    %525 = arith.truncf %524 : vector<1x8x4xf32> to vector<1x8x4xbf16>
    %cst_171 = arith.constant dense<0.000000e+00> : vector<1x8x4xf32>
    %526 = tpu.matmul %525, %467, %cst_171 {dimension_numbers = #tpu.dot_dimension_numbers<[2], [1], [1], [2], [0, 0, 0, 1, 1, 2], [0], [0]>} : vector<1x8x4xbf16>, vector<1x4x4xbf16>, vector<1x8x4xf32> -> vector<1x8x4xf32>
    %527 = arith.addf %522, %526 : vector<1x8x4xf32>
    %c0_172 = arith.constant 0 : index
    %c0_173 = arith.constant 0 : index
    %c8 = arith.constant 8 : index
    %528 = vector.load %arg28[%c0_172, %c0_173, %c8] : memref<1x8x32xf32, #tpu.memory_space<vmem>>, vector<1x8x4xf32>
    tpu.vector_store %arg28[%c0_172, %c0_173, %c8], %527 {strides = array<i32>} : memref<1x8x32xf32, #tpu.memory_space<vmem>>, vector<1x8x4xf32>,
    %529 = vector.extract_strided_slice %5 {offsets = [0, 12], sizes = [8, 4], strides = [1, 1]} : vector<8x32xf32> to vector<8x4xf32>
    %530 = vector.extract_strided_slice %7 {offsets = [0, 12], sizes = [8, 4], strides = [1, 1]} : vector<8x32xf32> to vector<8x4xf32>
    %cst_174 = arith.constant dense<0.000000e+00> : vector<8xf32>
    %531 = vector.multi_reduction <add>, %529, %cst_174 [1] : vector<8x4xf32> to vector<8xf32>
    %532 = vector.shape_cast %531 : vector<8xf32> to vector<8x1xf32>
    %cst_175 = arith.constant 4.000000e+00 : f32
    %533 = vector.broadcast %cst_175 : f32 to vector<8x1xf32>
    %534 = arith.divf %532, %533 : vector<8x1xf32>
    %535 = vector.broadcast %534 : vector<8x1xf32> to vector<8x4xf32>
    %536 = arith.subf %529, %535 : vector<8x4xf32>
    %537 = arith.mulf %536, %536 : vector<8x4xf32>
    %cst_176 = arith.constant dense<0.000000e+00> : vector<8xf32>
    %538 = vector.multi_reduction <add>, %537, %cst_176 [1] : vector<8x4xf32> to vector<8xf32>
    %539 = vector.shape_cast %538 : vector<8xf32> to vector<8x1xf32>
    %cst_177 = arith.constant 4.000000e+00 : f32
    %540 = vector.broadcast %cst_177 : f32 to vector<8x1xf32>
    %541 = arith.divf %539, %540 : vector<8x1xf32>
    %cst_178 = arith.constant 9.99999974E-6 : f32
    %542 = vector.broadcast %cst_178 : f32 to vector<8x1xf32>
    %543 = arith.addf %541, %542 : vector<8x1xf32>
    %544 = math.rsqrt %543 : vector<8x1xf32>
    %545 = vector.broadcast %544 : vector<8x1xf32> to vector<8x4xf32>
    %546 = arith.mulf %536, %545 : vector<8x4xf32>
    %547 = vector.broadcast %35 : vector<1x4xf32> to vector<8x4xf32>
    %548 = arith.mulf %546, %547 : vector<8x4xf32>
    %549 = vector.broadcast %36 : vector<1x4xf32> to vector<8x4xf32>
    %550 = arith.addf %548, %549 : vector<8x4xf32>
    %cst_179 = arith.constant dense<0.000000e+00> : vector<8xf32>
    %551 = vector.multi_reduction <add>, %530, %cst_179 [1] : vector<8x4xf32> to vector<8xf32>
    %552 = vector.shape_cast %551 : vector<8xf32> to vector<8x1xf32>
    %cst_180 = arith.constant 4.000000e+00 : f32
    %553 = vector.broadcast %cst_180 : f32 to vector<8x1xf32>
    %554 = arith.divf %552, %553 : vector<8x1xf32>
    %555 = vector.broadcast %554 : vector<8x1xf32> to vector<8x4xf32>
    %556 = arith.subf %530, %555 : vector<8x4xf32>
    %557 = arith.mulf %556, %556 : vector<8x4xf32>
    %cst_181 = arith.constant dense<0.000000e+00> : vector<8xf32>
    %558 = vector.multi_reduction <add>, %557, %cst_181 [1] : vector<8x4xf32> to vector<8xf32>
    %559 = vector.shape_cast %558 : vector<8xf32> to vector<8x1xf32>
    %cst_182 = arith.constant 4.000000e+00 : f32
    %560 = vector.broadcast %cst_182 : f32 to vector<8x1xf32>
    %561 = arith.divf %559, %560 : vector<8x1xf32>
    %cst_183 = arith.constant 9.99999974E-6 : f32
    %562 = vector.broadcast %cst_183 : f32 to vector<8x1xf32>
    %563 = arith.addf %561, %562 : vector<8x1xf32>
    %564 = math.rsqrt %563 : vector<8x1xf32>
    %565 = vector.broadcast %564 : vector<8x1xf32> to vector<8x4xf32>
    %566 = arith.mulf %556, %565 : vector<8x4xf32>
    %567 = vector.broadcast %37 : vector<1x4xf32> to vector<8x4xf32>
    %568 = arith.mulf %566, %567 : vector<8x4xf32>
    %569 = vector.broadcast %38 : vector<1x4xf32> to vector<8x4xf32>
    %570 = arith.addf %568, %569 : vector<8x4xf32>
    %571 = arith.truncf %550 : vector<8x4xf32> to vector<8x4xbf16>
    %572 = vector.shape_cast %571 : vector<8x4xbf16> to vector<1x8x4xbf16>
    %573 = arith.truncf %570 : vector<8x4xf32> to vector<8x4xbf16>
    %574 = vector.shape_cast %573 : vector<8x4xbf16> to vector<1x8x4xbf16>
    %575 = vector.extract_strided_slice %9 {offsets = [0, 12], sizes = [8, 4], strides = [1, 1]} : vector<8x32xf32> to vector<8x4xf32>
    %576 = arith.truncf %575 : vector<8x4xf32> to vector<8x4xbf16>
    %577 = vector.shape_cast %576 : vector<8x4xbf16> to vector<1x8x4xbf16>
    %578 = vector.extract_strided_slice %13 {offsets = [0, 12], sizes = [6, 4], strides = [1, 1]} : vector<6x32xf32> to vector<6x4xf32>
    %cst_184 = arith.constant dense<0.000000e+00> : vector<6xf32>
    %579 = vector.multi_reduction <add>, %578, %cst_184 [1] : vector<6x4xf32> to vector<6xf32>
    %580 = vector.shape_cast %579 : vector<6xf32> to vector<6x1xf32>
    %cst_185 = arith.constant 4.000000e+00 : f32
    %581 = vector.broadcast %cst_185 : f32 to vector<6x1xf32>
    %582 = arith.divf %580, %581 : vector<6x1xf32>
    %583 = vector.broadcast %582 : vector<6x1xf32> to vector<6x4xf32>
    %584 = arith.subf %578, %583 : vector<6x4xf32>
    %585 = arith.mulf %584, %584 : vector<6x4xf32>
    %cst_186 = arith.constant dense<0.000000e+00> : vector<6xf32>
    %586 = vector.multi_reduction <add>, %585, %cst_186 [1] : vector<6x4xf32> to vector<6xf32>
    %587 = vector.shape_cast %586 : vector<6xf32> to vector<6x1xf32>
    %cst_187 = arith.constant 4.000000e+00 : f32
    %588 = vector.broadcast %cst_187 : f32 to vector<6x1xf32>
    %589 = arith.divf %587, %588 : vector<6x1xf32>
    %cst_188 = arith.constant 9.99999974E-6 : f32
    %590 = vector.broadcast %cst_188 : f32 to vector<6x1xf32>
    %591 = arith.addf %589, %590 : vector<6x1xf32>
    %592 = math.rsqrt %591 : vector<6x1xf32>
    %593 = vector.broadcast %592 : vector<6x1xf32> to vector<6x4xf32>
    %594 = arith.mulf %584, %593 : vector<6x4xf32>
    %595 = vector.broadcast %39 : vector<1x4xf32> to vector<6x4xf32>
    %596 = arith.mulf %594, %595 : vector<6x4xf32>
    %597 = vector.broadcast %40 : vector<1x4xf32> to vector<6x4xf32>
    %598 = arith.addf %596, %597 : vector<6x4xf32>
    %599 = arith.truncf %598 : vector<6x4xf32> to vector<6x4xbf16>
    %600 = vector.shape_cast %599 : vector<6x4xbf16> to vector<1x6x4xbf16>
    %601 = vector.extract_strided_slice %15 {offsets = [0, 12], sizes = [6, 4], strides = [1, 1]} : vector<6x32xf32> to vector<6x4xf32>
    %602 = arith.truncf %601 : vector<6x4xf32> to vector<6x4xbf16>
    %603 = vector.shape_cast %602 : vector<6x4xbf16> to vector<1x6x4xbf16>
    %604 = vector.extract_strided_slice %19 {offsets = [0, 12], sizes = [4, 4], strides = [1, 1]} : vector<4x32xf32> to vector<4x4xf32>
    %cst_189 = arith.constant dense<0.000000e+00> : vector<4xf32>
    %605 = vector.multi_reduction <add>, %604, %cst_189 [1] : vector<4x4xf32> to vector<4xf32>
    %606 = vector.shape_cast %605 : vector<4xf32> to vector<4x1xf32>
    %cst_190 = arith.constant 4.000000e+00 : f32
    %607 = vector.broadcast %cst_190 : f32 to vector<4x1xf32>
    %608 = arith.divf %606, %607 : vector<4x1xf32>
    %609 = vector.broadcast %608 : vector<4x1xf32> to vector<4x4xf32>
    %610 = arith.subf %604, %609 : vector<4x4xf32>
    %611 = arith.mulf %610, %610 : vector<4x4xf32>
    %cst_191 = arith.constant dense<0.000000e+00> : vector<4xf32>
    %612 = vector.multi_reduction <add>, %611, %cst_191 [1] : vector<4x4xf32> to vector<4xf32>
    %613 = vector.shape_cast %612 : vector<4xf32> to vector<4x1xf32>
    %cst_192 = arith.constant 4.000000e+00 : f32
    %614 = vector.broadcast %cst_192 : f32 to vector<4x1xf32>
    %615 = arith.divf %613, %614 : vector<4x1xf32>
    %cst_193 = arith.constant 9.99999974E-6 : f32
    %616 = vector.broadcast %cst_193 : f32 to vector<4x1xf32>
    %617 = arith.addf %615, %616 : vector<4x1xf32>
    %618 = math.rsqrt %617 : vector<4x1xf32>
    %619 = vector.broadcast %618 : vector<4x1xf32> to vector<4x4xf32>
    %620 = arith.mulf %610, %619 : vector<4x4xf32>
    %621 = vector.broadcast %41 : vector<1x4xf32> to vector<4x4xf32>
    %622 = arith.mulf %620, %621 : vector<4x4xf32>
    %623 = vector.broadcast %42 : vector<1x4xf32> to vector<4x4xf32>
    %624 = arith.addf %622, %623 : vector<4x4xf32>
    %625 = arith.truncf %624 : vector<4x4xf32> to vector<4x4xbf16>
    %626 = vector.shape_cast %625 : vector<4x4xbf16> to vector<1x4x4xbf16>
    %627 = vector.extract_strided_slice %21 {offsets = [0, 12], sizes = [4, 4], strides = [1, 1]} : vector<4x32xf32> to vector<4x4xf32>
    %628 = arith.truncf %627 : vector<4x4xf32> to vector<4x4xbf16>
    %629 = vector.shape_cast %628 : vector<4x4xbf16> to vector<1x4x4xbf16>
    %cst_194 = arith.constant dense<0.000000e+00> : vector<1x8x8xf32>
    %630 = tpu.matmul %572, %574, %cst_194 {dimension_numbers = #tpu.dot_dimension_numbers<[2], [2], [1], [1], [0, 0, 0, 1, 1, 1], [0], [0]>} : vector<1x8x4xbf16>, vector<1x8x4xbf16>, vector<1x8x8xf32> -> vector<1x8x8xf32>
    %631 = arith.mulf %630, %26 : vector<1x8x8xf32>
    %cst_195 = arith.constant dense<0.000000e+00> : vector<1x8x6xf32>
    %632 = tpu.matmul %572, %600, %cst_195 {dimension_numbers = #tpu.dot_dimension_numbers<[2], [2], [1], [1], [0, 0, 0, 1, 1, 1], [0], [0]>} : vector<1x8x4xbf16>, vector<1x6x4xbf16>, vector<1x8x6xf32> -> vector<1x8x6xf32>
    %633 = arith.mulf %632, %30 : vector<1x8x6xf32>
    %cst_196 = arith.constant dense<0.000000e+00> : vector<1x8x4xf32>
    %634 = tpu.matmul %572, %626, %cst_196 {dimension_numbers = #tpu.dot_dimension_numbers<[2], [2], [1], [1], [0, 0, 0, 1, 1, 1], [0], [0]>} : vector<1x8x4xbf16>, vector<1x4x4xbf16>, vector<1x8x4xf32> -> vector<1x8x4xf32>
    %635 = arith.mulf %634, %34 : vector<1x8x4xf32>
    %cst_197 = arith.constant dense<0xFF800000> : vector<1x8xf32>
    %636 = vector.multi_reduction <maximumf>, %631, %cst_197 [2] : vector<1x8x8xf32> to vector<1x8xf32>
    %637 = vector.shape_cast %636 : vector<1x8xf32> to vector<1x8x1xf32>
    %cst_198 = arith.constant dense<0xFF800000> : vector<1x8xf32>
    %638 = vector.multi_reduction <maximumf>, %633, %cst_198 [2] : vector<1x8x6xf32> to vector<1x8xf32>
    %639 = vector.shape_cast %638 : vector<1x8xf32> to vector<1x8x1xf32>
    %640 = arith.maximumf %637, %639 : vector<1x8x1xf32>
    %cst_199 = arith.constant dense<0xFF800000> : vector<1x8xf32>
    %641 = vector.multi_reduction <maximumf>, %635, %cst_199 [2] : vector<1x8x4xf32> to vector<1x8xf32>
    %642 = vector.shape_cast %641 : vector<1x8xf32> to vector<1x8x1xf32>
    %643 = arith.maximumf %640, %642 : vector<1x8x1xf32>
    %644 = vector.broadcast %643 : vector<1x8x1xf32> to vector<1x8x8xf32>
    %645 = arith.subf %631, %644 : vector<1x8x8xf32>
    %646 = math.exp %645 : vector<1x8x8xf32>
    %647 = vector.broadcast %643 : vector<1x8x1xf32> to vector<1x8x6xf32>
    %648 = arith.subf %633, %647 : vector<1x8x6xf32>
    %649 = math.exp %648 : vector<1x8x6xf32>
    %650 = vector.broadcast %643 : vector<1x8x1xf32> to vector<1x8x4xf32>
    %651 = arith.subf %635, %650 : vector<1x8x4xf32>
    %652 = math.exp %651 : vector<1x8x4xf32>
    %cst_200 = arith.constant dense<0.000000e+00> : vector<1x8xf32>
    %653 = vector.multi_reduction <add>, %646, %cst_200 [2] : vector<1x8x8xf32> to vector<1x8xf32>
    %654 = vector.shape_cast %653 : vector<1x8xf32> to vector<1x8x1xf32>
    %cst_201 = arith.constant dense<0.000000e+00> : vector<1x8xf32>
    %655 = vector.multi_reduction <add>, %649, %cst_201 [2] : vector<1x8x6xf32> to vector<1x8xf32>
    %656 = vector.shape_cast %655 : vector<1x8xf32> to vector<1x8x1xf32>
    %657 = arith.addf %654, %656 : vector<1x8x1xf32>
    %cst_202 = arith.constant dense<0.000000e+00> : vector<1x8xf32>
    %658 = vector.multi_reduction <add>, %652, %cst_202 [2] : vector<1x8x4xf32> to vector<1x8xf32>
    %659 = vector.shape_cast %658 : vector<1x8xf32> to vector<1x8x1xf32>
    %660 = arith.addf %657, %659 : vector<1x8x1xf32>
    %661 = arith.mulf %646, %26 : vector<1x8x8xf32>
    %662 = arith.mulf %649, %30 : vector<1x8x6xf32>
    %663 = arith.mulf %652, %34 : vector<1x8x4xf32>
    %cst_203 = arith.constant dense<0.000000e+00> : vector<1x8xf32>
    %664 = vector.multi_reduction <add>, %661, %cst_203 [2] : vector<1x8x8xf32> to vector<1x8xf32>
    %665 = vector.shape_cast %664 : vector<1x8xf32> to vector<1x8x1xf32>
    %cst_204 = arith.constant dense<0.000000e+00> : vector<1x8xf32>
    %666 = vector.multi_reduction <add>, %662, %cst_204 [2] : vector<1x8x6xf32> to vector<1x8xf32>
    %667 = vector.shape_cast %666 : vector<1x8xf32> to vector<1x8x1xf32>
    %668 = arith.addf %665, %667 : vector<1x8x1xf32>
    %cst_205 = arith.constant dense<0.000000e+00> : vector<1x8xf32>
    %669 = vector.multi_reduction <add>, %663, %cst_205 [2] : vector<1x8x4xf32> to vector<1x8xf32>
    %670 = vector.shape_cast %669 : vector<1x8xf32> to vector<1x8x1xf32>
    %671 = arith.addf %668, %670 : vector<1x8x1xf32>
    %cst_206 = arith.constant 9.99999982E-14 : f32
    %672 = vector.broadcast %cst_206 : f32 to vector<1x8x1xf32>
    %673 = arith.mulf %672, %660 : vector<1x8x1xf32>
    %674 = arith.addf %671, %673 : vector<1x8x1xf32>
    %675 = tpu.reciprocal %674 {approx = true} : vector<1x8x1xf32> -> vector<1x8x1xf32>
    %676 = vector.broadcast %675 : vector<1x8x1xf32> to vector<1x8x8xf32>
    %677 = arith.mulf %661, %676 : vector<1x8x8xf32>
    %678 = arith.truncf %677 : vector<1x8x8xf32> to vector<1x8x8xbf16>
    %cst_207 = arith.constant dense<0.000000e+00> : vector<1x8x4xf32>
    %679 = tpu.matmul %678, %577, %cst_207 {dimension_numbers = #tpu.dot_dimension_numbers<[2], [1], [1], [2], [0, 0, 0, 1, 1, 2], [0], [0]>} : vector<1x8x8xbf16>, vector<1x8x4xbf16>, vector<1x8x4xf32> -> vector<1x8x4xf32>
    %680 = vector.broadcast %675 : vector<1x8x1xf32> to vector<1x8x6xf32>
    %681 = arith.mulf %662, %680 : vector<1x8x6xf32>
    %682 = arith.truncf %681 : vector<1x8x6xf32> to vector<1x8x6xbf16>
    %cst_208 = arith.constant dense<0.000000e+00> : vector<1x8x4xf32>
    %683 = tpu.matmul %682, %603, %cst_208 {dimension_numbers = #tpu.dot_dimension_numbers<[2], [1], [1], [2], [0, 0, 0, 1, 1, 2], [0], [0]>} : vector<1x8x6xbf16>, vector<1x6x4xbf16>, vector<1x8x4xf32> -> vector<1x8x4xf32>
    %684 = arith.addf %679, %683 : vector<1x8x4xf32>
    %685 = vector.broadcast %675 : vector<1x8x1xf32> to vector<1x8x4xf32>
    %686 = arith.mulf %663, %685 : vector<1x8x4xf32>
    %687 = arith.truncf %686 : vector<1x8x4xf32> to vector<1x8x4xbf16>
    %cst_209 = arith.constant dense<0.000000e+00> : vector<1x8x4xf32>
    %688 = tpu.matmul %687, %629, %cst_209 {dimension_numbers = #tpu.dot_dimension_numbers<[2], [1], [1], [2], [0, 0, 0, 1, 1, 2], [0], [0]>} : vector<1x8x4xbf16>, vector<1x4x4xbf16>, vector<1x8x4xf32> -> vector<1x8x4xf32>
    %689 = arith.addf %684, %688 : vector<1x8x4xf32>
    %c0_210 = arith.constant 0 : index
    %c0_211 = arith.constant 0 : index
    %c12 = arith.constant 12 : index
    %690 = vector.load %arg28[%c0_210, %c0_211, %c12] : memref<1x8x32xf32, #tpu.memory_space<vmem>>, vector<1x8x4xf32>
    tpu.vector_store %arg28[%c0_210, %c0_211, %c12], %689 {strides = array<i32>} : memref<1x8x32xf32, #tpu.memory_space<vmem>>, vector<1x8x4xf32>,
    %691 = vector.extract_strided_slice %5 {offsets = [0, 16], sizes = [8, 4], strides = [1, 1]} : vector<8x32xf32> to vector<8x4xf32>
    %692 = vector.extract_strided_slice %7 {offsets = [0, 16], sizes = [8, 4], strides = [1, 1]} : vector<8x32xf32> to vector<8x4xf32>
    %cst_212 = arith.constant dense<0.000000e+00> : vector<8xf32>
    %693 = vector.multi_reduction <add>, %691, %cst_212 [1] : vector<8x4xf32> to vector<8xf32>
    %694 = vector.shape_cast %693 : vector<8xf32> to vector<8x1xf32>
    %cst_213 = arith.constant 4.000000e+00 : f32
    %695 = vector.broadcast %cst_213 : f32 to vector<8x1xf32>
    %696 = arith.divf %694, %695 : vector<8x1xf32>
    %697 = vector.broadcast %696 : vector<8x1xf32> to vector<8x4xf32>
    %698 = arith.subf %691, %697 : vector<8x4xf32>
    %699 = arith.mulf %698, %698 : vector<8x4xf32>
    %cst_214 = arith.constant dense<0.000000e+00> : vector<8xf32>
    %700 = vector.multi_reduction <add>, %699, %cst_214 [1] : vector<8x4xf32> to vector<8xf32>
    %701 = vector.shape_cast %700 : vector<8xf32> to vector<8x1xf32>
    %cst_215 = arith.constant 4.000000e+00 : f32
    %702 = vector.broadcast %cst_215 : f32 to vector<8x1xf32>
    %703 = arith.divf %701, %702 : vector<8x1xf32>
    %cst_216 = arith.constant 9.99999974E-6 : f32
    %704 = vector.broadcast %cst_216 : f32 to vector<8x1xf32>
    %705 = arith.addf %703, %704 : vector<8x1xf32>
    %706 = math.rsqrt %705 : vector<8x1xf32>
    %707 = vector.broadcast %706 : vector<8x1xf32> to vector<8x4xf32>
    %708 = arith.mulf %698, %707 : vector<8x4xf32>
    %709 = vector.broadcast %35 : vector<1x4xf32> to vector<8x4xf32>
    %710 = arith.mulf %708, %709 : vector<8x4xf32>
    %711 = vector.broadcast %36 : vector<1x4xf32> to vector<8x4xf32>
    %712 = arith.addf %710, %711 : vector<8x4xf32>
    %cst_217 = arith.constant dense<0.000000e+00> : vector<8xf32>
    %713 = vector.multi_reduction <add>, %692, %cst_217 [1] : vector<8x4xf32> to vector<8xf32>
    %714 = vector.shape_cast %713 : vector<8xf32> to vector<8x1xf32>
    %cst_218 = arith.constant 4.000000e+00 : f32
    %715 = vector.broadcast %cst_218 : f32 to vector<8x1xf32>
    %716 = arith.divf %714, %715 : vector<8x1xf32>
    %717 = vector.broadcast %716 : vector<8x1xf32> to vector<8x4xf32>
    %718 = arith.subf %692, %717 : vector<8x4xf32>
    %719 = arith.mulf %718, %718 : vector<8x4xf32>
    %cst_219 = arith.constant dense<0.000000e+00> : vector<8xf32>
    %720 = vector.multi_reduction <add>, %719, %cst_219 [1] : vector<8x4xf32> to vector<8xf32>
    %721 = vector.shape_cast %720 : vector<8xf32> to vector<8x1xf32>
    %cst_220 = arith.constant 4.000000e+00 : f32
    %722 = vector.broadcast %cst_220 : f32 to vector<8x1xf32>
    %723 = arith.divf %721, %722 : vector<8x1xf32>
    %cst_221 = arith.constant 9.99999974E-6 : f32
    %724 = vector.broadcast %cst_221 : f32 to vector<8x1xf32>
    %725 = arith.addf %723, %724 : vector<8x1xf32>
    %726 = math.rsqrt %725 : vector<8x1xf32>
    %727 = vector.broadcast %726 : vector<8x1xf32> to vector<8x4xf32>
    %728 = arith.mulf %718, %727 : vector<8x4xf32>
    %729 = vector.broadcast %37 : vector<1x4xf32> to vector<8x4xf32>
    %730 = arith.mulf %728, %729 : vector<8x4xf32>
    %731 = vector.broadcast %38 : vector<1x4xf32> to vector<8x4xf32>
    %732 = arith.addf %730, %731 : vector<8x4xf32>
    %733 = arith.truncf %712 : vector<8x4xf32> to vector<8x4xbf16>
    %734 = vector.shape_cast %733 : vector<8x4xbf16> to vector<1x8x4xbf16>
    %735 = arith.truncf %732 : vector<8x4xf32> to vector<8x4xbf16>
    %736 = vector.shape_cast %735 : vector<8x4xbf16> to vector<1x8x4xbf16>
    %737 = vector.extract_strided_slice %9 {offsets = [0, 16], sizes = [8, 4], strides = [1, 1]} : vector<8x32xf32> to vector<8x4xf32>
    %738 = arith.truncf %737 : vector<8x4xf32> to vector<8x4xbf16>
    %739 = vector.shape_cast %738 : vector<8x4xbf16> to vector<1x8x4xbf16>
    %740 = vector.extract_strided_slice %13 {offsets = [0, 16], sizes = [6, 4], strides = [1, 1]} : vector<6x32xf32> to vector<6x4xf32>
    %cst_222 = arith.constant dense<0.000000e+00> : vector<6xf32>
    %741 = vector.multi_reduction <add>, %740, %cst_222 [1] : vector<6x4xf32> to vector<6xf32>
    %742 = vector.shape_cast %741 : vector<6xf32> to vector<6x1xf32>
    %cst_223 = arith.constant 4.000000e+00 : f32
    %743 = vector.broadcast %cst_223 : f32 to vector<6x1xf32>
    %744 = arith.divf %742, %743 : vector<6x1xf32>
    %745 = vector.broadcast %744 : vector<6x1xf32> to vector<6x4xf32>
    %746 = arith.subf %740, %745 : vector<6x4xf32>
    %747 = arith.mulf %746, %746 : vector<6x4xf32>
    %cst_224 = arith.constant dense<0.000000e+00> : vector<6xf32>
    %748 = vector.multi_reduction <add>, %747, %cst_224 [1] : vector<6x4xf32> to vector<6xf32>
    %749 = vector.shape_cast %748 : vector<6xf32> to vector<6x1xf32>
    %cst_225 = arith.constant 4.000000e+00 : f32
    %750 = vector.broadcast %cst_225 : f32 to vector<6x1xf32>
    %751 = arith.divf %749, %750 : vector<6x1xf32>
    %cst_226 = arith.constant 9.99999974E-6 : f32
    %752 = vector.broadcast %cst_226 : f32 to vector<6x1xf32>
    %753 = arith.addf %751, %752 : vector<6x1xf32>
    %754 = math.rsqrt %753 : vector<6x1xf32>
    %755 = vector.broadcast %754 : vector<6x1xf32> to vector<6x4xf32>
    %756 = arith.mulf %746, %755 : vector<6x4xf32>
    %757 = vector.broadcast %39 : vector<1x4xf32> to vector<6x4xf32>
    %758 = arith.mulf %756, %757 : vector<6x4xf32>
    %759 = vector.broadcast %40 : vector<1x4xf32> to vector<6x4xf32>
    %760 = arith.addf %758, %759 : vector<6x4xf32>
    %761 = arith.truncf %760 : vector<6x4xf32> to vector<6x4xbf16>
    %762 = vector.shape_cast %761 : vector<6x4xbf16> to vector<1x6x4xbf16>
    %763 = vector.extract_strided_slice %15 {offsets = [0, 16], sizes = [6, 4], strides = [1, 1]} : vector<6x32xf32> to vector<6x4xf32>
    %764 = arith.truncf %763 : vector<6x4xf32> to vector<6x4xbf16>
    %765 = vector.shape_cast %764 : vector<6x4xbf16> to vector<1x6x4xbf16>
    %766 = vector.extract_strided_slice %19 {offsets = [0, 16], sizes = [4, 4], strides = [1, 1]} : vector<4x32xf32> to vector<4x4xf32>
    %cst_227 = arith.constant dense<0.000000e+00> : vector<4xf32>
    %767 = vector.multi_reduction <add>, %766, %cst_227 [1] : vector<4x4xf32> to vector<4xf32>
    %768 = vector.shape_cast %767 : vector<4xf32> to vector<4x1xf32>
    %cst_228 = arith.constant 4.000000e+00 : f32
    %769 = vector.broadcast %cst_228 : f32 to vector<4x1xf32>
    %770 = arith.divf %768, %769 : vector<4x1xf32>
    %771 = vector.broadcast %770 : vector<4x1xf32> to vector<4x4xf32>
    %772 = arith.subf %766, %771 : vector<4x4xf32>
    %773 = arith.mulf %772, %772 : vector<4x4xf32>
    %cst_229 = arith.constant dense<0.000000e+00> : vector<4xf32>
    %774 = vector.multi_reduction <add>, %773, %cst_229 [1] : vector<4x4xf32> to vector<4xf32>
    %775 = vector.shape_cast %774 : vector<4xf32> to vector<4x1xf32>
    %cst_230 = arith.constant 4.000000e+00 : f32
    %776 = vector.broadcast %cst_230 : f32 to vector<4x1xf32>
    %777 = arith.divf %775, %776 : vector<4x1xf32>
    %cst_231 = arith.constant 9.99999974E-6 : f32
    %778 = vector.broadcast %cst_231 : f32 to vector<4x1xf32>
    %779 = arith.addf %777, %778 : vector<4x1xf32>
    %780 = math.rsqrt %779 : vector<4x1xf32>
    %781 = vector.broadcast %780 : vector<4x1xf32> to vector<4x4xf32>
    %782 = arith.mulf %772, %781 : vector<4x4xf32>
    %783 = vector.broadcast %41 : vector<1x4xf32> to vector<4x4xf32>
    %784 = arith.mulf %782, %783 : vector<4x4xf32>
    %785 = vector.broadcast %42 : vector<1x4xf32> to vector<4x4xf32>
    %786 = arith.addf %784, %785 : vector<4x4xf32>
    %787 = arith.truncf %786 : vector<4x4xf32> to vector<4x4xbf16>
    %788 = vector.shape_cast %787 : vector<4x4xbf16> to vector<1x4x4xbf16>
    %789 = vector.extract_strided_slice %21 {offsets = [0, 16], sizes = [4, 4], strides = [1, 1]} : vector<4x32xf32> to vector<4x4xf32>
    %790 = arith.truncf %789 : vector<4x4xf32> to vector<4x4xbf16>
    %791 = vector.shape_cast %790 : vector<4x4xbf16> to vector<1x4x4xbf16>
    %cst_232 = arith.constant dense<0.000000e+00> : vector<1x8x8xf32>
    %792 = tpu.matmul %734, %736, %cst_232 {dimension_numbers = #tpu.dot_dimension_numbers<[2], [2], [1], [1], [0, 0, 0, 1, 1, 1], [0], [0]>} : vector<1x8x4xbf16>, vector<1x8x4xbf16>, vector<1x8x8xf32> -> vector<1x8x8xf32>
    %793 = arith.mulf %792, %26 : vector<1x8x8xf32>
    %cst_233 = arith.constant dense<0.000000e+00> : vector<1x8x6xf32>
    %794 = tpu.matmul %734, %762, %cst_233 {dimension_numbers = #tpu.dot_dimension_numbers<[2], [2], [1], [1], [0, 0, 0, 1, 1, 1], [0], [0]>} : vector<1x8x4xbf16>, vector<1x6x4xbf16>, vector<1x8x6xf32> -> vector<1x8x6xf32>
    %795 = arith.mulf %794, %30 : vector<1x8x6xf32>
    %cst_234 = arith.constant dense<0.000000e+00> : vector<1x8x4xf32>
    %796 = tpu.matmul %734, %788, %cst_234 {dimension_numbers = #tpu.dot_dimension_numbers<[2], [2], [1], [1], [0, 0, 0, 1, 1, 1], [0], [0]>} : vector<1x8x4xbf16>, vector<1x4x4xbf16>, vector<1x8x4xf32> -> vector<1x8x4xf32>
    %797 = arith.mulf %796, %34 : vector<1x8x4xf32>
    %cst_235 = arith.constant dense<0xFF800000> : vector<1x8xf32>
    %798 = vector.multi_reduction <maximumf>, %793, %cst_235 [2] : vector<1x8x8xf32> to vector<1x8xf32>
    %799 = vector.shape_cast %798 : vector<1x8xf32> to vector<1x8x1xf32>
    %cst_236 = arith.constant dense<0xFF800000> : vector<1x8xf32>
    %800 = vector.multi_reduction <maximumf>, %795, %cst_236 [2] : vector<1x8x6xf32> to vector<1x8xf32>
    %801 = vector.shape_cast %800 : vector<1x8xf32> to vector<1x8x1xf32>
    %802 = arith.maximumf %799, %801 : vector<1x8x1xf32>
    %cst_237 = arith.constant dense<0xFF800000> : vector<1x8xf32>
    %803 = vector.multi_reduction <maximumf>, %797, %cst_237 [2] : vector<1x8x4xf32> to vector<1x8xf32>
    %804 = vector.shape_cast %803 : vector<1x8xf32> to vector<1x8x1xf32>
    %805 = arith.maximumf %802, %804 : vector<1x8x1xf32>
    %806 = vector.broadcast %805 : vector<1x8x1xf32> to vector<1x8x8xf32>
    %807 = arith.subf %793, %806 : vector<1x8x8xf32>
    %808 = math.exp %807 : vector<1x8x8xf32>
    %809 = vector.broadcast %805 : vector<1x8x1xf32> to vector<1x8x6xf32>
    %810 = arith.subf %795, %809 : vector<1x8x6xf32>
    %811 = math.exp %810 : vector<1x8x6xf32>
    %812 = vector.broadcast %805 : vector<1x8x1xf32> to vector<1x8x4xf32>
    %813 = arith.subf %797, %812 : vector<1x8x4xf32>
    %814 = math.exp %813 : vector<1x8x4xf32>
    %cst_238 = arith.constant dense<0.000000e+00> : vector<1x8xf32>
    %815 = vector.multi_reduction <add>, %808, %cst_238 [2] : vector<1x8x8xf32> to vector<1x8xf32>
    %816 = vector.shape_cast %815 : vector<1x8xf32> to vector<1x8x1xf32>
    %cst_239 = arith.constant dense<0.000000e+00> : vector<1x8xf32>
    %817 = vector.multi_reduction <add>, %811, %cst_239 [2] : vector<1x8x6xf32> to vector<1x8xf32>
    %818 = vector.shape_cast %817 : vector<1x8xf32> to vector<1x8x1xf32>
    %819 = arith.addf %816, %818 : vector<1x8x1xf32>
    %cst_240 = arith.constant dense<0.000000e+00> : vector<1x8xf32>
    %820 = vector.multi_reduction <add>, %814, %cst_240 [2] : vector<1x8x4xf32> to vector<1x8xf32>
    %821 = vector.shape_cast %820 : vector<1x8xf32> to vector<1x8x1xf32>
    %822 = arith.addf %819, %821 : vector<1x8x1xf32>
    %823 = arith.mulf %808, %26 : vector<1x8x8xf32>
    %824 = arith.mulf %811, %30 : vector<1x8x6xf32>
    %825 = arith.mulf %814, %34 : vector<1x8x4xf32>
    %cst_241 = arith.constant dense<0.000000e+00> : vector<1x8xf32>
    %826 = vector.multi_reduction <add>, %823, %cst_241 [2] : vector<1x8x8xf32> to vector<1x8xf32>
    %827 = vector.shape_cast %826 : vector<1x8xf32> to vector<1x8x1xf32>
    %cst_242 = arith.constant dense<0.000000e+00> : vector<1x8xf32>
    %828 = vector.multi_reduction <add>, %824, %cst_242 [2] : vector<1x8x6xf32> to vector<1x8xf32>
    %829 = vector.shape_cast %828 : vector<1x8xf32> to vector<1x8x1xf32>
    %830 = arith.addf %827, %829 : vector<1x8x1xf32>
    %cst_243 = arith.constant dense<0.000000e+00> : vector<1x8xf32>
    %831 = vector.multi_reduction <add>, %825, %cst_243 [2] : vector<1x8x4xf32> to vector<1x8xf32>
    %832 = vector.shape_cast %831 : vector<1x8xf32> to vector<1x8x1xf32>
    %833 = arith.addf %830, %832 : vector<1x8x1xf32>
    %cst_244 = arith.constant 9.99999982E-14 : f32
    %834 = vector.broadcast %cst_244 : f32 to vector<1x8x1xf32>
    %835 = arith.mulf %834, %822 : vector<1x8x1xf32>
    %836 = arith.addf %833, %835 : vector<1x8x1xf32>
    %837 = tpu.reciprocal %836 {approx = true} : vector<1x8x1xf32> -> vector<1x8x1xf32>
    %838 = vector.broadcast %837 : vector<1x8x1xf32> to vector<1x8x8xf32>
    %839 = arith.mulf %823, %838 : vector<1x8x8xf32>
    %840 = arith.truncf %839 : vector<1x8x8xf32> to vector<1x8x8xbf16>
    %cst_245 = arith.constant dense<0.000000e+00> : vector<1x8x4xf32>
    %841 = tpu.matmul %840, %739, %cst_245 {dimension_numbers = #tpu.dot_dimension_numbers<[2], [1], [1], [2], [0, 0, 0, 1, 1, 2], [0], [0]>} : vector<1x8x8xbf16>, vector<1x8x4xbf16>, vector<1x8x4xf32> -> vector<1x8x4xf32>
    %842 = vector.broadcast %837 : vector<1x8x1xf32> to vector<1x8x6xf32>
    %843 = arith.mulf %824, %842 : vector<1x8x6xf32>
    %844 = arith.truncf %843 : vector<1x8x6xf32> to vector<1x8x6xbf16>
    %cst_246 = arith.constant dense<0.000000e+00> : vector<1x8x4xf32>
    %845 = tpu.matmul %844, %765, %cst_246 {dimension_numbers = #tpu.dot_dimension_numbers<[2], [1], [1], [2], [0, 0, 0, 1, 1, 2], [0], [0]>} : vector<1x8x6xbf16>, vector<1x6x4xbf16>, vector<1x8x4xf32> -> vector<1x8x4xf32>
    %846 = arith.addf %841, %845 : vector<1x8x4xf32>
    %847 = vector.broadcast %837 : vector<1x8x1xf32> to vector<1x8x4xf32>
    %848 = arith.mulf %825, %847 : vector<1x8x4xf32>
    %849 = arith.truncf %848 : vector<1x8x4xf32> to vector<1x8x4xbf16>
    %cst_247 = arith.constant dense<0.000000e+00> : vector<1x8x4xf32>
    %850 = tpu.matmul %849, %791, %cst_247 {dimension_numbers = #tpu.dot_dimension_numbers<[2], [1], [1], [2], [0, 0, 0, 1, 1, 2], [0], [0]>} : vector<1x8x4xbf16>, vector<1x4x4xbf16>, vector<1x8x4xf32> -> vector<1x8x4xf32>
    %851 = arith.addf %846, %850 : vector<1x8x4xf32>
    %c0_248 = arith.constant 0 : index
    %c0_249 = arith.constant 0 : index
    %c16 = arith.constant 16 : index
    %852 = vector.load %arg28[%c0_248, %c0_249, %c16] : memref<1x8x32xf32, #tpu.memory_space<vmem>>, vector<1x8x4xf32>
    tpu.vector_store %arg28[%c0_248, %c0_249, %c16], %851 {strides = array<i32>} : memref<1x8x32xf32, #tpu.memory_space<vmem>>, vector<1x8x4xf32>,
    %853 = vector.extract_strided_slice %5 {offsets = [0, 20], sizes = [8, 4], strides = [1, 1]} : vector<8x32xf32> to vector<8x4xf32>
    %854 = vector.extract_strided_slice %7 {offsets = [0, 20], sizes = [8, 4], strides = [1, 1]} : vector<8x32xf32> to vector<8x4xf32>
    %cst_250 = arith.constant dense<0.000000e+00> : vector<8xf32>
    %855 = vector.multi_reduction <add>, %853, %cst_250 [1] : vector<8x4xf32> to vector<8xf32>
    %856 = vector.shape_cast %855 : vector<8xf32> to vector<8x1xf32>
    %cst_251 = arith.constant 4.000000e+00 : f32
    %857 = vector.broadcast %cst_251 : f32 to vector<8x1xf32>
    %858 = arith.divf %856, %857 : vector<8x1xf32>
    %859 = vector.broadcast %858 : vector<8x1xf32> to vector<8x4xf32>
    %860 = arith.subf %853, %859 : vector<8x4xf32>
    %861 = arith.mulf %860, %860 : vector<8x4xf32>
    %cst_252 = arith.constant dense<0.000000e+00> : vector<8xf32>
    %862 = vector.multi_reduction <add>, %861, %cst_252 [1] : vector<8x4xf32> to vector<8xf32>
    %863 = vector.shape_cast %862 : vector<8xf32> to vector<8x1xf32>
    %cst_253 = arith.constant 4.000000e+00 : f32
    %864 = vector.broadcast %cst_253 : f32 to vector<8x1xf32>
    %865 = arith.divf %863, %864 : vector<8x1xf32>
    %cst_254 = arith.constant 9.99999974E-6 : f32
    %866 = vector.broadcast %cst_254 : f32 to vector<8x1xf32>
    %867 = arith.addf %865, %866 : vector<8x1xf32>
    %868 = math.rsqrt %867 : vector<8x1xf32>
    %869 = vector.broadcast %868 : vector<8x1xf32> to vector<8x4xf32>
    %870 = arith.mulf %860, %869 : vector<8x4xf32>
    %871 = vector.broadcast %35 : vector<1x4xf32> to vector<8x4xf32>
    %872 = arith.mulf %870, %871 : vector<8x4xf32>
    %873 = vector.broadcast %36 : vector<1x4xf32> to vector<8x4xf32>
    %874 = arith.addf %872, %873 : vector<8x4xf32>
    %cst_255 = arith.constant dense<0.000000e+00> : vector<8xf32>
    %875 = vector.multi_reduction <add>, %854, %cst_255 [1] : vector<8x4xf32> to vector<8xf32>
    %876 = vector.shape_cast %875 : vector<8xf32> to vector<8x1xf32>
    %cst_256 = arith.constant 4.000000e+00 : f32
    %877 = vector.broadcast %cst_256 : f32 to vector<8x1xf32>
    %878 = arith.divf %876, %877 : vector<8x1xf32>
    %879 = vector.broadcast %878 : vector<8x1xf32> to vector<8x4xf32>
    %880 = arith.subf %854, %879 : vector<8x4xf32>
    %881 = arith.mulf %880, %880 : vector<8x4xf32>
    %cst_257 = arith.constant dense<0.000000e+00> : vector<8xf32>
    %882 = vector.multi_reduction <add>, %881, %cst_257 [1] : vector<8x4xf32> to vector<8xf32>
    %883 = vector.shape_cast %882 : vector<8xf32> to vector<8x1xf32>
    %cst_258 = arith.constant 4.000000e+00 : f32
    %884 = vector.broadcast %cst_258 : f32 to vector<8x1xf32>
    %885 = arith.divf %883, %884 : vector<8x1xf32>
    %cst_259 = arith.constant 9.99999974E-6 : f32
    %886 = vector.broadcast %cst_259 : f32 to vector<8x1xf32>
    %887 = arith.addf %885, %886 : vector<8x1xf32>
    %888 = math.rsqrt %887 : vector<8x1xf32>
    %889 = vector.broadcast %888 : vector<8x1xf32> to vector<8x4xf32>
    %890 = arith.mulf %880, %889 : vector<8x4xf32>
    %891 = vector.broadcast %37 : vector<1x4xf32> to vector<8x4xf32>
    %892 = arith.mulf %890, %891 : vector<8x4xf32>
    %893 = vector.broadcast %38 : vector<1x4xf32> to vector<8x4xf32>
    %894 = arith.addf %892, %893 : vector<8x4xf32>
    %895 = arith.truncf %874 : vector<8x4xf32> to vector<8x4xbf16>
    %896 = vector.shape_cast %895 : vector<8x4xbf16> to vector<1x8x4xbf16>
    %897 = arith.truncf %894 : vector<8x4xf32> to vector<8x4xbf16>
    %898 = vector.shape_cast %897 : vector<8x4xbf16> to vector<1x8x4xbf16>
    %899 = vector.extract_strided_slice %9 {offsets = [0, 20], sizes = [8, 4], strides = [1, 1]} : vector<8x32xf32> to vector<8x4xf32>
    %900 = arith.truncf %899 : vector<8x4xf32> to vector<8x4xbf16>
    %901 = vector.shape_cast %900 : vector<8x4xbf16> to vector<1x8x4xbf16>
    %902 = vector.extract_strided_slice %13 {offsets = [0, 20], sizes = [6, 4], strides = [1, 1]} : vector<6x32xf32> to vector<6x4xf32>
    %cst_260 = arith.constant dense<0.000000e+00> : vector<6xf32>
    %903 = vector.multi_reduction <add>, %902, %cst_260 [1] : vector<6x4xf32> to vector<6xf32>
    %904 = vector.shape_cast %903 : vector<6xf32> to vector<6x1xf32>
    %cst_261 = arith.constant 4.000000e+00 : f32
    %905 = vector.broadcast %cst_261 : f32 to vector<6x1xf32>
    %906 = arith.divf %904, %905 : vector<6x1xf32>
    %907 = vector.broadcast %906 : vector<6x1xf32> to vector<6x4xf32>
    %908 = arith.subf %902, %907 : vector<6x4xf32>
    %909 = arith.mulf %908, %908 : vector<6x4xf32>
    %cst_262 = arith.constant dense<0.000000e+00> : vector<6xf32>
    %910 = vector.multi_reduction <add>, %909, %cst_262 [1] : vector<6x4xf32> to vector<6xf32>
    %911 = vector.shape_cast %910 : vector<6xf32> to vector<6x1xf32>
    %cst_263 = arith.constant 4.000000e+00 : f32
    %912 = vector.broadcast %cst_263 : f32 to vector<6x1xf32>
    %913 = arith.divf %911, %912 : vector<6x1xf32>
    %cst_264 = arith.constant 9.99999974E-6 : f32
    %914 = vector.broadcast %cst_264 : f32 to vector<6x1xf32>
    %915 = arith.addf %913, %914 : vector<6x1xf32>
    %916 = math.rsqrt %915 : vector<6x1xf32>
    %917 = vector.broadcast %916 : vector<6x1xf32> to vector<6x4xf32>
    %918 = arith.mulf %908, %917 : vector<6x4xf32>
    %919 = vector.broadcast %39 : vector<1x4xf32> to vector<6x4xf32>
    %920 = arith.mulf %918, %919 : vector<6x4xf32>
    %921 = vector.broadcast %40 : vector<1x4xf32> to vector<6x4xf32>
    %922 = arith.addf %920, %921 : vector<6x4xf32>
    %923 = arith.truncf %922 : vector<6x4xf32> to vector<6x4xbf16>
    %924 = vector.shape_cast %923 : vector<6x4xbf16> to vector<1x6x4xbf16>
    %925 = vector.extract_strided_slice %15 {offsets = [0, 20], sizes = [6, 4], strides = [1, 1]} : vector<6x32xf32> to vector<6x4xf32>
    %926 = arith.truncf %925 : vector<6x4xf32> to vector<6x4xbf16>
    %927 = vector.shape_cast %926 : vector<6x4xbf16> to vector<1x6x4xbf16>
    %928 = vector.extract_strided_slice %19 {offsets = [0, 20], sizes = [4, 4], strides = [1, 1]} : vector<4x32xf32> to vector<4x4xf32>
    %cst_265 = arith.constant dense<0.000000e+00> : vector<4xf32>
    %929 = vector.multi_reduction <add>, %928, %cst_265 [1] : vector<4x4xf32> to vector<4xf32>
    %930 = vector.shape_cast %929 : vector<4xf32> to vector<4x1xf32>
    %cst_266 = arith.constant 4.000000e+00 : f32
    %931 = vector.broadcast %cst_266 : f32 to vector<4x1xf32>
    %932 = arith.divf %930, %931 : vector<4x1xf32>
    %933 = vector.broadcast %932 : vector<4x1xf32> to vector<4x4xf32>
    %934 = arith.subf %928, %933 : vector<4x4xf32>
    %935 = arith.mulf %934, %934 : vector<4x4xf32>
    %cst_267 = arith.constant dense<0.000000e+00> : vector<4xf32>
    %936 = vector.multi_reduction <add>, %935, %cst_267 [1] : vector<4x4xf32> to vector<4xf32>
    %937 = vector.shape_cast %936 : vector<4xf32> to vector<4x1xf32>
    %cst_268 = arith.constant 4.000000e+00 : f32
    %938 = vector.broadcast %cst_268 : f32 to vector<4x1xf32>
    %939 = arith.divf %937, %938 : vector<4x1xf32>
    %cst_269 = arith.constant 9.99999974E-6 : f32
    %940 = vector.broadcast %cst_269 : f32 to vector<4x1xf32>
    %941 = arith.addf %939, %940 : vector<4x1xf32>
    %942 = math.rsqrt %941 : vector<4x1xf32>
    %943 = vector.broadcast %942 : vector<4x1xf32> to vector<4x4xf32>
    %944 = arith.mulf %934, %943 : vector<4x4xf32>
    %945 = vector.broadcast %41 : vector<1x4xf32> to vector<4x4xf32>
    %946 = arith.mulf %944, %945 : vector<4x4xf32>
    %947 = vector.broadcast %42 : vector<1x4xf32> to vector<4x4xf32>
    %948 = arith.addf %946, %947 : vector<4x4xf32>
    %949 = arith.truncf %948 : vector<4x4xf32> to vector<4x4xbf16>
    %950 = vector.shape_cast %949 : vector<4x4xbf16> to vector<1x4x4xbf16>
    %951 = vector.extract_strided_slice %21 {offsets = [0, 20], sizes = [4, 4], strides = [1, 1]} : vector<4x32xf32> to vector<4x4xf32>
    %952 = arith.truncf %951 : vector<4x4xf32> to vector<4x4xbf16>
    %953 = vector.shape_cast %952 : vector<4x4xbf16> to vector<1x4x4xbf16>
    %cst_270 = arith.constant dense<0.000000e+00> : vector<1x8x8xf32>
    %954 = tpu.matmul %896, %898, %cst_270 {dimension_numbers = #tpu.dot_dimension_numbers<[2], [2], [1], [1], [0, 0, 0, 1, 1, 1], [0], [0]>} : vector<1x8x4xbf16>, vector<1x8x4xbf16>, vector<1x8x8xf32> -> vector<1x8x8xf32>
    %955 = arith.mulf %954, %26 : vector<1x8x8xf32>
    %cst_271 = arith.constant dense<0.000000e+00> : vector<1x8x6xf32>
    %956 = tpu.matmul %896, %924, %cst_271 {dimension_numbers = #tpu.dot_dimension_numbers<[2], [2], [1], [1], [0, 0, 0, 1, 1, 1], [0], [0]>} : vector<1x8x4xbf16>, vector<1x6x4xbf16>, vector<1x8x6xf32> -> vector<1x8x6xf32>
    %957 = arith.mulf %956, %30 : vector<1x8x6xf32>
    %cst_272 = arith.constant dense<0.000000e+00> : vector<1x8x4xf32>
    %958 = tpu.matmul %896, %950, %cst_272 {dimension_numbers = #tpu.dot_dimension_numbers<[2], [2], [1], [1], [0, 0, 0, 1, 1, 1], [0], [0]>} : vector<1x8x4xbf16>, vector<1x4x4xbf16>, vector<1x8x4xf32> -> vector<1x8x4xf32>
    %959 = arith.mulf %958, %34 : vector<1x8x4xf32>
    %cst_273 = arith.constant dense<0xFF800000> : vector<1x8xf32>
    %960 = vector.multi_reduction <maximumf>, %955, %cst_273 [2] : vector<1x8x8xf32> to vector<1x8xf32>
    %961 = vector.shape_cast %960 : vector<1x8xf32> to vector<1x8x1xf32>
    %cst_274 = arith.constant dense<0xFF800000> : vector<1x8xf32>
    %962 = vector.multi_reduction <maximumf>, %957, %cst_274 [2] : vector<1x8x6xf32> to vector<1x8xf32>
    %963 = vector.shape_cast %962 : vector<1x8xf32> to vector<1x8x1xf32>
    %964 = arith.maximumf %961, %963 : vector<1x8x1xf32>
    %cst_275 = arith.constant dense<0xFF800000> : vector<1x8xf32>
    %965 = vector.multi_reduction <maximumf>, %959, %cst_275 [2] : vector<1x8x4xf32> to vector<1x8xf32>
    %966 = vector.shape_cast %965 : vector<1x8xf32> to vector<1x8x1xf32>
    %967 = arith.maximumf %964, %966 : vector<1x8x1xf32>
    %968 = vector.broadcast %967 : vector<1x8x1xf32> to vector<1x8x8xf32>
    %969 = arith.subf %955, %968 : vector<1x8x8xf32>
    %970 = math.exp %969 : vector<1x8x8xf32>
    %971 = vector.broadcast %967 : vector<1x8x1xf32> to vector<1x8x6xf32>
    %972 = arith.subf %957, %971 : vector<1x8x6xf32>
    %973 = math.exp %972 : vector<1x8x6xf32>
    %974 = vector.broadcast %967 : vector<1x8x1xf32> to vector<1x8x4xf32>
    %975 = arith.subf %959, %974 : vector<1x8x4xf32>
    %976 = math.exp %975 : vector<1x8x4xf32>
    %cst_276 = arith.constant dense<0.000000e+00> : vector<1x8xf32>
    %977 = vector.multi_reduction <add>, %970, %cst_276 [2] : vector<1x8x8xf32> to vector<1x8xf32>
    %978 = vector.shape_cast %977 : vector<1x8xf32> to vector<1x8x1xf32>
    %cst_277 = arith.constant dense<0.000000e+00> : vector<1x8xf32>
    %979 = vector.multi_reduction <add>, %973, %cst_277 [2] : vector<1x8x6xf32> to vector<1x8xf32>
    %980 = vector.shape_cast %979 : vector<1x8xf32> to vector<1x8x1xf32>
    %981 = arith.addf %978, %980 : vector<1x8x1xf32>
    %cst_278 = arith.constant dense<0.000000e+00> : vector<1x8xf32>
    %982 = vector.multi_reduction <add>, %976, %cst_278 [2] : vector<1x8x4xf32> to vector<1x8xf32>
    %983 = vector.shape_cast %982 : vector<1x8xf32> to vector<1x8x1xf32>
    %984 = arith.addf %981, %983 : vector<1x8x1xf32>
    %985 = arith.mulf %970, %26 : vector<1x8x8xf32>
    %986 = arith.mulf %973, %30 : vector<1x8x6xf32>
    %987 = arith.mulf %976, %34 : vector<1x8x4xf32>
    %cst_279 = arith.constant dense<0.000000e+00> : vector<1x8xf32>
    %988 = vector.multi_reduction <add>, %985, %cst_279 [2] : vector<1x8x8xf32> to vector<1x8xf32>
    %989 = vector.shape_cast %988 : vector<1x8xf32> to vector<1x8x1xf32>
    %cst_280 = arith.constant dense<0.000000e+00> : vector<1x8xf32>
    %990 = vector.multi_reduction <add>, %986, %cst_280 [2] : vector<1x8x6xf32> to vector<1x8xf32>
    %991 = vector.shape_cast %990 : vector<1x8xf32> to vector<1x8x1xf32>
    %992 = arith.addf %989, %991 : vector<1x8x1xf32>
    %cst_281 = arith.constant dense<0.000000e+00> : vector<1x8xf32>
    %993 = vector.multi_reduction <add>, %987, %cst_281 [2] : vector<1x8x4xf32> to vector<1x8xf32>
    %994 = vector.shape_cast %993 : vector<1x8xf32> to vector<1x8x1xf32>
    %995 = arith.addf %992, %994 : vector<1x8x1xf32>
    %cst_282 = arith.constant 9.99999982E-14 : f32
    %996 = vector.broadcast %cst_282 : f32 to vector<1x8x1xf32>
    %997 = arith.mulf %996, %984 : vector<1x8x1xf32>
    %998 = arith.addf %995, %997 : vector<1x8x1xf32>
    %999 = tpu.reciprocal %998 {approx = true} : vector<1x8x1xf32> -> vector<1x8x1xf32>
    %1000 = vector.broadcast %999 : vector<1x8x1xf32> to vector<1x8x8xf32>
    %1001 = arith.mulf %985, %1000 : vector<1x8x8xf32>
    %1002 = arith.truncf %1001 : vector<1x8x8xf32> to vector<1x8x8xbf16>
    %cst_283 = arith.constant dense<0.000000e+00> : vector<1x8x4xf32>
    %1003 = tpu.matmul %1002, %901, %cst_283 {dimension_numbers = #tpu.dot_dimension_numbers<[2], [1], [1], [2], [0, 0, 0, 1, 1, 2], [0], [0]>} : vector<1x8x8xbf16>, vector<1x8x4xbf16>, vector<1x8x4xf32> -> vector<1x8x4xf32>
    %1004 = vector.broadcast %999 : vector<1x8x1xf32> to vector<1x8x6xf32>
    %1005 = arith.mulf %986, %1004 : vector<1x8x6xf32>
    %1006 = arith.truncf %1005 : vector<1x8x6xf32> to vector<1x8x6xbf16>
    %cst_284 = arith.constant dense<0.000000e+00> : vector<1x8x4xf32>
    %1007 = tpu.matmul %1006, %927, %cst_284 {dimension_numbers = #tpu.dot_dimension_numbers<[2], [1], [1], [2], [0, 0, 0, 1, 1, 2], [0], [0]>} : vector<1x8x6xbf16>, vector<1x6x4xbf16>, vector<1x8x4xf32> -> vector<1x8x4xf32>
    %1008 = arith.addf %1003, %1007 : vector<1x8x4xf32>
    %1009 = vector.broadcast %999 : vector<1x8x1xf32> to vector<1x8x4xf32>
    %1010 = arith.mulf %987, %1009 : vector<1x8x4xf32>
    %1011 = arith.truncf %1010 : vector<1x8x4xf32> to vector<1x8x4xbf16>
    %cst_285 = arith.constant dense<0.000000e+00> : vector<1x8x4xf32>
    %1012 = tpu.matmul %1011, %953, %cst_285 {dimension_numbers = #tpu.dot_dimension_numbers<[2], [1], [1], [2], [0, 0, 0, 1, 1, 2], [0], [0]>} : vector<1x8x4xbf16>, vector<1x4x4xbf16>, vector<1x8x4xf32> -> vector<1x8x4xf32>
    %1013 = arith.addf %1008, %1012 : vector<1x8x4xf32>
    %c0_286 = arith.constant 0 : index
    %c0_287 = arith.constant 0 : index
    %c20 = arith.constant 20 : index
    %1014 = vector.load %arg28[%c0_286, %c0_287, %c20] : memref<1x8x32xf32, #tpu.memory_space<vmem>>, vector<1x8x4xf32>
    tpu.vector_store %arg28[%c0_286, %c0_287, %c20], %1013 {strides = array<i32>} : memref<1x8x32xf32, #tpu.memory_space<vmem>>, vector<1x8x4xf32>,
    %1015 = vector.extract_strided_slice %5 {offsets = [0, 24], sizes = [8, 4], strides = [1, 1]} : vector<8x32xf32> to vector<8x4xf32>
    %1016 = vector.extract_strided_slice %7 {offsets = [0, 24], sizes = [8, 4], strides = [1, 1]} : vector<8x32xf32> to vector<8x4xf32>
    %cst_288 = arith.constant dense<0.000000e+00> : vector<8xf32>
    %1017 = vector.multi_reduction <add>, %1015, %cst_288 [1] : vector<8x4xf32> to vector<8xf32>
    %1018 = vector.shape_cast %1017 : vector<8xf32> to vector<8x1xf32>
    %cst_289 = arith.constant 4.000000e+00 : f32
    %1019 = vector.broadcast %cst_289 : f32 to vector<8x1xf32>
    %1020 = arith.divf %1018, %1019 : vector<8x1xf32>
    %1021 = vector.broadcast %1020 : vector<8x1xf32> to vector<8x4xf32>
    %1022 = arith.subf %1015, %1021 : vector<8x4xf32>
    %1023 = arith.mulf %1022, %1022 : vector<8x4xf32>
    %cst_290 = arith.constant dense<0.000000e+00> : vector<8xf32>
    %1024 = vector.multi_reduction <add>, %1023, %cst_290 [1] : vector<8x4xf32> to vector<8xf32>
    %1025 = vector.shape_cast %1024 : vector<8xf32> to vector<8x1xf32>
    %cst_291 = arith.constant 4.000000e+00 : f32
    %1026 = vector.broadcast %cst_291 : f32 to vector<8x1xf32>
    %1027 = arith.divf %1025, %1026 : vector<8x1xf32>
    %cst_292 = arith.constant 9.99999974E-6 : f32
    %1028 = vector.broadcast %cst_292 : f32 to vector<8x1xf32>
    %1029 = arith.addf %1027, %1028 : vector<8x1xf32>
    %1030 = math.rsqrt %1029 : vector<8x1xf32>
    %1031 = vector.broadcast %1030 : vector<8x1xf32> to vector<8x4xf32>
    %1032 = arith.mulf %1022, %1031 : vector<8x4xf32>
    %1033 = vector.broadcast %35 : vector<1x4xf32> to vector<8x4xf32>
    %1034 = arith.mulf %1032, %1033 : vector<8x4xf32>
    %1035 = vector.broadcast %36 : vector<1x4xf32> to vector<8x4xf32>
    %1036 = arith.addf %1034, %1035 : vector<8x4xf32>
    %cst_293 = arith.constant dense<0.000000e+00> : vector<8xf32>
    %1037 = vector.multi_reduction <add>, %1016, %cst_293 [1] : vector<8x4xf32> to vector<8xf32>
    %1038 = vector.shape_cast %1037 : vector<8xf32> to vector<8x1xf32>
    %cst_294 = arith.constant 4.000000e+00 : f32
    %1039 = vector.broadcast %cst_294 : f32 to vector<8x1xf32>
    %1040 = arith.divf %1038, %1039 : vector<8x1xf32>
    %1041 = vector.broadcast %1040 : vector<8x1xf32> to vector<8x4xf32>
    %1042 = arith.subf %1016, %1041 : vector<8x4xf32>
    %1043 = arith.mulf %1042, %1042 : vector<8x4xf32>
    %cst_295 = arith.constant dense<0.000000e+00> : vector<8xf32>
    %1044 = vector.multi_reduction <add>, %1043, %cst_295 [1] : vector<8x4xf32> to vector<8xf32>
    %1045 = vector.shape_cast %1044 : vector<8xf32> to vector<8x1xf32>
    %cst_296 = arith.constant 4.000000e+00 : f32
    %1046 = vector.broadcast %cst_296 : f32 to vector<8x1xf32>
    %1047 = arith.divf %1045, %1046 : vector<8x1xf32>
    %cst_297 = arith.constant 9.99999974E-6 : f32
    %1048 = vector.broadcast %cst_297 : f32 to vector<8x1xf32>
    %1049 = arith.addf %1047, %1048 : vector<8x1xf32>
    %1050 = math.rsqrt %1049 : vector<8x1xf32>
    %1051 = vector.broadcast %1050 : vector<8x1xf32> to vector<8x4xf32>
    %1052 = arith.mulf %1042, %1051 : vector<8x4xf32>
    %1053 = vector.broadcast %37 : vector<1x4xf32> to vector<8x4xf32>
    %1054 = arith.mulf %1052, %1053 : vector<8x4xf32>
    %1055 = vector.broadcast %38 : vector<1x4xf32> to vector<8x4xf32>
    %1056 = arith.addf %1054, %1055 : vector<8x4xf32>
    %1057 = arith.truncf %1036 : vector<8x4xf32> to vector<8x4xbf16>
    %1058 = vector.shape_cast %1057 : vector<8x4xbf16> to vector<1x8x4xbf16>
    %1059 = arith.truncf %1056 : vector<8x4xf32> to vector<8x4xbf16>
    %1060 = vector.shape_cast %1059 : vector<8x4xbf16> to vector<1x8x4xbf16>
    %1061 = vector.extract_strided_slice %9 {offsets = [0, 24], sizes = [8, 4], strides = [1, 1]} : vector<8x32xf32> to vector<8x4xf32>
    %1062 = arith.truncf %1061 : vector<8x4xf32> to vector<8x4xbf16>
    %1063 = vector.shape_cast %1062 : vector<8x4xbf16> to vector<1x8x4xbf16>
    %1064 = vector.extract_strided_slice %13 {offsets = [0, 24], sizes = [6, 4], strides = [1, 1]} : vector<6x32xf32> to vector<6x4xf32>
    %cst_298 = arith.constant dense<0.000000e+00> : vector<6xf32>
    %1065 = vector.multi_reduction <add>, %1064, %cst_298 [1] : vector<6x4xf32> to vector<6xf32>
    %1066 = vector.shape_cast %1065 : vector<6xf32> to vector<6x1xf32>
    %cst_299 = arith.constant 4.000000e+00 : f32
    %1067 = vector.broadcast %cst_299 : f32 to vector<6x1xf32>
    %1068 = arith.divf %1066, %1067 : vector<6x1xf32>
    %1069 = vector.broadcast %1068 : vector<6x1xf32> to vector<6x4xf32>
    %1070 = arith.subf %1064, %1069 : vector<6x4xf32>
    %1071 = arith.mulf %1070, %1070 : vector<6x4xf32>
    %cst_300 = arith.constant dense<0.000000e+00> : vector<6xf32>
    %1072 = vector.multi_reduction <add>, %1071, %cst_300 [1] : vector<6x4xf32> to vector<6xf32>
    %1073 = vector.shape_cast %1072 : vector<6xf32> to vector<6x1xf32>
    %cst_301 = arith.constant 4.000000e+00 : f32
    %1074 = vector.broadcast %cst_301 : f32 to vector<6x1xf32>
    %1075 = arith.divf %1073, %1074 : vector<6x1xf32>
    %cst_302 = arith.constant 9.99999974E-6 : f32
    %1076 = vector.broadcast %cst_302 : f32 to vector<6x1xf32>
    %1077 = arith.addf %1075, %1076 : vector<6x1xf32>
    %1078 = math.rsqrt %1077 : vector<6x1xf32>
    %1079 = vector.broadcast %1078 : vector<6x1xf32> to vector<6x4xf32>
    %1080 = arith.mulf %1070, %1079 : vector<6x4xf32>
    %1081 = vector.broadcast %39 : vector<1x4xf32> to vector<6x4xf32>
    %1082 = arith.mulf %1080, %1081 : vector<6x4xf32>
    %1083 = vector.broadcast %40 : vector<1x4xf32> to vector<6x4xf32>
    %1084 = arith.addf %1082, %1083 : vector<6x4xf32>
    %1085 = arith.truncf %1084 : vector<6x4xf32> to vector<6x4xbf16>
    %1086 = vector.shape_cast %1085 : vector<6x4xbf16> to vector<1x6x4xbf16>
    %1087 = vector.extract_strided_slice %15 {offsets = [0, 24], sizes = [6, 4], strides = [1, 1]} : vector<6x32xf32> to vector<6x4xf32>
    %1088 = arith.truncf %1087 : vector<6x4xf32> to vector<6x4xbf16>
    %1089 = vector.shape_cast %1088 : vector<6x4xbf16> to vector<1x6x4xbf16>
    %1090 = vector.extract_strided_slice %19 {offsets = [0, 24], sizes = [4, 4], strides = [1, 1]} : vector<4x32xf32> to vector<4x4xf32>
    %cst_303 = arith.constant dense<0.000000e+00> : vector<4xf32>
    %1091 = vector.multi_reduction <add>, %1090, %cst_303 [1] : vector<4x4xf32> to vector<4xf32>
    %1092 = vector.shape_cast %1091 : vector<4xf32> to vector<4x1xf32>
    %cst_304 = arith.constant 4.000000e+00 : f32
    %1093 = vector.broadcast %cst_304 : f32 to vector<4x1xf32>
    %1094 = arith.divf %1092, %1093 : vector<4x1xf32>
    %1095 = vector.broadcast %1094 : vector<4x1xf32> to vector<4x4xf32>
    %1096 = arith.subf %1090, %1095 : vector<4x4xf32>
    %1097 = arith.mulf %1096, %1096 : vector<4x4xf32>
    %cst_305 = arith.constant dense<0.000000e+00> : vector<4xf32>
    %1098 = vector.multi_reduction <add>, %1097, %cst_305 [1] : vector<4x4xf32> to vector<4xf32>
    %1099 = vector.shape_cast %1098 : vector<4xf32> to vector<4x1xf32>
    %cst_306 = arith.constant 4.000000e+00 : f32
    %1100 = vector.broadcast %cst_306 : f32 to vector<4x1xf32>
    %1101 = arith.divf %1099, %1100 : vector<4x1xf32>
    %cst_307 = arith.constant 9.99999974E-6 : f32
    %1102 = vector.broadcast %cst_307 : f32 to vector<4x1xf32>
    %1103 = arith.addf %1101, %1102 : vector<4x1xf32>
    %1104 = math.rsqrt %1103 : vector<4x1xf32>
    %1105 = vector.broadcast %1104 : vector<4x1xf32> to vector<4x4xf32>
    %1106 = arith.mulf %1096, %1105 : vector<4x4xf32>
    %1107 = vector.broadcast %41 : vector<1x4xf32> to vector<4x4xf32>
    %1108 = arith.mulf %1106, %1107 : vector<4x4xf32>
    %1109 = vector.broadcast %42 : vector<1x4xf32> to vector<4x4xf32>
    %1110 = arith.addf %1108, %1109 : vector<4x4xf32>
    %1111 = arith.truncf %1110 : vector<4x4xf32> to vector<4x4xbf16>
    %1112 = vector.shape_cast %1111 : vector<4x4xbf16> to vector<1x4x4xbf16>
    %1113 = vector.extract_strided_slice %21 {offsets = [0, 24], sizes = [4, 4], strides = [1, 1]} : vector<4x32xf32> to vector<4x4xf32>
    %1114 = arith.truncf %1113 : vector<4x4xf32> to vector<4x4xbf16>
    %1115 = vector.shape_cast %1114 : vector<4x4xbf16> to vector<1x4x4xbf16>
    %cst_308 = arith.constant dense<0.000000e+00> : vector<1x8x8xf32>
    %1116 = tpu.matmul %1058, %1060, %cst_308 {dimension_numbers = #tpu.dot_dimension_numbers<[2], [2], [1], [1], [0, 0, 0, 1, 1, 1], [0], [0]>} : vector<1x8x4xbf16>, vector<1x8x4xbf16>, vector<1x8x8xf32> -> vector<1x8x8xf32>
    %1117 = arith.mulf %1116, %26 : vector<1x8x8xf32>
    %cst_309 = arith.constant dense<0.000000e+00> : vector<1x8x6xf32>
    %1118 = tpu.matmul %1058, %1086, %cst_309 {dimension_numbers = #tpu.dot_dimension_numbers<[2], [2], [1], [1], [0, 0, 0, 1, 1, 1], [0], [0]>} : vector<1x8x4xbf16>, vector<1x6x4xbf16>, vector<1x8x6xf32> -> vector<1x8x6xf32>
    %1119 = arith.mulf %1118, %30 : vector<1x8x6xf32>
    %cst_310 = arith.constant dense<0.000000e+00> : vector<1x8x4xf32>
    %1120 = tpu.matmul %1058, %1112, %cst_310 {dimension_numbers = #tpu.dot_dimension_numbers<[2], [2], [1], [1], [0, 0, 0, 1, 1, 1], [0], [0]>} : vector<1x8x4xbf16>, vector<1x4x4xbf16>, vector<1x8x4xf32> -> vector<1x8x4xf32>
    %1121 = arith.mulf %1120, %34 : vector<1x8x4xf32>
    %cst_311 = arith.constant dense<0xFF800000> : vector<1x8xf32>
    %1122 = vector.multi_reduction <maximumf>, %1117, %cst_311 [2] : vector<1x8x8xf32> to vector<1x8xf32>
    %1123 = vector.shape_cast %1122 : vector<1x8xf32> to vector<1x8x1xf32>
    %cst_312 = arith.constant dense<0xFF800000> : vector<1x8xf32>
    %1124 = vector.multi_reduction <maximumf>, %1119, %cst_312 [2] : vector<1x8x6xf32> to vector<1x8xf32>
    %1125 = vector.shape_cast %1124 : vector<1x8xf32> to vector<1x8x1xf32>
    %1126 = arith.maximumf %1123, %1125 : vector<1x8x1xf32>
    %cst_313 = arith.constant dense<0xFF800000> : vector<1x8xf32>
    %1127 = vector.multi_reduction <maximumf>, %1121, %cst_313 [2] : vector<1x8x4xf32> to vector<1x8xf32>
    %1128 = vector.shape_cast %1127 : vector<1x8xf32> to vector<1x8x1xf32>
    %1129 = arith.maximumf %1126, %1128 : vector<1x8x1xf32>
    %1130 = vector.broadcast %1129 : vector<1x8x1xf32> to vector<1x8x8xf32>
    %1131 = arith.subf %1117, %1130 : vector<1x8x8xf32>
    %1132 = math.exp %1131 : vector<1x8x8xf32>
    %1133 = vector.broadcast %1129 : vector<1x8x1xf32> to vector<1x8x6xf32>
    %1134 = arith.subf %1119, %1133 : vector<1x8x6xf32>
    %1135 = math.exp %1134 : vector<1x8x6xf32>
    %1136 = vector.broadcast %1129 : vector<1x8x1xf32> to vector<1x8x4xf32>
    %1137 = arith.subf %1121, %1136 : vector<1x8x4xf32>
    %1138 = math.exp %1137 : vector<1x8x4xf32>
    %cst_314 = arith.constant dense<0.000000e+00> : vector<1x8xf32>
    %1139 = vector.multi_reduction <add>, %1132, %cst_314 [2] : vector<1x8x8xf32> to vector<1x8xf32>
    %1140 = vector.shape_cast %1139 : vector<1x8xf32> to vector<1x8x1xf32>
    %cst_315 = arith.constant dense<0.000000e+00> : vector<1x8xf32>
    %1141 = vector.multi_reduction <add>, %1135, %cst_315 [2] : vector<1x8x6xf32> to vector<1x8xf32>
    %1142 = vector.shape_cast %1141 : vector<1x8xf32> to vector<1x8x1xf32>
    %1143 = arith.addf %1140, %1142 : vector<1x8x1xf32>
    %cst_316 = arith.constant dense<0.000000e+00> : vector<1x8xf32>
    %1144 = vector.multi_reduction <add>, %1138, %cst_316 [2] : vector<1x8x4xf32> to vector<1x8xf32>
    %1145 = vector.shape_cast %1144 : vector<1x8xf32> to vector<1x8x1xf32>
    %1146 = arith.addf %1143, %1145 : vector<1x8x1xf32>
    %1147 = arith.mulf %1132, %26 : vector<1x8x8xf32>
    %1148 = arith.mulf %1135, %30 : vector<1x8x6xf32>
    %1149 = arith.mulf %1138, %34 : vector<1x8x4xf32>
    %cst_317 = arith.constant dense<0.000000e+00> : vector<1x8xf32>
    %1150 = vector.multi_reduction <add>, %1147, %cst_317 [2] : vector<1x8x8xf32> to vector<1x8xf32>
    %1151 = vector.shape_cast %1150 : vector<1x8xf32> to vector<1x8x1xf32>
    %cst_318 = arith.constant dense<0.000000e+00> : vector<1x8xf32>
    %1152 = vector.multi_reduction <add>, %1148, %cst_318 [2] : vector<1x8x6xf32> to vector<1x8xf32>
    %1153 = vector.shape_cast %1152 : vector<1x8xf32> to vector<1x8x1xf32>
    %1154 = arith.addf %1151, %1153 : vector<1x8x1xf32>
    %cst_319 = arith.constant dense<0.000000e+00> : vector<1x8xf32>
    %1155 = vector.multi_reduction <add>, %1149, %cst_319 [2] : vector<1x8x4xf32> to vector<1x8xf32>
    %1156 = vector.shape_cast %1155 : vector<1x8xf32> to vector<1x8x1xf32>
    %1157 = arith.addf %1154, %1156 : vector<1x8x1xf32>
    %cst_320 = arith.constant 9.99999982E-14 : f32
    %1158 = vector.broadcast %cst_320 : f32 to vector<1x8x1xf32>
    %1159 = arith.mulf %1158, %1146 : vector<1x8x1xf32>
    %1160 = arith.addf %1157, %1159 : vector<1x8x1xf32>
    %1161 = tpu.reciprocal %1160 {approx = true} : vector<1x8x1xf32> -> vector<1x8x1xf32>
    %1162 = vector.broadcast %1161 : vector<1x8x1xf32> to vector<1x8x8xf32>
    %1163 = arith.mulf %1147, %1162 : vector<1x8x8xf32>
    %1164 = arith.truncf %1163 : vector<1x8x8xf32> to vector<1x8x8xbf16>
    %cst_321 = arith.constant dense<0.000000e+00> : vector<1x8x4xf32>
    %1165 = tpu.matmul %1164, %1063, %cst_321 {dimension_numbers = #tpu.dot_dimension_numbers<[2], [1], [1], [2], [0, 0, 0, 1, 1, 2], [0], [0]>} : vector<1x8x8xbf16>, vector<1x8x4xbf16>, vector<1x8x4xf32> -> vector<1x8x4xf32>
    %1166 = vector.broadcast %1161 : vector<1x8x1xf32> to vector<1x8x6xf32>
    %1167 = arith.mulf %1148, %1166 : vector<1x8x6xf32>
    %1168 = arith.truncf %1167 : vector<1x8x6xf32> to vector<1x8x6xbf16>
    %cst_322 = arith.constant dense<0.000000e+00> : vector<1x8x4xf32>
    %1169 = tpu.matmul %1168, %1089, %cst_322 {dimension_numbers = #tpu.dot_dimension_numbers<[2], [1], [1], [2], [0, 0, 0, 1, 1, 2], [0], [0]>} : vector<1x8x6xbf16>, vector<1x6x4xbf16>, vector<1x8x4xf32> -> vector<1x8x4xf32>
    %1170 = arith.addf %1165, %1169 : vector<1x8x4xf32>
    %1171 = vector.broadcast %1161 : vector<1x8x1xf32> to vector<1x8x4xf32>
    %1172 = arith.mulf %1149, %1171 : vector<1x8x4xf32>
    %1173 = arith.truncf %1172 : vector<1x8x4xf32> to vector<1x8x4xbf16>
    %cst_323 = arith.constant dense<0.000000e+00> : vector<1x8x4xf32>
    %1174 = tpu.matmul %1173, %1115, %cst_323 {dimension_numbers = #tpu.dot_dimension_numbers<[2], [1], [1], [2], [0, 0, 0, 1, 1, 2], [0], [0]>} : vector<1x8x4xbf16>, vector<1x4x4xbf16>, vector<1x8x4xf32> -> vector<1x8x4xf32>
    %1175 = arith.addf %1170, %1174 : vector<1x8x4xf32>
    %c0_324 = arith.constant 0 : index
    %c0_325 = arith.constant 0 : index
    %c24 = arith.constant 24 : index
    %1176 = vector.load %arg28[%c0_324, %c0_325, %c24] : memref<1x8x32xf32, #tpu.memory_space<vmem>>, vector<1x8x4xf32>
    tpu.vector_store %arg28[%c0_324, %c0_325, %c24], %1175 {strides = array<i32>} : memref<1x8x32xf32, #tpu.memory_space<vmem>>, vector<1x8x4xf32>,
    %1177 = vector.extract_strided_slice %5 {offsets = [0, 28], sizes = [8, 4], strides = [1, 1]} : vector<8x32xf32> to vector<8x4xf32>
    %1178 = vector.extract_strided_slice %7 {offsets = [0, 28], sizes = [8, 4], strides = [1, 1]} : vector<8x32xf32> to vector<8x4xf32>
    %cst_326 = arith.constant dense<0.000000e+00> : vector<8xf32>
    %1179 = vector.multi_reduction <add>, %1177, %cst_326 [1] : vector<8x4xf32> to vector<8xf32>
    %1180 = vector.shape_cast %1179 : vector<8xf32> to vector<8x1xf32>
    %cst_327 = arith.constant 4.000000e+00 : f32
    %1181 = vector.broadcast %cst_327 : f32 to vector<8x1xf32>
    %1182 = arith.divf %1180, %1181 : vector<8x1xf32>
    %1183 = vector.broadcast %1182 : vector<8x1xf32> to vector<8x4xf32>
    %1184 = arith.subf %1177, %1183 : vector<8x4xf32>
    %1185 = arith.mulf %1184, %1184 : vector<8x4xf32>
    %cst_328 = arith.constant dense<0.000000e+00> : vector<8xf32>
    %1186 = vector.multi_reduction <add>, %1185, %cst_328 [1] : vector<8x4xf32> to vector<8xf32>
    %1187 = vector.shape_cast %1186 : vector<8xf32> to vector<8x1xf32>
    %cst_329 = arith.constant 4.000000e+00 : f32
    %1188 = vector.broadcast %cst_329 : f32 to vector<8x1xf32>
    %1189 = arith.divf %1187, %1188 : vector<8x1xf32>
    %cst_330 = arith.constant 9.99999974E-6 : f32
    %1190 = vector.broadcast %cst_330 : f32 to vector<8x1xf32>
    %1191 = arith.addf %1189, %1190 : vector<8x1xf32>
    %1192 = math.rsqrt %1191 : vector<8x1xf32>
    %1193 = vector.broadcast %1192 : vector<8x1xf32> to vector<8x4xf32>
    %1194 = arith.mulf %1184, %1193 : vector<8x4xf32>
    %1195 = vector.broadcast %35 : vector<1x4xf32> to vector<8x4xf32>
    %1196 = arith.mulf %1194, %1195 : vector<8x4xf32>
    %1197 = vector.broadcast %36 : vector<1x4xf32> to vector<8x4xf32>
    %1198 = arith.addf %1196, %1197 : vector<8x4xf32>
    %cst_331 = arith.constant dense<0.000000e+00> : vector<8xf32>
    %1199 = vector.multi_reduction <add>, %1178, %cst_331 [1] : vector<8x4xf32> to vector<8xf32>
    %1200 = vector.shape_cast %1199 : vector<8xf32> to vector<8x1xf32>
    %cst_332 = arith.constant 4.000000e+00 : f32
    %1201 = vector.broadcast %cst_332 : f32 to vector<8x1xf32>
    %1202 = arith.divf %1200, %1201 : vector<8x1xf32>
    %1203 = vector.broadcast %1202 : vector<8x1xf32> to vector<8x4xf32>
    %1204 = arith.subf %1178, %1203 : vector<8x4xf32>
    %1205 = arith.mulf %1204, %1204 : vector<8x4xf32>
    %cst_333 = arith.constant dense<0.000000e+00> : vector<8xf32>
    %1206 = vector.multi_reduction <add>, %1205, %cst_333 [1] : vector<8x4xf32> to vector<8xf32>
    %1207 = vector.shape_cast %1206 : vector<8xf32> to vector<8x1xf32>
    %cst_334 = arith.constant 4.000000e+00 : f32
    %1208 = vector.broadcast %cst_334 : f32 to vector<8x1xf32>
    %1209 = arith.divf %1207, %1208 : vector<8x1xf32>
    %cst_335 = arith.constant 9.99999974E-6 : f32
    %1210 = vector.broadcast %cst_335 : f32 to vector<8x1xf32>
    %1211 = arith.addf %1209, %1210 : vector<8x1xf32>
    %1212 = math.rsqrt %1211 : vector<8x1xf32>
    %1213 = vector.broadcast %1212 : vector<8x1xf32> to vector<8x4xf32>
    %1214 = arith.mulf %1204, %1213 : vector<8x4xf32>
    %1215 = vector.broadcast %37 : vector<1x4xf32> to vector<8x4xf32>
    %1216 = arith.mulf %1214, %1215 : vector<8x4xf32>
    %1217 = vector.broadcast %38 : vector<1x4xf32> to vector<8x4xf32>
    %1218 = arith.addf %1216, %1217 : vector<8x4xf32>
    %1219 = arith.truncf %1198 : vector<8x4xf32> to vector<8x4xbf16>
    %1220 = vector.shape_cast %1219 : vector<8x4xbf16> to vector<1x8x4xbf16>
    %1221 = arith.truncf %1218 : vector<8x4xf32> to vector<8x4xbf16>
    %1222 = vector.shape_cast %1221 : vector<8x4xbf16> to vector<1x8x4xbf16>
    %1223 = vector.extract_strided_slice %9 {offsets = [0, 28], sizes = [8, 4], strides = [1, 1]} : vector<8x32xf32> to vector<8x4xf32>
    %1224 = arith.truncf %1223 : vector<8x4xf32> to vector<8x4xbf16>
    %1225 = vector.shape_cast %1224 : vector<8x4xbf16> to vector<1x8x4xbf16>
    %1226 = vector.extract_strided_slice %13 {offsets = [0, 28], sizes = [6, 4], strides = [1, 1]} : vector<6x32xf32> to vector<6x4xf32>
    %cst_336 = arith.constant dense<0.000000e+00> : vector<6xf32>
    %1227 = vector.multi_reduction <add>, %1226, %cst_336 [1] : vector<6x4xf32> to vector<6xf32>
    %1228 = vector.shape_cast %1227 : vector<6xf32> to vector<6x1xf32>
    %cst_337 = arith.constant 4.000000e+00 : f32
    %1229 = vector.broadcast %cst_337 : f32 to vector<6x1xf32>
    %1230 = arith.divf %1228, %1229 : vector<6x1xf32>
    %1231 = vector.broadcast %1230 : vector<6x1xf32> to vector<6x4xf32>
    %1232 = arith.subf %1226, %1231 : vector<6x4xf32>
    %1233 = arith.mulf %1232, %1232 : vector<6x4xf32>
    %cst_338 = arith.constant dense<0.000000e+00> : vector<6xf32>
    %1234 = vector.multi_reduction <add>, %1233, %cst_338 [1] : vector<6x4xf32> to vector<6xf32>
    %1235 = vector.shape_cast %1234 : vector<6xf32> to vector<6x1xf32>
    %cst_339 = arith.constant 4.000000e+00 : f32
    %1236 = vector.broadcast %cst_339 : f32 to vector<6x1xf32>
    %1237 = arith.divf %1235, %1236 : vector<6x1xf32>
    %cst_340 = arith.constant 9.99999974E-6 : f32
    %1238 = vector.broadcast %cst_340 : f32 to vector<6x1xf32>
    %1239 = arith.addf %1237, %1238 : vector<6x1xf32>
    %1240 = math.rsqrt %1239 : vector<6x1xf32>
    %1241 = vector.broadcast %1240 : vector<6x1xf32> to vector<6x4xf32>
    %1242 = arith.mulf %1232, %1241 : vector<6x4xf32>
    %1243 = vector.broadcast %39 : vector<1x4xf32> to vector<6x4xf32>
    %1244 = arith.mulf %1242, %1243 : vector<6x4xf32>
    %1245 = vector.broadcast %40 : vector<1x4xf32> to vector<6x4xf32>
    %1246 = arith.addf %1244, %1245 : vector<6x4xf32>
    %1247 = arith.truncf %1246 : vector<6x4xf32> to vector<6x4xbf16>
    %1248 = vector.shape_cast %1247 : vector<6x4xbf16> to vector<1x6x4xbf16>
    %1249 = vector.extract_strided_slice %15 {offsets = [0, 28], sizes = [6, 4], strides = [1, 1]} : vector<6x32xf32> to vector<6x4xf32>
    %1250 = arith.truncf %1249 : vector<6x4xf32> to vector<6x4xbf16>
    %1251 = vector.shape_cast %1250 : vector<6x4xbf16> to vector<1x6x4xbf16>
    %1252 = vector.extract_strided_slice %19 {offsets = [0, 28], sizes = [4, 4], strides = [1, 1]} : vector<4x32xf32> to vector<4x4xf32>
    %cst_341 = arith.constant dense<0.000000e+00> : vector<4xf32>
    %1253 = vector.multi_reduction <add>, %1252, %cst_341 [1] : vector<4x4xf32> to vector<4xf32>
    %1254 = vector.shape_cast %1253 : vector<4xf32> to vector<4x1xf32>
    %cst_342 = arith.constant 4.000000e+00 : f32
    %1255 = vector.broadcast %cst_342 : f32 to vector<4x1xf32>
    %1256 = arith.divf %1254, %1255 : vector<4x1xf32>
    %1257 = vector.broadcast %1256 : vector<4x1xf32> to vector<4x4xf32>
    %1258 = arith.subf %1252, %1257 : vector<4x4xf32>
    %1259 = arith.mulf %1258, %1258 : vector<4x4xf32>
    %cst_343 = arith.constant dense<0.000000e+00> : vector<4xf32>
    %1260 = vector.multi_reduction <add>, %1259, %cst_343 [1] : vector<4x4xf32> to vector<4xf32>
    %1261 = vector.shape_cast %1260 : vector<4xf32> to vector<4x1xf32>
    %cst_344 = arith.constant 4.000000e+00 : f32
    %1262 = vector.broadcast %cst_344 : f32 to vector<4x1xf32>
    %1263 = arith.divf %1261, %1262 : vector<4x1xf32>
    %cst_345 = arith.constant 9.99999974E-6 : f32
    %1264 = vector.broadcast %cst_345 : f32 to vector<4x1xf32>
    %1265 = arith.addf %1263, %1264 : vector<4x1xf32>
    %1266 = math.rsqrt %1265 : vector<4x1xf32>
    %1267 = vector.broadcast %1266 : vector<4x1xf32> to vector<4x4xf32>
    %1268 = arith.mulf %1258, %1267 : vector<4x4xf32>
    %1269 = vector.broadcast %41 : vector<1x4xf32> to vector<4x4xf32>
    %1270 = arith.mulf %1268, %1269 : vector<4x4xf32>
    %1271 = vector.broadcast %42 : vector<1x4xf32> to vector<4x4xf32>
    %1272 = arith.addf %1270, %1271 : vector<4x4xf32>
    %1273 = arith.truncf %1272 : vector<4x4xf32> to vector<4x4xbf16>
    %1274 = vector.shape_cast %1273 : vector<4x4xbf16> to vector<1x4x4xbf16>
    %1275 = vector.extract_strided_slice %21 {offsets = [0, 28], sizes = [4, 4], strides = [1, 1]} : vector<4x32xf32> to vector<4x4xf32>
    %1276 = arith.truncf %1275 : vector<4x4xf32> to vector<4x4xbf16>
    %1277 = vector.shape_cast %1276 : vector<4x4xbf16> to vector<1x4x4xbf16>
    %cst_346 = arith.constant dense<0.000000e+00> : vector<1x8x8xf32>
    %1278 = tpu.matmul %1220, %1222, %cst_346 {dimension_numbers = #tpu.dot_dimension_numbers<[2], [2], [1], [1], [0, 0, 0, 1, 1, 1], [0], [0]>} : vector<1x8x4xbf16>, vector<1x8x4xbf16>, vector<1x8x8xf32> -> vector<1x8x8xf32>
    %1279 = arith.mulf %1278, %26 : vector<1x8x8xf32>
    %cst_347 = arith.constant dense<0.000000e+00> : vector<1x8x6xf32>
    %1280 = tpu.matmul %1220, %1248, %cst_347 {dimension_numbers = #tpu.dot_dimension_numbers<[2], [2], [1], [1], [0, 0, 0, 1, 1, 1], [0], [0]>} : vector<1x8x4xbf16>, vector<1x6x4xbf16>, vector<1x8x6xf32> -> vector<1x8x6xf32>
    %1281 = arith.mulf %1280, %30 : vector<1x8x6xf32>
    %cst_348 = arith.constant dense<0.000000e+00> : vector<1x8x4xf32>
    %1282 = tpu.matmul %1220, %1274, %cst_348 {dimension_numbers = #tpu.dot_dimension_numbers<[2], [2], [1], [1], [0, 0, 0, 1, 1, 1], [0], [0]>} : vector<1x8x4xbf16>, vector<1x4x4xbf16>, vector<1x8x4xf32> -> vector<1x8x4xf32>
    %1283 = arith.mulf %1282, %34 : vector<1x8x4xf32>
    %cst_349 = arith.constant dense<0xFF800000> : vector<1x8xf32>
    %1284 = vector.multi_reduction <maximumf>, %1279, %cst_349 [2] : vector<1x8x8xf32> to vector<1x8xf32>
    %1285 = vector.shape_cast %1284 : vector<1x8xf32> to vector<1x8x1xf32>
    %cst_350 = arith.constant dense<0xFF800000> : vector<1x8xf32>
    %1286 = vector.multi_reduction <maximumf>, %1281, %cst_350 [2] : vector<1x8x6xf32> to vector<1x8xf32>
    %1287 = vector.shape_cast %1286 : vector<1x8xf32> to vector<1x8x1xf32>
    %1288 = arith.maximumf %1285, %1287 : vector<1x8x1xf32>
    %cst_351 = arith.constant dense<0xFF800000> : vector<1x8xf32>
    %1289 = vector.multi_reduction <maximumf>, %1283, %cst_351 [2] : vector<1x8x4xf32> to vector<1x8xf32>
    %1290 = vector.shape_cast %1289 : vector<1x8xf32> to vector<1x8x1xf32>
    %1291 = arith.maximumf %1288, %1290 : vector<1x8x1xf32>
    %1292 = vector.broadcast %1291 : vector<1x8x1xf32> to vector<1x8x8xf32>
    %1293 = arith.subf %1279, %1292 : vector<1x8x8xf32>
    %1294 = math.exp %1293 : vector<1x8x8xf32>
    %1295 = vector.broadcast %1291 : vector<1x8x1xf32> to vector<1x8x6xf32>
    %1296 = arith.subf %1281, %1295 : vector<1x8x6xf32>
    %1297 = math.exp %1296 : vector<1x8x6xf32>
    %1298 = vector.broadcast %1291 : vector<1x8x1xf32> to vector<1x8x4xf32>
    %1299 = arith.subf %1283, %1298 : vector<1x8x4xf32>
    %1300 = math.exp %1299 : vector<1x8x4xf32>
    %cst_352 = arith.constant dense<0.000000e+00> : vector<1x8xf32>
    %1301 = vector.multi_reduction <add>, %1294, %cst_352 [2] : vector<1x8x8xf32> to vector<1x8xf32>
    %1302 = vector.shape_cast %1301 : vector<1x8xf32> to vector<1x8x1xf32>
    %cst_353 = arith.constant dense<0.000000e+00> : vector<1x8xf32>
    %1303 = vector.multi_reduction <add>, %1297, %cst_353 [2] : vector<1x8x6xf32> to vector<1x8xf32>
    %1304 = vector.shape_cast %1303 : vector<1x8xf32> to vector<1x8x1xf32>
    %1305 = arith.addf %1302, %1304 : vector<1x8x1xf32>
    %cst_354 = arith.constant dense<0.000000e+00> : vector<1x8xf32>
    %1306 = vector.multi_reduction <add>, %1300, %cst_354 [2] : vector<1x8x4xf32> to vector<1x8xf32>
    %1307 = vector.shape_cast %1306 : vector<1x8xf32> to vector<1x8x1xf32>
    %1308 = arith.addf %1305, %1307 : vector<1x8x1xf32>
    %1309 = arith.mulf %1294, %26 : vector<1x8x8xf32>
    %1310 = arith.mulf %1297, %30 : vector<1x8x6xf32>
    %1311 = arith.mulf %1300, %34 : vector<1x8x4xf32>
    %cst_355 = arith.constant dense<0.000000e+00> : vector<1x8xf32>
    %1312 = vector.multi_reduction <add>, %1309, %cst_355 [2] : vector<1x8x8xf32> to vector<1x8xf32>
    %1313 = vector.shape_cast %1312 : vector<1x8xf32> to vector<1x8x1xf32>
    %cst_356 = arith.constant dense<0.000000e+00> : vector<1x8xf32>
    %1314 = vector.multi_reduction <add>, %1310, %cst_356 [2] : vector<1x8x6xf32> to vector<1x8xf32>
    %1315 = vector.shape_cast %1314 : vector<1x8xf32> to vector<1x8x1xf32>
    %1316 = arith.addf %1313, %1315 : vector<1x8x1xf32>
    %cst_357 = arith.constant dense<0.000000e+00> : vector<1x8xf32>
    %1317 = vector.multi_reduction <add>, %1311, %cst_357 [2] : vector<1x8x4xf32> to vector<1x8xf32>
    %1318 = vector.shape_cast %1317 : vector<1x8xf32> to vector<1x8x1xf32>
    %1319 = arith.addf %1316, %1318 : vector<1x8x1xf32>
    %cst_358 = arith.constant 9.99999982E-14 : f32
    %1320 = vector.broadcast %cst_358 : f32 to vector<1x8x1xf32>
    %1321 = arith.mulf %1320, %1308 : vector<1x8x1xf32>
    %1322 = arith.addf %1319, %1321 : vector<1x8x1xf32>
    %1323 = tpu.reciprocal %1322 {approx = true} : vector<1x8x1xf32> -> vector<1x8x1xf32>
    %1324 = vector.broadcast %1323 : vector<1x8x1xf32> to vector<1x8x8xf32>
    %1325 = arith.mulf %1309, %1324 : vector<1x8x8xf32>
    %1326 = arith.truncf %1325 : vector<1x8x8xf32> to vector<1x8x8xbf16>
    %cst_359 = arith.constant dense<0.000000e+00> : vector<1x8x4xf32>
    %1327 = tpu.matmul %1326, %1225, %cst_359 {dimension_numbers = #tpu.dot_dimension_numbers<[2], [1], [1], [2], [0, 0, 0, 1, 1, 2], [0], [0]>} : vector<1x8x8xbf16>, vector<1x8x4xbf16>, vector<1x8x4xf32> -> vector<1x8x4xf32>
    %1328 = vector.broadcast %1323 : vector<1x8x1xf32> to vector<1x8x6xf32>
    %1329 = arith.mulf %1310, %1328 : vector<1x8x6xf32>
    %1330 = arith.truncf %1329 : vector<1x8x6xf32> to vector<1x8x6xbf16>
    %cst_360 = arith.constant dense<0.000000e+00> : vector<1x8x4xf32>
    %1331 = tpu.matmul %1330, %1251, %cst_360 {dimension_numbers = #tpu.dot_dimension_numbers<[2], [1], [1], [2], [0, 0, 0, 1, 1, 2], [0], [0]>} : vector<1x8x6xbf16>, vector<1x6x4xbf16>, vector<1x8x4xf32> -> vector<1x8x4xf32>
    %1332 = arith.addf %1327, %1331 : vector<1x8x4xf32>
    %1333 = vector.broadcast %1323 : vector<1x8x1xf32> to vector<1x8x4xf32>
    %1334 = arith.mulf %1311, %1333 : vector<1x8x4xf32>
    %1335 = arith.truncf %1334 : vector<1x8x4xf32> to vector<1x8x4xbf16>
    %cst_361 = arith.constant dense<0.000000e+00> : vector<1x8x4xf32>
    %1336 = tpu.matmul %1335, %1277, %cst_361 {dimension_numbers = #tpu.dot_dimension_numbers<[2], [1], [1], [2], [0, 0, 0, 1, 1, 2], [0], [0]>} : vector<1x8x4xbf16>, vector<1x4x4xbf16>, vector<1x8x4xf32> -> vector<1x8x4xf32>
    %1337 = arith.addf %1332, %1336 : vector<1x8x4xf32>
    %c0_362 = arith.constant 0 : index
    %c0_363 = arith.constant 0 : index
    %c28 = arith.constant 28 : index
    %1338 = vector.load %arg28[%c0_362, %c0_363, %c28] : memref<1x8x32xf32, #tpu.memory_space<vmem>>, vector<1x8x4xf32>
    tpu.vector_store %arg28[%c0_362, %c0_363, %c28], %1337 {strides = array<i32>} : memref<1x8x32xf32, #tpu.memory_space<vmem>>, vector<1x8x4xf32>,
    %c0_364 = arith.constant 0 : index
    %c0_365 = arith.constant 0 : index
    %c0_366 = arith.constant 0 : index
    %1339 = vector.load %arg28[%c0_364, %c0_365, %c0_366] : memref<1x8x32xf32, #tpu.memory_space<vmem>>, vector<1x8x32xf32>
    %1340 = vector.shape_cast %1339 : vector<1x8x32xf32> to vector<8x32xf32>
    %1341 = arith.truncf %1340 : vector<8x32xf32> to vector<8x32xbf16>
    %c0_367 = arith.constant 0 : index
    %c0_368 = arith.constant 0 : index
    %1342 = vector.load %arg25[%c0_367, %c0_368] : memref<32x32xbf16, #tpu.memory_space<vmem>>, vector<32x32xbf16>
    %cst_369 = arith.constant dense<0.000000e+00> : vector<8x32xf32>
    %1343 = tpu.matmul %1341, %1342, %cst_369 {dimension_numbers = #tpu.dot_dimension_numbers<[1], [0], [0], [1], [0, 0, 1, 1], [], []>} : vector<8x32xbf16>, vector<32x32xbf16>, vector<8x32xf32> -> vector<8x32xf32>
    %c0_370 = arith.constant 0 : index
    %c0_371 = arith.constant 0 : index
    %1344 = vector.load %arg26[%c0_370, %c0_371] : memref<1x32xf32, #tpu.memory_space<vmem>>, vector<1x32xf32>
    %1345 = vector.broadcast %1344 : vector<1x32xf32> to vector<8x32xf32>
    %1346 = arith.addf %1343, %1345 : vector<8x32xf32>
    %1347 = vector.shape_cast %1346 : vector<8x32xf32> to vector<1x8x32xf32>
    %c0_372 = arith.constant 0 : index
    %c0_373 = arith.constant 0 : index
    %c0_374 = arith.constant 0 : index
    %1348 = vector.load %arg27[%c0_372, %c0_373, %c0_374] : memref<1x8x32xf32, #tpu.memory_space<vmem>>, vector<1x8x32xf32>
    tpu.vector_store %arg27[%c0_372, %c0_373, %c0_374], %1347 {strides = array<i32>} : memref<1x8x32xf32, #tpu.memory_space<vmem>>, vector<1x8x32xf32>,
    return
  }
  func.func @transform_0(%arg0: i32, %arg1: i32) -> (i32, i32, i32) {
    %c0_i32 = arith.constant 0 : i32
    %c0_i32_0 = arith.constant 0 : i32
    return %arg0, %arg1, %c0_i32 : i32, i32, i32
  }
  func.func @transform_1(%arg0: i32, %arg1: i32) -> (i32, i32, i32) {
    %c0_i32 = arith.constant 0 : i32
    %c0_i32_0 = arith.constant 0 : i32
    %c0_i32_1 = arith.constant 0 : i32
    return %arg0, %c0_i32, %c0_i32_0 : i32, i32, i32
  }
  func.func @transform_2(%arg0: i32, %arg1: i32) -> (i32, i32, i32) {
    %c0_i32 = arith.constant 0 : i32
    %c0_i32_0 = arith.constant 0 : i32
    %c0_i32_1 = arith.constant 0 : i32
    return %arg0, %c0_i32, %c0_i32_0 : i32, i32, i32
  }
  func.func @transform_3(%arg0: i32, %arg1: i32) -> (i32, i32, i32) {
    %c0_i32 = arith.constant 0 : i32
    %c0_i32_0 = arith.constant 0 : i32
    %c0_i32_1 = arith.constant 0 : i32
    return %arg0, %c0_i32, %c0_i32_0 : i32, i32, i32
  }
  func.func @transform_4(%arg0: i32, %arg1: i32) -> (i32, i32, i32) {
    %c0_i32 = arith.constant 0 : i32
    %c0_i32_0 = arith.constant 0 : i32
    return %arg0, %arg1, %c0_i32 : i32, i32, i32
  }
  func.func @transform_5(%arg0: i32, %arg1: i32) -> (i32, i32, i32) {
    %c0_i32 = arith.constant 0 : i32
    %c0_i32_0 = arith.constant 0 : i32
    %c0_i32_1 = arith.constant 0 : i32
    return %arg0, %c0_i32, %c0_i32_0 : i32, i32, i32
  }
  func.func @transform_6(%arg0: i32, %arg1: i32) -> (i32, i32, i32) {
    %c0_i32 = arith.constant 0 : i32
    %c0_i32_0 = arith.constant 0 : i32
    %c0_i32_1 = arith.constant 0 : i32
    return %arg0, %c0_i32, %c0_i32_0 : i32, i32, i32
  }
  func.func @transform_7(%arg0: i32, %arg1: i32) -> (i32, i32, i32) {
    %c0_i32 = arith.constant 0 : i32
    %c0_i32_0 = arith.constant 0 : i32
    %c0_i32_1 = arith.constant 0 : i32
    return %arg0, %c0_i32, %c0_i32_0 : i32, i32, i32
  }
  func.func @transform_8(%arg0: i32, %arg1: i32) -> (i32, i32) {
    %c0_i32 = arith.constant 0 : i32
    %c0_i32_0 = arith.constant 0 : i32
    %c0_i32_1 = arith.constant 0 : i32
    return %c0_i32, %c0_i32_0 : i32, i32
  }
  func.func @transform_9(%arg0: i32, %arg1: i32) -> (i32, i32) {
    %c0_i32 = arith.constant 0 : i32
    %c0_i32_0 = arith.constant 0 : i32
    %c0_i32_1 = arith.constant 0 : i32
    return %c0_i32, %c0_i32_0 : i32, i32
  }
  func.func @transform_10(%arg0: i32, %arg1: i32) -> (i32, i32) {
    %c0_i32 = arith.constant 0 : i32
    %c0_i32_0 = arith.constant 0 : i32
    %c0_i32_1 = arith.constant 0 : i32
    return %c0_i32, %c0_i32_0 : i32, i32
  }
  func.func @transform_11(%arg0: i32, %arg1: i32) -> (i32, i32) {
    %c0_i32 = arith.constant 0 : i32
    %c0_i32_0 = arith.constant 0 : i32
    %c0_i32_1 = arith.constant 0 : i32
    return %c0_i32, %c0_i32_0 : i32, i32
  }
  func.func @transform_12(%arg0: i32, %arg1: i32) -> (i32, i32) {
    %c0_i32 = arith.constant 0 : i32
    %c0_i32_0 = arith.constant 0 : i32
    %c0_i32_1 = arith.constant 0 : i32
    return %c0_i32, %c0_i32_0 : i32, i32
  }
  func.func @transform_13(%arg0: i32, %arg1: i32) -> (i32, i32) {
    %c0_i32 = arith.constant 0 : i32
    %c0_i32_0 = arith.constant 0 : i32
    %c0_i32_1 = arith.constant 0 : i32
    return %c0_i32, %c0_i32_0 : i32, i32
  }
  func.func @transform_14(%arg0: i32, %arg1: i32) -> (i32, i32) {
    %c0_i32 = arith.constant 0 : i32
    %c0_i32_0 = arith.constant 0 : i32
    %c0_i32_1 = arith.constant 0 : i32
    return %c0_i32, %c0_i32_0 : i32, i32
  }
  func.func @transform_15(%arg0: i32, %arg1: i32) -> (i32, i32) {
    %c0_i32 = arith.constant 0 : i32
    %c0_i32_0 = arith.constant 0 : i32
    %c0_i32_1 = arith.constant 0 : i32
    return %c0_i32, %c0_i32_0 : i32, i32
  }
  func.func @transform_16(%arg0: i32, %arg1: i32) -> (i32, i32) {
    %c0_i32 = arith.constant 0 : i32
    %c0_i32_0 = arith.constant 0 : i32
    %c0_i32_1 = arith.constant 0 : i32
    return %c0_i32, %c0_i32_0 : i32, i32
  }
  func.func @transform_17(%arg0: i32, %arg1: i32) -> (i32, i32) {
    %c0_i32 = arith.constant 0 : i32
    %c0_i32_0 = arith.constant 0 : i32
    %c0_i32_1 = arith.constant 0 : i32
    return %c0_i32, %c0_i32_0 : i32, i32
  }
  func.func @transform_18(%arg0: i32, %arg1: i32) -> (i32, i32) {
    %c0_i32 = arith.constant 0 : i32
    %c0_i32_0 = arith.constant 0 : i32
    %c0_i32_1 = arith.constant 0 : i32
    return %c0_i32, %c0_i32_0 : i32, i32
  }
  func.func @transform_19(%arg0: i32, %arg1: i32) -> (i32, i32) {
    %c0_i32 = arith.constant 0 : i32
    %c0_i32_0 = arith.constant 0 : i32
    %c0_i32_1 = arith.constant 0 : i32
    return %c0_i32, %c0_i32_0 : i32, i32
  }
  func.func @transform_20(%arg0: i32, %arg1: i32) -> (i32, i32) {
    %c0_i32 = arith.constant 0 : i32
    %c0_i32_0 = arith.constant 0 : i32
    %c0_i32_1 = arith.constant 0 : i32
    return %c0_i32, %c0_i32_0 : i32, i32
  }
  func.func @transform_21(%arg0: i32, %arg1: i32) -> (i32, i32) {
    %c0_i32 = arith.constant 0 : i32
    %c0_i32_0 = arith.constant 0 : i32
    %c0_i32_1 = arith.constant 0 : i32
    return %c0_i32, %c0_i32_0 : i32, i32
  }
  func.func @transform_22(%arg0: i32, %arg1: i32) -> (i32, i32) {
    %c0_i32 = arith.constant 0 : i32
    %c0_i32_0 = arith.constant 0 : i32
    %c0_i32_1 = arith.constant 0 : i32
    return %c0_i32, %c0_i32_0 : i32, i32
  }
  func.func @transform_23(%arg0: i32, %arg1: i32) -> (i32, i32) {
    %c0_i32 = arith.constant 0 : i32
    %c0_i32_0 = arith.constant 0 : i32
    %c0_i32_1 = arith.constant 0 : i32
    return %c0_i32, %c0_i32_0 : i32, i32
  }
  func.func @transform_24(%arg0: i32, %arg1: i32) -> (i32, i32) {
    %c0_i32 = arith.constant 0 : i32
    %c0_i32_0 = arith.constant 0 : i32
    %c0_i32_1 = arith.constant 0 : i32
    return %c0_i32, %c0_i32_0 : i32, i32
  }
  func.func @transform_25(%arg0: i32, %arg1: i32) -> (i32, i32, i32) {
    %c0_i32 = arith.constant 0 : i32
    %c0_i32_0 = arith.constant 0 : i32
    return %arg0, %arg1, %c0_i32 : i32, i32, i32
  }
}

</mosaic_0001>

<bundles_post_ra>
// kernel: tpu_custom_call.1
= control target key start
LH: loop header
LB: loop body
LE: loop exit
PB: predicated region body
PF: predicated region fallthrough
CT: control target
= control target key end

     0   :  { %s7457_s0 = inlined_call_operand.hbm [shape: bf16[2,8,32], index: 0, kind: input, shape index: {}]   ;;  %s7458_s1 = inlined_call_operand.hbm [shape: bf16[2,8,32], index: 1, kind: input, shape index: {}]   ;;  %s7459_s2 = inlined_call_operand.vmem [shape: bf16[2,6,32], index: 2, kind: input, shape index: {}]   ;;  %s7460_s3 = inlined_call_operand.hbm [shape: bf16[2,4,32], index: 3, kind: input, shape index: {}]   ;;  %s7461_s4 = inlined_call_operand.vmem [shape: f32[2,8,1], index: 4, kind: input, shape index: {}]   ;;  %s7462_s5 = inlined_call_operand.vmem [shape: f32[2,1,8], index: 5, kind: input, shape index: {}]   ;;  %s7463_s6 = inlined_call_operand.hbm [shape: f32[2,1,6], index: 6, kind: input, shape index: {}]   ;;  %s7464_s7 = inlined_call_operand.hbm [shape: f32[2,1,4], index: 7, kind: input, shape index: {}]   ;;  %s7465_s8 = inlined_call_operand.vmem [shape: bf16[32,32], index: 8, kind: input, shape index: {}]   ;;  %s7466_s9 = inlined_call_operand.vmem [shape: bf16[32,32], index: 9, kind: input, shape index: {}]   ;;  %s7467_s10 = inlined_call_operand.hbm [shape: bf16[32,32], index: 10, kind: input, shape index: {}]   ;;  %s7468_s11 = inlined_call_operand.hbm [shape: bf16[32,32], index: 11, kind: input, shape index: {}]   ;;  %s7469_s12 = inlined_call_operand.hbm [shape: bf16[32,32], index: 12, kind: input, shape index: {}]   ;;  %s7470_s13 = inlined_call_operand.hbm [shape: bf16[32,32], index: 13, kind: input, shape index: {}]   ;;  %s7471_s14 = inlined_call_operand.hbm [shape: bf16[32,32], index: 14, kind: input, shape index: {}]   ;;  %s7472_s15 = inlined_call_operand.hbm [shape: f32[1,4], index: 15, kind: input, shape index: {}]   ;;  %s7473_s16 = inlined_call_operand.hbm [shape: f32[1,4], index: 16, kind: input, shape index: {}]   ;;  %s7474_s17 = inlined_call_operand.hbm [shape: f32[1,4], index: 17, kind: input, shape index: {}]   ;;  %s7475_s18 = inlined_call_operand.hbm [shape: f32[1,4], index: 18, kind: input, shape index: {}]   ;;  %s7476_s19 = inlined_call_operand.hbm [shape: f32[1,4], index: 19, kind: input, shape index: {}]   ;;  %s7477_s20 = inlined_call_operand.hbm [shape: f32[1,4], index: 20, kind: input, shape index: {}]   ;;  %s7478_s21 = inlined_call_operand.hbm [shape: f32[1,4], index: 21, kind: input, shape index: {}]   ;;  %s7479_s22 = inlined_call_operand.vmem [shape: f32[1,4], index: 22, kind: input, shape index: {}]   ;;  %s7480_s23 = inlined_call_operand.vmem [shape: bf16[32,32], index: 23, kind: input, shape index: {}]   ;;  %s7481_s24 = inlined_call_operand.vmem [shape: f32[1,32], index: 24, kind: input, shape index: {}]   ;;  %s7482_s25 = inlined_call_operand.hbm [shape: f32[2,8,32], index: 25, kind: output, shape index: {}]  }
   0x1   :  { %7502 = sst [smem:[#allocation48_spill]] %s7457_s0 }
   0x2   :  { %7503 = sst [smem:[#allocation49_spill]] %s7458_s1 }
   0x3   :  { %7504 = sst [smem:[#allocation50_spill]] %s7459_s2 }
   0x4   :  { %7505 = sst [smem:[#allocation51_spill]] %s7460_s3 }
   0x5   :  { %7506 = sst [smem:[#allocation52_spill]] %s7461_s4 }
   0x6   :  { %7507 = sst [smem:[#allocation53_spill]] %s7462_s5 }
   0x7   :  { %7508 = sst [smem:[#allocation54_spill]] %s7463_s6 }
   0x8   :  { %7509 = sst [smem:[#allocation55_spill]] %s7464_s7 }
   0x9   :  { %7510 = sst [smem:[#allocation56_spill]] %s7465_s8 }
   0xa   :  { %7511 = sst [smem:[#allocation57_spill]] %s7466_s9 }
   0xb   :  { %7512 = sst [smem:[#allocation58_spill]] %s7467_s10 }
   0xc   :  { %7513 = sst [smem:[#allocation59_spill]] %s7468_s11 }
   0xd   :  { %7514 = sst [smem:[#allocation60_spill]] %s7469_s12 }
   0xe   :  { %7515 = sst [smem:[#allocation61_spill]] %s7470_s13 }
   0xf   :  { %7516 = sst [smem:[#allocation62_spill]] %s7471_s14 }
  0x10   :  { %7517 = sst [smem:[#allocation63_spill]] %s7472_s15 }
  0x11   :  { %7518 = sst [smem:[#allocation64_spill]] %s7473_s16 }
  0x12   :  { %7519 = sst [smem:[#allocation65_spill]] %s7474_s17 }
  0x13   :  { %7520 = sst [smem:[#allocation66_spill]] %s7475_s18 }
  0x14   :  { %7521 = sst [smem:[#allocation67_spill]] %s7477_s20 }
  0x15   :  { %7522 = sst [smem:[#allocation68_spill]] %s7479_s22 }
  0x16   :  { %7523 = sst [smem:[#allocation69_spill]] %s7480_s23 }
  0x17   :  { %7524 = sst [smem:[#allocation70_spill]] %s7481_s24 }
  0x18   :  { %7525 = sst [smem:[#allocation71_spill]] %s7482_s25 }
  0x19   :  { %30 = vsyncpa [#allocation4], 0 }
  0x1a   :  { %32 = vsyncpa [#allocation4 + $0x1], 0 }
  0x1b   :  { %33 = vsyncpa [#allocation7], 0 }
  0x1c   :  { %35 = vsyncpa [#allocation7 + $0x1], 0 }
  0x1d   :  { %36 = vsyncpa [#allocation10], 0 }
  0x1e   :  { %38 = vsyncpa [#allocation10 + $0x1], 0 }
  0x1f   :  { %39 = vsyncpa [#allocation13], 0 }
  0x20   :  { %40 = vsyncpa [#allocation16], 0 }
  0x21   :  { %41 = vsyncpa [#allocation19], 0 }
  0x22   :  { %42 = vsyncpa [#allocation22], 0 }
  0x23   :  { %43 = vsyncpa [#allocation25], 0 }
  0x24   :  { %44 = vsyncpa [#allocation28], 0 }
  0x25   :  { %45 = vsyncpa [#allocation5], 0 }
  0x26   :  { %47 = vsyncpa [#allocation5 + $0x1], 0  ;;  %s5919_s29 = smov 0   ;;  %s5921_s2 = smov 0  }
  0x27   :  { %s5923_s6 = smov 0   ;;  %s5925_s30 = smov 0  }
  0x28   :  { %s5927_s7 = smov 0   ;;  %s5929_s3 = smov 0  }
  0x29 LB: > { %7526 = sst [smem:[#allocation41_spill]] %s5745_s6  ;;  %s5950_s26 = sadd.s32 4294967295, %s5757_s3   ;;  %s5757_s3 = sphi %s5929_s3, %s53_s3   ;;  %s5753_s7 = sphi %s5927_s7, %s7578_s7   ;;  %s5749_s30 = sphi %s5925_s30, %s7577_s30   ;;  %s5745_s6 = sphi %s5923_s6, %s7573_s6   ;;  %s5741_s2 = sphi %s5921_s2, %s7576_s2   ;;  %s5737_s29 = sphi %s5919_s29, %s7575_s29  }
  0x2a   : > { %7527 = sst [smem:[#allocation42_spill]] %s5749_s30  ;;  %p4572_p0 = scmp.ge.s32.totalorder %s5757_s3, 1 }
  0x2b   : > { %7528 = sst [smem:[#allocation43_spill]] %s5757_s3  ;;  %p88_p1 = scmp.eq.s32.totalorder %s5950_s26, 0 }
  0x2c   : > { %p667_p2 = scmp.lt.s32.totalorder %s5757_s3, 3  ;;  %s7529_s10 = sld [smem:[#allocation58_spill]] }
  0x2d   : > { %s5759_s28 = smov [#allocation12]   ;;  %p4585_p6 = scmp.ge.s32.totalorder %s5757_s3, 2 }
  0x2e   : > { %p5958_p3 = pnand %p4572_p0, %p667_p2  ;;  %s686_s9 = sshll.u32 %s5759_s28, 4  ;;  %s687_s9 = int_to_ptr.vmem [resolvable:$true] %s686_s9 }
  0x2f   : > { %s7533_s12 = sld [smem:[#allocation60_spill]]  ;;  %s7493_s24 = smov 4  }
  0x30   : > { %s7530_s4 = scalar_select %p5958_p3, 1, 0 }
  0x31   : > { %p4811_p4 = pneg %p5958_p3  ;;  %s5762_s28 = smov [#allocation15]  }
  0x32   : > { %s684_s27 = sshll.u32 %s7529_s10, 4  ;;  %7531 = sst [smem:[#allocation44_spill]] %s7530_s4  ;;  %s685_s27 = int_to_ptr.hbm [resolvable:$true] %s684_s27 }
  0x33   : > { %p5966_p5 = pnand %p4811_p4, %p88_p1  ;;  %s7491_s10 = smov 64  }
  0x34   : > { %s714_s25 = sshll.u32 %s5762_s28, 4  ;;  %s7534_s14 = sld [smem:[#allocation62_spill]]  ;;  %s715_s25 = int_to_ptr.vmem [resolvable:$true] %s714_s25 }
  0x35   : > { %s712_s8 = sshll.u32 %s7533_s12, 4  ;;  %s7535_s16 = sld [smem:[#allocation64_spill]]  ;;  %s713_s8 = int_to_ptr.hbm [resolvable:$true] %s712_s8 }
  0x36   : > { %4814 = dma.hbm_to_vmem [thread:$0]  (!%p5966_p5), %s685_s27, 256, %s687_s9, [#allocation13], %s7491_s10, %s7491_s10, %s7493_s24  }
  0x37   : > { %4820 = dma.hbm_to_vmem [thread:$0]  (!%p5966_p5), %s713_s8, 256, %s715_s25, [#allocation16], %s7491_s10, %s7491_s10, %s7493_s24  }
  0x38   : > { %s5763_s4 = smov [#allocation18]   ;;  %s5764_s22 = smov [#allocation21]  }
  0x39   : > { %s742_s27 = sshll.u32 %s5763_s4, 4  ;;  %s769_s23 = sshll.u32 %s5764_s22, 4  ;;  %s743_s27 = int_to_ptr.vmem [resolvable:$true] %s742_s27  ;;  %s770_s23 = int_to_ptr.vmem [resolvable:$true] %s769_s23 }
  0x3a   : > { %s740_s30 = sshll.u32 %s7534_s14, 4  ;;  %s7536_s18 = sld [smem:[#allocation66_spill]]  ;;  %s741_s30 = int_to_ptr.hbm [resolvable:$true] %s740_s30 }
  0x3b   : > { %s767_s12 = sshll.u32 %s7535_s16, 4  ;;  %s7537_s20 = sld [smem:[#allocation67_spill]]  ;;  %s768_s12 = int_to_ptr.hbm [resolvable:$true] %s767_s12 }
  0x3c   : > { %4826 = dma.hbm_to_vmem [thread:$0]  (!%p5966_p5), %s741_s30, 256, %s743_s27, [#allocation19], %s7491_s10, %s7491_s10, %s7493_s24  }
  0x3d   : > { %4832 = dma.hbm_to_vmem [thread:$0]  (!%p5966_p5), %s768_s12, 16, %s770_s23, [#allocation22]  }
  0x3e   : > { %s5765_s0 = smov [#allocation24]   ;;  %s5766_s27 = smov [#allocation27]  }
  0x3f   : > { %s793_s1 = sshll.u32 %s5765_s0, 4  ;;  %s817_s22 = sshll.u32 %s5766_s27, 4  ;;  %s794_s1 = int_to_ptr.vmem [resolvable:$true] %s793_s1  ;;  %s818_s22 = int_to_ptr.vmem [resolvable:$true] %s817_s22 }
  0x40   : > { %s791_s8 = sshll.u32 %s7536_s18, 4  ;;  %s4571_s12 = sadd.s32 4294967294, %s5757_s3   ;;  %s792_s8 = int_to_ptr.hbm [resolvable:$true] %s791_s8 }
  0x41   : > { %s815_s30 = sshll.u32 %s7537_s20, 4  ;;  %s65_s23 = sadd.s32 1, %s5753_s7  ;;  %s816_s30 = int_to_ptr.hbm [resolvable:$true] %s815_s30 }
  0x42   : > { %4838 = dma.hbm_to_vmem [thread:$0]  (!%p5966_p5), %s792_s8, 16, %s794_s1, [#allocation25]  }
  0x43   : > { %4844 = dma.hbm_to_vmem [thread:$0]  (!%p5966_p5), %s816_s30, 16, %s818_s22, [#allocation28]  }
  0x44   : > { %p67_p7 = scmp.ge.s32.totalorder %s65_s23, 2  ;;  %s74_s9 = sadd.s32 1, %s5745_s6 }
  0x45   : > { %p81_p8 = scmp.ne.s32.totalorder %s5745_s6, %s5741_s2  ;;  %p82_p9 = scmp.eq.s32.totalorder %s5757_s3, 0 }
  0x46   : > { %s7580_s23 = smov (%p67_p7, %s65_s23), 0  ;;  %p87_p11 = scmp.ne.s32.totalorder %s5741_s2, %s5737_s29 }
  0x47   : > { %7538 = sst [smem:[#allocation45_spill]] %s7580_s23  ;;  %p6015_p10 = por %p82_p9, %p81_p8 }
  0x48   : > { %s69_s8 = ssub.s32 %s5753_s7, %s7580_s23  ;;  %p654_p12 = scmp.eq.s32.totalorder %s5950_s26, 1 }
  0x49   : > { %p72_p13 = scmp.eq.s32.totalorder %s69_s8, 0  ;;  %p6026_p0 = por %p88_p1, %p87_p11 }
  0x4a   : > { %p6030_p2 = por %p654_p12, %p81_p8  ;;  %p660_p4 = scmp.eq.s32.totalorder %s4571_s12, 1 }
  0x4b   : > { %s6035_s30 = scalar_select %p72_p13, %s5745_s6, %s74_s9  }
  0x4c   : > { %p6037_p7 = por %p660_p4, %p87_p11  ;;  %p4880_p9 = scmp.lt.s32.totalorder %s5757_s3, 2 }
  0x4d   : > { %7542 = sst [smem:[#allocation46_spill]] %s6035_s30  ;;  %s6043_s1 = sand.u32 1, %s5745_s6  }
  0x4e   : > { %s7543_s0 = scalar_select %p6037_p7, 1, 0 }
  0x4f   : > { %s7501_s27 = sshll.u32 %s5753_s7, 2  ;;  %s7500_s22 = sshll.u32 %s6043_s1, 2 }
  0x50   : > { %7544 = sst [smem:[#allocation47_spill]] %s7543_s0  ;;  %p6049_p8 = pnand %p4880_p9, %p6015_p10 }
  0x51   : > { %s869_s12 = sand.u32 1, %s5757_s3   ;;  %s7546_s24 = sld [smem:[#allocation49_spill]] }
  0x52   : > { %s873_s16 = scalar_lea.vmem [#allocation6], %s7500_s22  ;;  %s6061_s23 = scalar_lea.sflag [#allocation7], %s869_s12 }
  0x53   : > { %s881_s18 = sshll.u32 %s873_s16, 4  ;;  %s7547_s6 = sld [smem:[#allocation54_spill]]  ;;  %s882_s18 = int_to_ptr.vmem [resolvable:$true] %s881_s18 }
  0x54   : > { %s933_s10 = scalar_lea.vmem [#allocation9], %s6043_s1  ;;  %s6071_s16 = scalar_lea.sflag [#allocation10], %s869_s12 }
  0x55   : > { %s940_s9 = sshll.u32 %s933_s10, 4  ;;  %s7548_s11 = sld [smem:[#allocation59_spill]]  ;;  %s941_s9 = int_to_ptr.vmem [resolvable:$true] %s940_s9 }
  0x56   : > { %s7549_s13 = sld [smem:[#allocation61_spill]]  ;;  %s7550_s25 = smov 4  }
  0x57   : > { %s877_s14 = scalar_lea.hbm %s7546_s24, %s7501_s27  ;;  %s7551_s12 = smov 64  }
  0x58   : > { %s879_s20 = sshll.u32 %s877_s14, 4  ;;  %s7552_s15 = sld [smem:[#allocation63_spill]]  ;;  %s880_s20 = int_to_ptr.hbm [resolvable:$true] %s879_s20 }
  0x59   : > { %4854 = dma.hbm_to_vmem [thread:$0]  (!%p6049_p8), %s880_s20, 64, %s882_s18, %s6061_s23  }
  0x5a   : > { %s936_s3 = scalar_lea.hbm %s7547_s6, %s5753_s7  ;;  %s5767_s18 = smov [#allocation14]  }
  0x5b   : > { %s938_s0 = sshll.u32 %s936_s3, 4  ;;  %s698_s22 = sshll.u32 %s7548_s11, 4  ;;  %s939_s0 = int_to_ptr.hbm [resolvable:$true] %s938_s0  ;;  %s699_s22 = int_to_ptr.hbm [resolvable:$true] %s698_s22 }
  0x5c   : > { %4860 = dma.hbm_to_vmem [thread:$0]  (!%p6049_p8), %s939_s0, 16, %s941_s9, %s6071_s16  }
  0x5d   : > { %s700_s20 = sshll.u32 %s5767_s18, 4  ;;  %s726_s30 = sshll.u32 %s7549_s13, 4  ;;  %s701_s20 = int_to_ptr.vmem [resolvable:$true] %s700_s20  ;;  %s727_s30 = int_to_ptr.hbm [resolvable:$true] %s726_s30 }
  0x5e   : > { %4817 = dma.hbm_to_vmem [thread:$0]  (!%p5966_p5), %s699_s22, 256, %s701_s20, [#allocation13], %s7551_s12, %s7551_s12, %s7550_s25  }
  0x5f   : > { %s5768_s0 = smov [#allocation17]   ;;  %s755_s24 = sshll.u32 %s7552_s15, 4  ;;  %s756_s24 = int_to_ptr.hbm [resolvable:$true] %s755_s24 }
  0x60   : > { %s728_s10 = sshll.u32 %s5768_s0, 4  ;;  %s7553_s17 = sld [smem:[#allocation65_spill]]  ;;  %s729_s10 = int_to_ptr.vmem [resolvable:$true] %s728_s10 }
  0x61   : > { %4823 = dma.hbm_to_vmem [thread:$0]  (!%p5966_p5), %s727_s30, 256, %s729_s10, [#allocation16], %s7551_s12, %s7551_s12, %s7550_s25  }
  0x62   : > { %s5769_s22 = smov [#allocation20]   ;;  %s5770_s0 = smov [#allocation23]  }
  0x63   : > { %s757_s20 = sshll.u32 %s5769_s22, 4  ;;  %s781_s9 = sshll.u32 %s5770_s0, 4  ;;  %s758_s20 = int_to_ptr.vmem [resolvable:$true] %s757_s20  ;;  %s782_s9 = int_to_ptr.vmem [resolvable:$true] %s781_s9 }
  0x64   : > { %4829 = dma.hbm_to_vmem [thread:$0]  (!%p5966_p5), %s756_s24, 16, %s758_s20, [#allocation19]  }
  0x65   : > { %s803_s30 = sshll.u32 %s7476_s19, 4  ;;  %s827_s10 = sshll.u32 %s7478_s21, 4  ;;  %s804_s30 = int_to_ptr.hbm [resolvable:$true] %s803_s30  ;;  %s828_s10 = int_to_ptr.hbm [resolvable:$true] %s827_s10 }
  0x66   : > { %s779_s3 = sshll.u32 %s7553_s17, 4  ;;  %s5771_s18 = smov [#allocation26]   ;;  %s780_s3 = int_to_ptr.hbm [resolvable:$true] %s779_s3 }
  0x67   : > { %4835 = dma.hbm_to_vmem [thread:$0]  (!%p5966_p5), %s780_s3, 16, %s782_s9, [#allocation22]  }
  0x68   : > { %s805_s24 = sshll.u32 %s5771_s18, 4  ;;  %s5772_s27 = smov [#allocation29]   ;;  %s806_s24 = int_to_ptr.vmem [resolvable:$true] %s805_s24 }
  0x69   : > { %4841 = dma.hbm_to_vmem [thread:$0]  (!%p5966_p5), %s804_s30, 16, %s806_s24, [#allocation25]  }
  0x6a   : > { %s829_s6 = sshll.u32 %s5772_s27, 4  ;;  %s7554_s3 = sshll.u32 %s5753_s7, 2  ;;  %s830_s6 = int_to_ptr.vmem [resolvable:$true] %s829_s6 }
  0x6b   : > { %4847 = dma.hbm_to_vmem [thread:$0]  (!%p5966_p5), %s828_s10, 16, %s830_s6, [#allocation28]  }
  0x6c   : > { %s7555_s0 = sld [smem:[#allocation48_spill]]  ;;  %s7556_s14 = sshll.u32 %s6043_s1, 2 }
  0x6d   : > { %s853_s25 = scalar_lea.vmem [#allocation3], %s7556_s14  ;;  %s4590_s30 = sshll.u32 %s6043_s1, 1 }
  0x6e   : > { %s862_s12 = sshll.u32 %s853_s25, 4  ;;  %s850_s24 = scalar_lea.sflag [#allocation4], %s6043_s1  ;;  %s863_s12 = int_to_ptr.vmem [resolvable:$true] %s862_s12 }
  0x6f   : > { %s4591_s5 = sshll.u32 %s5753_s7, 1  ;;  %s7557_s6 = sld [smem:[#allocation51_spill]] }
  0x70   : > { %s899_s22 = scalar_lea.vmem [#allocation8], %s4590_s30  ;;  %s7558_s25 = sld [smem:[#allocation55_spill]] }
  0x71   : > { %s907_s20 = sshll.u32 %s899_s22, 4  ;;  %s950_s13 = scalar_lea.vmem [#allocation11], %s6043_s1  ;;  %s908_s20 = int_to_ptr.vmem [resolvable:$true] %s907_s20 }
  0x72   : > { %s858_s9 = scalar_lea.hbm %s7555_s0, %s7554_s3  ;;  %s957_s15 = sshll.u32 %s950_s13, 4  ;;  %s958_s15 = int_to_ptr.vmem [resolvable:$true] %s957_s15 }
  0x73   : > { %s860_s18 = sshll.u32 %s858_s9, 4  ;;  %s861_s18 = int_to_ptr.hbm [resolvable:$true] %s860_s18 }
  0x74   : > { %4851 = dma.hbm_to_vmem [thread:$0]  (!%p6049_p8), %s861_s18, 64, %s863_s12, %s850_s24  }
  0x75   : > { %s903_s3 = scalar_lea.hbm %s7557_s6, %s4591_s5  ;;  %966 = sbr.rel (%p5958_p3) target bundleno = 6183 (0x1827), region = 120 }
  0x76   : > { %s905_s0 = sshll.u32 %s903_s3, 4  ;;  %s953_s11 = scalar_lea.hbm %s7558_s25, %s5753_s7  ;;  %s906_s0 = int_to_ptr.hbm [resolvable:$true] %s905_s0 }
  0x77   : > { %4857 = dma.hbm_to_vmem [thread:$0]  (!%p6049_p8), %s906_s0, 32, %s908_s20, %s6061_s23  }
  0x78   : > { %s955_s17 = sshll.u32 %s953_s11, 4  ;;  %s6141_s18 = sand.u32 (!%p5958_p3), 1, %s5741_s2   ;;  %s956_s17 = int_to_ptr.hbm [resolvable:$true] %s955_s17 }
  0x79   : > { %4863 = dma.hbm_to_vmem [thread:$0]  (!%p6049_p8), %s956_s17, 16, %s958_s15, %s6071_s16  }
  0x7a   : > { %s4593_s23 = sshll.u32 %s6141_s18, 2  ;;  %s969_s30 = scalar_lea.sflag [#allocation4], %s6141_s18 }
  0x7b   : > { %s6145_s24 = scalar_lea.vmem [#allocation3], %s4593_s23 }
  0x7c   : > { %5696 = dma.done.wait (%p6026_p0), %s969_s30, 64  }
  0x7d   : > { %5698 = vsyncadd (%p6026_p0), %s969_s30, 4294967232  ;;  %s978_s11 = sand.u32 1, %s5950_s26   ;;  %s6152_s15 = scalar_lea.vmem [#allocation6], %s4593_s23 }
  0x7e   : > { %s979_s13 = scalar_lea.sflag [#allocation7], %s978_s11 }
  0x7f   : > { %5700 = dma.done.wait (%p6026_p0), %s979_s13, 96  }
  0x80   : > { %5702 = vsyncadd (%p6026_p0), %s979_s13, 4294967200  ;;  %s4595_s17 = sshll.u32 %s6141_s18, 1  ;;  %s999_s8 = scalar_lea.sflag [#allocation10], %s978_s11 }
  0x81   : > { %s6159_s1 = scalar_lea.vmem [#allocation8], %s4595_s17  ;;  %s1001_s16 = scalar_lea.vmem [#allocation9], %s6141_s18 }
  0x82   : > { %5704 = dma.done.wait (%p6026_p0), %s999_s8, 32  }
  0x83   : > { %5706 = vsyncadd (%p6026_p0), %s999_s8, 4294967264  ;;  %s1010_s5 = scalar_lea.vmem [#allocation11], %s6141_s18 }
  0x84   : > { %5708 = dma.done.wait (%p88_p1), [#allocation13], 512  }
  0x85   : > { %5710 = vsyncadd (%p88_p1), [#allocation13], 4294966784 }
  0x86   : > { %5712 = dma.done.wait (%p88_p1), [#allocation16], 512  }
  0x87   : > { %5714 = vsyncadd (%p88_p1), [#allocation16], 4294966784 }
  0x88   : > { %5716 = dma.done.wait (%p88_p1), [#allocation19], 272  }
  0x89   : > { %5718 = vsyncadd (%p88_p1), [#allocation19], 4294967024 }
  0x8a   : > { %5720 = dma.done.wait (%p88_p1), [#allocation22], 32  }
  0x8b   : > { %5722 = vsyncadd (%p88_p1), [#allocation22], 4294967264 }
  0x8c   : > { %5724 = dma.done.wait (%p88_p1), [#allocation25], 32  }
  0x8d   : > { %5726 = vsyncadd (%p88_p1), [#allocation25], 4294967264 }
  0x8e   : > { %5728 = dma.done.wait (%p88_p1), [#allocation28], 32  }
  0x8f   : > { %5730 = vsyncadd (%p88_p1), [#allocation28], 4294967264  ;;  %s7560_s4 = sld [smem:[#allocation42_spill]]  ;;  %v4742_v2 = vld [vmem:[#allocation14 + $0x8] sm:$0xff]  ;;  %v4741_v5 = vld [vmem:[#allocation14] sm:$0xff]  ;;  %vm1203_vm0 = vcmask 261120  }
  0x90   : > { %s7561_s22 = sld [smem:[#allocation56_spill]]  ;;  %1307 = vmatpush.bf16.msra.mxu3 %v4742_v2  ;;  %v4746_v6 = vld [vmem:[#allocation15 + $0x8] sm:$0xff]  ;;  %v6213_v8 = vld [vmem:[%s6152_s15] sm:$0xf]  ;;  %v4745_v10 = vld [vmem:[#allocation15] sm:$0xff]  ;;  %vm1434_vm1 = vcmask 31744  }
  0x91   : > { %s7562_s9 = sld [smem:[#allocation57_spill]]  ;;  %v1185_v7 = vld [vmem:[%s6145_s24] sm:$0xf]  ;;  %v6223_v11 = vld [vmem:[%s6159_s1] sm:$0x3]  ;;  %vm1505_vm2 = vcmask 29696  }
  0x92   : > { %s7563_s11 = sld [smem:[#allocation50_spill]]  ;;  %vm1538_vm3 = vcmask 27648   ;;  %v5773_v24 = vmov 4.0   ;;  %s5774_s24 = smov 124   ;;  %v4744_v51 = vld [vmem:[#allocation17 + $0x8] sm:$0xff]  ;;  %v4743_v52 = vld [vmem:[#allocation17] sm:$0xff] }
  0x93   : > { %4986 = vrcp.f32 %v5773_v24  ;;  %v5775_v63 = vmov 0   ;;  %s7564_s1 = sld [smem:[#allocation53_spill]]  ;;  %s5776_s12 = smov 4  }
  0x94   : > { %1308 = vmatpush.bf16.msra.mxu3 %v4741_v5  ;;  %4972 = vset.pattern.permute.xlu2 %v5775_v63  ;;  %s7565_s20 = sld [smem:[#allocation52_spill]]  ;;  %s5777_s23 = smov 120  }
  0x95   : > { %p1170_p3 = scmp.lt.s32.totalorder %s7560_s4, 1  ;;  %4973 = vset.pattern.permute.xlu0 %v5775_v63  ;;  %v6317_v63 = vld [vmem:[#allocation27] ss:$0 sm:$0xff]  ;;  %s7566_s25 = sld [smem:[#allocation68_spill]] }
  0x96   : > { %v4736_v0 = vld [vmem:[%s7561_s22 + $0x8] sm:$0xff]  ;;  %v4735_v3 = vld [vmem:[%s7561_s22] sm:$0xff]  ;;  %s5782_s17 = smov 16   ;;  %s5785_s6 = smov 104  }
  0x97   : > { %s6193_s10 = scalar_select %p1170_p3, %s7560_s4, 1  ;;  %v4738_v1 = vld [vmem:[%s7562_s9 + $0x8] sm:$0xff]  ;;  %1213 = vmatpush.bf16.msra.mxu0 %v4736_v0  ;;  %v4737_v4 = vld [vmem:[%s7562_s9] sm:$0xff] }
  0x98   : > { %1245 = vmatpush.bf16.msra.mxu1 %v4738_v1  ;;  %s5786_s3 = smov 24   ;;  %s5787_s26 = smov 100  }
  0x99   : > { %s4609_s27 = sshll.u32 %s6193_s10, 2  ;;  %v4987_v25 = vpop.eup %4986  ;;  %s1183_s8 = scalar_lea.vmem %s7564_s1, %s6193_s10 }
  0x9a   : > { %s1173_s13 = scalar_lea.vmem %s7563_s11, %s4609_s27  ;;  %v1439_v26 = vmul.f32 4.0, %v4987_v25  ;;  %vm1443_vm4 = vweird.f32 %v4987_v25  ;;  %s4610_s27 = sshll.u32 %s6193_s10, 3 }
  0x9b   : > { %v6215_v9 = vld [vmem:[%s1173_s13] sm:$0x7]  ;;  %1214 = vmatpush.bf16.msra.mxu0 %v4735_v3  ;;  %s1180_s0 = scalar_lea.vmem %s7565_s20, %s4610_s27  ;;  %s5779_s10 = smov 116  }
  0x9c   : > { %1246 = vmatpush.bf16.msra.mxu1 %v4737_v4  ;;  %4646 = vmatmul.msk.bf16.vlgmr.msra.gmra.mxu3 %vm1203_vm0, %v6215_v9  ;;  %v1440_v27 = vsub.f32 1.0, %v1439_v26  ;;  %v6293_v26 = vld [vmem:[#allocation23] ss:$0 sm:$0xff]  ;;  %s5780_s11 = smov 12   ;;  %s5784_s27 = smov 20  }
  0x9d   : > { %s5788_s14 = smov 28  }
  0x9e   : > { %4619 = vmatmul.msk.bf16.vlgmr.msra.gmra.mxu0 %vm1203_vm0, %v1185_v7  ;;  %v1441_v28 = vmul.f32 %v4987_v25, %v1440_v27 }
  0x9f   : > { %4628 = vmatmul.msk.bf16.vlgmr.msra.gmra.mxu1 %vm1203_vm0, %v6213_v8  ;;  %1336 = vmatpush.bf16.msrb.mxu0 %v4744_v51 }
  0xa0   : > { %1369 = vmatpush.bf16.msrb.mxu1 %v4746_v6  ;;  %v1442_v29 = vadd.f32 %v4987_v25, %v1441_v28 }
  0xa2   : > { %v6243_v30 = vsel %vm1443_vm4, %v4987_v25, %v1442_v29 }
  0xa3   : > { %1337 = vmatpush.bf16.msrb.mxu0 %v4743_v52 }
  0xa4   : > { %1370 = vmatpush.bf16.msrb.mxu1 %v4745_v10 }
  0xae   : > { %4655 = vmatmul.msk.bf16.vlgmr.msrb.gmra.mxu0 %vm1203_vm0, %v6215_v9 }
  0xaf   : > { %4664 = vmatmul.msk.bf16.vlgmr.msrb.gmra.mxu1 %vm1203_vm0, %v6223_v11 }
 0x11b   : > { %v6227_v12 = vpop.f32.mrf.mxu0 }
 0x11c   : > { %v6229_v13 = vpop.f32.mrf.mxu1  ;;  %v1435_v15 = vsel %vm1434_vm1, %v6227_v12, 0.0 }
 0x11d   : > { %v1472_v14 = vsel %vm1434_vm1, %v6229_v13, 0.0  ;;  %1436 = vadd.xlane.f32.xlu1 %v1435_v15 }
 0x11e   : > { %1473 = vadd.xlane.f32.xlu0 %v1472_v14 }
 0x11f   : > { %v6235_v16 = vpop.f32.mrf.mxu3 }
 0x120   : > { %v1506_v18 = vsel %vm1505_vm2, %v6235_v16, 0.0 }
 0x123   : > { %v1218_v19 = vpop.f32.mrf.mxu0 }
 0x124   : > { %v1250_v17 = vpop.f32.mrf.mxu1 }
 0x126   : > { %1507 = vadd.xlane.f32.xlu0 %v1506_v18 }
 0x127   : > { %v1312_v20 = vpop.f32.mrf.mxu3 }
 0x12c   : > { %v6239_v21 = vpop.f32.mrf.mxu1 }
 0x12d   : > { %v1539_v22 = vsel %vm1538_vm3, %v6239_v21, 0.0 }
 0x12e   : > { %1540 = vadd.xlane.f32.xlu1 %v1539_v22 }
 0x134   : > { %v1374_v23 = vpop.f32.mrf.mxu1 }
 0x190   : > { %v1437_v32 = vpop.xlane.xlu1 %1436 }
 0x191   : > { %v1474_v31 = vpop.xlane.xlu0 %1473  ;;  %v1445_v34 = vmul.f32 %v6243_v30, %v1437_v32  ;;  %v6296_v32 = vld [vmem:[#allocation24] ss:$0 sm:$0xff] }
 0x192   : > { %v1475_v33 = vmul.f32 %v1474_v31, %v6243_v30 }
 0x193   : > { %v6248_v35 = vsub.f32 %v6227_v12, %v1445_v34 }
 0x194   : > { %v6251_v36 = vsub.f32 %v6229_v13, %v1475_v33 }
 0x195   : > { %v1447_v38 = vmul.f32 %v6248_v35, %v6248_v35 }
 0x196   : > { %v1477_v37 = vmul.f32 %v6251_v36, %v6251_v36 }
 0x197   : > { %v1448_v40 = vsel %vm1434_vm1, %v1447_v38, 0.0 }
 0x198   : > { %v1478_v39 = vsel %vm1434_vm1, %v1477_v37, 0.0  ;;  %1449 = vadd.xlane.f32.xlu0 %v1448_v40  ;;  %v6301_v40 = vld [vmem:[#allocation20] ss:$0 sm:$0xff] }
 0x199   : > { %1479 = vadd.xlane.f32.xlu2 %v1478_v39  ;;  %v1508_v41 = vpop.xlane.xlu0 %1507 }
 0x19a   : > { %v1509_v42 = vmul.f32 %v1508_v41, %v6243_v30 }
 0x19c   : > { %v6261_v43 = vsub.f32 %v6235_v16, %v1509_v42 }
 0x19e   : > { %v1511_v44 = vmul.f32 %v6261_v43, %v6261_v43 }
 0x1a0   : > { %v1512_v45 = vsel %vm1505_vm2, %v1511_v44, 0.0 }
 0x1a1   : > { %1513 = vadd.xlane.f32.xlu2 %v1512_v45  ;;  %v1541_v46 = vpop.xlane.xlu1 %1540 }
 0x1a2   : > { %v1542_v47 = vmul.f32 %v1541_v46, %v6243_v30 }
 0x1a4   : > { %v6268_v48 = vsub.f32 %v6239_v21, %v1542_v47 }
 0x1a6   : > { %v1544_v49 = vmul.f32 %v6268_v48, %v6268_v48 }
 0x1a8   : > { %v1545_v50 = vsel %vm1538_vm3, %v1544_v49, 0.0  ;;  %v6307_v49 = vld [vmem:[#allocation26] ss:$0 sm:$0xff] }
 0x1a9   : > { %1546 = vadd.xlane.f32.xlu1 %v1545_v50 }
 0x1ac   : > { %1861 = vrot.lane.b32.xlu0 %v6239_v21, %s5774_s24 }
 0x1b9   : > { %1822 = vrot.lane.b32.xlu2 %v6235_v16, %s5774_s24 }
 0x1c1   : > { %1744 = vrot.lane.b32.xlu2 %v6227_v12, %s5774_s24 }
 0x1c2   : > { %1782 = vrot.lane.b32.xlu1 %v6229_v13, %s5774_s24 }
 0x20b   : > { %v1450_v54 = vpop.xlane.xlu0 %1449 }
 0x20c   : > { %v1480_v53 = vpop.xlane.xlu2 %1479  ;;  %v1451_v56 = vmul.f32 %v1450_v54, %v6243_v30  ;;  %v6311_v54 = vld [vmem:[#allocation29] ss:$0 sm:$0xff] }
 0x20d   : > { %v1481_v55 = vmul.f32 %v1480_v53, %v6243_v30 }
 0x20e   : > { %v1452_v58 = vadd.f32 1e-05, %v1451_v56 }
 0x20f   : > { %v1482_v57 = vadd.f32 1e-05, %v1481_v55 }
 0x210   : > { %vm1459_vm9 = vweird.f32 %v1452_v58 }
 0x211   : > { %4988 = vrsqrt.f32 %v1482_v57  ;;  %vm1489_vm7 = vweird.f32 %v1482_v57 }
 0x212   : > { %4990 = vrsqrt.f32 %v1452_v58 }
 0x214   : > { %v1514_v59 = vpop.xlane.xlu2 %1513 }
 0x215   : > { %v1515_v60 = vmul.f32 %v1514_v59, %v6243_v30 }
 0x217   : > { %v4989_v61 = vpop.eup %4988  ;;  %v1516_v62 = vadd.f32 1e-05, %v1515_v60 }
 0x218   : > { %v4991_v0 = vpop.eup %4990  ;;  %v1484_v1 = vmul.f32 %v4989_v61, %v1482_v57  ;;  %vm1490_vm5 = vweird.f32 %v4989_v61 }
 0x219   : > { %v1454_v2 = vmul.f32 %v4991_v0, %v1452_v58  ;;  %4992 = vrsqrt.f32 %v1516_v62  ;;  %vm1460_vm6 = vweird.f32 %v4991_v0  ;;  %vm1491_vm8 = vmor %vm1489_vm7, %vm1490_vm5  ;;  %vm1523_vm12 = vweird.f32 %v1516_v62 }
 0x21a   : > { %v1485_v3 = vmul.f32 %v4989_v61, %v1484_v1  ;;  %vm1461_vm10 = vmor %vm1459_vm9, %vm1460_vm6  ;;  %vm1682_vm5 = vcmask 1042432   ;;  %vm1625_vm6 = vcmask 64512   ;;  %vm1629_vm7 = vcmask 48128  }
 0x21b   : > { %v1455_v4 = vmul.f32 %v4991_v0, %v1454_v2  ;;  %v6328_v2 = vld [vmem:[%s7566_s25] ss:$0 sm:$0xff] }
 0x21c   : > { %v1486_v5 = vmul.f32 0.5, %v1485_v3  ;;  %v1823_v6 = vpop.permute.xlu2 %1822  ;;  %v1547_v7 = vpop.xlane.xlu1 %1546 }
 0x21d   : > { %v1456_v9 = vmul.f32 0.5, %v1455_v4  ;;  %v1548_v10 = vmul.f32 %v1547_v7, %v6243_v30  ;;  %v1825_v14 = vsel %vm1505_vm2, %v1823_v6, 0.0  ;;  %v1405_v6 = vld [vmem:[%s1180_s0] sm:$0xff] }
 0x21e   : > { %v1487_v15 = vsub.f32 1.5, %v1486_v5  ;;  %1826 = vadd.xlane.f32.xlu0 %v1825_v14  ;;  %v1862_v20 = vpop.permute.xlu0 %1861 }
 0x21f   : > { %v4993_v17 = vpop.eup %4992  ;;  %v1457_v18 = vsub.f32 1.5, %v1456_v9  ;;  %v1549_v19 = vadd.f32 1e-05, %v1548_v10  ;;  %v1864_v24 = vsel %vm1538_vm3, %v1862_v20, 0.0  ;;  %v1339_v10 = vpop.f32.mrf.mxu0 }
 0x220   : > { %v1488_v22 = vmul.f32 %v4989_v61, %v1487_v15  ;;  %v1518_v23 = vmul.f32 %v4993_v17, %v1516_v62  ;;  %1865 = vadd.xlane.f32.xlu2 %v1864_v24  ;;  %vm1524_vm11 = vweird.f32 %v4993_v17 }
 0x221   : > { %v1458_v25 = vmul.f32 %v4991_v0, %v1457_v18  ;;  %4994 = vrsqrt.f32 %v1549_v19  ;;  %vm1525_vm13 = vmor %vm1523_vm12, %vm1524_vm11  ;;  %vm1556_vm15 = vweird.f32 %v1549_v19 }
 0x222   : > { %v1519_v27 = vmul.f32 %v4993_v17, %v1518_v23  ;;  %v1492_v28 = vsel %vm1491_vm8, %v4989_v61, %v1488_v22 }
 0x223   : > { %v1462_v29 = vsel %vm1461_vm10, %v4991_v0, %v1458_v25  ;;  %v1493_v31 = vmul.f32 %v1492_v28, %v6251_v36 }
 0x224   : > { %v1520_v33 = vmul.f32 0.5, %v1519_v27  ;;  %v1745_v34 = vpop.permute.xlu2 %1744  ;;  %v1463_v37 = vmul.f32 %v1462_v29, %v6248_v35  ;;  %v6305_v35 = vld [vmem:[#allocation21] ss:$0 sm:$0xff] }
 0x225   : > { %v1747_v38 = vsel %vm1434_vm1, %v1745_v34, 0.0  ;;  %v1497_v39 = vmul.f32 %v6293_v26, %v1493_v31 }
 0x226   : > { %v1521_v41 = vsub.f32 1.5, %v1520_v33  ;;  %1748 = vadd.xlane.f32.xlu0 %v1747_v38  ;;  %v1467_v47 = vmul.f32 %v6301_v40, %v1463_v37 }
 0x227   : > { %v4995_v42 = vpop.eup %4994  ;;  %v1501_v44 = vadd.f32 %v6296_v32, %v1497_v39  ;;  %v1341_v15 = vpop.f32.mrf.mxu0 }
 0x228   : > { %v1522_v45 = vmul.f32 %v4993_v17, %v1521_v41  ;;  %v1551_v36 = vmul.f32 %v4995_v42, %v1549_v19  ;;  %v1471_v56 = vadd.f32 %v6305_v35, %v1467_v47  ;;  %vm1557_vm14 = vweird.f32 %v4995_v42 }
 0x229   : > { %v1503_v46 = vpack.c.bf16 %v1501_v44, %v1501_v44  ;;  %vm1558_vm4 = vmor %vm1556_vm15, %vm1557_vm14 }
 0x22a   : > { %v1526_v50 = vsel %vm1525_vm13, %v4993_v17, %v1522_v45  ;;  %v1552_v51 = vmul.f32 %v4995_v42, %v1551_v36  ;;  %v1502_v61 = vpack.c.bf16 %v1471_v56, %v1471_v56  ;;  %v4740_v56 = vld [vmem:[#allocation12 + $0x8] sm:$0xff] }
 0x22b   : > { %v1575_v52 = vsel %vm1434_vm1, %v1503_v46, 0  ;;  %v1527_v53 = vmul.f32 %v1526_v50, %v6261_v43  ;;  %1274 = vmatpush.bf16.msra.mxu2 %v4740_v56 }
 0x22c   : > { %v1553_v55 = vmul.f32 0.5, %v1552_v51  ;;  %1584 = vmatpush.bf16.xpose.msrb.mxu3 %v1575_v52 }
 0x22d   : > { %v1531_v57 = vmul.f32 %v6307_v49, %v1527_v53 }
 0x22e   : > { %v1554_v58 = vsub.f32 1.5, %v1553_v55 }
 0x22f   : > { %v1535_v59 = vadd.f32 %v6311_v54, %v1531_v57 }
 0x230   : > { %v1555_v60 = vmul.f32 %v4995_v42, %v1554_v58  ;;  %v4739_v58 = vld [vmem:[#allocation12] sm:$0xff] }
 0x231   : > { %v1536_v62 = vpack.c.bf16 %v1535_v59, %v1535_v59  ;;  %v4984_v59 = vld [vmem:[%s1010_s5] ss:$0 sm:$0xff]  ;;  %1275 = vmatpush.bf16.msra.mxu2 %v4739_v58  ;;  %s7567_s5 = sld [smem:[#allocation69_spill]] }
 0x232   : > { %v1559_v43 = vsel %vm1558_vm4, %v4995_v42, %v1555_v60  ;;  %v4748_v60 = vld [vmem:[#allocation18 + $0x8] sm:$0xff] }
 0x233   : > { %4674 = vmatmul.msk.bf16.vlgmr.msrb.gmra.mxu3 %vm1434_vm1, %v1502_v61  ;;  %v1592_v0 = vsel %vm1434_vm1, %v1536_v62, 0  ;;  %v1560_v1 = vmul.f32 %v1559_v43, %v6268_v48  ;;  %v6404_v62 = vpack.c.bf16 %v1339_v10, %v1339_v10  ;;  %v4983_v10 = vld [vmem:[%s1001_s16] ss:$0 sm:$0xff]  ;;  %s5778_s16 = smov 8  }
 0x234   : > { %1601 = vmatpush.bf16.xpose.msra.mxu0 %v1592_v0  ;;  %v1783_v3 = vpop.permute.xlu1 %1782  ;;  %4637 = vmatmul.msk.bf16.vlgmr.msra.gmra.mxu2 %vm1203_vm0, %v6213_v8  ;;  %v4982_v8 = vld [vmem:[%s1183_s8] ss:$0 sm:$0xff]  ;;  %s5783_s8 = smov 108  }
 0x235   : > { %v1785_v4 = vsel %vm1434_vm1, %v1783_v3, 0.0  ;;  %v1564_v5 = vmul.f32 %v6317_v63, %v1560_v1  ;;  %1398 = vmatpush.bf16.msrb.mxu2 %v4748_v60  ;;  %v4747_v3 = vld [vmem:[#allocation18] sm:$0xff] }
 0x236   : > { %1786 = vadd.xlane.f32.xlu1 %v1785_v4  ;;  %v1684_v4 = vsel %vm1682_vm5, %v6404_v62, 0 }
 0x237   : > { %v1568_v7 = vadd.f32 %v6328_v2, %v1564_v5 }
 0x238   : > { %1409 = vperm.xlu2 %4972, %v1405_v6  }
 0x239   : > { %v1569_v9 = vpack.c.bf16 %v1568_v7, %v1568_v7  ;;  %1399 = vmatpush.bf16.msrb.mxu2 %v4747_v3 }
 0x23a   : > { %1855 = vrot.lane.b32.xlu0 %v6311_v54, %s5776_s12 }
 0x23b   : > { %4675 = vmatmul.msk.bf16.vlgmr.msra.gmra.mxu0 %vm1434_vm1, %v1502_v61  ;;  %v1609_v48 = vsel %vm1434_vm1, %v1569_v9, 0 }
 0x23c   : > { %1618 = vmatpush.bf16.xpose.msra.mxu1 %v1609_v48 }
 0x23d   : > { %1693 = vmatpush.bf16.msra.mxu2 %v1684_v4 }
 0x240   : > { %1851 = vrot.lane.b32.xlu2 %v6307_v49, %s5776_s12 }
 0x242   : > { %1894 = vrot.lane.b32.xlu0 %v6328_v2, %s5776_s12 }
 0x243   : > { %4676 = vmatmul.msk.bf16.vlgmr.msra.gmra.mxu1 %vm1434_vm1, %v1502_v61 }
 0x244   : > { %4673 = vmatmul.msk.bf16.vlgmr.msrb.gmra.mxu2 %vm1203_vm0, %v6223_v11 }
 0x248   : > { %1811 = vrot.lane.b32.xlu2 %v6293_v26, %s5776_s12 }
 0x24a   : > { %1815 = vrot.lane.b32.xlu0 %v6296_v32, %s5776_s12 }
 0x24f   : > { %1890 = vrot.lane.b32.xlu1 %v6317_v63, %s5776_s12 }
 0x250   : > { %1777 = vrot.lane.b32.xlu2 %v6305_v35, %s5776_s12 }
 0x257   : > { %1773 = vrot.lane.b32.xlu1 %v6301_v40, %s5776_s12 }
 0x258   : > { %2182 = vrot.lane.b32.xlu2 %v6235_v16, %s5777_s23 }
 0x25f   : > { %2143 = vrot.lane.b32.xlu1 %v6229_v13, %s5777_s23 }
 0x291   : > { %v1827_v14 = vpop.xlane.xlu0 %1826 }
 0x292   : > { %v1828_v17 = vmul.f32 %v1827_v14, %v6243_v30 }
 0x293   : > { %v1866_v23 = vpop.xlane.xlu2 %1865 }
 0x294   : > { %v6358_v18 = vsub.f32 %v6235_v16, %v1828_v17  ;;  %v1867_v25 = vmul.f32 %v1866_v23, %v6243_v30 }
 0x296   : > { %v1830_v19 = vmul.f32 %v6358_v18, %v6358_v18  ;;  %v6372_v28 = vsub.f32 %v6239_v21, %v1867_v25 }
 0x298   : > { %1832 = vrot.lane.b32.xlu1 %v1830_v19, %s5774_s24  ;;  %v1869_v29 = vmul.f32 %v6372_v28, %v6372_v28 }
 0x299   : > { %v1749_v20 = vpop.xlane.xlu0 %1748 }
 0x29a   : > { %v1750_v22 = vmul.f32 %v1749_v20, %v6243_v30 }
 0x29b   : > { %v1410_v36 = vpop.permute.xlu2 %1409 }
 0x29c   : > { %v6365_v24 = vsub.f32 %v6227_v12, %v1750_v22  ;;  %v6406_v0 = vmul.f32 %v4984_v59, %v1410_v36  ;;  %v6428_v17 = vmul.f32 %v4982_v8, %v1410_v36  ;;  %v6430_v19 = vmul.f32 %v4983_v10, %v1410_v36 }
 0x29e   : > { %v1752_v27 = vmul.f32 %v6365_v24, %v6365_v24 }
 0x2a0   : > { %1754 = vrot.lane.b32.xlu0 %v1752_v27, %s5774_s24 }
 0x2a3   : > { %v6384_v46 = vpop.permute.xlu2 %1851 }
 0x2a8   : > { %1871 = vrot.lane.b32.xlu0 %v1869_v29, %s5774_s24 }
 0x2a9   : > { %v1787_v31 = vpop.xlane.xlu1 %1786 }
 0x2aa   : > { %v1788_v33 = vmul.f32 %v1787_v31, %v6243_v30 }
 0x2ab   : > { %v6386_v47 = vpop.permute.xlu2 %1811 }
 0x2ac   : > { %v6379_v34 = vsub.f32 %v6229_v13, %v1788_v33  ;;  %v6388_v50 = vpop.permute.xlu0 %1855 }
 0x2ae   : > { %v1790_v37 = vmul.f32 %v6379_v34, %v6379_v34 }
 0x2b0   : > { %1792 = vrot.lane.b32.xlu2 %v1790_v37, %s5774_s24 }
 0x2b3   : > { %v6390_v51 = vpop.permute.xlu2 %1777 }
 0x2b4   : > { %v6394_v53 = vpop.permute.xlu0 %1894 }
 0x2b6   : > { %v1586_v38 = vpop.f32.mrf.mxu3 }
 0x2b7   : > { %v6437_v23 = vmul.f32 %v1586_v38, %v6428_v17 }
 0x2b8   : > { %v1603_v39 = vpop.f32.mrf.mxu0 }
 0x2b9   : > { %v6440_v25 = vmul.f32 %v1603_v39, %v6430_v19  ;;  %v1626_v27 = vsel %vm1625_vm6, %v6437_v23, -inf }
 0x2bb   : > { %v6396_v55 = vpop.permute.xlu2 %2182  ;;  %v1630_v29 = vsel %vm1629_vm7, %v6440_v25, -inf }
 0x2bc   : > { %v6402_v61 = vpop.permute.xlu0 %1815 }
 0x2be   : > { %v1588_v41 = vpop.f32.mrf.mxu3 }
 0x2c0   : > { %v1605_v42 = vpop.f32.mrf.mxu0  ;;  %v1620_v44 = vpop.f32.mrf.mxu1 }
 0x2c1   : > { %v6392_v52 = vpop.permute.xlu1 %1890  ;;  %v6414_v5 = vmul.f32 %v1620_v44, %v6406_v0 }
 0x2c3   : > { %v1634_v48 = vsel %vm1434_vm1, %v6414_v5, -inf }
 0x2c8   : > { %v1622_v45 = vpop.f32.mrf.mxu1 }
 0x2c9   : > { %v6398_v57 = vpop.permute.xlu1 %1773 }
 0x2d1   : > { %v6416_v6 = vpop.permute.xlu1 %2143 }
 0x30a   : > { %v1793_v43 = vpop.permute.xlu2 %1792  ;;  %v1833_v14 = vpop.permute.xlu1 %1832 }
 0x30b   : > { %v1795_v1 = vsel %vm1434_vm1, %v1793_v43, 0.0  ;;  %v1835_v22 = vsel %vm1505_vm2, %v1833_v14, 0.0 }
 0x30c   : > { %1796 = vadd.xlane.f32.xlu0 %v1795_v1 }
 0x312   : > { %v1755_v7 = vpop.permute.xlu0 %1754 }
 0x313   : > { %v1757_v9 = vsel %vm1434_vm1, %v1755_v7, 0.0 }
 0x314   : > { %1758 = vadd.xlane.f32.xlu1 %v1757_v9  ;;  %1635 = vmax.xlane.f32.xlu0 %v1634_v48 }
 0x31a   : > { %v1872_v15 = vpop.permute.xlu0 %1871 }
 0x31b   : > { %v1874_v20 = vsel %vm1538_vm3, %v1872_v15, 0.0 }
 0x31c   : > { %1875 = vadd.xlane.f32.xlu2 %v1874_v20  ;;  %1836 = vadd.xlane.f32.xlu1 %v1835_v22 }
 0x324   : > { %1627 = vmax.xlane.f32.xlu1 %v1626_v27  ;;  %1631 = vmax.xlane.f32.xlu2 %v1630_v29 }
 0x37f   : > { %v1797_v31 = vpop.xlane.xlu0 %1796 }
 0x380   : > { %v1798_v33 = vmul.f32 %v1797_v31, %v6243_v30 }
 0x382   : > { %v1799_v11 = vadd.f32 1e-05, %v1798_v33 }
 0x384   : > { %4996 = vrsqrt.f32 %v1799_v11  ;;  %vm1806_vm9 = vweird.f32 %v1799_v11 }
 0x387   : > { %v1759_v37 = vpop.xlane.xlu1 %1758 }
 0x388   : > { %v1760_v38 = vmul.f32 %v1759_v37, %v6243_v30 }
 0x38a   : > { %v4997_v39 = vpop.eup %4996  ;;  %v1761_v41 = vadd.f32 1e-05, %v1760_v38 }
 0x38b   : > { %v1801_v42 = vmul.f32 %v4997_v39, %v1799_v11  ;;  %vm1807_vm8 = vweird.f32 %v4997_v39 }
 0x38c   : > { %4998 = vrsqrt.f32 %v1761_v41  ;;  %vm1808_vm10 = vmor %vm1806_vm9, %vm1807_vm8  ;;  %vm1768_vm12 = vweird.f32 %v1761_v41 }
 0x38d   : > { %v1802_v44 = vmul.f32 %v4997_v39, %v1801_v42 }
 0x38f   : > { %v1803_v45 = vmul.f32 0.5, %v1802_v44  ;;  %v1876_v36 = vpop.xlane.xlu2 %1875  ;;  %v1837_v56 = vpop.xlane.xlu1 %1836 }
 0x390   : > { %v1877_v58 = vmul.f32 %v1876_v36, %v6243_v30  ;;  %v1838_v59 = vmul.f32 %v1837_v56, %v6243_v30 }
 0x391   : > { %v1804_v60 = vsub.f32 1.5, %v1803_v45 }
 0x392   : > { %v4999_v43 = vpop.eup %4998  ;;  %v1878_v1 = vadd.f32 1e-05, %v1877_v58  ;;  %v1839_v3 = vadd.f32 1e-05, %v1838_v59 }
 0x393   : > { %v1805_v4 = vmul.f32 %v4997_v39, %v1804_v60  ;;  %v1763_v7 = vmul.f32 %v4999_v43, %v1761_v41  ;;  %vm1769_vm11 = vweird.f32 %v4999_v43 }
 0x394   : > { %5000 = vrsqrt.f32 %v1878_v1  ;;  %vm1770_vm13 = vmor %vm1768_vm12, %vm1769_vm11  ;;  %vm1885_vm4 = vweird.f32 %v1878_v1  ;;  %vm1846_vm9 = vweird.f32 %v1839_v3  ;;  %vm1702_vm11 = vcmask 1043456  }
 0x395   : > { %v1809_v9 = vsel %vm1808_vm10, %v4997_v39, %v1805_v4  ;;  %v1764_v48 = vmul.f32 %v4999_v43, %v1763_v7  ;;  %5002 = vrsqrt.f32 %v1839_v3  ;;  %vm1724_vm12 = vcmask 1041408  }
 0x396   : > { %v1810_v8 = vmul.f32 %v1809_v9, %v6379_v34 }
 0x397   : > { %v1765_v10 = vmul.f32 0.5, %v1764_v48 }
 0x398   : > { %v1814_v14 = vmul.f32 %v6386_v47, %v1810_v8 }
 0x399   : > { %v1766_v15 = vsub.f32 1.5, %v1765_v10 }
 0x39a   : > { %v5001_v20 = vpop.eup %5000  ;;  %v1818_v22 = vadd.f32 %v6402_v61, %v1814_v14 }
 0x39b   : > { %v5003_v27 = vpop.eup %5002  ;;  %v1767_v29 = vmul.f32 %v4999_v43, %v1766_v15  ;;  %v1880_v31 = vmul.f32 %v5001_v20, %v1878_v1  ;;  %vm1886_vm14 = vweird.f32 %v5001_v20  ;;  %v1628_v15 = vpop.xlane.xlu1 %1627 }
 0x39c   : > { %v1841_v33 = vmul.f32 %v5003_v27, %v1839_v3  ;;  %v1820_v38 = vpack.c.bf16 %v1818_v22, %v1818_v22  ;;  %vm1847_vm15 = vweird.f32 %v5003_v27  ;;  %vm1887_vm8 = vmor %vm1885_vm4, %vm1886_vm14 }
 0x39d   : > { %v1771_v11 = vsel %vm1770_vm13, %v4999_v43, %v1767_v29  ;;  %v1881_v37 = vmul.f32 %v5001_v20, %v1880_v31  ;;  %vm1848_vm10 = vmor %vm1846_vm9, %vm1847_vm15 }
 0x39e   : > { %v1842_v39 = vmul.f32 %v5003_v27, %v1841_v33  ;;  %v1772_v34 = vmul.f32 %v1771_v11, %v6365_v24  ;;  %v1905_v44 = vunpack.c.l.b16 %v1820_v38 }
 0x39f   : > { %v1882_v42 = vmul.f32 0.5, %v1881_v37 }
 0x3a0   : > { %v1843_v47 = vmul.f32 0.5, %v1842_v39  ;;  %v1776_v45 = vmul.f32 %v6398_v57, %v1772_v34  ;;  %v1906_v61 = vpack.c.b16 %v1905_v44, %v1905_v44 }
 0x3a1   : > { %v1883_v36 = vsub.f32 1.5, %v1882_v42 }
 0x3a2   : > { %v1844_v56 = vsub.f32 1.5, %v1843_v47  ;;  %v1780_v41 = vadd.f32 %v6390_v51, %v1776_v45  ;;  %1907 = vrot.lane.b32.xlu2 %v1906_v61, %s5774_s24 }
 0x3a3   : > { %v1884_v58 = vmul.f32 %v5001_v20, %v1883_v36 }
 0x3a4   : > { %v1845_v59 = vmul.f32 %v5003_v27, %v1844_v56  ;;  %v1819_v24 = vpack.c.bf16 %v1780_v41, %v1780_v41  ;;  %v1277_v56 = vpop.f32.mrf.mxu2 }
 0x3a5   : > { %v1888_v60 = vsel %vm1887_vm8, %v5001_v20, %v1884_v58  ;;  %v1632_v20 = vpop.xlane.xlu2 %1631  ;;  %v6488_v58 = vpack.c.bf16 %v1277_v56, %v1277_v56 }
 0x3a6   : > { %v1849_v43 = vsel %vm1848_vm10, %v5003_v27, %v1845_v59  ;;  %v1900_v4 = vunpack.c.l.b16 %v1819_v24  ;;  %v1889_v57 = vmul.f32 %v1888_v60, %v6372_v28 }
 0x3a7   : > { %v1850_v7 = vmul.f32 %v1849_v43, %v6358_v18  ;;  %v1633_v18 = vmax.f32 %v1628_v15, %v1632_v20  ;;  %v1704_v59 = vsel %vm1702_vm11, %v6488_v58, 0  ;;  %v2185_v43 = vsel %vm1505_vm2, %v6396_v55, 0.0 }
 0x3a8   : > { %v1901_v9 = vpack.c.b16 %v1900_v4, %v1900_v4  ;;  %v1893_v48 = vmul.f32 %v6392_v52, %v1889_v57  ;;  %1713 = vmatpush.bf16.msra.mxu3 %v1704_v59 }
 0x3a9   : > { %v1854_v51 = vmul.f32 %v6384_v46, %v1850_v7  ;;  %v1636_v46 = vpop.xlane.xlu0 %1635 }
 0x3aa   : > { %1902 = vrot.lane.b32.xlu0 %v1901_v9, %s5774_s24  ;;  %v1897_v1 = vadd.f32 %v6394_v53, %v1893_v48  ;;  %v1637_v52 = vmax.f32 %v1633_v18, %v1636_v46 }
 0x3ab   : > { %v1858_v3 = vadd.f32 %v6388_v50, %v1854_v51 }
 0x3ac   : > { %v1898_v8 = vpack.c.bf16 %v1897_v1, %v1897_v1  ;;  %v1644_v29 = vsub.f32 %v6414_v5, %v1637_v52  ;;  %v1641_v31 = vsub.f32 %v6440_v25, %v1637_v52  ;;  %v1638_v33 = vsub.f32 %v6437_v23, %v1637_v52  ;;  %v1279_v24 = vpop.f32.mrf.mxu2 }
 0x3ad   : > { %v1859_v10 = vpack.c.bf16 %v1858_v3, %v1858_v3  ;;  %v2146_v25 = vsel %vm1434_vm1, %v6416_v6, 0.0 }
 0x3ae   : > { %v1952_v14 = vunpack.c.l.b16 %v1898_v8  ;;  %v1645_v53 = vmul.f32 1.442695, %v1644_v29  ;;  %v1642_v37 = vmul.f32 1.442695, %v1641_v31  ;;  %v1639_v39 = vmul.f32 1.442695, %v1638_v33 }
 0x3af   : > { %v1930_v22 = vunpack.c.l.b16 %v1859_v10 }
 0x3b0   : > { %v1953_v28 = vpack.c.b16 %v1952_v14, %v1952_v14  ;;  %5004 = vpow2.f32 %v1645_v53 }
 0x3b1   : > { %v1931_v27 = vpack.c.b16 %v1930_v22, %v1930_v22  ;;  %5006 = vpow2.f32 %v1642_v37 }
 0x3b2   : > { %1954 = vrot.lane.b32.xlu0 %v1953_v28, %s5774_s24  ;;  %5008 = vpow2.f32 %v1639_v39 }
 0x3b3   : > { %1932 = vrot.lane.b32.xlu1 %v1931_v27, %s5774_s24 }
 0x3b4   : > { %v1401_v51 = vpop.f32.mrf.mxu2 }
 0x3b5   : > { %v6497_v1 = vpack.c.bf16 %v1401_v51, %v1401_v51 }
 0x3b6   : > { %v5005_v50 = vpop.eup %5004 }
 0x3b7   : > { %v1654_v11 = vsel %vm1434_vm1, %v5005_v50, 0.0  ;;  %v6471_v38 = vmul.f32 %v5005_v50, %v6406_v0  ;;  %v5007_v5 = vpop.eup %5006  ;;  %v1726_v3 = vsel %vm1724_vm12, %v6497_v1, 0 }
 0x3b8   : > { %v5009_v42 = vpop.eup %5008  ;;  %v1650_v23 = vsel %vm1629_vm7, %v5007_v5, 0.0  ;;  %v1659_v47 = vmul.f32 %v5007_v5, %v6430_v19  ;;  %1735 = vmatpush.bf16.msrb.mxu0 %v1726_v3 }
 0x3b9   : > { %v1668_v34 = vsel %vm1434_vm1, %v6471_v38, 0.0  ;;  %v1647_v44 = vsel %vm1625_vm6, %v5009_v42, 0.0  ;;  %v1658_v45 = vmul.f32 %v5009_v42, %v6428_v17 }
 0x3ba   : > { %v1664_v36 = vsel %vm1629_vm7, %v1659_v47, 0.0 }
 0x3bb   : > { %v1661_v61 = vsel %vm1625_vm6, %v1658_v45, 0.0 }
 0x3bc   : > { %v1403_v55 = vpop.f32.mrf.mxu2 }
 0x3cb   : > { %1655 = vadd.xlane.f32.xlu2 %v1654_v11 }
 0x3d3   : > { %1669 = vadd.xlane.f32.xlu2 %v1668_v34 }
 0x3db   : > { %2147 = vadd.xlane.f32.xlu2 %v2146_v25 }
 0x3dc   : > { %1651 = vadd.xlane.f32.xlu0 %v1650_v23 }
 0x3dd   : > { %1648 = vadd.xlane.f32.xlu1 %v1647_v44 }
 0x3e4   : > { %1665 = vadd.xlane.f32.xlu0 %v1664_v36 }
 0x3e5   : > { %1662 = vadd.xlane.f32.xlu1 %v1661_v61 }
 0x3f8   : > { %2106 = vrot.lane.b32.xlu0 %v6227_v12, %s5777_s23 }
 0x3fc   : > { %v1908_v6 = vpop.permute.xlu2 %1907 }
 0x3fd   : > { %v1913_v41 = vsel %vm1434_vm1, %v1908_v6, 0 }
 0x3fe   : > { %2220 = vrot.lane.b32.xlu1 %v6239_v21, %s5777_s23  ;;  %1922 = vmatpush.bf16.xpose.msrb.mxu1 %v1913_v41 }
 0x41c   : > { %v1903_v60 = vpop.permute.xlu0 %1902 }
 0x41d   : > { %4680 = vmatmul.msk.bf16.vlgmr.msrb.gmra.mxu1 %vm1434_vm1, %v1903_v60 }
 0x422   : > { %2186 = vadd.xlane.f32.xlu0 %v2185_v43 }
 0x424   : > { %v1955_v4 = vpop.permute.xlu0 %1954 }
 0x425   : > { %v1957_v57 = vsel %vm1434_vm1, %v1955_v4, 0  ;;  %v1933_v7 = vpop.permute.xlu1 %1932 }
 0x426   : > { %v1935_v9 = vsel %vm1434_vm1, %v1933_v7, 0  ;;  %1966 = vmatpush.bf16.xpose.msrb.mxu3 %v1957_v57 }
 0x427   : > { %1944 = vmatpush.bf16.xpose.msrb.mxu2 %v1935_v9 }
 0x43e   : > { %v1656_v48 = vpop.xlane.xlu2 %1655 }
 0x446   : > { %v1670_v8 = vpop.xlane.xlu2 %1669 }
 0x44e   : > { %v2148_v10 = vpop.xlane.xlu2 %2147 }
 0x44f   : > { %v1652_v14 = vpop.xlane.xlu0 %1651  ;;  %v2149_v15 = vmul.f32 %v2148_v10, %v6243_v30 }
 0x450   : > { %v1649_v20 = vpop.xlane.xlu1 %1648 }
 0x451   : > { %v6503_v22 = vsub.f32 %v6229_v13, %v2149_v15  ;;  %v1653_v28 = vadd.f32 %v1652_v14, %v1649_v20 }
 0x453   : > { %v2151_v27 = vmul.f32 %v6503_v22, %v6503_v22  ;;  %v1657_v18 = vadd.f32 %v1656_v48, %v1653_v28 }
 0x455   : > { %2153 = vrot.lane.b32.xlu0 %v2151_v27, %s5777_s23  ;;  %v1672_v53 = vmul.f32 1e-13, %v1657_v18 }
 0x457   : > { %v1666_v46 = vpop.xlane.xlu0 %1665 }
 0x458   : > { %v1663_v52 = vpop.xlane.xlu1 %1662 }
 0x459   : > { %v1667_v29 = vadd.f32 %v1666_v46, %v1663_v52 }
 0x45b   : > { %v1671_v50 = vadd.f32 %v1670_v8, %v1667_v29 }
 0x45d   : > { %v1673_v31 = vadd.f32 %v1672_v53, %v1671_v50  ;;  %v2026_v53 = vunpack.c.l.b16 %v6404_v62 }
 0x45f   : > { %5010 = vrcp.f32 %v1673_v31  ;;  %v6551_v50 = vpack.c.b16 %v2026_v53, %v2026_v53 }
 0x465   : > { %v5011_v33 = vpop.eup %5010 }
 0x466   : > { %v1677_v11 = vmul.f32 %v5011_v33, %v1659_v47  ;;  %v1675_v37 = vmul.f32 %v5011_v33, %v1658_v45  ;;  %v1719_v39 = vmul.f32 %v5011_v33, %v6471_v38 }
 0x468   : > { %v1678_v34 = vpack.c.bf16 %v1677_v11, %v1677_v11  ;;  %v1676_v5 = vpack.c.bf16 %v1675_v37, %v1675_v37  ;;  %v1720_v42 = vpack.c.bf16 %v1719_v39, %v1719_v39 }
 0x46a   : > { %4677 = vmatmul.msk.bf16.vlgmr.msra.gmra.mxu2 %vm1629_vm7, %v1678_v34  ;;  %4678 = vmatmul.msk.bf16.vlgmr.msra.gmra.mxu3 %vm1625_vm6, %v1676_v5  ;;  %v2107_v25 = vpop.permute.xlu0 %2106 }
 0x46b   : > { %4679 = vmatmul.msk.bf16.vlgmr.msrb.gmra.mxu0 %vm1434_vm1, %v1720_v42  ;;  %v2109_v23 = vsel %vm1434_vm1, %v2107_v25, 0.0 }
 0x46c   : > { %2110 = vadd.xlane.f32.xlu1 %v2109_v23 }
 0x470   : > { %v2221_v44 = vpop.permute.xlu1 %2220 }
 0x471   : > { %v2223_v36 = vsel %vm1538_vm3, %v2221_v44, 0.0 }
 0x472   : > { %2224 = vadd.xlane.f32.xlu2 %v2223_v36 }
 0x47a   : > { %4681 = vmatmul.msk.bf16.vlgmr.msrb.gmra.mxu2 %vm1434_vm1, %v1903_v60  ;;  %4682 = vmatmul.msk.bf16.vlgmr.msrb.gmra.mxu3 %vm1434_vm1, %v1903_v60 }
 0x495   : > { %v2187_v38 = vpop.xlane.xlu0 %2186 }
 0x496   : > { %v2188_v47 = vmul.f32 %v2187_v38, %v6243_v30 }
 0x498   : > { %v6518_v45 = vsub.f32 %v6235_v16, %v2188_v47 }
 0x49a   : > { %v1924_v61 = vpop.f32.mrf.mxu1  ;;  %v2190_v6 = vmul.f32 %v6518_v45, %v6518_v45 }
 0x49c   : > { %2192 = vrot.lane.b32.xlu1 %v2190_v6, %s5777_s23 }
 0x4a2   : > { %v1926_v56 = vpop.f32.mrf.mxu1 }
 0x4c7   : > { %v2154_v18 = vpop.permute.xlu0 %2153 }
 0x4c8   : > { %v2156_v46 = vsel %vm1434_vm1, %v2154_v18, 0.0 }
 0x4df   : > { %v2111_v41 = vpop.xlane.xlu1 %2110 }
 0x4e0   : > { %v2112_v59 = vmul.f32 %v2111_v41, %v6243_v30 }
 0x4e2   : > { %v6525_v24 = vsub.f32 %v6227_v12, %v2112_v59 }
 0x4e4   : > { %v2114_v60 = vmul.f32 %v6525_v24, %v6525_v24 }
 0x4e5   : > { %v2225_v43 = vpop.xlane.xlu2 %2224 }
 0x4e6   : > { %v2226_v4 = vmul.f32 %v2225_v43, %v6243_v30  ;;  %2116 = vrot.lane.b32.xlu2 %v2114_v60, %s5777_s23 }
 0x4e8   : > { %v6532_v57 = vsub.f32 %v6239_v21, %v2226_v4  ;;  %v1737_v7 = vpop.f32.mrf.mxu0 }
 0x4ea   : > { %v2228_v9 = vmul.f32 %v6532_v57, %v6532_v57 }
 0x4ec   : > { %2230 = vrot.lane.b32.xlu0 %v2228_v9, %s5777_s23 }
 0x4ed   : > { %v1695_v48 = vpop.f32.mrf.mxu2  ;;  %v1715_v51 = vpop.f32.mrf.mxu3 }
 0x4ee   : > { %v1716_v3 = vadd.f32 %v1715_v51, %v1695_v48 }
 0x4f0   : > { %v1741_v8 = vadd.f32 %v1737_v7, %v1716_v3  ;;  %v1739_v55 = vpop.f32.mrf.mxu0 }
 0x4f2   : > { %1742 = vst.msk [vmem:[#allocation2] sm:$0xff] %vm1434_vm1, %v1741_v8 }
 0x4f5   : > { %v1697_v10 = vpop.f32.mrf.mxu2  ;;  %v1717_v14 = vpop.f32.mrf.mxu3 }
 0x4fd   : > { %v6538_v15 = vpop.f32.mrf.mxu2  ;;  %v6540_v20 = vpop.f32.mrf.mxu3 }
 0x505   : > { %v1948_v28 = vpop.f32.mrf.mxu2  ;;  %v1970_v27 = vpop.f32.mrf.mxu3 }
 0x50e   : > { %v2193_v52 = vpop.permute.xlu1 %2192 }
 0x50f   : > { %2157 = vadd.xlane.f32.xlu2 %v2156_v46  ;;  %v2195_v29 = vsel %vm1505_vm2, %v2193_v52, 0.0 }
 0x516   : > { %2196 = vadd.xlane.f32.xlu0 %v2195_v29 }
 0x52a   : > { %2172 = vrot.lane.b32.xlu0 %v6293_v26, %s5778_s16 }
 0x532   : > { %2135 = vrot.lane.b32.xlu0 %v6301_v40, %s5778_s16 }
 0x53a   : > { %2249 = vrot.lane.b32.xlu0 %v6317_v63, %s5778_s16  ;;  %v6562_v63 = vmul.f32 %v1924_v61, %v6428_v17 }
 0x53c   : > { %v1973_v62 = vsel %vm1625_vm6, %v6562_v63, -inf }
 0x540   : > { %v2117_v31 = vpop.permute.xlu2 %2116 }
 0x541   : > { %v2119_v33 = vsel %vm1434_vm1, %v2117_v31, 0.0 }
 0x542   : > { %2028 = vrot.lane.b32.xlu0 %v6551_v50, %s5774_s24  ;;  %2120 = vadd.xlane.f32.xlu1 %v2119_v33 }
 0x55b   : > { %2176 = vrot.lane.b32.xlu1 %v6296_v32, %s5778_s16  ;;  %v2050_v32 = vunpack.c.l.b16 %v6488_v58 }
 0x55d   : > { %v6573_v11 = vpack.c.b16 %v2050_v32, %v2050_v32 }
 0x55e   : > { %v2231_v26 = vpop.permute.xlu0 %2230 }
 0x55f   : > { %v2233_v40 = vsel %vm1538_vm3, %v2231_v26, 0.0 }
 0x560   : > { %2234 = vadd.xlane.f32.xlu2 %v2233_v40 }
 0x563   : > { %2215 = vrot.lane.b32.xlu1 %v6311_v54, %s5778_s16 }
 0x56b   : > { %2253 = vrot.lane.b32.xlu1 %v6328_v2, %s5778_s16 }
 0x56c   : > { %1974 = vmax.xlane.f32.xlu0 %v1973_v62 }
 0x578   : > { %2211 = vrot.lane.b32.xlu2 %v6307_v49, %s5778_s16 }
 0x580   : > { %2139 = vrot.lane.b32.xlu2 %v6305_v35, %s5778_s16 }
 0x582   : > { %v2158_v39 = vpop.xlane.xlu2 %2157 }
 0x583   : > { %v2159_v34 = vmul.f32 %v2158_v39, %v6243_v30 }
 0x585   : > { %v2160_v2 = vadd.f32 1e-05, %v2159_v34 }
 0x587   : > { %5012 = vrsqrt.f32 %v2160_v2  ;;  %vm2167_vm14 = vweird.f32 %v2160_v2 }
 0x588   : > { %2052 = vrot.lane.b32.xlu2 %v6573_v11, %s5774_s24 }
 0x589   : > { %v2197_v54 = vpop.xlane.xlu0 %2196 }
 0x58a   : > { %v2198_v35 = vmul.f32 %v2197_v54, %v6243_v30 }
 0x58c   : > { %v2199_v38 = vadd.f32 1e-05, %v2198_v35 }
 0x58d   : > { %v5013_v49 = vpop.eup %5012 }
 0x58e   : > { %v2162_v25 = vmul.f32 %v5013_v49, %v2160_v2  ;;  %5014 = vrsqrt.f32 %v2199_v38  ;;  %vm2168_vm13 = vweird.f32 %v5013_v49  ;;  %vm2206_vm8 = vweird.f32 %v2199_v38 }
 0x58f   : > { %vm2169_vm15 = vmor %vm2167_vm14, %vm2168_vm13 }
 0x590   : > { %v2163_v23 = vmul.f32 %v5013_v49, %v2162_v25 }
 0x592   : > { %v2164_v61 = vmul.f32 0.5, %v2163_v23 }
 0x594   : > { %v2165_v56 = vsub.f32 1.5, %v2164_v61  ;;  %v5015_v41 = vpop.eup %5014 }
 0x595   : > { %v2201_v60 = vmul.f32 %v5015_v41, %v2199_v38  ;;  %vm2207_vm4 = vweird.f32 %v5015_v41 }
 0x596   : > { %v2166_v59 = vmul.f32 %v5013_v49, %v2165_v56  ;;  %vm2208_vm9 = vmor %vm2206_vm8, %vm2207_vm4 }
 0x597   : > { %v2202_v7 = vmul.f32 %v5015_v41, %v2201_v60 }
 0x598   : > { %v2170_v4 = vsel %vm2169_vm15, %v5013_v49, %v2166_v59 }
 0x599   : > { %v2171_v48 = vmul.f32 %v2170_v4, %v6503_v22  ;;  %v2203_v51 = vmul.f32 0.5, %v2202_v7 }
 0x59b   : > { %v2204_v14 = vsub.f32 1.5, %v2203_v51 }
 0x59c   : > { %v2173_v37 = vpop.permute.xlu0 %2172 }
 0x59d   : > { %v2175_v8 = vmul.f32 %v2173_v37, %v2171_v48  ;;  %v2205_v29 = vmul.f32 %v5015_v41, %v2204_v14 }
 0x59f   : > { %v2209_v22 = vsel %vm2208_vm9, %v5015_v41, %v2205_v29 }
 0x5a0   : > { %v2210_v33 = vmul.f32 %v2209_v22, %v6518_v45 }
 0x5a4   : > { %v2136_v5 = vpop.permute.xlu0 %2135 }
 0x5ac   : > { %v6578_v42 = vpop.permute.xlu0 %2249 }
 0x5b4   : > { %v2029_v58 = vpop.permute.xlu0 %2028 }
 0x5b5   : > { %v2034_v44 = vsel %vm1682_vm5, %v2029_v58, 0  ;;  %v2121_v36 = vpop.xlane.xlu1 %2120 }
 0x5b6   : > { %2043 = vmatpush.bf16.msra.mxu0 %v2034_v44  ;;  %v2122_v47 = vmul.f32 %v2121_v36, %v6243_v30 }
 0x5b8   : > { %v2123_v6 = vadd.f32 1e-05, %v2122_v47 }
 0x5ba   : > { %5016 = vrsqrt.f32 %v2123_v6  ;;  %vm2130_vm13 = vweird.f32 %v2123_v6 }
 0x5c0   : > { %v5017_v43 = vpop.eup %5016 }
 0x5c1   : > { %v2125_v9 = vmul.f32 %v5017_v43, %v2123_v6  ;;  %vm2131_vm10 = vweird.f32 %v5017_v43 }
 0x5c2   : > { %vm2132_vm14 = vmor %vm2130_vm13, %vm2131_vm10 }
 0x5c3   : > { %v2126_v3 = vmul.f32 %v5017_v43, %v2125_v9 }
 0x5c5   : > { %v2127_v28 = vmul.f32 0.5, %v2126_v3 }
 0x5c7   : > { %v2128_v46 = vsub.f32 1.5, %v2127_v28 }
 0x5c9   : > { %v2129_v31 = vmul.f32 %v5017_v43, %v2128_v46 }
 0x5cb   : > { %v2133_v62 = vsel %vm2132_vm14, %v5017_v43, %v2129_v31 }
 0x5cc   : > { %v2134_v37 = vmul.f32 %v2133_v62, %v6525_v24  ;;  %v1972_v24 = vmul.f32 %v6540_v20, %v6406_v0 }
 0x5cd   : > { %v2177_v55 = vpop.permute.xlu1 %2176 }
 0x5ce   : > { %v2179_v10 = vadd.f32 %v2177_v55, %v2175_v8  ;;  %v2138_v2 = vmul.f32 %v2136_v5, %v2134_v37  ;;  %v1980_v38 = vsel %vm1434_vm1, %v1972_v24, -inf  ;;  %v1950_v5 = vmul.f32 %v6538_v15, %v6430_v19 }
 0x5d0   : > { %v2181_v27 = vpack.c.bf16 %v2179_v10, %v2179_v10  ;;  %v1976_v47 = vsel %vm1629_vm7, %v1950_v5, -inf }
 0x5d2   : > { %v2264_v18 = vunpack.c.l.b16 %v2181_v27 }
 0x5d3   : > { %v2235_v52 = vpop.xlane.xlu2 %2234 }
 0x5d4   : > { %v2265_v53 = vpack.c.b16 %v2264_v18, %v2264_v18  ;;  %v2236_v15 = vmul.f32 %v2235_v52, %v6243_v30 }
 0x5d5   : > { %v2216_v40 = vpop.permute.xlu1 %2215 }
 0x5d6   : > { %2266 = vrot.lane.b32.xlu1 %v2265_v53, %s5777_s23  ;;  %v2237_v43 = vadd.f32 1e-05, %v2236_v15 }
 0x5d8   : > { %5018 = vrsqrt.f32 %v2237_v43  ;;  %vm2244_vm4 = vweird.f32 %v2237_v43 }
 0x5db   : > { %v2212_v26 = vpop.permute.xlu2 %2211 }
 0x5dc   : > { %v2214_v32 = vmul.f32 %v2212_v26, %v2210_v33 }
 0x5dd   : > { %v2254_v61 = vpop.permute.xlu1 %2253 }
 0x5de   : > { %v2218_v54 = vadd.f32 %v2216_v40, %v2214_v32  ;;  %v5019_v4 = vpop.eup %5018 }
 0x5df   : > { %v1975_v41 = vpop.xlane.xlu0 %1974  ;;  %v2239_v48 = vmul.f32 %v5019_v4, %v2237_v43  ;;  %vm2245_vm15 = vweird.f32 %v5019_v4 }
 0x5e0   : > { %v2219_v39 = vpack.c.bf16 %v2218_v54, %v2218_v54  ;;  %vm2246_vm8 = vmor %vm2244_vm4, %vm2245_vm15 }
 0x5e1   : > { %v2240_v14 = vmul.f32 %v5019_v4, %v2239_v48 }
 0x5e2   : > { %v2289_v34 = vunpack.c.l.b16 %v2219_v39 }
 0x5e3   : > { %v2140_v49 = vpop.permute.xlu2 %2139  ;;  %v2241_v46 = vmul.f32 0.5, %v2240_v14 }
 0x5e4   : > { %v2290_v25 = vpack.c.b16 %v2289_v34, %v2289_v34  ;;  %v2142_v35 = vadd.f32 %v2140_v49, %v2138_v2 }
 0x5e5   : > { %v2242_v52 = vsub.f32 1.5, %v2241_v46 }
 0x5e6   : > { %v2180_v58 = vpack.c.bf16 %v2142_v35, %v2142_v35  ;;  %2291 = vrot.lane.b32.xlu0 %v2290_v25, %s5777_s23 }
 0x5e8   : > { %v2259_v23 = vunpack.c.l.b16 %v2180_v58 }
 0x5ea   : > { %v2260_v44 = vpack.c.b16 %v2259_v23, %v2259_v23 }
 0x5eb   : > { %v2053_v36 = vpop.permute.xlu2 %2052 }
 0x5ec   : > { %v2058_v45 = vsel %vm1702_vm11, %v2053_v36, 0  ;;  %2261 = vrot.lane.b32.xlu2 %v2260_v44, %s5777_s23 }
 0x5ed   : > { %2067 = vmatpush.bf16.msra.mxu1 %v2058_v45 }
 0x600   : > { %1981 = vmax.xlane.f32.xlu1 %v1980_v38 }
 0x615   : > { %1977 = vmax.xlane.f32.xlu2 %v1976_v47 }
 0x646   : > { %v6597_v59 = vpop.permute.xlu2 %2261 }
 0x648   : > { %v2267_v6 = vpop.permute.xlu1 %2266 }
 0x649   : > { %v2272_v56 = vsel %vm1434_vm1, %v2267_v6, 0 }
 0x64a   : > { %2281 = vmatpush.bf16.xpose.msra.mxu3 %v2272_v56 }
 0x651   : > { %4686 = vmatmul.msk.bf16.vlgmr.msra.gmra.mxu3 %vm1434_vm1, %v6597_v59 }
 0x658   : > { %v2292_v20 = vpop.permute.xlu0 %2291 }
 0x659   : > { %v2294_v60 = vsel %vm1434_vm1, %v2292_v20, 0 }
 0x65a   : > { %2303 = vmatpush.bf16.xpose.msrb.mxu0 %v2294_v60 }
 0x673   : > { %v1982_v51 = vpop.xlane.xlu1 %1981 }
 0x688   : > { %v1978_v7 = vpop.xlane.xlu2 %1977 }
 0x689   : > { %v1979_v9 = vmax.f32 %v1975_v41, %v1978_v7 }
 0x68b   : > { %v1983_v3 = vmax.f32 %v1979_v9, %v1982_v51 }
 0x68d   : > { %v1984_v8 = vsub.f32 %v6562_v63, %v1983_v3  ;;  %v1987_v55 = vsub.f32 %v1950_v5, %v1983_v3  ;;  %v1990_v10 = vsub.f32 %v1972_v24, %v1983_v3  ;;  %v2243_v63 = vmul.f32 %v5019_v4, %v2242_v52 }
 0x68f   : > { %v1991_v28 = vmul.f32 1.442695, %v1990_v10  ;;  %v1988_v27 = vmul.f32 1.442695, %v1987_v55  ;;  %v1985_v18 = vmul.f32 1.442695, %v1984_v8  ;;  %v2247_v40 = vsel %vm2246_vm8, %v5019_v4, %v2243_v63 }
 0x690   : > { %v2248_v32 = vmul.f32 %v2247_v40, %v6532_v57 }
 0x691   : > { %5020 = vpow2.f32 %v1991_v28 }
 0x692   : > { %5022 = vpow2.f32 %v1988_v27  ;;  %v2252_v37 = vmul.f32 %v6578_v42, %v2248_v32 }
 0x693   : > { %5024 = vpow2.f32 %v1985_v18 }
 0x694   : > { %v2256_v39 = vadd.f32 %v2254_v61, %v2252_v37 }
 0x696   : > { %v2257_v34 = vpack.c.bf16 %v2256_v39, %v2256_v39 }
 0x697   : > { %v5021_v29 = vpop.eup %5020 }
 0x698   : > { %v5023_v53 = vpop.eup %5022  ;;  %v2000_v22 = vsel %vm1434_vm1, %v5021_v29, 0.0  ;;  %v2311_v2 = vunpack.c.l.b16 %v2257_v34  ;;  %v6633_v60 = vmul.f32 %v5021_v29, %v6406_v0 }
 0x699   : > { %v5025_v31 = vpop.eup %5024  ;;  %2001 = vadd.xlane.f32.xlu1 %v2000_v22  ;;  %v1996_v33 = vsel %vm1629_vm7, %v5023_v53, 0.0  ;;  %v2005_v5 = vmul.f32 %v5023_v53, %v6430_v19 }
 0x69a   : > { %1997 = vadd.xlane.f32.xlu2 %v1996_v33  ;;  %v1993_v26 = vsel %vm1625_vm6, %v5025_v31, 0.0  ;;  %v6608_v62 = vmul.f32 %v5025_v31, %v6428_v17  ;;  %v2312_v49 = vpack.c.b16 %v2311_v2, %v2311_v2  ;;  %v2014_v15 = vsel %vm1434_vm1, %v6633_v60, 0.0 }
 0x69b   : > { %1994 = vadd.xlane.f32.xlu0 %v1993_v26  ;;  %v2010_v61 = vsel %vm1629_vm7, %v2005_v5, 0.0 }
 0x69c   : > { %v2007_v54 = vsel %vm1625_vm6, %v6608_v62, 0.0 }
 0x6a3   : > { %2008 = vadd.xlane.f32.xlu0 %v2007_v54 }
 0x6b2   : > { %2570 = vrot.lane.b32.xlu2 %v6239_v21, %s5779_s10  ;;  %2532 = vrot.lane.b32.xlu1 %v6235_v16, %s5779_s10 }
 0x6b7   : > { %2313 = vrot.lane.b32.xlu0 %v2312_v49, %s5777_s23 }
 0x6ba   : > { %2456 = vrot.lane.b32.xlu1 %v6227_v12, %s5779_s10 }
 0x6bf   : > { %2493 = vrot.lane.b32.xlu0 %v6229_v13, %s5779_s10 }
 0x6d4   : > { %v6623_v57 = vpop.f32.mrf.mxu3 }
 0x6d5   : > { %v6678_v2 = vmul.f32 %v6623_v57, %v6428_v17  ;;  %v6689_v57 = vld [vmem:[#allocation29] ss:$0 sm:$0xff] }
 0x6d7   : > { %v2332_v49 = vsel %vm1625_vm6, %v6678_v2, -inf }
 0x6dc   : > { %v2285_v42 = vpop.f32.mrf.mxu3 }
 0x70c   : > { %v2002_v44 = vpop.xlane.xlu1 %2001 }
 0x70d   : > { %v1998_v25 = vpop.xlane.xlu2 %1997 }
 0x70e   : > { %v1995_v23 = vpop.xlane.xlu0 %1994 }
 0x70f   : > { %v1999_v14 = vadd.f32 %v1998_v25, %v1995_v23 }
 0x711   : > { %v2003_v52 = vadd.f32 %v2002_v44, %v1999_v14 }
 0x713   : > { %v2018_v63 = vmul.f32 1e-13, %v2003_v52 }
 0x715   : > { %v2571_v35 = vpop.permute.xlu2 %2570 }
 0x716   : > { %v2573_v58 = vsel %vm1538_vm3, %v2571_v35, 0.0  ;;  %v2009_v36 = vpop.xlane.xlu0 %2008 }
 0x717   : > { %2574 = vadd.xlane.f32.xlu0 %v2573_v58 }
 0x724   : > { %v2533_v45 = vpop.permute.xlu1 %2532 }
 0x725   : > { %v2535_v24 = vsel %vm1505_vm2, %v2533_v45, 0.0  ;;  %v6694_v45 = vld [vmem:[#allocation23] ss:$0 sm:$0xff] }
 0x726   : > { %2536 = vadd.xlane.f32.xlu2 %v2535_v24  ;;  %v6701_v24 = vld [vmem:[%s7566_s25] ss:$0 sm:$0xff] }
 0x729   : > { %v2314_v38 = vpop.permute.xlu0 %2313 }
 0x72a   : > { %v2316_v47 = vsel %vm1434_vm1, %v2314_v38, 0  ;;  %v6705_v38 = vld [vmem:[#allocation21] ss:$0 sm:$0xff] }
 0x72b   : > { %2325 = vmatpush.bf16.xpose.msrb.mxu1 %v2316_v47  ;;  %v6715_v47 = vld [vmem:[#allocation27] ss:$0 sm:$0xff] }
 0x72c   : > { %v2457_v56 = vpop.permute.xlu1 %2456 }
 0x72d   : > { %v2459_v20 = vsel %vm1434_vm1, %v2457_v56, 0.0 }
 0x72e   : > { %2011 = vadd.xlane.f32.xlu2 %v2010_v61 }
 0x731   : > { %v2494_v6 = vpop.permute.xlu0 %2493 }
 0x732   : > { %v2496_v41 = vsel %vm1434_vm1, %v2494_v6, 0.0 }
 0x733   : > { %2497 = vadd.xlane.f32.xlu1 %v2496_v41  ;;  %v6723_v41 = vld [vmem:[#allocation20] ss:$0 sm:$0xff] }
 0x736   : > { %2460 = vadd.xlane.f32.xlu2 %v2459_v20  ;;  %v2076_v20 = vunpack.c.l.b16 %v6497_v1 }
 0x73b   : > { %2015 = vadd.xlane.f32.xlu1 %v2014_v15 }
 0x78a   : > { %v2575_v43 = vpop.xlane.xlu0 %2574 }
 0x78b   : > { %v2576_v4 = vmul.f32 %v2575_v43, %v6243_v30 }
 0x78d   : > { %v6639_v7 = vsub.f32 %v6239_v21, %v2576_v4  ;;  %v6728_v4 = vpack.c.b16 %v2076_v20, %v2076_v20 }
 0x78f   : > { %v2578_v9 = vmul.f32 %v6639_v7, %v6639_v7 }
 0x791   : > { %2580 = vrot.lane.b32.xlu1 %v2578_v9, %s5779_s10 }
 0x799   : > { %v2537_v48 = vpop.xlane.xlu2 %2536 }
 0x79a   : > { %v2538_v51 = vmul.f32 %v2537_v48, %v6243_v30 }
 0x79c   : > { %v6646_v3 = vsub.f32 %v6235_v16, %v2538_v51 }
 0x79e   : > { %v2540_v8 = vmul.f32 %v6646_v3, %v6646_v3 }
 0x7a0   : > { %2542 = vrot.lane.b32.xlu0 %v2540_v8, %s5779_s10 }
 0x7a1   : > { %v2012_v55 = vpop.xlane.xlu2 %2011 }
 0x7a2   : > { %v2013_v22 = vadd.f32 %v2012_v55, %v2009_v36 }
 0x7a6   : > { %v2498_v10 = vpop.xlane.xlu1 %2497 }
 0x7a7   : > { %v2499_v28 = vmul.f32 %v2498_v10, %v6243_v30 }
 0x7a9   : > { %v6653_v27 = vsub.f32 %v6229_v13, %v2499_v28  ;;  %v2461_v18 = vpop.xlane.xlu2 %2460 }
 0x7aa   : > { %v2462_v46 = vmul.f32 %v2461_v18, %v6243_v30 }
 0x7ab   : > { %v2501_v29 = vmul.f32 %v6653_v27, %v6653_v27 }
 0x7ac   : > { %v6659_v53 = vsub.f32 %v6227_v12, %v2462_v46 }
 0x7ad   : > { %2503 = vrot.lane.b32.xlu2 %v2501_v29, %s5779_s10 }
 0x7ae   : > { %v2016_v31 = vpop.xlane.xlu1 %2015  ;;  %v2464_v33 = vmul.f32 %v6659_v53, %v6659_v53 }
 0x7af   : > { %v2017_v26 = vadd.f32 %v2016_v31, %v2013_v22 }
 0x7b0   : > { %2466 = vrot.lane.b32.xlu0 %v2464_v33, %s5779_s10 }
 0x7b1   : > { %v2019_v40 = vadd.f32 %v2018_v63, %v2017_v26 }
 0x7b3   : > { %5026 = vrcp.f32 %v2019_v40 }
 0x7b9   : > { %v6665_v32 = vpop.eup %5026 }
 0x7ba   : > { %v2023_v54 = vmul.f32 %v6665_v32, %v2005_v5  ;;  %v2021_v37 = vmul.f32 %v6665_v32, %v6608_v62  ;;  %v6709_v5 = vld [vmem:[#allocation24] ss:$0 sm:$0xff] }
 0x7bc   : > { %v2024_v39 = vpack.c.bf16 %v2023_v54, %v2023_v54  ;;  %v2022_v34 = vpack.c.bf16 %v2021_v37, %v2021_v37 }
 0x7be   : > { %4683 = vmatmul.msk.bf16.vlgmr.msra.gmra.mxu0 %vm1629_vm7, %v2024_v39  ;;  %4684 = vmatmul.msk.bf16.vlgmr.msra.gmra.mxu1 %vm1625_vm6, %v2022_v34 }
 0x7ce   : > { %4687 = vmatmul.msk.bf16.vlgmr.msrb.gmra.mxu0 %vm1434_vm1, %v6597_v59  ;;  %4688 = vmatmul.msk.bf16.vlgmr.msrb.gmra.mxu1 %vm1434_vm1, %v6597_v59  ;;  %v6685_v59 = vld [vmem:[#allocation26] ss:$0 sm:$0xff] }
 0x7da   : > { %2333 = vmax.xlane.f32.xlu0 %v2332_v49 }
 0x803   : > { %v2581_v62 = vpop.permute.xlu1 %2580 }
 0x804   : > { %v2583_v42 = vsel %vm1538_vm3, %v2581_v62, 0.0 }
 0x805   : > { %2584 = vadd.xlane.f32.xlu1 %v2583_v42 }
 0x807   : > { %v2504_v25 = vpop.permute.xlu2 %2503 }
 0x808   : > { %v2506_v35 = vsel %vm1434_vm1, %v2504_v25, 0.0 }
 0x809   : > { %2507 = vadd.xlane.f32.xlu2 %v2506_v35 }
 0x812   : > { %v2543_v58 = vpop.permute.xlu0 %2542 }
 0x813   : > { %v2545_v23 = vsel %vm1505_vm2, %v2543_v58, 0.0 }
 0x814   : > { %2546 = vadd.xlane.f32.xlu0 %v2545_v23 }
 0x81e   : > { %2561 = vrot.lane.b32.xlu1 %v6685_v59, %s5780_s11 }
 0x821   : > { %2565 = vrot.lane.b32.xlu2 %v6689_v57, %s5780_s11 }
 0x822   : > { %v2467_v44 = vpop.permute.xlu0 %2466 }
 0x823   : > { %v2469_v36 = vsel %vm1434_vm1, %v2467_v44, 0.0 }
 0x824   : > { %2470 = vadd.xlane.f32.xlu0 %v2469_v36 }
 0x826   : > { %2522 = vrot.lane.b32.xlu1 %v6694_v45, %s5780_s11 }
 0x829   : > { %2603 = vrot.lane.b32.xlu2 %v6701_v24, %s5780_s11 }
 0x82e   : > { %2489 = vrot.lane.b32.xlu1 %v6705_v38, %s5780_s11 }
 0x831   : > { %2526 = vrot.lane.b32.xlu2 %v6709_v5, %s5780_s11 }
 0x836   : > { %2405 = vrot.lane.b32.xlu1 %v6573_v11, %s5777_s23 }
 0x838   : > { %2599 = vrot.lane.b32.xlu0 %v6715_v47, %s5780_s11 }
 0x839   : > { %2384 = vrot.lane.b32.xlu2 %v6551_v50, %s5777_s23 }
 0x83b   : > { %v2045_v61 = vpop.f32.mrf.mxu0  ;;  %v2069_v6 = vpop.f32.mrf.mxu1 }
 0x83c   : > { %v6721_v56 = vadd.f32 %v2069_v6, %v2045_v61 }
 0x840   : > { %2485 = vrot.lane.b32.xlu0 %v6723_v41, %s5780_s11 }
 0x843   : > { %v2047_v15 = vpop.f32.mrf.mxu0  ;;  %v2071_v43 = vpop.f32.mrf.mxu1 }
 0x848   : > { %2078 = vrot.lane.b32.xlu0 %v6728_v4, %s5774_s24  ;;  %s5781_s24 = smov 112  }
 0x84b   : > { %v2305_v9 = vpop.f32.mrf.mxu0  ;;  %v6732_v48 = vpop.f32.mrf.mxu1 }
 0x84c   : > { %v6735_v55 = vmul.f32 %v2305_v9, %v6430_v19 }
 0x84d   : > { %v6740_v18 = vpop.xlane.xlu0 %2333 }
 0x84e   : > { %v2335_v10 = vsel %vm1629_vm7, %v6735_v55, -inf }
 0x853   : > { %v2307_v51 = vpop.f32.mrf.mxu0  ;;  %v2329_v8 = vpop.f32.mrf.mxu1 }
 0x860   : > { %2336 = vmax.xlane.f32.xlu1 %v2335_v10 }
 0x878   : > { %v2585_v28 = vpop.xlane.xlu1 %2584 }
 0x879   : > { %v2586_v52 = vmul.f32 %v2585_v28, %v6243_v30 }
 0x87b   : > { %v2587_v29 = vadd.f32 1e-05, %v2586_v52 }
 0x87c   : > { %v2508_v1 = vpop.xlane.xlu2 %2507 }
 0x87d   : > { %v2509_v14 = vmul.f32 %v2508_v1, %v6243_v30 }
 0x87f   : > { %v2510_v46 = vadd.f32 1e-05, %v2509_v14 }
 0x881   : > { %5028 = vrsqrt.f32 %v2510_v46  ;;  %vm2517_vm10 = vweird.f32 %v2510_v46 }
 0x882   : > { %5030 = vrsqrt.f32 %v2587_v29 }
 0x884   : > { %v2566_v39 = vpop.permute.xlu2 %2565 }
 0x887   : > { %v5029_v22 = vpop.eup %5028  ;;  %v2547_v31 = vpop.xlane.xlu0 %2546 }
 0x888   : > { %v2512_v33 = vmul.f32 %v5029_v22, %v2510_v46  ;;  %v2548_v63 = vmul.f32 %v2547_v31, %v6243_v30  ;;  %v5031_v54 = vpop.eup %5030  ;;  %vm2518_vm9 = vweird.f32 %v5029_v22 }
 0x889   : > { %v2589_v62 = vmul.f32 %v5031_v54, %v2587_v29  ;;  %vm2519_vm14 = vmor %vm2517_vm10, %vm2518_vm9  ;;  %vm2595_vm8 = vweird.f32 %v5031_v54  ;;  %vm2594_vm9 = vweird.f32 %v2587_v29 }
 0x88a   : > { %v2549_v26 = vadd.f32 1e-05, %v2548_v63  ;;  %v2513_v40 = vmul.f32 %v5029_v22, %v2512_v33  ;;  %vm2596_vm10 = vmor %vm2594_vm9, %vm2595_vm8 }
 0x88b   : > { %v2590_v58 = vmul.f32 %v5031_v54, %v2589_v62 }
 0x88c   : > { %5032 = vrsqrt.f32 %v2549_v26  ;;  %v2514_v37 = vmul.f32 0.5, %v2513_v40  ;;  %v2604_v15 = vpop.permute.xlu2 %2603  ;;  %vm2556_vm15 = vweird.f32 %v2549_v26 }
 0x88d   : > { %v2591_v43 = vmul.f32 0.5, %v2590_v58 }
 0x88e   : > { %v2515_v42 = vsub.f32 1.5, %v2514_v37 }
 0x88f   : > { %v2592_v1 = vsub.f32 1.5, %v2591_v43 }
 0x890   : > { %v2562_v34 = vpop.permute.xlu1 %2561  ;;  %v2516_v44 = vmul.f32 %v5029_v22, %v2515_v42 }
 0x891   : > { %v2593_v40 = vmul.f32 %v5031_v54, %v2592_v1 }
 0x892   : > { %v5033_v49 = vpop.eup %5032  ;;  %v2520_v8 = vsel %vm2519_vm14, %v5029_v22, %v2516_v44 }
 0x893   : > { %v2551_v25 = vmul.f32 %v5033_v49, %v2549_v26  ;;  %vm2557_vm13 = vweird.f32 %v5033_v49  ;;  %v2521_v28 = vmul.f32 %v2520_v8, %v6653_v27 }
 0x894   : > { %vm2558_vm4 = vmor %vm2556_vm15, %vm2557_vm13  ;;  %v2527_v37 = vpop.permute.xlu2 %2526 }
 0x895   : > { %v2552_v35 = vmul.f32 %v5033_v49, %v2551_v25  ;;  %v2597_v25 = vsel %vm2596_vm10, %v5031_v54, %v2593_v40 }
 0x897   : > { %v2553_v23 = vmul.f32 0.5, %v2552_v35  ;;  %v2471_v36 = vpop.xlane.xlu0 %2470 }
 0x898   : > { %v2523_v61 = vpop.permute.xlu1 %2522  ;;  %v2472_v6 = vmul.f32 %v2471_v36, %v6243_v30 }
 0x899   : > { %v2554_v20 = vsub.f32 1.5, %v2553_v23  ;;  %v2525_v31 = vmul.f32 %v2523_v61, %v2521_v28 }
 0x89a   : > { %v2473_v9 = vadd.f32 1e-05, %v2472_v6 }
 0x89b   : > { %v2555_v51 = vmul.f32 %v5033_v49, %v2554_v20  ;;  %v2529_v22 = vadd.f32 %v2527_v37, %v2525_v31 }
 0x89c   : > { %5034 = vrsqrt.f32 %v2473_v9  ;;  %vm2480_vm14 = vweird.f32 %v2473_v9 }
 0x89d   : > { %v2559_v10 = vsel %vm2558_vm4, %v5033_v49, %v2555_v51 }
 0x89e   : > { %v2560_v14 = vmul.f32 %v2559_v10, %v6646_v3  ;;  %v2531_v3 = vpack.c.bf16 %v2529_v22, %v2529_v22 }
 0x8a0   : > { %v2564_v52 = vmul.f32 %v2562_v34, %v2560_v14  ;;  %v2490_v46 = vpop.permute.xlu1 %2489  ;;  %v2614_v61 = vunpack.c.l.b16 %v2531_v3 }
 0x8a2   : > { %v5035_v33 = vpop.eup %5034  ;;  %v2568_v63 = vadd.f32 %v2566_v39, %v2564_v52  ;;  %v2598_v39 = vmul.f32 %v2597_v25, %v6639_v7  ;;  %v2615_v43 = vpack.c.b16 %v2614_v61, %v2614_v61  ;;  %v2385_v52 = vpop.permute.xlu2 %2384 }
 0x8a3   : > { %v2475_v62 = vmul.f32 %v5035_v33, %v2473_v9  ;;  %vm2481_vm13 = vweird.f32 %v5035_v33 }
 0x8a4   : > { %v2569_v26 = vpack.c.bf16 %v2568_v63, %v2568_v63  ;;  %vm2482_vm15 = vmor %vm2480_vm14, %vm2481_vm13 }
 0x8a5   : > { %v2476_v42 = vmul.f32 %v5035_v33, %v2475_v62 }
 0x8a6   : > { %v2639_v49 = vunpack.c.l.b16 %v2569_v26 }
 0x8a7   : > { %v2477_v35 = vmul.f32 0.5, %v2476_v42 }
 0x8a8   : > { %v2406_v58 = vpop.permute.xlu1 %2405  ;;  %v2640_v27 = vpack.c.b16 %v2639_v49, %v2639_v49 }
 0x8a9   : > { %v2478_v34 = vsub.f32 1.5, %v2477_v35  ;;  %v2411_v23 = vsel %vm1702_vm11, %v2406_v58, 0 }
 0x8aa   : > { %2420 = vmatpush.bf16.msrb.mxu3 %v2411_v23  ;;  %2641 = vrot.lane.b32.xlu0 %v2640_v27, %s5779_s10  ;;  %v2600_v44 = vpop.permute.xlu0 %2599 }
 0x8ab   : > { %v2602_v29 = vmul.f32 %v2600_v44, %v2598_v39  ;;  %v2479_v36 = vmul.f32 %v5035_v33, %v2478_v34 }
 0x8ad   : > { %v2606_v6 = vadd.f32 %v2604_v15, %v2602_v29  ;;  %v2483_v54 = vsel %vm2482_vm15, %v5035_v33, %v2479_v36  ;;  %v2073_v15 = vmul.f32 %v6665_v32, %v6633_v60  ;;  %v2331_v60 = vmul.f32 %v6732_v48, %v6406_v0 }
 0x8ae   : > { %v2484_v51 = vmul.f32 %v2483_v54, %v6659_v53  ;;  %v2390_v53 = vsel %vm1682_vm5, %v2385_v52, 0 }
 0x8af   : > { %v2607_v20 = vpack.c.bf16 %v2606_v6, %v2606_v6  ;;  %v2339_v32 = vsel %vm1434_vm1, %v2331_v60, -inf }
 0x8b1   : > { %v2661_v8 = vunpack.c.l.b16 %v2607_v20 }
 0x8b2   : > { %2616 = vrot.lane.b32.xlu0 %v2615_v43, %s5779_s10  ;;  %v2486_v7 = vpop.permute.xlu0 %2485 }
 0x8b3   : > { %v2488_v10 = vmul.f32 %v2486_v7, %v2484_v51  ;;  %v2662_v1 = vpack.c.b16 %v2661_v8, %v2661_v8 }
 0x8b5   : > { %v2492_v14 = vadd.f32 %v2490_v46, %v2488_v10  ;;  %2663 = vrot.lane.b32.xlu2 %v2662_v1, %s5779_s10  ;;  %v2074_v46 = vpack.c.bf16 %v2073_v15, %v2073_v15 }
 0x8b7   : > { %v2530_v28 = vpack.c.bf16 %v2492_v14, %v2492_v14 }
 0x8b9   : > { %v2609_v9 = vunpack.c.l.b16 %v2530_v28 }
 0x8ba   : > { %v2079_v31 = vpop.permute.xlu0 %2078 }
 0x8bb   : > { %v2084_v33 = vsel %vm1724_vm12, %v2079_v31, 0  ;;  %v2610_v63 = vpack.c.b16 %v2609_v9, %v2609_v9 }
 0x8bc   : > { %2093 = vmatpush.bf16.msra.mxu2 %v2084_v33 }
 0x8bd   : > { %2843 = vrot.lane.b32.xlu2 %v6229_v13, %s5781_s24  ;;  %2611 = vrot.lane.b32.xlu1 %v2610_v63, %s5779_s10 }
 0x8bf   : > { %4685 = vmatmul.msk.bf16.vlgmr.msra.gmra.mxu2 %vm1434_vm1, %v2074_v46 }
 0x8c0   : > { %2399 = vmatpush.bf16.msrb.mxu2 %v2390_v53 }
 0x8d3   : > { %v2337_v49 = vpop.xlane.xlu1 %2336 }
 0x8d4   : > { %v2338_v27 = vmax.f32 %v6740_v18, %v2337_v49 }
 0x8e6   : > { %2340 = vmax.xlane.f32.xlu2 %v2339_v32 }
 0x90f   : > { %v2664_v40 = vpop.permute.xlu2 %2663 }
 0x910   : > { %v2666_v37 = vsel %vm1434_vm1, %v2664_v40, 0 }
 0x911   : > { %2675 = vmatpush.bf16.xpose.msra.mxu3 %v2666_v37 }
 0x917   : > { %v2844_v58 = vpop.permute.xlu2 %2843 }
 0x918   : > { %v2846_v28 = vsel %vm1434_vm1, %v2844_v58, 0.0 }
 0x91c   : > { %v2642_v62 = vpop.permute.xlu0 %2641 }
 0x91d   : > { %v2644_v26 = vsel %vm1434_vm1, %v2642_v62, 0 }
 0x91e   : > { %2653 = vmatpush.bf16.xpose.msra.mxu2 %v2644_v26 }
 0x924   : > { %v2617_v22 = vpop.permute.xlu0 %2616 }
 0x925   : > { %v2622_v42 = vsel %vm1434_vm1, %v2617_v22, 0 }
 0x926   : > { %2631 = vmatpush.bf16.xpose.msra.mxu1 %v2622_v42 }
 0x92f   : > { %v6767_v25 = vpop.permute.xlu1 %2611 }
 0x930   : > { %4692 = vmatmul.msk.bf16.vlgmr.msra.gmra.mxu1 %vm1434_vm1, %v6767_v25 }
 0x942   : > { %v2095_v48 = vpop.f32.mrf.mxu2 }
 0x943   : > { %v6772_v35 = vadd.f32 %v2095_v48, %v6721_v56 }
 0x94a   : > { %v2097_v3 = vpop.f32.mrf.mxu2 }
 0x959   : > { %v2341_v34 = vpop.xlane.xlu2 %2340 }
 0x95a   : > { %v2342_v23 = vmax.f32 %v2338_v27, %v2341_v34 }
 0x95c   : > { %v2343_v39 = vsub.f32 %v6678_v2, %v2342_v23  ;;  %v2346_v44 = vsub.f32 %v6735_v55, %v2342_v23  ;;  %v2349_v29 = vsub.f32 %v2331_v60, %v2342_v23 }
 0x95e   : > { %v2344_v36 = vmul.f32 1.442695, %v2343_v39  ;;  %v2347_v61 = vmul.f32 1.442695, %v2346_v44  ;;  %v2350_v6 = vmul.f32 1.442695, %v2349_v29 }
 0x960   : > { %5036 = vpow2.f32 %v2344_v36 }
 0x961   : > { %5038 = vpow2.f32 %v2347_v61 }
 0x962   : > { %5040 = vpow2.f32 %v2350_v6 }
 0x966   : > { %v5037_v54 = vpop.eup %5036 }
 0x967   : > { %v5039_v56 = vpop.eup %5038  ;;  %v2352_v20 = vsel %vm1625_vm6, %v5037_v54, 0.0  ;;  %v2363_v2 = vmul.f32 %v5037_v54, %v6428_v17 }
 0x968   : > { %v5041_v43 = vpop.eup %5040  ;;  %v2355_v18 = vsel %vm1629_vm7, %v5039_v56, 0.0  ;;  %2353 = vadd.xlane.f32.xlu2 %v2352_v20  ;;  %v2364_v55 = vmul.f32 %v5039_v56, %v6430_v19 }
 0x969   : > { %v2359_v51 = vsel %vm1434_vm1, %v5041_v43, 0.0  ;;  %2356 = vadd.xlane.f32.xlu1 %v2355_v18  ;;  %v6783_v8 = vmul.f32 %v5041_v43, %v6406_v0  ;;  %v2366_v7 = vsel %vm1625_vm6, %v2363_v2, 0.0 }
 0x96a   : > { %2360 = vadd.xlane.f32.xlu0 %v2359_v51  ;;  %v2369_v10 = vsel %vm1629_vm7, %v2364_v55, 0.0 }
 0x96b   : > { %v2373_v1 = vsel %vm1434_vm1, %v6783_v8, 0.0 }
 0x970   : > { %2367 = vadd.xlane.f32.xlu2 %v2366_v7 }
 0x971   : > { %2370 = vadd.xlane.f32.xlu1 %v2369_v10 }
 0x972   : > { %2374 = vadd.xlane.f32.xlu0 %v2373_v1 }
 0x986   : > { %2882 = vrot.lane.b32.xlu0 %v6235_v16, %s5781_s24 }
 0x988   : > { %2920 = vrot.lane.b32.xlu2 %v6239_v21, %s5781_s24 }
 0x98a   : > { %2806 = vrot.lane.b32.xlu1 %v6227_v12, %s5781_s24 }
 0x9ad   : > { %v6795_v14 = vpop.f32.mrf.mxu1 }
 0x9b0   : > { %2847 = vadd.xlane.f32.xlu0 %v2846_v28 }
 0x9b5   : > { %v2635_v52 = vpop.f32.mrf.mxu1 }
 0x9db   : > { %v2354_v9 = vpop.xlane.xlu2 %2353 }
 0x9dc   : > { %v2357_v15 = vpop.xlane.xlu1 %2356 }
 0x9dd   : > { %v2361_v31 = vpop.xlane.xlu0 %2360  ;;  %v2358_v33 = vadd.f32 %v2357_v15, %v2354_v9 }
 0x9df   : > { %v2362_v63 = vadd.f32 %v2361_v31, %v2358_v33 }
 0x9e1   : > { %v2377_v40 = vmul.f32 1e-13, %v2362_v63 }
 0x9e3   : > { %v2368_v53 = vpop.xlane.xlu2 %2367 }
 0x9e4   : > { %v2371_v46 = vpop.xlane.xlu1 %2370 }
 0x9e5   : > { %v2372_v60 = vadd.f32 %v2371_v46, %v2368_v53  ;;  %v2375_v32 = vpop.xlane.xlu0 %2374  ;;  %v6847_v46 = vmul.f32 %v6795_v14, %v6428_v17 }
 0x9e7   : > { %v2376_v37 = vadd.f32 %v2375_v32, %v2372_v60  ;;  %v2682_v60 = vsel %vm1625_vm6, %v6847_v46, -inf }
 0x9e9   : > { %v2378_v62 = vadd.f32 %v2377_v40, %v2376_v37 }
 0x9eb   : > { %5042 = vrcp.f32 %v2378_v62  ;;  %v2921_v26 = vpop.permute.xlu2 %2920 }
 0x9ec   : > { %v2923_v22 = vsel %vm1538_vm3, %v2921_v26, 0.0 }
 0x9ed   : > { %2924 = vadd.xlane.f32.xlu0 %v2923_v22 }
 0x9f1   : > { %v6799_v42 = vpop.eup %5042 }
 0x9f2   : > { %v2382_v49 = vmul.f32 %v6799_v42, %v2364_v55  ;;  %v2380_v48 = vmul.f32 %v6799_v42, %v2363_v2 }
 0x9f4   : > { %v2383_v3 = vpack.c.bf16 %v2382_v49, %v2382_v49  ;;  %v2381_v58 = vpack.c.bf16 %v2380_v48, %v2380_v48 }
 0x9f6   : > { %4689 = vmatmul.msk.bf16.vlgmr.msrb.gmra.mxu2 %vm1629_vm7, %v2383_v3  ;;  %4690 = vmatmul.msk.bf16.vlgmr.msrb.gmra.mxu3 %vm1625_vm6, %v2381_v58 }
 0x9f8   : > { %v2883_v27 = vpop.permute.xlu0 %2882 }
 0x9f9   : > { %v2885_v34 = vsel %vm1505_vm2, %v2883_v27, 0.0 }
 0x9fa   : > { %2886 = vadd.xlane.f32.xlu1 %v2885_v34 }
 0x9fc   : > { %v2807_v23 = vpop.permute.xlu1 %2806 }
 0x9fd   : > { %v2809_v39 = vsel %vm1434_vm1, %v2807_v23, 0.0 }
 0x9fe   : > { %2810 = vadd.xlane.f32.xlu2 %v2809_v39 }
 0xa06   : > { %4693 = vmatmul.msk.bf16.vlgmr.msra.gmra.mxu2 %vm1434_vm1, %v6767_v25  ;;  %4694 = vmatmul.msk.bf16.vlgmr.msra.gmra.mxu3 %vm1434_vm1, %v6767_v25 }
 0xa23   : > { %v2848_v44 = vpop.xlane.xlu0 %2847 }
 0xa24   : > { %v2849_v29 = vmul.f32 %v2848_v44, %v6243_v30 }
 0xa26   : > { %v6813_v36 = vsub.f32 %v6229_v13, %v2849_v29 }
 0xa28   : > { %v2851_v61 = vmul.f32 %v6813_v36, %v6813_v36 }
 0xa2a   : > { %2853 = vrot.lane.b32.xlu1 %v2851_v61, %s5781_s24 }
 0xa60   : > { %v2925_v6 = vpop.xlane.xlu0 %2924 }
 0xa61   : > { %v2926_v54 = vmul.f32 %v2925_v6, %v6243_v30 }
 0xa63   : > { %v6820_v56 = vsub.f32 %v6239_v21, %v2926_v54 }
 0xa65   : > { %v2928_v25 = vmul.f32 %v6820_v56, %v6820_v56 }
 0xa67   : > { %2930 = vrot.lane.b32.xlu1 %v2928_v25, %s5781_s24 }
 0xa6d   : > { %v2887_v20 = vpop.xlane.xlu1 %2886 }
 0xa6e   : > { %v2888_v43 = vmul.f32 %v2887_v20, %v6243_v30 }
 0xa70   : > { %v6827_v18 = vsub.f32 %v6235_v16, %v2888_v43 }
 0xa71   : > { %v2811_v51 = vpop.xlane.xlu2 %2810 }
 0xa72   : > { %v2812_v2 = vmul.f32 %v2811_v51, %v6243_v30  ;;  %v2890_v55 = vmul.f32 %v6827_v18, %v6827_v18 }
 0xa74   : > { %v6833_v7 = vsub.f32 %v6227_v12, %v2812_v2  ;;  %2892 = vrot.lane.b32.xlu2 %v2890_v55, %s5781_s24 }
 0xa76   : > { %v2814_v10 = vmul.f32 %v6833_v7, %v6833_v7 }
 0xa78   : > { %2816 = vrot.lane.b32.xlu0 %v2814_v10, %s5781_s24 }
 0xa79   : > { %v2401_v1 = vpop.f32.mrf.mxu2  ;;  %v2422_v28 = vpop.f32.mrf.mxu3 }
 0xa7a   : > { %v6839_v52 = vadd.f32 %v2422_v28, %v2401_v1 }
 0xa81   : > { %v2403_v9 = vpop.f32.mrf.mxu2  ;;  %v2424_v15 = vpop.f32.mrf.mxu3 }
 0xa89   : > { %v6841_v31 = vpop.f32.mrf.mxu2  ;;  %v6843_v33 = vpop.f32.mrf.mxu3 }
 0xa91   : > { %v2657_v63 = vpop.f32.mrf.mxu2  ;;  %v2679_v53 = vpop.f32.mrf.mxu3 }
 0xa9c   : > { %v2854_v32 = vpop.permute.xlu1 %2853 }
 0xa9d   : > { %v2856_v40 = vsel %vm1434_vm1, %v2854_v32, 0.0 }
 0xaa2   : > { %2683 = vmax.xlane.f32.xlu0 %v2682_v60 }
 0xaaa   : > { %2857 = vadd.xlane.f32.xlu0 %v2856_v40 }
 0xace   : > { %v2893_v37 = vpop.permute.xlu2 %2892 }
 0xacf   : > { %v2895_v62 = vsel %vm1505_vm2, %v2893_v37, 0.0 }
 0xad0   : > { %2896 = vadd.xlane.f32.xlu2 %v2895_v62 }
 0xad9   : > { %v2931_v26 = vpop.permute.xlu1 %2930 }
 0xada   : > { %v2933_v22 = vsel %vm1538_vm3, %v2931_v26, 0.0 }
 0xadb   : > { %2934 = vadd.xlane.f32.xlu0 %v2933_v22 }
 0xae8   : > { %2872 = vrot.lane.b32.xlu2 %v6694_v45, %s5782_s17 }
 0xaea   : > { %v2817_v14 = vpop.permute.xlu0 %2816 }
 0xaeb   : > { %v2819_v49 = vsel %vm1434_vm1, %v2817_v14, 0.0 }
 0xaec   : > { %2820 = vadd.xlane.f32.xlu1 %v2819_v49 }
 0xaef   : > { %2911 = vrot.lane.b32.xlu0 %v6685_v59, %s5782_s17 }
 0xaf0   : > { %2835 = vrot.lane.b32.xlu2 %v6723_v41, %s5782_s17 }
 0xaf7   : > { %2915 = vrot.lane.b32.xlu0 %v6689_v57, %s5782_s17 }
 0xaf8   : > { %2839 = vrot.lane.b32.xlu2 %v6705_v38, %s5782_s17 }
 0xaff   : > { %2953 = vrot.lane.b32.xlu0 %v6701_v24, %s5782_s17 }
 0xb00   : > { %2734 = vrot.lane.b32.xlu2 %v6551_v50, %s5779_s10 }
 0xb05   : > { %2876 = vrot.lane.b32.xlu1 %v6709_v5, %s5782_s17 }
 0xb07   : > { %2755 = vrot.lane.b32.xlu0 %v6573_v11, %s5779_s10 }
 0xb0d   : > { %2949 = vrot.lane.b32.xlu1 %v6715_v47, %s5782_s17 }
 0xb15   : > { %2428 = vrot.lane.b32.xlu1 %v6728_v4, %s5777_s23  ;;  %v6877_v41 = vpop.xlane.xlu0 %2683 }
 0xb1d   : > { %v2858_v27 = vpop.xlane.xlu0 %2857 }
 0xb1e   : > { %v2859_v34 = vmul.f32 %v2858_v27, %v6243_v30 }
 0xb20   : > { %v2860_v44 = vadd.f32 1e-05, %v2859_v34 }
 0xb22   : > { %vm2867_vm13 = vweird.f32 %v2860_v44 }
 0xb43   : > { %v2897_v48 = vpop.xlane.xlu2 %2896 }
 0xb44   : > { %v2898_v3 = vmul.f32 %v2897_v48, %v6243_v30 }
 0xb46   : > { %v2899_v58 = vadd.f32 1e-05, %v2898_v3 }
 0xb48   : > { %5044 = vrsqrt.f32 %v2899_v58  ;;  %vm2906_vm8 = vweird.f32 %v2899_v58 }
 0xb49   : > { %5046 = vrsqrt.f32 %v2860_v44 }
 0xb4b   : > { %v2873_v53 = vpop.permute.xlu2 %2872 }
 0xb4e   : > { %v5045_v23 = vpop.eup %5044  ;;  %v2935_v61 = vpop.xlane.xlu0 %2934 }
 0xb4f   : > { %v2901_v39 = vmul.f32 %v5045_v23, %v2899_v58  ;;  %v2936_v47 = vmul.f32 %v2935_v61, %v6243_v30  ;;  %v5047_v54 = vpop.eup %5046  ;;  %vm2907_vm4 = vweird.f32 %v5045_v23 }
 0xb50   : > { %v2862_v43 = vmul.f32 %v5047_v54, %v2860_v44  ;;  %vm2908_vm9 = vmor %vm2906_vm8, %vm2907_vm4  ;;  %vm2868_vm10 = vweird.f32 %v5047_v54 }
 0xb51   : > { %v2902_v29 = vmul.f32 %v5045_v23, %v2901_v39  ;;  %v2937_v25 = vadd.f32 1e-05, %v2936_v47  ;;  %vm2869_vm14 = vmor %vm2867_vm13, %vm2868_vm10 }
 0xb52   : > { %v2863_v10 = vmul.f32 %v5047_v54, %v2862_v43 }
 0xb53   : > { %v2903_v6 = vmul.f32 0.5, %v2902_v29  ;;  %5048 = vrsqrt.f32 %v2937_v25  ;;  %vm2944_vm10 = vweird.f32 %v2937_v25 }
 0xb54   : > { %v2864_v63 = vmul.f32 0.5, %v2863_v10 }
 0xb55   : > { %v2904_v20 = vsub.f32 1.5, %v2903_v6 }
 0xb56   : > { %v2865_v37 = vsub.f32 1.5, %v2864_v63 }
 0xb57   : > { %v2905_v2 = vmul.f32 %v5045_v23, %v2904_v20 }
 0xb58   : > { %v2866_v3 = vmul.f32 %v5047_v54, %v2865_v37 }
 0xb59   : > { %v2909_v9 = vsel %vm2908_vm9, %v5045_v23, %v2905_v2  ;;  %v5049_v15 = vpop.eup %5048  ;;  %v2836_v23 = vpop.permute.xlu2 %2835 }
 0xb5a   : > { %v2910_v60 = vmul.f32 %v2909_v9, %v6827_v18  ;;  %v2939_v32 = vmul.f32 %v5049_v15, %v2937_v25  ;;  %v2870_v18 = vsel %vm2869_vm14, %v5047_v54, %v2866_v3  ;;  %vm2945_vm9 = vweird.f32 %v5049_v15 }
 0xb5b   : > { %v2871_v43 = vmul.f32 %v2870_v18, %v6813_v36  ;;  %vm2946_vm13 = vmor %vm2944_vm10, %vm2945_vm9 }
 0xb5c   : > { %v2940_v14 = vmul.f32 %v5049_v15, %v2939_v32 }
 0xb5d   : > { %v2875_v2 = vmul.f32 %v2873_v53, %v2871_v43 }
 0xb5e   : > { %v2941_v34 = vmul.f32 0.5, %v2940_v14 }
 0xb5f   : > { %v2821_v51 = vpop.xlane.xlu1 %2820 }
 0xb60   : > { %v2822_v55 = vmul.f32 %v2821_v51, %v6243_v30  ;;  %v2942_v6 = vsub.f32 1.5, %v2941_v34 }
 0xb61   : > { %v2912_v1 = vpop.permute.xlu0 %2911  ;;  %v2840_v9 = vpop.permute.xlu2 %2839 }
 0xb62   : > { %v2823_v28 = vadd.f32 1e-05, %v2822_v55  ;;  %v2914_v40 = vmul.f32 %v2912_v1, %v2910_v60  ;;  %v2943_v10 = vmul.f32 %v5049_v15, %v2942_v6 }
 0xb64   : > { %5050 = vrsqrt.f32 %v2823_v28  ;;  %vm2830_vm4 = vweird.f32 %v2823_v28  ;;  %v2947_v36 = vsel %vm2946_vm13, %v5049_v15, %v2943_v10  ;;  %v2426_v15 = vmul.f32 %v6799_v42, %v6783_v8 }
 0xb65   : > { %v2659_v8 = vmul.f32 %v6841_v31, %v6430_v19 }
 0xb67   : > { %v2685_v42 = vsel %vm1629_vm7, %v2659_v8, -inf }
 0xb69   : > { %v2916_v62 = vpop.permute.xlu0 %2915 }
 0xb6a   : > { %v5051_v26 = vpop.eup %5050  ;;  %v2918_v22 = vadd.f32 %v2916_v62, %v2914_v40 }
 0xb6b   : > { %v2825_v49 = vmul.f32 %v5051_v26, %v2823_v28  ;;  %vm2831_vm15 = vweird.f32 %v5051_v26 }
 0xb6c   : > { %v2919_v48 = vpack.c.bf16 %v2918_v22, %v2918_v22  ;;  %vm2832_vm8 = vmor %vm2830_vm4, %vm2831_vm15 }
 0xb6d   : > { %v2826_v58 = vmul.f32 %v5051_v26, %v2825_v49 }
 0xb6e   : > { %v2989_v27 = vunpack.c.l.b16 %v2919_v48  ;;  %v2735_v48 = vpop.permute.xlu2 %2734 }
 0xb6f   : > { %v2827_v39 = vmul.f32 0.5, %v2826_v58 }
 0xb70   : > { %v2990_v29 = vpack.c.b16 %v2989_v27, %v2989_v27 }
 0xb71   : > { %v2828_v61 = vsub.f32 1.5, %v2827_v39  ;;  %v2954_v47 = vpop.permute.xlu0 %2953  ;;  %v2681_v39 = vmul.f32 %v6843_v33, %v6406_v0 }
 0xb72   : > { %2991 = vrot.lane.b32.xlu0 %v2990_v29, %s5781_s24 }
 0xb73   : > { %v2829_v20 = vmul.f32 %v5051_v26, %v2828_v61  ;;  %v2689_v29 = vsel %vm1434_vm1, %v2681_v39, -inf }
 0xb75   : > { %v2833_v51 = vsel %vm2832_vm8, %v5051_v26, %v2829_v20 }
 0xb76   : > { %v2834_v44 = vmul.f32 %v2833_v51, %v6833_v7  ;;  %v2948_v7 = vmul.f32 %v2947_v36, %v6820_v56  ;;  %v2740_v56 = vsel %vm1682_vm5, %v2735_v48, 0 }
 0xb77   : > { %v2877_v55 = vpop.permute.xlu1 %2876 }
 0xb78   : > { %v2879_v1 = vadd.f32 %v2877_v55, %v2875_v2  ;;  %v2838_v54 = vmul.f32 %v2836_v23, %v2834_v44  ;;  %v2427_v23 = vpack.c.bf16 %v2426_v15, %v2426_v15 }
 0xb79   : > { %v2756_v63 = vpop.permute.xlu0 %2755 }
 0xb7a   : > { %v2881_v60 = vpack.c.bf16 %v2879_v1, %v2879_v1  ;;  %v2761_v32 = vsel %vm1702_vm11, %v2756_v63, 0  ;;  %v2842_v28 = vadd.f32 %v2840_v9, %v2838_v54 }
 0xb7b   : > { %2770 = vmatpush.bf16.msrb.mxu1 %v2761_v32 }
 0xb7c   : > { %v2964_v40 = vunpack.c.l.b16 %v2881_v60  ;;  %v2880_v37 = vpack.c.bf16 %v2842_v28, %v2842_v28 }
 0xb7e   : > { %v2965_v53 = vpack.c.b16 %v2964_v40, %v2964_v40  ;;  %v2959_v62 = vunpack.c.l.b16 %v2880_v37 }
 0xb7f   : > { %v2950_v26 = vpop.permute.xlu1 %2949 }
 0xb80   : > { %v2952_v22 = vmul.f32 %v2950_v26, %v2948_v7  ;;  %2966 = vrot.lane.b32.xlu1 %v2965_v53, %s5781_s24  ;;  %v2960_v25 = vpack.c.b16 %v2959_v62, %v2959_v62 }
 0xb82   : > { %v2956_v14 = vadd.f32 %v2954_v47, %v2952_v22  ;;  %2961 = vrot.lane.b32.xlu2 %v2960_v25, %s5781_s24 }
 0xb84   : > { %v2957_v49 = vpack.c.bf16 %v2956_v14, %v2956_v14 }
 0xb86   : > { %v3011_v3 = vunpack.c.l.b16 %v2957_v49 }
 0xb87   : > { %v2429_v58 = vpop.permute.xlu1 %2428 }
 0xb88   : > { %v3012_v27 = vpack.c.b16 %v3011_v3, %v3011_v3  ;;  %v2434_v34 = vsel %vm1724_vm12, %v2429_v58, 0  ;;  %3270 = vrot.lane.b32.xlu1 %v6239_v21, %s5783_s8 }
 0xb89   : > { %2443 = vmatpush.bf16.msra.mxu0 %v2434_v34 }
 0xb8a   : > { %3013 = vrot.lane.b32.xlu0 %v3012_v27, %s5781_s24 }
 0xb8c   : > { %4691 = vmatmul.msk.bf16.vlgmr.msra.gmra.mxu0 %vm1434_vm1, %v2427_v23 }
 0xb8d   : > { %2749 = vmatpush.bf16.msrb.mxu0 %v2740_v56 }
 0xb92   : > { %3193 = vrot.lane.b32.xlu0 %v6229_v13, %s5783_s8 }
 0xbab   : > { %2686 = vmax.xlane.f32.xlu2 %v2685_v42 }
 0xbb2   : > { %2690 = vmax.xlane.f32.xlu1 %v2689_v29 }
 0xbc3   : > { %3232 = vrot.lane.b32.xlu2 %v6235_v16, %s5783_s8 }
 0xbdc   : > { %v6911_v31 = vpop.permute.xlu2 %2961 }
 0xbe4   : > { %v2992_v18 = vpop.permute.xlu0 %2991 }
 0xbe5   : > { %v2994_v61 = vsel %vm1434_vm1, %v2992_v18, 0 }
 0xbe6   : > { %3003 = vmatpush.bf16.xpose.msra.mxu0 %v2994_v61 }
 0xbf2   : > { %v2967_v47 = vpop.permute.xlu1 %2966 }
 0xbf3   : > { %v2972_v6 = vsel %vm1434_vm1, %v2967_v47, 0 }
 0xbf4   : > { %2981 = vmatpush.bf16.xpose.msrb.mxu3 %v2972_v6 }
 0xbfa   : > { %v3271_v44 = vpop.permute.xlu1 %3270 }
 0xbfb   : > { %4698 = vmatmul.msk.bf16.vlgmr.msrb.gmra.mxu3 %vm1434_vm1, %v6911_v31  ;;  %v3273_v22 = vsel %vm1538_vm3, %v3271_v44, 0.0 }
 0xbfc   : > { %v3014_v33 = vpop.permute.xlu0 %3013 }
 0xbfd   : > { %v3016_v20 = vsel %vm1434_vm1, %v3014_v33, 0 }
 0xbfe   : > { %3025 = vmatpush.bf16.xpose.msra.mxu1 %v3016_v20 }
 0xc04   : > { %v3194_v48 = vpop.permute.xlu0 %3193 }
 0xc05   : > { %v3196_v3 = vsel %vm1434_vm1, %v3194_v48, 0.0 }
 0xc09   : > { %v2445_v43 = vpop.f32.mrf.mxu0 }
 0xc0a   : > { %v6917_v51 = vadd.f32 %v2445_v43, %v6839_v52 }
 0xc11   : > { %v2447_v2 = vpop.f32.mrf.mxu0 }
 0xc1e   : > { %v2687_v55 = vpop.xlane.xlu2 %2686 }
 0xc1f   : > { %v2688_v10 = vmax.f32 %v6877_v41, %v2687_v55 }
 0xc25   : > { %v2691_v1 = vpop.xlane.xlu1 %2690 }
 0xc26   : > { %v2692_v54 = vmax.f32 %v2688_v10, %v2691_v1  ;;  %v3233_v62 = vpop.permute.xlu2 %3232 }
 0xc27   : > { %v3235_v25 = vsel %vm1505_vm2, %v3233_v62, 0.0 }
 0xc28   : > { %v2693_v9 = vsub.f32 %v6847_v46, %v2692_v54  ;;  %v2696_v63 = vsub.f32 %v2659_v8, %v2692_v54  ;;  %v2699_v60 = vsub.f32 %v2681_v39, %v2692_v54 }
 0xc2a   : > { %v2694_v32 = vmul.f32 1.442695, %v2693_v9  ;;  %v2697_v28 = vmul.f32 1.442695, %v2696_v63  ;;  %v2700_v36 = vmul.f32 1.442695, %v2699_v60 }
 0xc2c   : > { %5052 = vpow2.f32 %v2694_v32 }
 0xc2d   : > { %5054 = vpow2.f32 %v2697_v28 }
 0xc2e   : > { %5056 = vpow2.f32 %v2700_v36 }
 0xc32   : > { %v5053_v40 = vpop.eup %5052 }
 0xc33   : > { %v5055_v52 = vpop.eup %5054  ;;  %v2702_v37 = vsel %vm1625_vm6, %v5053_v40, 0.0  ;;  %v6925_v46 = vmul.f32 %v5053_v40, %v6428_v17 }
 0xc34   : > { %v5057_v53 = vpop.eup %5056  ;;  %v2705_v7 = vsel %vm1629_vm7, %v5055_v52, 0.0  ;;  %2703 = vadd.xlane.f32.xlu2 %v2702_v37  ;;  %v2714_v14 = vmul.f32 %v5055_v52, %v6430_v19 }
 0xc35   : > { %v2709_v41 = vsel %vm1434_vm1, %v5057_v53, 0.0  ;;  %2706 = vadd.xlane.f32.xlu0 %v2705_v7  ;;  %v2716_v26 = vsel %vm1625_vm6, %v6925_v46, 0.0  ;;  %v6952_v44 = vmul.f32 %v5057_v53, %v6406_v0 }
 0xc36   : > { %2710 = vadd.xlane.f32.xlu1 %v2709_v41  ;;  %v2719_v49 = vsel %vm1629_vm7, %v2714_v14, 0.0 }
 0xc37   : > { %v2723_v55 = vsel %vm1434_vm1, %v6952_v44, 0.0 }
 0xc3c   : > { %2717 = vadd.xlane.f32.xlu2 %v2716_v26 }
 0xc3d   : > { %3274 = vadd.xlane.f32.xlu0 %v3273_v22 }
 0xc3e   : > { %3236 = vadd.xlane.f32.xlu1 %v3235_v25 }
 0xc45   : > { %2720 = vadd.xlane.f32.xlu0 %v2719_v49 }
 0xc54   : > { %3156 = vrot.lane.b32.xlu2 %v6227_v12, %s5783_s8 }
 0xc7d   : > { %3197 = vadd.xlane.f32.xlu2 %v3196_v3 }
 0xc7e   : > { %v2983_v15 = vpop.f32.mrf.mxu3 }
 0xc7f   : > { %v6957_v10 = vmul.f32 %v2983_v15, %v6428_v17 }
 0xc81   : > { %v3032_v1 = vsel %vm1625_vm6, %v6957_v10, -inf }
 0xc86   : > { %v2985_v58 = vpop.f32.mrf.mxu3 }
 0xca7   : > { %v2704_v27 = vpop.xlane.xlu2 %2703 }
 0xca8   : > { %v2707_v34 = vpop.xlane.xlu0 %2706 }
 0xca9   : > { %v2711_v56 = vpop.xlane.xlu1 %2710  ;;  %v2708_v23 = vadd.f32 %v2707_v34, %v2704_v27 }
 0xcab   : > { %v2712_v8 = vadd.f32 %v2711_v56, %v2708_v23  ;;  %v7008_v23 = vld [vmem:[#allocation27] ss:$0 sm:$0xff] }
 0xcad   : > { %v2727_v22 = vmul.f32 1e-13, %v2712_v8 }
 0xcaf   : > { %v2718_v42 = vpop.xlane.xlu2 %2717 }
 0xcb0   : > { %v3275_v39 = vpop.xlane.xlu0 %3274 }
 0xcb1   : > { %v3237_v29 = vpop.xlane.xlu1 %3236  ;;  %v3276_v18 = vmul.f32 %v3275_v39, %v6243_v30 }
 0xcb2   : > { %v3238_v61 = vmul.f32 %v3237_v29, %v6243_v30  ;;  %v7017_v29 = vld [vmem:[#allocation20] ss:$0 sm:$0xff] }
 0xcb3   : > { %v6939_v47 = vsub.f32 %v6239_v21, %v3276_v18 }
 0xcb4   : > { %v6942_v6 = vsub.f32 %v6235_v16, %v3238_v61 }
 0xcb5   : > { %v3278_v33 = vmul.f32 %v6939_v47, %v6939_v47 }
 0xcb6   : > { %v3240_v20 = vmul.f32 %v6942_v6, %v6942_v6 }
 0xcb7   : > { %3280 = vrot.lane.b32.xlu0 %v3278_v33, %s5783_s8  ;;  %v3157_v43 = vpop.permute.xlu2 %3156 }
 0xcb8   : > { %3242 = vrot.lane.b32.xlu2 %v3240_v20, %s5783_s8  ;;  %v3159_v2 = vsel %vm1434_vm1, %v3157_v43, 0.0  ;;  %v2721_v36 = vpop.xlane.xlu0 %2720 }
 0xcb9   : > { %3160 = vadd.xlane.f32.xlu1 %v3159_v2  ;;  %v2722_v62 = vadd.f32 %v2721_v36, %v2718_v42 }
 0xcc1   : > { %2724 = vadd.xlane.f32.xlu1 %v2723_v55 }
 0xce1   : > { %3033 = vmax.xlane.f32.xlu2 %v3032_v1 }
 0xcf0   : > { %v3198_v54 = vpop.xlane.xlu2 %3197 }
 0xcf1   : > { %v3199_v9 = vmul.f32 %v3198_v54, %v6243_v30 }
 0xcf3   : > { %v6963_v63 = vsub.f32 %v6229_v13, %v3199_v9 }
 0xcf5   : > { %v3201_v60 = vmul.f32 %v6963_v63, %v6963_v63 }
 0xcf7   : > { %3203 = vrot.lane.b32.xlu1 %v3201_v60, %s5783_s8 }
 0xd12   : > { %v3243_v32 = vpop.permute.xlu2 %3242 }
 0xd13   : > { %v3245_v28 = vsel %vm1505_vm2, %v3243_v32, 0.0 }
 0xd14   : > { %3246 = vadd.xlane.f32.xlu2 %v3245_v28 }
 0xd29   : > { %v3281_v40 = vpop.permute.xlu0 %3280 }
 0xd2a   : > { %v3283_v52 = vsel %vm1538_vm3, %v3281_v40, 0.0 }
 0xd2b   : > { %3284 = vadd.xlane.f32.xlu1 %v3283_v52 }
 0xd2c   : > { %v3161_v37 = vpop.xlane.xlu1 %3160 }
 0xd2d   : > { %v3162_v53 = vmul.f32 %v3161_v37, %v6243_v30 }
 0xd2f   : > { %v6972_v7 = vsub.f32 %v6227_v12, %v3162_v53 }
 0xd31   : > { %v3164_v41 = vmul.f32 %v6972_v7, %v6972_v7 }
 0xd33   : > { %3166 = vrot.lane.b32.xlu0 %v3164_v41, %s5783_s8 }
 0xd34   : > { %v2725_v26 = vpop.xlane.xlu1 %2724 }
 0xd35   : > { %v2726_v25 = vadd.f32 %v2725_v26, %v2722_v62 }
 0xd37   : > { %v2728_v49 = vadd.f32 %v2727_v22, %v2726_v25 }
 0xd39   : > { %5058 = vrcp.f32 %v2728_v49 }
 0xd3f   : > { %v6977_v48 = vpop.eup %5058 }
 0xd40   : > { %v2732_v3 = vmul.f32 %v6977_v48, %v2714_v14  ;;  %v2730_v15 = vmul.f32 %v6977_v48, %v6925_v46 }
 0xd42   : > { %v2733_v58 = vpack.c.bf16 %v2732_v3, %v2732_v3  ;;  %v2731_v27 = vpack.c.bf16 %v2730_v15, %v2730_v15 }
 0xd44   : > { %3261 = vrot.lane.b32.xlu1 %v6685_v59, %s5784_s27  ;;  %4695 = vmatmul.msk.bf16.vlgmr.msrb.gmra.mxu0 %vm1629_vm7, %v2733_v58 }
 0xd45   : > { %4696 = vmatmul.msk.bf16.vlgmr.msrb.gmra.mxu1 %vm1625_vm6, %v2731_v27 }
 0xd4c   : > { %3222 = vrot.lane.b32.xlu1 %v6694_v45, %s5784_s27 }
 0xd54   : > { %3189 = vrot.lane.b32.xlu1 %v6705_v38, %s5784_s27  ;;  %4699 = vmatmul.msk.bf16.vlgmr.msra.gmra.mxu0 %vm1434_vm1, %v6911_v31  ;;  %v7006_v34 = vpop.xlane.xlu2 %3033 }
 0xd55   : > { %4700 = vmatmul.msk.bf16.vlgmr.msra.gmra.mxu1 %vm1434_vm1, %v6911_v31 }
 0xd5c   : > { %3105 = vrot.lane.b32.xlu1 %v6573_v11, %s5781_s24 }
 0xd69   : > { %v3204_v59 = vpop.permute.xlu1 %3203 }
 0xd6a   : > { %v3206_v46 = vsel %vm1434_vm1, %v3204_v59, 0.0 }
 0xd6b   : > { %3207 = vadd.xlane.f32.xlu0 %v3206_v46 }
 0xd7f   : > { %3265 = vrot.lane.b32.xlu0 %v6689_v57, %s5784_s27 }
 0xd87   : > { %3303 = vrot.lane.b32.xlu0 %v6701_v24, %s5784_s27 }
 0xd8f   : > { %3226 = vrot.lane.b32.xlu0 %v6709_v5, %s5784_s27  ;;  %v3247_v5 = vpop.xlane.xlu2 %3246 }
 0xd90   : > { %v3248_v42 = vmul.f32 %v3247_v5, %v6243_v30 }
 0xd92   : > { %v3249_v61 = vadd.f32 1e-05, %v3248_v42 }
 0xd94   : > { %5060 = vrsqrt.f32 %v3249_v61  ;;  %vm3256_vm15 = vweird.f32 %v3249_v61 }
 0xd97   : > { %3084 = vrot.lane.b32.xlu0 %v6551_v50, %s5781_s24 }
 0xd9a   : > { %v5061_v54 = vpop.eup %5060 }
 0xd9b   : > { %v3251_v60 = vmul.f32 %v5061_v54, %v3249_v61  ;;  %vm3257_vm14 = vweird.f32 %v5061_v54 }
 0xd9c   : > { %vm3258_vm4 = vmor %vm3256_vm15, %vm3257_vm14 }
 0xd9d   : > { %v3252_v36 = vmul.f32 %v5061_v54, %v3251_v60 }
 0xd9e   : > { %v3285_v31 = vpop.xlane.xlu1 %3284 }
 0xd9f   : > { %v3253_v52 = vmul.f32 0.5, %v3252_v36  ;;  %v3286_v61 = vmul.f32 %v3285_v31, %v6243_v30 }
 0xda1   : > { %v3254_v41 = vsub.f32 1.5, %v3253_v52 }
 0xda3   : > { %v3255_v62 = vmul.f32 %v5061_v54, %v3254_v41 }
 0xda5   : > { %v3167_v45 = vpop.permute.xlu0 %3166  ;;  %v3259_v25 = vsel %vm3258_vm4, %v5061_v54, %v3255_v62 }
 0xda6   : > { %v3169_v38 = vsel %vm1434_vm1, %v3167_v45, 0.0  ;;  %v3260_v3 = vmul.f32 %v3259_v25, %v6942_v6  ;;  %v3287_v6 = vadd.f32 1e-05, %v3286_v61 }
 0xda7   : > { %3170 = vadd.xlane.f32.xlu2 %v3169_v38 }
 0xda8   : > { %vm3294_vm14 = vweird.f32 %v3287_v6 }
 0xdb6   : > { %v3262_v14 = vpop.permute.xlu1 %3261 }
 0xdb7   : > { %v3264_v58 = vmul.f32 %v3262_v14, %v3260_v3 }
 0xdbe   : > { %v3223_v56 = vpop.permute.xlu1 %3222 }
 0xdbf   : > { %3299 = vrot.lane.b32.xlu2 %v7008_v23, %s5784_s27 }
 0xdc1   : > { %v2751_v57 = vpop.f32.mrf.mxu0 }
 0xdc2   : > { %v2772_v24 = vpop.f32.mrf.mxu1 }
 0xdc3   : > { %v7012_v8 = vadd.f32 %v2772_v24, %v2751_v57 }
 0xdc6   : > { %v7015_v39 = vpop.permute.xlu1 %3189 }
 0xdc7   : > { %3185 = vrot.lane.b32.xlu2 %v7017_v29, %s5784_s27 }
 0xdc9   : > { %v2753_v18 = vpop.f32.mrf.mxu0 }
 0xdca   : > { %v2774_v33 = vpop.f32.mrf.mxu1 }
 0xdce   : > { %v3106_v20 = vpop.permute.xlu1 %3105 }
 0xdcf   : > { %v3111_v43 = vsel %vm1702_vm11, %v3106_v20, 0  ;;  %2778 = vrot.lane.b32.xlu2 %v6728_v4, %s5779_s10  ;;  %s4732_s10 = sshll.u32 %s7560_s4, 3  ;;  %s4246_s4 = scalar_lea.sflag [#allocation5], %s6141_s18 }
 0xdd0   : > { %3120 = vmatpush.bf16.msra.mxu3 %v3111_v43 }
 0xdd1   : > { %v3005_v2 = vpop.f32.mrf.mxu0 }
 0xdd2   : > { %v7025_v55 = vmul.f32 %v3005_v2, %v6430_v19  ;;  %v7027_v1 = vpop.f32.mrf.mxu1 }
 0xdd4   : > { %v3035_v9 = vsel %vm1629_vm7, %v7025_v55, -inf }
 0xdd5   : > { %3036 = vmax.xlane.f32.xlu1 %v3035_v9 }
 0xdd9   : > { %v3007_v32 = vpop.f32.mrf.mxu0 }
 0xdda   : > { %v3029_v28 = vpop.f32.mrf.mxu1 }
 0xdde   : > { %v3208_v40 = vpop.xlane.xlu0 %3207 }
 0xddf   : > { %v3209_v37 = vmul.f32 %v3208_v40, %v6243_v30 }
 0xde1   : > { %v3210_v53 = vadd.f32 1e-05, %v3209_v37 }
 0xde3   : > { %5062 = vrsqrt.f32 %v3210_v53  ;;  %vm3217_vm9 = vweird.f32 %v3210_v53 }
 0xde4   : > { %5064 = vrsqrt.f32 %v3287_v6 }
 0xde9   : > { %v5063_v26 = vpop.eup %5062 }
 0xdea   : > { %v3212_v22 = vmul.f32 %v5063_v26, %v3210_v53  ;;  %vm3218_vm8 = vweird.f32 %v5063_v26  ;;  %v5065_v14 = vpop.eup %5064 }
 0xdeb   : > { %vm3219_vm10 = vmor %vm3217_vm9, %vm3218_vm8  ;;  %v3289_v33 = vmul.f32 %v5065_v14, %v3287_v6  ;;  %vm3295_vm13 = vweird.f32 %v5065_v14 }
 0xdec   : > { %v3213_v49 = vmul.f32 %v5063_v26, %v3212_v22  ;;  %vm3296_vm15 = vmor %vm3294_vm14, %vm3295_vm13  ;;  %vm2454_vm13 = vcmask 97344   ;;  %vm2804_vm14 = vcmask 130144  }
 0xded   : > { %v3290_v20 = vmul.f32 %v5065_v14, %v3289_v33 }
 0xdee   : > { %v3214_v15 = vmul.f32 0.5, %v3213_v49 }
 0xdef   : > { %v3291_v43 = vmul.f32 0.5, %v3290_v20 }
 0xdf0   : > { %v3215_v27 = vsub.f32 1.5, %v3214_v15 }
 0xdf1   : > { %v3266_v59 = vpop.permute.xlu0 %3265  ;;  %v3292_v2 = vsub.f32 1.5, %v3291_v43 }
 0xdf2   : > { %v3268_v46 = vadd.f32 %v3266_v59, %v3264_v58  ;;  %v3216_v45 = vmul.f32 %v5063_v26, %v3215_v27  ;;  %v2776_v59 = vmul.f32 %v6977_v48, %v6952_v44  ;;  %v3031_v44 = vmul.f32 %v7027_v1, %v6406_v0 }
 0xdf3   : > { %v3293_v54 = vmul.f32 %v5065_v14, %v3292_v2 }
 0xdf4   : > { %v3269_v38 = vpack.c.bf16 %v3268_v46, %v3268_v46  ;;  %v3220_v57 = vsel %vm3219_vm10, %v5063_v26, %v3216_v45  ;;  %vm2104_vm10 = vcmask 64544  }
 0xdf5   : > { %v3221_v24 = vmul.f32 %v3220_v57, %v6963_v63  ;;  %v3297_v60 = vsel %vm3296_vm15, %v5065_v14, %v3293_v54  ;;  %v3039_v14 = vsel %vm1434_vm1, %v3031_v44, -inf }
 0xdf6   : > { %v3339_v5 = vunpack.c.l.b16 %v3269_v38  ;;  %v3298_v32 = vmul.f32 %v3297_v60, %v6939_v47 }
 0xdf7   : > { %v7034_v42 = vmul.f32 %v3223_v56, %v3221_v24 }
 0xdf8   : > { %v3340_v18 = vpack.c.b16 %v3339_v5, %v3339_v5  ;;  %v2777_v5 = vpack.c.bf16 %v2776_v59, %v2776_v59 }
 0xdf9   : > { %v3304_v31 = vpop.permute.xlu0 %3303 }
 0xdfa   : > { %3341 = vrot.lane.b32.xlu2 %v3340_v18, %s5783_s8 }
 0xe01   : > { %v3227_v53 = vpop.permute.xlu0 %3226 }
 0xe02   : > { %3543 = vrot.lane.b32.xlu2 %v6229_v13, %s5785_s6 }
 0xe09   : > { %v3085_v58 = vpop.permute.xlu0 %3084 }
 0xe0a   : > { %v3090_v57 = vsel %vm1682_vm5, %v3085_v58, 0 }
 0xe1a   : > { %v3171_v63 = vpop.xlane.xlu2 %3170 }
 0xe1b   : > { %v3172_v56 = vmul.f32 %v3171_v63, %v6243_v30 }
 0xe1d   : > { %v3173_v9 = vadd.f32 1e-05, %v3172_v56 }
 0xe1f   : > { %5066 = vrsqrt.f32 %v3173_v9  ;;  %vm3180_vm8 = vweird.f32 %v3173_v9 }
 0xe22   : > { %v3300_v28 = vpop.permute.xlu2 %3299 }
 0xe23   : > { %v3302_v36 = vmul.f32 %v3300_v28, %v3298_v32 }
 0xe25   : > { %v5067_v40 = vpop.eup %5066  ;;  %v3306_v52 = vadd.f32 %v3304_v31, %v3302_v36 }
 0xe26   : > { %v3175_v37 = vmul.f32 %v5067_v40, %v3173_v9  ;;  %vm3181_vm4 = vweird.f32 %v5067_v40 }
 0xe27   : > { %v3307_v41 = vpack.c.bf16 %v3306_v52, %v3306_v52  ;;  %vm3182_vm9 = vmor %vm3180_vm8, %vm3181_vm4 }
 0xe28   : > { %v3176_v62 = vmul.f32 %v5067_v40, %v3175_v37 }
 0xe29   : > { %v3361_v26 = vunpack.c.l.b16 %v3307_v41 }
 0xe2a   : > { %v3177_v22 = vmul.f32 0.5, %v3176_v62  ;;  %v3186_v25 = vpop.permute.xlu2 %3185 }
 0xe2b   : > { %v3362_v49 = vpack.c.b16 %v3361_v26, %v3361_v26 }
 0xe2c   : > { %v3178_v3 = vsub.f32 1.5, %v3177_v22 }
 0xe2d   : > { %3363 = vrot.lane.b32.xlu0 %v3362_v49, %s5783_s8 }
 0xe2e   : > { %v3179_v15 = vmul.f32 %v5067_v40, %v3178_v3 }
 0xe30   : > { %v3183_v47 = vsel %vm3182_vm9, %v5067_v40, %v3179_v15 }
 0xe31   : > { %v3184_v27 = vmul.f32 %v3183_v47, %v6972_v7 }
 0xe32   : > { %v2779_v46 = vpop.permute.xlu2 %2778 }
 0xe33   : > { %v3188_v45 = vmul.f32 %v3186_v25, %v3184_v27  ;;  %v2784_v38 = vsel %vm1724_vm12, %v2779_v46, 0 }
 0xe34   : > { %2793 = vmatpush.bf16.msrb.mxu2 %v2784_v38 }
 0xe35   : > { %v3192_v24 = vadd.f32 %v7015_v39, %v3188_v45  ;;  %v3229_v39 = vadd.f32 %v3227_v53, %v7034_v42 }
 0xe37   : > { %v3230_v18 = vpack.c.bf16 %v3192_v24, %v3192_v24  ;;  %4697 = vmatmul.msk.bf16.vlgmr.msrb.gmra.mxu2 %vm1434_vm1, %v2777_v5  ;;  %v3231_v33 = vpack.c.bf16 %v3229_v39, %v3229_v39 }
 0xe38   : > { %3099 = vmatpush.bf16.msra.mxu2 %v3090_v57 }
 0xe39   : > { %v3309_v61 = vunpack.c.l.b16 %v3230_v18  ;;  %v3314_v20 = vunpack.c.l.b16 %v3231_v33 }
 0xe3b   : > { %v3310_v6 = vpack.c.b16 %v3309_v61, %v3309_v61  ;;  %v3315_v43 = vpack.c.b16 %v3314_v20, %v3314_v20 }
 0xe3d   : > { %3311 = vrot.lane.b32.xlu1 %v3310_v6, %s5783_s8 }
 0xe48   : > { %v3037_v31 = vpop.xlane.xlu1 %3036 }
 0xe49   : > { %v3038_v9 = vmax.f32 %v7006_v34, %v3037_v31 }
 0xe54   : > { %v3342_v7 = vpop.permute.xlu2 %3341 }
 0xe55   : > { %v3344_v48 = vsel %vm1434_vm1, %v3342_v7, 0 }
 0xe56   : > { %3353 = vmatpush.bf16.xpose.msrb.mxu2 %v3344_v48 }
 0xe57   : > { %3040 = vmax.xlane.f32.xlu0 %v3039_v14 }
 0xe5c   : > { %v3544_v27 = vpop.permute.xlu2 %3543 }
 0xe5d   : > { %v3546_v59 = vsel %vm1434_vm1, %v3544_v27, 0.0 }
 0xe6b   : > { %3316 = vrot.lane.b32.xlu0 %v3315_v43, %s5783_s8 }
 0xe9f   : > { %v3364_v2 = vpop.permute.xlu0 %3363 }
 0xea0   : > { %v3366_v63 = vsel %vm1434_vm1, %v3364_v2, 0 }
 0xea1   : > { %3375 = vmatpush.bf16.xpose.msrb.mxu3 %v3366_v63 }
 0xeaf   : > { %v3312_v58 = vpop.permute.xlu1 %3311 }
 0xeba   : > { %v2795_v54 = vpop.f32.mrf.mxu2 }
 0xebb   : > { %v7059_v1 = vadd.f32 %v2795_v54, %v7012_v8 }
 0xec2   : > { %v2797_v56 = vpop.f32.mrf.mxu2 }
 0xeca   : > { %v3041_v60 = vpop.xlane.xlu0 %3040 }
 0xecb   : > { %v3042_v32 = vmax.f32 %v3038_v9, %v3041_v60 }
 0xecd   : > { %v3043_v42 = vsub.f32 %v6957_v10, %v3042_v32  ;;  %v3046_v28 = vsub.f32 %v7025_v55, %v3042_v32  ;;  %v3049_v36 = vsub.f32 %v3031_v44, %v3042_v32 }
 0xecf   : > { %v3044_v40 = vmul.f32 1.442695, %v3043_v42  ;;  %v3047_v52 = vmul.f32 1.442695, %v3046_v28  ;;  %v3050_v37 = vmul.f32 1.442695, %v3049_v36 }
 0xed1   : > { %5068 = vpow2.f32 %v3044_v40 }
 0xed2   : > { %5070 = vpow2.f32 %v3047_v52 }
 0xed3   : > { %5072 = vpow2.f32 %v3050_v37 }
 0xed7   : > { %v5069_v53 = vpop.eup %5068 }
 0xed8   : > { %v5071_v8 = vpop.eup %5070  ;;  %v3052_v41 = vsel %vm1625_vm6, %v5069_v53, 0.0  ;;  %v3063_v10 = vmul.f32 %v5069_v53, %v6428_v17 }
 0xed9   : > { %v5073_v62 = vpop.eup %5072  ;;  %v3055_v34 = vsel %vm1629_vm7, %v5071_v8, 0.0  ;;  %3053 = vadd.xlane.f32.xlu0 %v3052_v41  ;;  %v3064_v22 = vmul.f32 %v5071_v8, %v6430_v19 }
 0xeda   : > { %v3059_v26 = vsel %vm1434_vm1, %v5073_v62, 0.0  ;;  %3056 = vadd.xlane.f32.xlu1 %v3055_v34  ;;  %v7071_v49 = vmul.f32 %v5073_v62, %v6406_v0  ;;  %v3066_v3 = vsel %vm1625_vm6, %v3063_v10, 0.0 }
 0xedb   : > { %3060 = vadd.xlane.f32.xlu2 %v3059_v26  ;;  %v3069_v15 = vsel %vm1629_vm7, %v3064_v22, 0.0 }
 0xedc   : > { %v3073_v47 = vsel %vm1434_vm1, %v7071_v49, 0.0 }
 0xedd   : > { %v3317_v55 = vpop.permute.xlu0 %3316 }
 0xede   : > { %v3322_v25 = vsel %vm1434_vm1, %v3317_v55, 0 }
 0xedf   : > { %3331 = vmatpush.bf16.xpose.msrb.mxu1 %v3322_v25 }
 0xee1   : > { %3067 = vadd.xlane.f32.xlu0 %v3066_v3 }
 0xee2   : > { %3070 = vadd.xlane.f32.xlu1 %v3069_v15 }
 0xee3   : > { %3074 = vadd.xlane.f32.xlu2 %v3073_v47 }
 0xee6   : > { %4704 = vmatmul.msk.bf16.vlgmr.msrb.gmra.mxu1 %vm1434_vm1, %v3312_v58 }
 0xef5   : > { %3582 = vrot.lane.b32.xlu0 %v6235_v16, %s5785_s6 }
 0xefb   : > { %3620 = vrot.lane.b32.xlu2 %v6239_v21, %s5785_s6  ;;  %3506 = vrot.lane.b32.xlu1 %v6227_v12, %s5785_s6 }
 0xf1f   : > { %3547 = vadd.xlane.f32.xlu0 %v3546_v59 }
 0xf4c   : > { %v3054_v46 = vpop.xlane.xlu0 %3053 }
 0xf4d   : > { %v3057_v45 = vpop.xlane.xlu1 %3056 }
 0xf4e   : > { %v3061_v38 = vpop.xlane.xlu2 %3060  ;;  %v3058_v57 = vadd.f32 %v3057_v45, %v3054_v46 }
 0xf50   : > { %v3062_v24 = vadd.f32 %v3061_v38, %v3058_v57 }
 0xf52   : > { %v3077_v44 = vmul.f32 1e-13, %v3062_v24 }
 0xf54   : > { %v3068_v5 = vpop.xlane.xlu0 %3067 }
 0xf55   : > { %v3071_v18 = vpop.xlane.xlu1 %3070 }
 0xf56   : > { %v3075_v61 = vpop.xlane.xlu2 %3074  ;;  %v3072_v6 = vadd.f32 %v3071_v18, %v3068_v5 }
 0xf58   : > { %v3076_v7 = vadd.f32 %v3075_v61, %v3072_v6 }
 0xf5a   : > { %v3078_v48 = vadd.f32 %v3077_v44, %v3076_v7 }
 0xf5c   : > { %5074 = vrcp.f32 %v3078_v48 }
 0xf5e   : > { %v3621_v14 = vpop.permute.xlu2 %3620 }
 0xf5f   : > { %v3623_v39 = vsel %vm1538_vm3, %v3621_v14, 0.0 }
 0xf60   : > { %3624 = vadd.xlane.f32.xlu0 %v3623_v39 }
 0xf62   : > { %v5075_v33 = vpop.eup %5074 }
 0xf63   : > { %v3333_v20 = vpop.f32.mrf.mxu1  ;;  %v3082_v43 = vmul.f32 %v5075_v33, %v3064_v22  ;;  %v3080_v2 = vmul.f32 %v5075_v33, %v3063_v10  ;;  %v3126_v5 = vmul.f32 %v5075_v33, %v7071_v49  ;;  %v7143_v49 = vld [vmem:[#allocation23] ss:$0 sm:$0xff]  ;;  %v7147_v33 = vld [vmem:[#allocation26] ss:$0 sm:$0xff] }
 0xf64   : > { %v7133_v24 = vmul.f32 %v3333_v20, %v6428_v17 }
 0xf65   : > { %v3083_v63 = vpack.c.bf16 %v3082_v43, %v3082_v43  ;;  %v3081_v54 = vpack.c.bf16 %v3080_v2, %v3080_v2  ;;  %v3127_v61 = vpack.c.bf16 %v3126_v5, %v3126_v5  ;;  %v7154_v2 = vld [vmem:[#allocation29] ss:$0 sm:$0xff] }
 0xf67   : > { %4701 = vmatmul.msk.bf16.vlgmr.msra.gmra.mxu2 %vm1629_vm7, %v3083_v63  ;;  %4702 = vmatmul.msk.bf16.vlgmr.msra.gmra.mxu3 %vm1625_vm6, %v3081_v54  ;;  %v3583_v56 = vpop.permute.xlu0 %3582  ;;  %v7158_v54 = vld [vmem:[#allocation21] ss:$0 sm:$0xff] }
 0xf68   : > { %v3585_v31 = vsel %vm1505_vm2, %v3583_v56, 0.0  ;;  %v7165_v56 = vld [vmem:[%s7566_s25] ss:$0 sm:$0xff] }
 0xf69   : > { %3586 = vadd.xlane.f32.xlu1 %v3585_v31  ;;  %v7171_v31 = vld [vmem:[#allocation24] ss:$0 sm:$0xff] }
 0xf6b   : > { %v3335_v9 = vpop.f32.mrf.mxu1 }
 0xf6d   : > { %v3507_v60 = vpop.permute.xlu1 %3506 }
 0xf6e   : > { %v3509_v32 = vsel %vm1434_vm1, %v3507_v60, 0.0 }
 0xf6f   : > { %3510 = vadd.xlane.f32.xlu2 %v3509_v32 }
 0xf77   : > { %4705 = vmatmul.msk.bf16.vlgmr.msrb.gmra.mxu2 %vm1434_vm1, %v3312_v58  ;;  %4706 = vmatmul.msk.bf16.vlgmr.msrb.gmra.mxu3 %vm1434_vm1, %v3312_v58 }
 0xf92   : > { %v3548_v42 = vpop.xlane.xlu0 %3547 }
 0xf93   : > { %v3549_v28 = vmul.f32 %v3548_v42, %v6243_v30 }
 0xf95   : > { %v7094_v36 = vsub.f32 %v6229_v13, %v3549_v28 }
 0xf97   : > { %v3551_v40 = vmul.f32 %v7094_v36, %v7094_v36 }
 0xf99   : > { %3553 = vrot.lane.b32.xlu1 %v3551_v40, %s5785_s6 }
 0xfa1   : > { %2101 = vrot.lane.b32.xlu1 %v6772_v35, %s5776_s12 }
 0xfa9   : > { %3128 = vrot.lane.b32.xlu1 %v6728_v4, %s5781_s24  ;;  %s7568_s24 = sld [smem:[#allocation71_spill]] }
 0xfaf   : > { %s5663_s30 = scalar_lea.hbm %s7568_s24, 16 }
 0xfd3   : > { %v3625_v53 = vpop.xlane.xlu0 %3624 }
 0xfd4   : > { %v3626_v41 = vmul.f32 %v3625_v53, %v6243_v30 }
 0xfd6   : > { %v7113_v35 = vsub.f32 %v6239_v21, %v3626_v41 }
 0xfd8   : > { %v3628_v22 = vmul.f32 %v7113_v35, %v7113_v35 }
 0xfdc   : > { %v3587_v52 = vpop.xlane.xlu1 %3586 }
 0xfdd   : > { %v3588_v37 = vmul.f32 %v3587_v52, %v6243_v30 }
 0xfdf   : > { %v7105_v8 = vsub.f32 %v6235_v16, %v3588_v37 }
 0xfe1   : > { %v3590_v62 = vmul.f32 %v7105_v8, %v7105_v8 }
 0xfe2   : > { %v3511_v34 = vpop.xlane.xlu2 %3510 }
 0xfe3   : > { %v3512_v26 = vmul.f32 %v3511_v34, %v6243_v30  ;;  %3592 = vrot.lane.b32.xlu2 %v3590_v62, %s5785_s6 }
 0xfe5   : > { %v7116_v10 = vsub.f32 %v6227_v12, %v3512_v26 }
 0xfe7   : > { %v3514_v55 = vmul.f32 %v7116_v10, %v7116_v10 }
 0xfe9   : > { %3516 = vrot.lane.b32.xlu0 %v3514_v55, %s5785_s6 }
 0xfea   : > { %v3101_v25 = vpop.f32.mrf.mxu2  ;;  %v3122_v3 = vpop.f32.mrf.mxu3 }
 0xfeb   : > { %v3123_v15 = vadd.f32 %v3122_v3, %v3101_v25  ;;  %3630 = vrot.lane.b32.xlu2 %v3628_v22, %s5785_s6 }
 0xff1   : > { %2451 = vrot.lane.b32.xlu0 %v6917_v51, %s5778_s16  ;;  %v3382_v51 = vsel %vm1625_vm6, %v7133_v24, -inf }
 0xff2   : > { %v3103_v47 = vpop.f32.mrf.mxu2  ;;  %v3124_v58 = vpop.f32.mrf.mxu3 }
 0xff3   : > { %2801 = vrot.lane.b32.xlu2 %v7059_v1, %s5780_s11  ;;  %s4608_s11 = sshll.u32 %s6141_s18, 3 }
 0xffa   : > { %v7128_v27 = vpop.f32.mrf.mxu2  ;;  %v7130_v59 = vpop.f32.mrf.mxu3 }
0x1002   : > { %v3357_v46 = vpop.f32.mrf.mxu2  ;;  %v3379_v45 = vpop.f32.mrf.mxu3 }
0x100b   : > { %v3554_v38 = vpop.permute.xlu1 %3553 }
0x100c   : > { %v3556_v6 = vsel %vm1434_vm1, %v3554_v38, 0.0 }
0x1013   : > { %v2102_v57 = vpop.permute.xlu1 %2101 }
0x1014   : > { %2105 = vst.msk [vmem:[#allocation2] sm:$0xff] %vm2104_vm10, %v2102_v57 }
0x101b   : > { %3383 = vmax.xlane.f32.xlu0 %v3382_v51  ;;  %v3129_v1 = vpop.permute.xlu1 %3128 }
0x101c   : > { %v3134_v18 = vsel %vm1724_vm12, %v3129_v1, 0 }
0x101d   : > { %3143 = vmatpush.bf16.msrb.mxu0 %v3134_v18 }
0x1020   : > { %4703 = vmatmul.msk.bf16.vlgmr.msrb.gmra.mxu0 %vm1434_vm1, %v3127_v61 }
0x1023   : > { %3557 = vadd.xlane.f32.xlu0 %v3556_v6 }
0x103d   : > { %v3593_v44 = vpop.permute.xlu2 %3592 }
0x103e   : > { %v3595_v7 = vsel %vm1505_vm2, %v3593_v44, 0.0 }
0x103f   : > { %3596 = vadd.xlane.f32.xlu2 %v3595_v7 }
0x1045   : > { %v3631_v48 = vpop.permute.xlu2 %3630 }
0x1046   : > { %v3633_v14 = vsel %vm1538_vm3, %v3631_v48, 0.0 }
0x1047   : > { %3634 = vadd.xlane.f32.xlu0 %v3633_v14 }
0x104d   : > { %v2802_v63 = vpop.permute.xlu2 %2801 }
0x1057   : > { %3572 = vrot.lane.b32.xlu2 %v7143_v49, %s5786_s3 }
0x105b   : > { %v3517_v39 = vpop.permute.xlu0 %3516  ;;  %3611 = vrot.lane.b32.xlu0 %v7147_v33, %s5786_s3 }
0x105c   : > { %v3519_v20 = vsel %vm1434_vm1, %v3517_v39, 0.0 }
0x105d   : > { %3520 = vadd.xlane.f32.xlu1 %v3519_v20 }
0x105f   : > { %3535 = vrot.lane.b32.xlu2 %v7017_v29, %s5786_s3 }
0x1063   : > { %v2452_v43 = vpop.permute.xlu0 %2451  ;;  %3615 = vrot.lane.b32.xlu0 %v7154_v2, %s5786_s3 }
0x1064   : > { %2455 = vst.msk [vmem:[#allocation2] sm:$0xff] %vm2454_vm13, %v2452_v43 }
0x1065   : > { %2805 = vst.msk [vmem:[#allocation2] sm:$0xff] %vm2804_vm14, %v2802_v63 }
0x1067   : > { %3539 = vrot.lane.b32.xlu2 %v7158_v54, %s5786_s3 }
0x106b   : > { %3653 = vrot.lane.b32.xlu0 %v7165_v56, %s5786_s3 }
0x106f   : > { %3455 = vrot.lane.b32.xlu2 %v6573_v11, %s5783_s8 }
0x1076   : > { %3576 = vrot.lane.b32.xlu1 %v7171_v31, %s5786_s3 }
0x107e   : > { %3649 = vrot.lane.b32.xlu1 %v7008_v23, %s5786_s3 }
0x1086   : > { %3434 = vrot.lane.b32.xlu1 %v6551_v50, %s5783_s8 }
0x108e   : > { %v7181_v42 = vpop.xlane.xlu0 %3383 }
0x1096   : > { %v3558_v37 = vpop.xlane.xlu0 %3557 }
0x1097   : > { %v3559_v23 = vmul.f32 %v3558_v37, %v6243_v30 }
0x1099   : > { %v3560_v26 = vadd.f32 1e-05, %v3559_v23 }
0x109b   : > { %vm3567_vm10 = vweird.f32 %v3560_v26 }
0x109d   : > { %v3145_v9 = vpop.f32.mrf.mxu0 }
0x109e   : > { %v7179_v60 = vadd.f32 %v3145_v9, %v3123_v15 }
0x10a5   : > { %v3147_v32 = vpop.f32.mrf.mxu0 }
0x10b2   : > { %v3597_v28 = vpop.xlane.xlu2 %3596 }
0x10b3   : > { %v3598_v40 = vmul.f32 %v3597_v28, %v6243_v30 }
0x10b5   : > { %v3599_v52 = vadd.f32 1e-05, %v3598_v40 }
0x10b7   : > { %5076 = vrsqrt.f32 %v3599_v52  ;;  %vm3606_vm4 = vweird.f32 %v3599_v52 }
0x10b8   : > { %5078 = vrsqrt.f32 %v3560_v26 }
0x10ba   : > { %v7184_v53 = vpop.permute.xlu2 %3572  ;;  %v3635_v25 = vpop.xlane.xlu0 %3634 }
0x10bb   : > { %v3636_v15 = vmul.f32 %v3635_v25, %v6243_v30 }
0x10bd   : > { %v5077_v41 = vpop.eup %5076  ;;  %v3637_v46 = vadd.f32 1e-05, %v3636_v15 }
0x10be   : > { %v3601_v62 = vmul.f32 %v5077_v41, %v3599_v52  ;;  %v5079_v58 = vpop.eup %5078  ;;  %vm3607_vm15 = vweird.f32 %v5077_v41 }
0x10bf   : > { %v3562_v57 = vmul.f32 %v5079_v58, %v3560_v26  ;;  %vm3608_vm8 = vmor %vm3606_vm4, %vm3607_vm15  ;;  %5080 = vrsqrt.f32 %v3637_v46  ;;  %vm3568_vm9 = vweird.f32 %v5079_v58 }
0x10c0   : > { %v3602_v34 = vmul.f32 %v5077_v41, %v3601_v62  ;;  %vm3569_vm13 = vmor %vm3567_vm10, %vm3568_vm9  ;;  %vm3644_vm9 = vweird.f32 %v3637_v46 }
0x10c1   : > { %v3563_v18 = vmul.f32 %v5079_v58, %v3562_v57 }
0x10c2   : > { %v7187_v55 = vpop.permute.xlu2 %3535  ;;  %v3603_v22 = vmul.f32 0.5, %v3602_v34 }
0x10c3   : > { %v3564_v20 = vmul.f32 0.5, %v3563_v18 }
0x10c4   : > { %v3604_v3 = vsub.f32 1.5, %v3603_v22 }
0x10c5   : > { %v5081_v14 = vpop.eup %5080  ;;  %v3565_v32 = vsub.f32 1.5, %v3564_v20 }
0x10c6   : > { %v3605_v45 = vmul.f32 %v5077_v41, %v3604_v3  ;;  %v3639_v63 = vmul.f32 %v5081_v14, %v3637_v46 }
0x10c8   : > { %v3609_v51 = vsel %vm3608_vm8, %v5077_v41, %v3605_v45  ;;  %v3640_v52 = vmul.f32 %v5081_v14, %v3639_v63  ;;  %vm3645_vm8 = vweird.f32 %v5081_v14 }
0x10c9   : > { %v3610_v61 = vmul.f32 %v3609_v51, %v7105_v8  ;;  %v3566_v8 = vmul.f32 %v5079_v58, %v3565_v32  ;;  %vm3646_vm10 = vmor %vm3644_vm9, %vm3645_vm8  ;;  %v3359_v32 = vmul.f32 %v7128_v27, %v6430_v19 }
0x10ca   : > { %v3540_v47 = vpop.permute.xlu2 %3539  ;;  %v3641_v62 = vmul.f32 0.5, %v3640_v52 }
0x10cb   : > { %v3570_v22 = vsel %vm3569_vm13, %v5079_v58, %v3566_v8  ;;  %vm3154_vm13 = vcmask 162944  }
0x10cc   : > { %v3642_v3 = vsub.f32 1.5, %v3641_v62  ;;  %v3571_v45 = vmul.f32 %v3570_v22, %v7094_v36 }
0x10cd   : > { %v3612_v38 = vpop.permute.xlu0 %3611 }
0x10ce   : > { %v3614_v48 = vmul.f32 %v3612_v38, %v3610_v61  ;;  %v3575_v57 = vmul.f32 %v7184_v53, %v3571_v45 }
0x10d0   : > { %v3521_v5 = vpop.xlane.xlu1 %3520 }
0x10d1   : > { %v3522_v1 = vmul.f32 %v3521_v5, %v6243_v30  ;;  %v3643_v5 = vmul.f32 %v5081_v14, %v3642_v3 }
0x10d2   : > { %v3456_v6 = vpop.permute.xlu2 %3455 }
0x10d3   : > { %v3523_v44 = vadd.f32 1e-05, %v3522_v1  ;;  %v3461_v7 = vsel %vm1702_vm11, %v3456_v6, 0  ;;  %v3647_v36 = vsel %vm3646_vm10, %v5081_v14, %v3643_v5 }
0x10d4   : > { %3470 = vmatpush.bf16.msra.mxu1 %v3461_v7  ;;  %v3648_v7 = vmul.f32 %v3647_v36, %v7113_v35  ;;  %v3381_v35 = vmul.f32 %v7130_v59, %v6406_v0 }
0x10d5   : > { %5082 = vrsqrt.f32 %v3523_v44  ;;  %v3616_v39 = vpop.permute.xlu0 %3615  ;;  %vm3530_vm15 = vweird.f32 %v3523_v44 }
0x10d6   : > { %v3618_v43 = vadd.f32 %v3616_v39, %v3614_v48  ;;  %v3389_v14 = vsel %vm1434_vm1, %v3381_v35, -inf }
0x10d8   : > { %v3619_v9 = vpack.c.bf16 %v3618_v43, %v3618_v43 }
0x10da   : > { %v3689_v28 = vunpack.c.l.b16 %v3619_v9 }
0x10db   : > { %v5083_v40 = vpop.eup %5082 }
0x10dc   : > { %v3525_v37 = vmul.f32 %v5083_v40, %v3523_v44  ;;  %v3690_v41 = vpack.c.b16 %v3689_v28, %v3689_v28  ;;  %vm3531_vm14 = vweird.f32 %v5083_v40  ;;  %v3385_v28 = vsel %vm1629_vm7, %v3359_v32, -inf }
0x10dd   : > { %vm3532_vm4 = vmor %vm3530_vm15, %vm3531_vm14  ;;  %v3654_v53 = vpop.permute.xlu0 %3653 }
0x10de   : > { %v3526_v23 = vmul.f32 %v5083_v40, %v3525_v37  ;;  %3691 = vrot.lane.b32.xlu1 %v3690_v41, %s5785_s6 }
0x10e0   : > { %v3527_v34 = vmul.f32 0.5, %v3526_v23 }
0x10e2   : > { %v3528_v25 = vsub.f32 1.5, %v3527_v34 }
0x10e4   : > { %v3529_v15 = vmul.f32 %v5083_v40, %v3528_v25 }
0x10e6   : > { %v3533_v38 = vsel %vm3532_vm4, %v5083_v40, %v3529_v15  ;;  %3151 = vrot.lane.b32.xlu1 %v7179_v60, %s5782_s17  ;;  %s4257_s17 = scalar_lea.hbm %s7568_s24, %s4732_s10 }
0x10e7   : > { %v3534_v26 = vmul.f32 %v3533_v38, %v7116_v10  ;;  %s4261_s0 = sshll.u32 %s4257_s17, 4  ;;  %s4262_s0 = int_to_ptr.hbm [resolvable:$true] %s4261_s0 }
0x10e8   : > { %v3577_v51 = vpop.permute.xlu1 %3576 }
0x10e9   : > { %v3579_v58 = vadd.f32 %v3577_v51, %v3575_v57  ;;  %v3538_v1 = vmul.f32 %v7187_v55, %v3534_v26 }
0x10eb   : > { %v3581_v18 = vpack.c.bf16 %v3579_v58, %v3579_v58  ;;  %v3542_v61 = vadd.f32 %v3540_v47, %v3538_v1 }
0x10ed   : > { %v3664_v6 = vunpack.c.l.b16 %v3581_v18  ;;  %v3580_v60 = vpack.c.bf16 %v3542_v61, %v3542_v61 }
0x10ef   : > { %v3665_v44 = vpack.c.b16 %v3664_v6, %v3664_v6  ;;  %v3659_v20 = vunpack.c.l.b16 %v3580_v60 }
0x10f0   : > { %v3650_v48 = vpop.permute.xlu1 %3649 }
0x10f1   : > { %v3652_v39 = vmul.f32 %v3650_v48, %v3648_v7  ;;  %3666 = vrot.lane.b32.xlu0 %v3665_v44, %s5785_s6  ;;  %v3660_v55 = vpack.c.b16 %v3659_v20, %v3659_v20 }
0x10f3   : > { %v3656_v10 = vadd.f32 %v3654_v53, %v3652_v39 }
0x10f5   : > { %v3657_v43 = vpack.c.bf16 %v3656_v10, %v3656_v10 }
0x10f7   : > { %v3711_v63 = vunpack.c.l.b16 %v3657_v43 }
0x10f8   : > { %v3435_v46 = vpop.permute.xlu1 %3434 }
0x10f9   : > { %v3712_v9 = vpack.c.b16 %v3711_v63, %v3711_v63  ;;  %v3440_v47 = vsel %vm1682_vm5, %v3435_v46, 0  ;;  %3661 = vrot.lane.b32.xlu0 %v3660_v55, %s5785_s6 }
0x10fa   : > { %3449 = vmatpush.bf16.msra.mxu0 %v3440_v47 }
0x10fb   : > { %3713 = vrot.lane.b32.xlu2 %v3712_v9, %s5785_s6 }
0x1101   : > { %3478 = vrot.lane.b32.xlu0 %v6728_v4, %s5783_s8 }
0x1109   : > { %3932 = vrot.lane.b32.xlu0 %v6235_v16, %s5787_s26 }
0x1110   : > { %3390 = vmax.xlane.f32.xlu1 %v3389_v14 }
0x1124   : > { %3386 = vmax.xlane.f32.xlu2 %v3385_v28 }
0x1150   : > { %v3692_v40 = vpop.permute.xlu1 %3691 }
0x1151   : > { %v3694_v52 = vsel %vm1434_vm1, %v3692_v40, 0 }
0x1152   : > { %3703 = vmatpush.bf16.xpose.msrb.mxu0 %v3694_v52 }
0x1155   : > { %v3714_v37 = vpop.permute.xlu2 %3713 }
0x1156   : > { %v3716_v41 = vsel %vm1434_vm1, %v3714_v37, 0 }
0x1157   : > { %3725 = vmatpush.bf16.xpose.msrb.mxu1 %v3716_v41 }
0x1158   : > { %v3152_v8 = vpop.permute.xlu1 %3151 }
0x1159   : > { %3155 = vst.msk [vmem:[#allocation2] sm:$0xff] %vm3154_vm13, %v3152_v8 }
0x1163   : > { %v3667_v59 = vpop.permute.xlu0 %3666 }
0x1164   : > { %v3672_v23 = vsel %vm1434_vm1, %v3667_v59, 0 }
0x1165   : > { %3681 = vmatpush.bf16.xpose.msra.mxu3 %v3672_v23 }
0x116b   : > { %v7218_v62 = vpop.permute.xlu0 %3661 }
0x116c   : > { %4710 = vmatmul.msk.bf16.vlgmr.msra.gmra.mxu3 %vm1434_vm1, %v7218_v62 }
0x1173   : > { %v3479_v27 = vpop.permute.xlu0 %3478 }
0x1174   : > { %v3484_v34 = vsel %vm1724_vm12, %v3479_v27, 0 }
0x1175   : > { %3493 = vmatpush.bf16.msra.mxu2 %v3484_v34 }
0x117b   : > { %v3933_v44 = vpop.permute.xlu0 %3932 }
0x117c   : > { %v3935_v60 = vsel %vm1505_vm2, %v3933_v44, 0.0 }
0x1183   : > { %v3391_v3 = vpop.xlane.xlu1 %3390 }
0x1197   : > { %v3387_v22 = vpop.xlane.xlu2 %3386 }
0x1198   : > { %v3388_v25 = vmax.f32 %v7181_v42, %v3387_v22 }
0x119a   : > { %v3392_v15 = vmax.f32 %v3388_v25, %v3391_v3 }
0x119c   : > { %v3396_v45 = vsub.f32 %v3359_v32, %v3392_v15  ;;  %v3399_v38 = vsub.f32 %v3381_v35, %v3392_v15  ;;  %v3393_v6 = vsub.f32 %v7133_v24, %v3392_v15 }
0x119e   : > { %v3397_v57 = vmul.f32 1.442695, %v3396_v45  ;;  %v3400_v26 = vmul.f32 1.442695, %v3399_v38  ;;  %v3394_v7 = vmul.f32 1.442695, %v3393_v6 }
0x11a0   : > { %5084 = vpow2.f32 %v3397_v57 }
0x11a1   : > { %5086 = vpow2.f32 %v3400_v26 }
0x11a2   : > { %5088 = vpow2.f32 %v3394_v7 }
0x11a6   : > { %v5085_v51 = vpop.eup %5084 }
0x11a7   : > { %v5087_v5 = vpop.eup %5086  ;;  %v3405_v58 = vsel %vm1629_vm7, %v5085_v51, 0.0  ;;  %v3414_v18 = vmul.f32 %v5085_v51, %v6430_v19 }
0x11a8   : > { %v3409_v1 = vsel %vm1434_vm1, %v5087_v5, 0.0  ;;  %3406 = vadd.xlane.f32.xlu2 %v3405_v58  ;;  %v3415_v42 = vmul.f32 %v5087_v5, %v6406_v0  ;;  %v5089_v10 = vpop.eup %5088 }
0x11a9   : > { %3410 = vadd.xlane.f32.xlu0 %v3409_v1  ;;  %v3419_v61 = vsel %vm1629_vm7, %v3414_v18, 0.0  ;;  %v3402_v43 = vsel %vm1625_vm6, %v5089_v10, 0.0  ;;  %v3413_v24 = vmul.f32 %v5089_v10, %v6428_v17 }
0x11aa   : > { %v3423_v36 = vsel %vm1434_vm1, %v3415_v42, 0.0 }
0x11ab   : > { %v3416_v63 = vsel %vm1625_vm6, %v3413_v24, 0.0 }
0x11b0   : > { %3420 = vadd.xlane.f32.xlu2 %v3419_v61 }
0x11b1   : > { %3424 = vadd.xlane.f32.xlu0 %v3423_v36 }
0x11c5   : > { %3856 = vrot.lane.b32.xlu0 %v6227_v12, %s5787_s26 }
0x11c8   : > { %3970 = vrot.lane.b32.xlu2 %v6239_v21, %s5787_s26 }
0x11ef   : > { %v3683_v48 = vpop.f32.mrf.mxu3  ;;  %3936 = vadd.xlane.f32.xlu0 %v3935_v60 }
0x11f0   : > { %v7237_v53 = vmul.f32 %v3683_v48, %v6428_v17 }
0x11f2   : > { %v3732_v39 = vsel %vm1625_vm6, %v7237_v53, -inf }
0x11f3   : > { %3733 = vmax.xlane.f32.xlu1 %v3732_v39 }
0x11f7   : > { %v3685_v20 = vpop.f32.mrf.mxu3 }
0x11fb   : > { %3403 = vadd.xlane.f32.xlu1 %v3402_v43 }
0x1203   : > { %3417 = vadd.xlane.f32.xlu1 %v3416_v63 }
0x121b   : > { %v3407_v46 = vpop.xlane.xlu2 %3406 }
0x121c   : > { %3893 = vrot.lane.b32.xlu1 %v6229_v13, %s5787_s26  ;;  %v3411_v55 = vpop.xlane.xlu0 %3410 }
0x1223   : > { %v3421_v47 = vpop.xlane.xlu2 %3420 }
0x1224   : > { %v3425_v9 = vpop.xlane.xlu0 %3424 }
0x122b   : > { %v3971_v32 = vpop.permute.xlu2 %3970 }
0x122c   : > { %v3973_v28 = vsel %vm1538_vm3, %v3971_v32, 0.0 }
0x1237   : > { %v3857_v35 = vpop.permute.xlu0 %3856 }
0x1238   : > { %v3859_v14 = vsel %vm1434_vm1, %v3857_v35, 0.0 }
0x1239   : > { %3860 = vadd.xlane.f32.xlu0 %v3859_v14 }
0x1246   : > { %3974 = vadd.xlane.f32.xlu1 %v3973_v28 }
0x124d   : > { %3805 = vrot.lane.b32.xlu0 %v6573_v11, %s5785_s6 }
0x125f   : > { %3828 = vrot.lane.b32.xlu1 %v6728_v4, %s5785_s6 }
0x1262   : > { %v3937_v5 = vpop.xlane.xlu0 %3936 }
0x1266   : > { %v7252_v40 = vpop.xlane.xlu1 %3733 }
0x126e   : > { %v3404_v52 = vpop.xlane.xlu1 %3403 }
0x126f   : > { %v3408_v37 = vadd.f32 %v3407_v46, %v3404_v52 }
0x1271   : > { %v3412_v41 = vadd.f32 %v3411_v55, %v3408_v37 }
0x1273   : > { %v3427_v23 = vmul.f32 1e-13, %v3412_v41 }
0x1276   : > { %v3418_v8 = vpop.xlane.xlu1 %3417 }
0x1277   : > { %v3422_v59 = vadd.f32 %v3421_v47, %v3418_v8 }
0x1279   : > { %v3426_v27 = vadd.f32 %v3425_v9, %v3422_v59 }
0x127b   : > { %v3428_v34 = vadd.f32 %v3427_v23, %v3426_v27 }
0x127d   : > { %5090 = vrcp.f32 %v3428_v34 }
0x1283   : > { %v5091_v22 = vpop.eup %5090 }
0x1284   : > { %v3432_v25 = vmul.f32 %v5091_v22, %v3414_v18  ;;  %v3430_v3 = vmul.f32 %v5091_v22, %v3413_v24  ;;  %v3476_v15 = vmul.f32 %v5091_v22, %v3415_v42  ;;  %v3938_v42 = vmul.f32 %v3937_v5, %v6243_v30 }
0x1286   : > { %v3433_v45 = vpack.c.bf16 %v3432_v25, %v3432_v25  ;;  %v3431_v38 = vpack.c.bf16 %v3430_v3, %v3430_v3  ;;  %v3477_v57 = vpack.c.bf16 %v3476_v15, %v3476_v15  ;;  %v7273_v36 = vsub.f32 %v6235_v16, %v3938_v42 }
0x1288   : > { %4707 = vmatmul.msk.bf16.vlgmr.msra.gmra.mxu0 %vm1629_vm7, %v3433_v45  ;;  %4708 = vmatmul.msk.bf16.vlgmr.msra.gmra.mxu1 %vm1625_vm6, %v3431_v38  ;;  %v3940_v6 = vmul.f32 %v7273_v36, %v7273_v36 }
0x1289   : > { %4709 = vmatmul.msk.bf16.vlgmr.msra.gmra.mxu2 %vm1434_vm1, %v3477_v57 }
0x128e   : > { %v3894_v26 = vpop.permute.xlu1 %3893 }
0x128f   : > { %v3896_v51 = vsel %vm1434_vm1, %v3894_v26, 0.0 }
0x1290   : > { %3897 = vadd.xlane.f32.xlu2 %v3896_v51 }
0x1298   : > { %4711 = vmatmul.msk.bf16.vlgmr.msrb.gmra.mxu0 %vm1434_vm1, %v7218_v62  ;;  %4712 = vmatmul.msk.bf16.vlgmr.msrb.gmra.mxu1 %vm1434_vm1, %v7218_v62 }
0x12a8   : > { %3784 = vrot.lane.b32.xlu2 %v6551_v50, %s5785_s6  ;;  %s7569_s6 = sld [smem:[#allocation70_spill]] }
0x12ac   : > { %v3861_v58 = vpop.xlane.xlu0 %3860 }
0x12ad   : > { %v3862_v1 = vmul.f32 %v3861_v58, %v6243_v30 }
0x12af   : > { %v7266_v18 = vsub.f32 %v6227_v12, %v3862_v1 }
0x12b1   : > { %v3864_v61 = vmul.f32 %v7266_v18, %v7266_v18 }
0x12b3   : > { %3866 = vrot.lane.b32.xlu2 %v3864_v61, %s5787_s26 }
0x12b9   : > { %v3975_v62 = vpop.xlane.xlu1 %3974 }
0x12ba   : > { %v3976_v44 = vmul.f32 %v3975_v62, %v6243_v30 }
0x12bb   : > { %3942 = vrot.lane.b32.xlu2 %v3940_v6, %s5787_s26 }
0x12bc   : > { %v7279_v7 = vsub.f32 %v6239_v21, %v3976_v44 }
0x12be   : > { %v3978_v12 = vmul.f32 %v7279_v7, %v7279_v7 }
0x12bf   : > { %v3806_v60 = vpop.permute.xlu0 %3805 }
0x12c0   : > { %3980 = vrot.lane.b32.xlu1 %v3978_v12, %s5787_s26  ;;  %v3811_v16 = vsel %vm1702_vm11, %v3806_v60, 0 }
0x12c1   : > { %3820 = vmatpush.bf16.msrb.mxu3 %v3811_v16 }
0x12c8   : > { %3885 = vrot.lane.b32.xlu1 %v7017_v29, %s5788_s14 }
0x12d1   : > { %v3829_v48 = vpop.permute.xlu1 %3828 }
0x12d2   : > { %v3834_v39 = vsel %vm1724_vm12, %v3829_v48, 0 }
0x12d3   : > { %3843 = vmatpush.bf16.msra.mxu0 %v3834_v39 }
0x1303   : > { %v3898_v21 = vpop.xlane.xlu2 %3897 }
0x1304   : > { %v3899_v10 = vmul.f32 %v3898_v21, %v6243_v30 }
0x1305   : > { %v3451_v20 = vpop.f32.mrf.mxu0  ;;  %v3472_v43 = vpop.f32.mrf.mxu1 }
0x1306   : > { %v7291_v24 = vsub.f32 %v6229_v13, %v3899_v10  ;;  %v3473_v63 = vadd.f32 %v3472_v43, %v3451_v20 }
0x1308   : > { %v3901_v55 = vmul.f32 %v7291_v24, %v7291_v24 }
0x130a   : > { %3903 = vrot.lane.b32.xlu2 %v3901_v55, %s5787_s26 }
0x130b   : > { %v3785_v46 = vpop.permute.xlu2 %3784 }
0x130c   : > { %v3495_v29 = vpop.f32.mrf.mxu2  ;;  %v3790_v9 = vsel %vm1682_vm5, %v3785_v46, 0 }
0x130d   : > { %v3499_v47 = vadd.f32 %v3495_v29, %v3473_v63  ;;  %v3453_v35 = vpop.f32.mrf.mxu0  ;;  %v3474_v14 = vpop.f32.mrf.mxu1  ;;  %3799 = vmatpush.bf16.msrb.mxu2 %v3790_v9 }
0x1312   : > { %3889 = vrot.lane.b32.xlu2 %v7158_v54, %s5788_s14 }
0x1313   : > { %v3867_v32 = vpop.permute.xlu2 %3866 }
0x1314   : > { %v3497_v13 = vpop.f32.mrf.mxu2  ;;  %v3869_v28 = vsel %vm1434_vm1, %v3867_v32, 0.0 }
0x1315   : > { %v3727_v52 = vpop.f32.mrf.mxu1  ;;  %3870 = vadd.xlane.f32.xlu0 %v3869_v28  ;;  %v3705_v37 = vpop.f32.mrf.mxu0 }
0x1316   : > { %v3709_v22 = vmul.f32 %v3705_v37, %v6430_v19  ;;  %v3731_v3 = vmul.f32 %v3727_v52, %v6406_v0 }
0x1318   : > { %v3735_v25 = vsel %vm1629_vm7, %v3709_v22, -inf }
0x131a   : > { %3922 = vrot.lane.b32.xlu2 %v7143_v49, %s5788_s14 }
0x131b   : > { %v3943_v27 = vpop.permute.xlu2 %3942 }
0x131c   : > { %v3945_v34 = vsel %vm1505_vm2, %v3943_v27, 0.0  ;;  %vm3504_vm2 = vcmask 195744  }
0x131d   : > { %v3707_v41 = vpop.f32.mrf.mxu0  ;;  %v3729_v8 = vpop.f32.mrf.mxu1 }
0x1332   : > { %v3981_v59 = vpop.permute.xlu1 %3980 }
0x1333   : > { %v3983_v23 = vsel %vm1538_vm3, %v3981_v59, 0.0 }
0x1334   : > { %3984 = vadd.xlane.f32.xlu0 %v3983_v23 }
0x133a   : > { %v7323_v1 = vpop.permute.xlu1 %3885 }
0x1343   : > { %3946 = vadd.xlane.f32.xlu2 %v3945_v34 }
0x1348   : > { %3926 = vrot.lane.b32.xlu0 %v7171_v31, %s5788_s14  ;;  %v3739_v31 = vsel %vm1434_vm1, %v3731_v3, -inf }
0x1350   : > { %3965 = vrot.lane.b32.xlu0 %v7154_v2, %s5788_s14 }
0x135b   : > { %3501 = vrot.lane.b32.xlu2 %v3499_v47, %s5784_s27 }
0x1364   : > { %v3904_v54 = vpop.permute.xlu2 %3903 }
0x1365   : > { %v3906_v49 = vsel %vm1434_vm1, %v3904_v54, 0.0 }
0x1366   : > { %3907 = vadd.xlane.f32.xlu1 %v3906_v49 }
0x136c   : > { %v7316_v2 = vpop.permute.xlu2 %3889 }
0x1374   : > { %v7318_v15 = vpop.permute.xlu2 %3922 }
0x137a   : > { %3736 = vmax.xlane.f32.xlu0 %v3735_v25 }
0x137f   : > { %3961 = vrot.lane.b32.xlu1 %v7147_v33, %s5788_s14 }
0x1384   : > { %3740 = vmax.xlane.f32.xlu2 %v3739_v31 }
0x1388   : > { %v3871_v51 = vpop.xlane.xlu0 %3870 }
0x1389   : > { %v3872_v60 = vmul.f32 %v3871_v51, %v6243_v30 }
0x138b   : > { %v3873_v21 = vadd.f32 1e-05, %v3872_v60 }
0x138d   : > { %vm3880_vm13 = vweird.f32 %v3873_v21 }
0x13a7   : > { %v7321_v58 = vpop.xlane.xlu0 %3984 }
0x13b6   : > { %v3947_v45 = vpop.xlane.xlu2 %3946 }
0x13b7   : > { %v3948_v57 = vmul.f32 %v3947_v45, %v6243_v30 }
0x13b9   : > { %v3949_v26 = vadd.f32 1e-05, %v3948_v57 }
0x13ba   : > { %v7325_v62 = vpop.permute.xlu0 %3926 }
0x13bb   : > { %5092 = vrsqrt.f32 %v3949_v26  ;;  %vm3956_vm14 = vweird.f32 %v3949_v26 }
0x13be   : > { %v3502_v38 = vpop.permute.xlu2 %3501 }
0x13bf   : > { %3505 = vst.msk [vmem:[#allocation2] sm:$0xff] %vm3504_vm2, %v3502_v38 }
0x13c1   : > { %v5093_v5 = vpop.eup %5092 }
0x13c2   : > { %v3951_v33 = vmul.f32 %v5093_v5, %v3949_v26  ;;  %vm3957_vm3 = vweird.f32 %v5093_v5  ;;  %v3966_v39 = vpop.permute.xlu0 %3965 }
0x13c3   : > { %vm3958_vm15 = vmor %vm3956_vm14, %vm3957_vm3 }
0x13c4   : > { %v3952_v42 = vmul.f32 %v5093_v5, %v3951_v33 }
0x13c6   : > { %v3953_v61 = vmul.f32 0.5, %v3952_v42 }
0x13c8   : > { %v3954_v44 = vsub.f32 1.5, %v3953_v61 }
0x13ca   : > { %v3955_v16 = vmul.f32 %v5093_v5, %v3954_v44 }
0x13cc   : > { %v3959_v10 = vsel %vm3958_vm15, %v5093_v5, %v3955_v16 }
0x13cd   : > { %v3960_v20 = vmul.f32 %v3959_v10, %v7273_v36 }
0x13d9   : > { %v3908_v6 = vpop.xlane.xlu1 %3907 }
0x13da   : > { %v3909_v12 = vmul.f32 %v3908_v6, %v6243_v30 }
0x13dc   : > { %v3910_v48 = vadd.f32 1e-05, %v3909_v12 }
0x13de   : > { %5094 = vrsqrt.f32 %v3910_v48  ;;  %vm3917_vm8 = vweird.f32 %v3910_v48 }
0x13df   : > { %5096 = vrsqrt.f32 %v3873_v21 }
0x13e4   : > { %v5095_v46 = vpop.eup %5094 }
0x13e5   : > { %v5097_v47 = vpop.eup %5096  ;;  %v3912_v35 = vmul.f32 %v5095_v46, %v3910_v48  ;;  %vm3918_vm4 = vweird.f32 %v5095_v46 }
0x13e6   : > { %v3875_v13 = vmul.f32 %v5097_v47, %v3873_v21  ;;  %vm3881_vm9 = vweird.f32 %v5097_v47  ;;  %vm3919_vm10 = vmor %vm3917_vm8, %vm3918_vm4  ;;  %vm3854_vm4 = vcmask 228544  }
0x13e7   : > { %v3913_v41 = vmul.f32 %v5095_v46, %v3912_v35  ;;  %vm3882_vm2 = vmor %vm3880_vm13, %vm3881_vm9 }
0x13e8   : > { %v3876_v23 = vmul.f32 %v5097_v47, %v3875_v13 }
0x13e9   : > { %v3914_v27 = vmul.f32 0.5, %v3913_v41 }
0x13ea   : > { %v3877_v34 = vmul.f32 0.5, %v3876_v23 }
0x13ec   : > { %v3878_v45 = vsub.f32 1.5, %v3877_v34 }
0x13ed   : > { %v3737_v55 = vpop.xlane.xlu0 %3736 }
0x13ee   : > { %v3738_v9 = vmax.f32 %v7252_v40, %v3737_v55  ;;  %v3915_v40 = vsub.f32 1.5, %v3914_v27  ;;  %v3879_v57 = vmul.f32 %v5097_v47, %v3878_v45 }
0x13f0   : > { %v3883_v33 = vsel %vm3882_vm2, %v5097_v47, %v3879_v57 }
0x13f1   : > { %v3962_v43 = vpop.permute.xlu1 %3961  ;;  %v3884_v6 = vmul.f32 %v3883_v33, %v7266_v18  ;;  %v5132_v18 = vld [vmem:[#allocation27] ss:$0 sm:$0xff] }
0x13f2   : > { %v3964_v63 = vmul.f32 %v3962_v43, %v3960_v20 }
0x13f3   : > { %v3888_v12 = vmul.f32 %v7323_v1, %v3884_v6  ;;  %v3986_v1 = vmul.f32 %v7321_v58, %v6243_v30 }
0x13f4   : > { %v7330_v29 = vadd.f32 %v3966_v39, %v3964_v63 }
0x13f5   : > { %v3892_v16 = vadd.f32 %v7316_v2, %v3888_v12  ;;  %v3987_v43 = vadd.f32 1e-05, %v3986_v1 }
0x13f7   : > { %v3741_v14 = vpop.xlane.xlu2 %3740  ;;  %vm3994_vm14 = vweird.f32 %v3987_v43 }
0x13f8   : > { %v3742_v32 = vmax.f32 %v3738_v9, %v3741_v14 }
0x13fa   : > { %v3743_v28 = vsub.f32 %v7237_v53, %v3742_v32  ;;  %v3746_v52 = vsub.f32 %v3709_v22, %v3742_v32  ;;  %v3749_v37 = vsub.f32 %v3731_v3, %v3742_v32  ;;  %v3916_v22 = vmul.f32 %v5095_v46, %v3915_v40 }
0x13fc   : > { %v3744_v36 = vmul.f32 1.442695, %v3743_v28  ;;  %v3747_v8 = vmul.f32 1.442695, %v3746_v52  ;;  %v3750_v59 = vmul.f32 1.442695, %v3749_v37  ;;  %v3920_v51 = vsel %vm3919_vm10, %v5095_v46, %v3916_v22 }
0x13fd   : > { %v3921_v42 = vmul.f32 %v3920_v51, %v7291_v24  ;;  %v3930_v24 = vpack.c.bf16 %v3892_v16, %v3892_v16 }
0x13fe   : > { %5098 = vpow2.f32 %v3744_v36 }
0x13ff   : > { %5100 = vpow2.f32 %v3747_v8  ;;  %v3925_v44 = vmul.f32 %v7318_v15, %v3921_v42  ;;  %v4009_v21 = vunpack.c.l.b16 %v3930_v24 }
0x1400   : > { %5102 = vpow2.f32 %v3750_v59 }
0x1401   : > { %v3929_v60 = vadd.f32 %v7325_v62, %v3925_v44  ;;  %v4010_v20 = vpack.c.b16 %v4009_v21, %v4009_v21  ;;  %5104 = vrsqrt.f32 %v3987_v43 }
0x1403   : > { %v3931_v48 = vpack.c.bf16 %v3929_v60, %v3929_v60 }
0x1404   : > { %v5099_v54 = vpop.eup %5098 }
0x1405   : > { %v5101_v49 = vpop.eup %5100  ;;  %v3752_v25 = vsel %vm1625_vm6, %v5099_v54, 0.0  ;;  %v7338_v38 = vmul.f32 %v5099_v54, %v6428_v17  ;;  %v4014_v39 = vunpack.c.l.b16 %v3931_v48 }
0x1406   : > { %v5103_v31 = vpop.eup %5102  ;;  %v3755_v53 = vsel %vm1629_vm7, %v5101_v49, 0.0  ;;  %3753 = vadd.xlane.f32.xlu1 %v3752_v25  ;;  %v7341_v26 = vmul.f32 %v5101_v49, %v6430_v19 }
0x1407   : > { %v3759_v3 = vsel %vm1434_vm1, %v5103_v31, 0.0  ;;  %3756 = vadd.xlane.f32.xlu2 %v3755_v53  ;;  %v3766_v5 = vsel %vm1625_vm6, %v7338_v38, 0.0  ;;  %v4015_v10 = vpack.c.b16 %v4014_v39, %v4014_v39  ;;  %v3765_v15 = vmul.f32 %v5103_v31, %v6406_v0  ;;  %v5105_v55 = vpop.eup %5104 }
0x1408   : > { %3760 = vadd.xlane.f32.xlu0 %v3759_v3  ;;  %v3769_v61 = vsel %vm1629_vm7, %v7341_v26, 0.0  ;;  %v3989_v46 = vmul.f32 %v5105_v55, %v3987_v43  ;;  %vm3995_vm3 = vweird.f32 %v5105_v55 }
0x1409   : > { %v3773_v2 = vsel %vm1434_vm1, %v3765_v15, 0.0  ;;  %vm3996_vm15 = vmor %vm3994_vm14, %vm3995_vm3 }
0x140a   : > { %v3990_v9 = vmul.f32 %v5105_v55, %v3989_v46 }
0x140c   : > { %v3991_v47 = vmul.f32 0.5, %v3990_v9 }
0x140e   : > { %3767 = vadd.xlane.f32.xlu1 %v3766_v5  ;;  %v3992_v14 = vsub.f32 1.5, %v3991_v47 }
0x140f   : > { %3770 = vadd.xlane.f32.xlu2 %v3769_v61 }
0x1410   : > { %v3993_v13 = vmul.f32 %v5105_v55, %v3992_v14 }
0x1412   : > { %v3997_v28 = vsel %vm3996_vm15, %v5105_v55, %v3993_v13 }
0x1413   : > { %v3998_v30 = vmul.f32 %v3997_v28, %v7279_v7 }
0x141c   : > { %4003 = vrot.lane.b32.xlu0 %v7165_v56, %s5788_s14  ;;  %v3969_v56 = vpack.c.bf16 %v7330_v29, %v7330_v29 }
0x141e   : > { %v4039_v62 = vunpack.c.l.b16 %v3969_v56 }
0x1420   : > { %v4040_v63 = vpack.c.b16 %v4039_v62, %v4039_v62 }
0x1424   : > { %4016 = vrot.lane.b32.xlu0 %v4015_v10, %s5787_s26 }
0x1427   : > { %4011 = vrot.lane.b32.xlu1 %v4010_v20, %s5787_s26  ;;  %3999 = vrot.lane.b32.xlu2 %v5132_v18, %s5788_s14 }
0x1451   : > { %3774 = vadd.xlane.f32.xlu1 %v3773_v2 }
0x146a   : > { %4041 = vrot.lane.b32.xlu1 %v4040_v63, %s5787_s26 }
0x1479   : > { %v3754_v37 = vpop.xlane.xlu1 %3753 }
0x147a   : > { %v3757_v35 = vpop.xlane.xlu2 %3756 }
0x147b   : > { %v3761_v29 = vpop.xlane.xlu0 %3760  ;;  %v3758_v49 = vadd.f32 %v3757_v35, %v3754_v37 }
0x147d   : > { %v3762_v7 = vadd.f32 %v3761_v29, %v3758_v49 }
0x147f   : > { %v3777_v45 = vmul.f32 1e-13, %v3762_v7 }
0x1481   : > { %v3768_v27 = vpop.xlane.xlu1 %3767 }
0x1482   : > { %v3771_v32 = vpop.xlane.xlu2 %3770 }
0x1483   : > { %v3772_v25 = vadd.f32 %v3771_v32, %v3768_v27 }
0x148a   : > { %v4000_v58 = vpop.permute.xlu2 %3999 }
0x148b   : > { %v4002_v52 = vmul.f32 %v4000_v58, %v3998_v30 }
0x148e   : > { %v4004_v41 = vpop.permute.xlu0 %4003 }
0x148f   : > { %v4006_v36 = vadd.f32 %v4004_v41, %v4002_v52 }
0x1491   : > { %v4007_v8 = vpack.c.bf16 %v4006_v36, %v4006_v36 }
0x1493   : > { %v4061_v59 = vunpack.c.l.b16 %v4007_v8 }
0x1495   : > { %v4062_v23 = vpack.c.b16 %v4061_v59, %v4061_v59 }
0x1496   : > { %v4017_v34 = vpop.permute.xlu0 %4016 }
0x1497   : > { %v4022_v40 = vsel %vm1434_vm1, %v4017_v34, 0  ;;  %4063 = vrot.lane.b32.xlu0 %v4062_v23, %s5787_s26 }
0x1498   : > { %4031 = vmatpush.bf16.xpose.msra.mxu1 %v4022_v40 }
0x1499   : > { %v4012_v54 = vpop.permute.xlu1 %4011 }
0x149f   : > { %4716 = vmatmul.msk.bf16.vlgmr.msra.gmra.mxu1 %vm1434_vm1, %v4012_v54 }
0x14c4   : > { %v3775_v31 = vpop.xlane.xlu1 %3774 }
0x14c5   : > { %v3776_v53 = vadd.f32 %v3775_v31, %v3772_v25 }
0x14c7   : > { %v3778_v22 = vadd.f32 %v3777_v45, %v3776_v53 }
0x14c9   : > { %5106 = vrcp.f32 %v3778_v22 }
0x14cf   : > { %v5107_v3 = vpop.eup %5106 }
0x14d0   : > { %v3782_v57 = vmul.f32 %v5107_v3, %v7341_v26  ;;  %v3780_v51 = vmul.f32 %v5107_v3, %v7338_v38  ;;  %v3826_v5 = vmul.f32 %v5107_v3, %v3765_v15 }
0x14d2   : > { %v3783_v33 = vpack.c.bf16 %v3782_v57, %v3782_v57  ;;  %v3781_v42 = vpack.c.bf16 %v3780_v51, %v3780_v51  ;;  %v3827_v61 = vpack.c.bf16 %v3826_v5, %v3826_v5 }
0x14d4   : > { %4713 = vmatmul.msk.bf16.vlgmr.msrb.gmra.mxu2 %vm1629_vm7, %v3783_v33  ;;  %4714 = vmatmul.msk.bf16.vlgmr.msrb.gmra.mxu3 %vm1625_vm6, %v3781_v42 }
0x14d5   : > { %4715 = vmatmul.msk.bf16.vlgmr.msra.gmra.mxu0 %vm1434_vm1, %v3827_v61 }
0x14dc   : > { %v4042_v6 = vpop.permute.xlu1 %4041 }
0x14dd   : > { %v4044_v44 = vsel %vm1434_vm1, %v4042_v6, 0 }
0x14de   : > { %4053 = vmatpush.bf16.xpose.msra.mxu2 %v4044_v44 }
0x14e5   : > { %4717 = vmatmul.msk.bf16.vlgmr.msra.gmra.mxu2 %vm1434_vm1, %v4012_v54 }
0x1509   : > { %v4064_v12 = vpop.permute.xlu0 %4063 }
0x150a   : > { %v4066_v26 = vsel %vm1434_vm1, %v4064_v12, 0 }
0x150b   : > { %4075 = vmatpush.bf16.xpose.msra.mxu3 %v4066_v26 }
0x1512   : > { %4718 = vmatmul.msk.bf16.vlgmr.msra.gmra.mxu3 %vm1434_vm1, %v4012_v54 }
0x151c   : > { %v4033_v38 = vpop.f32.mrf.mxu1 }
0x151d   : > { %v4037_v60 = vmul.f32 %v4033_v38, %v6428_v17 }
0x151f   : > { %v4082_v16 = vsel %vm1625_vm6, %v4037_v60, -inf }
0x1520   : > { %4083 = vmax.xlane.f32.xlu2 %v4082_v16 }
0x1524   : > { %v4035_v48 = vpop.f32.mrf.mxu1 }
0x1552   : > { %v3845_v24 = vpop.f32.mrf.mxu0 }
0x1557   : > { %v3801_v39 = vpop.f32.mrf.mxu2  ;;  %v3822_v21 = vpop.f32.mrf.mxu3 }
0x1558   : > { %v3823_v10 = vadd.f32 %v3822_v21, %v3801_v39 }
0x155a   : > { %v3849_v20 = vadd.f32 %v3845_v24, %v3823_v10  ;;  %v3847_v18 = vpop.f32.mrf.mxu0 }
0x155c   : > { %3851 = vrot.lane.b32.xlu0 %v3849_v20, %s5786_s3  ;;  %s1169_s3 = scalar_lea.vmem [#allocation30], %s4608_s11 }
0x155d   : > { %s4259_s20 = sshll.u32 %s1169_s3, 4  ;;  %s4260_s20 = int_to_ptr.vmem [resolvable:$true] %s4259_s20 }
0x155f   : > { %v3803_v15 = vpop.f32.mrf.mxu2  ;;  %v3824_v2 = vpop.f32.mrf.mxu3 }
0x1568   : > { %v4055_v56 = vpop.f32.mrf.mxu2 }
0x1569   : > { %v4059_v1 = vmul.f32 %v4055_v56, %v6430_v19 }
0x156b   : > { %v4085_v62 = vsel %vm1629_vm7, %v4059_v1, -inf }
0x156c   : > { %4086 = vmax.xlane.f32.xlu1 %v4085_v62  ;;  %v4749_v62 = vld [vmem:[%s7567_s5] sm:$0xff] }
0x1570   : > { %v4057_v43 = vpop.f32.mrf.mxu2 }
0x1593   : > { %v4084_v14 = vpop.xlane.xlu2 %4083 }
0x1595   : > { %v4077_v63 = vpop.f32.mrf.mxu3 }
0x1596   : > { %v4081_v55 = vmul.f32 %v4077_v63, %v6406_v0 }
0x1598   : > { %v4089_v46 = vsel %vm1434_vm1, %v4081_v55, -inf }
0x1599   : > { %4090 = vmax.xlane.f32.xlu0 %v4089_v46  ;;  %v4985_v46 = vld [vmem:[%s7569_s6] ss:$0 sm:$0xff] }
0x159d   : > { %v4079_v9 = vpop.f32.mrf.mxu3 }
0x15ce   : > { %v3852_v47 = vpop.permute.xlu0 %3851 }
0x15cf   : > { %3855 = vst.msk [vmem:[#allocation2] sm:$0xff] %vm3854_vm4, %v3852_v47 }
0x15df   : > { %v4087_v35 = vpop.xlane.xlu1 %4086 }
0x15e0   : > { %v4088_v32 = vmax.f32 %v4084_v14, %v4087_v35 }
0x160c   : > { %v4091_v13 = vpop.xlane.xlu0 %4090 }
0x160d   : > { %v4092_v29 = vmax.f32 %v4088_v32, %v4091_v13 }
0x160f   : > { %v4093_v28 = vsub.f32 %v4037_v60, %v4092_v29  ;;  %v4096_v30 = vsub.f32 %v4059_v1, %v4092_v29  ;;  %v4099_v58 = vsub.f32 %v4081_v55, %v4092_v29  ;;  %v4750_v1 = vld [vmem:[%s7567_s5 + $0x8] sm:$0xff] }
0x1610   : > { %4237 = vmatpush.bf16.msrb.mxu3 %v4750_v1 }
0x1611   : > { %v4094_v52 = vmul.f32 1.442695, %v4093_v28  ;;  %v4097_v37 = vmul.f32 1.442695, %v4096_v30  ;;  %v4100_v41 = vmul.f32 1.442695, %v4099_v58 }
0x1613   : > { %5108 = vpow2.f32 %v4094_v52 }
0x1614   : > { %5110 = vpow2.f32 %v4097_v37  ;;  %4238 = vmatpush.bf16.msrb.mxu3 %v4749_v62 }
0x1615   : > { %5112 = vpow2.f32 %v4100_v41 }
0x1619   : > { %v5109_v36 = vpop.eup %5108 }
0x161a   : > { %v5111_v8 = vpop.eup %5110  ;;  %v4102_v59 = vsel %vm1625_vm6, %v5109_v36, 0.0  ;;  %v4113_v40 = vmul.f32 %v5109_v36, %v6428_v17 }
0x161b   : > { %v5113_v23 = vpop.eup %5112  ;;  %v4105_v27 = vsel %vm1629_vm7, %v5111_v8, 0.0  ;;  %4103 = vadd.xlane.f32.xlu2 %v4102_v59  ;;  %v4114_v54 = vmul.f32 %v5111_v8, %v6430_v19 }
0x161c   : > { %v4109_v34 = vsel %vm1434_vm1, %v5113_v23, 0.0  ;;  %4106 = vadd.xlane.f32.xlu1 %v4105_v27  ;;  %v4115_v49 = vmul.f32 %v5113_v23, %v6406_v0  ;;  %v4116_v7 = vsel %vm1625_vm6, %v4113_v40, 0.0 }
0x161d   : > { %4110 = vadd.xlane.f32.xlu0 %v4109_v34  ;;  %v4119_v25 = vsel %vm1629_vm7, %v4114_v54, 0.0 }
0x161e   : > { %v4123_v31 = vsel %vm1434_vm1, %v4115_v49, 0.0 }
0x1623   : > { %4117 = vadd.xlane.f32.xlu2 %v4116_v7 }
0x1624   : > { %4120 = vadd.xlane.f32.xlu1 %v4119_v25 }
0x1625   : > { %4124 = vadd.xlane.f32.xlu0 %v4123_v31 }
0x1639   : > { %4178 = vrot.lane.b32.xlu0 %v6728_v4, %s5787_s26 }
0x163b   : > { %4134 = vrot.lane.b32.xlu2 %v6551_v50, %s5787_s26 }
0x163d   : > { %4155 = vrot.lane.b32.xlu1 %v6573_v11, %s5787_s26  ;;  %s5657_s26 = sshra.s32 %s4262_s0, 4  ;;  %s5658_s26 = int_to_ptr.hbm [resolvable:$true] %s5657_s26 }
0x163e   : > { %p5664_p11 = scmp.lt.s32.totalorder %s5658_s26, %s7568_s24 }
0x168e   : > { %v4104_v17 = vpop.xlane.xlu2 %4103 }
0x168f   : > { %v4107_v0 = vpop.xlane.xlu1 %4106 }
0x1690   : > { %v4111_v19 = vpop.xlane.xlu0 %4110  ;;  %v4108_v45 = vadd.f32 %v4107_v0, %v4104_v17 }
0x1692   : > { %v4112_v53 = vadd.f32 %v4111_v19, %v4108_v45 }
0x1694   : > { %v4127_v5 = vmul.f32 1e-13, %v4112_v53 }
0x1696   : > { %v4118_v22 = vpop.xlane.xlu2 %4117 }
0x1697   : > { %v4121_v3 = vpop.xlane.xlu1 %4120 }
0x1698   : > { %v4122_v57 = vadd.f32 %v4121_v3, %v4118_v22  ;;  %v4125_v51 = vpop.xlane.xlu0 %4124 }
0x169a   : > { %v4126_v33 = vadd.f32 %v4125_v51, %v4122_v57 }
0x169c   : > { %v4128_v42 = vadd.f32 %v4127_v5, %v4126_v33 }
0x169e   : > { %5114 = vrcp.f32 %v4128_v42  ;;  %v4135_v4 = vpop.permute.xlu2 %4134 }
0x169f   : > { %v4140_v61 = vsel %vm1682_vm5, %v4135_v4, 0 }
0x16a0   : > { %4149 = vmatpush.bf16.msrb.mxu0 %v4140_v61 }
0x16a4   : > { %v5115_v50 = vpop.eup %5114 }
0x16a5   : > { %v4132_v6 = vmul.f32 %v5115_v50, %v4114_v54  ;;  %v4176_v44 = vmul.f32 %v5115_v50, %v4115_v49  ;;  %v4130_v60 = vmul.f32 %v5115_v50, %v4113_v40 }
0x16a7   : > { %v4133_v11 = vpack.c.bf16 %v4132_v6, %v4132_v6  ;;  %v4177_v38 = vpack.c.bf16 %v4176_v44, %v4176_v44  ;;  %v4131_v24 = vpack.c.bf16 %v4130_v60, %v4130_v60 }
0x16a9   : > { %4719 = vmatmul.msk.bf16.vlgmr.msrb.gmra.mxu0 %vm1629_vm7, %v4133_v11 }
0x16ab   : > { %v4179_v12 = vpop.permute.xlu0 %4178 }
0x16ac   : > { %v4184_v26 = vsel %vm1724_vm12, %v4179_v12, 0 }
0x16ad   : > { %4193 = vmatpush.bf16.msrb.mxu2 %v4184_v26 }
0x16af   : > { %v4156_v16 = vpop.permute.xlu1 %4155 }
0x16b0   : > { %v4161_v48 = vsel %vm1702_vm11, %v4156_v16, 0  ;;  %4721 = vmatmul.msk.bf16.vlgmr.msrb.gmra.mxu2 %vm1434_vm1, %v4177_v38  ;;  %vm4204_vm1 = vcmask 261344  }
0x16b1   : > { %4170 = vmatpush.bf16.msrb.mxu1 %v4161_v48 }
0x16b4   : > { %4720 = vmatmul.msk.bf16.vlgmr.msrb.gmra.mxu1 %vm1625_vm6, %v4131_v24 }
0x1726   : > { %v4151_v39 = vpop.f32.mrf.mxu0 }
0x172e   : > { %v4153_v21 = vpop.f32.mrf.mxu0 }
0x1731   : > { %v4172_v10 = vpop.f32.mrf.mxu1 }
0x1732   : > { %v4173_v20 = vadd.f32 %v4172_v10, %v4151_v39 }
0x1733   : > { %v4195_v18 = vpop.f32.mrf.mxu2 }
0x1734   : > { %v4199_v15 = vadd.f32 %v4195_v18, %v4173_v20 }
0x1736   : > { %4201 = vrot.lane.b32.xlu2 %v4199_v15, %s5788_s14  ;;  %s5659_s14 = scalar_lea.hbm %s5658_s26, 8 }
0x1737   : > { %p5660_p1 = scmp.ne.s32.totalorder %s5658_s26, %s5659_s14  ;;  %p5665_p12 = scmp.lt.s32.totalorder %s5663_s30, %s5659_s14 }
0x1739   : > { %v4174_v2 = vpop.f32.mrf.mxu1  ;;  %p5661_p5 = pnand %p5660_p1, %p6030_p2  ;;  %p5666_p13 = por %p5665_p12, %p5664_p11 }
0x173b   : > { %v4197_v56 = vpop.f32.mrf.mxu2  ;;  %p5662_p10 = pneg %p5661_p5 }
0x173d   : > { %p5667_p0 = pnand %p5666_p13, %p5662_p10 }
0x1790   : > { %v4202_v43 = vpop.permute.xlu2 %4201 }
0x1791   : > { %4205 = vst.msk [vmem:[#allocation2] sm:$0xff] %vm4204_vm1, %v4202_v43 }
0x1798   : > { %v4206_v63 = vld [vmem:[#allocation2] sm:$0xff] }
0x1799   : > { %v4207_v55 = vpack.c.bf16 %v4206_v63, %v4206_v63 }
0x179b   : > { %4730 = vmatmul.msk.bf16.vlgmr.msrb.gmra.mxu3 %vm1203_vm0, %v4207_v55 }
0x181e   : > { %v4240_v9 = vpop.f32.mrf.mxu3 }
0x181f   : > { %v4241_v47 = vadd.f32 %v4985_v46, %v4240_v9 }
0x1821   : > { %4244 = vst.msk [vmem:[%s1169_s3] sm:$0xff] %vm1203_vm0, %v4241_v47 }
0x1822   : > { %5670 = shalt.err (!%p5667_p0)
}
0x1823   : > { %4809 = dma.vmem_to_hbm [thread:$0]  (%p6030_p2), %s4260_s20, 128, %s4262_s0, %s4246_s4  }
0x1826   : > { %v4242_v35 = vpop.f32.mrf.mxu3 }
0x1827 PF: > { %s7571_s11 = sld [smem:[#allocation43_spill]]  ;;  %s4273_s13 = sand.u32 1, %s5737_s29  }
0x1828   : > { %p4865_p4 = pnand %p4585_p6, %p6037_p7  ;;  %s4274_s15 = scalar_lea.sflag [#allocation5], %s4273_s13 }
0x182a   : > { %p4866_p9 = pneg %p4865_p4 }
0x182c   : > { %5732 = dma.done.wait (%p4866_p9), %s4274_s15, 128  }
0x182d   : > { %5734 = vsyncadd (%p4866_p9), %s4274_s15, 4294967168  ;;  %s53_s3 = sadd.s32 1, %s7571_s11   ;;  %s7572_s17 = sld [smem:[#allocation41_spill]] }
0x182e   : > { %p50_p8 = scmp.ge.s32.totalorder %s53_s3, 4   ;;  %s7573_s6 = sld [smem:[#allocation46_spill]] }
0x182f   : > { %s7574_s28 = sld [smem:[#allocation45_spill]]  ;;  %s7575_s29 = smov %s5741_s2 }
0x1830   : > { %s7577_s30 = smov %s5753_s7 }
0x1831   :  { %52 = sbr.rel (!%p50_p8) target bundleno = 41 (0x29), region = 270 }
0x1833   : > { %s7576_s2 = smov %s7572_s17 }
0x1835   : > { %s7578_s7 = smov %s7574_s28 }
0x1836   :  { %4280 = vsyncpa [#allocation4], 1 }
0x1837   :  { %4282 = vsyncpa [#allocation4 + $0x1], 1 }
0x1838   :  { %4283 = vsyncpa [#allocation7], 1 }
0x1839   :  { %4285 = vsyncpa [#allocation7 + $0x1], 1 }
0x183a   :  { %4286 = vsyncpa [#allocation10], 1 }
0x183b   :  { %4288 = vsyncpa [#allocation10 + $0x1], 1 }
0x183c   :  { %4289 = vsyncpa [#allocation13], 1 }
0x183d   :  { %4290 = vsyncpa [#allocation16], 1 }
0x183e   :  { %4291 = vsyncpa [#allocation19], 1 }
0x183f   :  { %4292 = vsyncpa [#allocation22], 1 }
0x1840   :  { %4293 = vsyncpa [#allocation25], 1 }
0x1841   :  { %4294 = vsyncpa [#allocation28], 1 }
0x1842   :  { %4295 = vsyncpa [#allocation5], 1 }
0x1843   :  { %4297 = vsyncpa [#allocation5 + $0x1], 1 }

</bundles_post_ra>
